<compile_context>
chip_gen: v5e
topology: v5e:2x2
jax: 0.10.0
libtpu: 0.0.40
codegen_flags: <defaults>
</compile_context>

<pallas_src>
import functools

import jax
import jax.numpy as jnp
from jax.experimental import pallas as pl
from jax.experimental.pallas import tpu as pltpu

NUM_HEADS = 4
NUM_CLASSES = 10
NP = 128  # fc2 output padded to a lane-dense 128 columns


# ----------------------------- Pallas kernel -------------------------------

def _frozen_heads_kernel(xa_ref, w1_ref, w2_ref, w3_ref, b3_ref, w4_ref,
                         b4_ref, o_ref, *, heads, batch):
    B = batch
    for h in range(heads):  # static unroll over heads in this block
        # conv_8_4 as one patch matmul.  xa rows are ordered (r, s, u, v, b)
        # where (u, v) is the conv_4_2 output position and (r, s) its kernel
        # position; columns are (i, j, c).
        xa = xa_ref[h]                                   # (16B, Cin*4) bf16
        ya = jnp.dot(xa, w1_ref[h], preferred_element_type=jnp.float32)
        ya = jnp.maximum(ya, 0.0)                        # (16B, 64) f32

        # conv_4_2 as a sum of 4 matmuls over kernel positions q=(r,s); each
        # term uses a contiguous row slice of ya thanks to the row ordering.
        m2 = 4 * B
        yb = None
        for q in range(4):
            blk = ya[q * m2:(q + 1) * m2, :]             # (4B, 64), rows (u,v,b)
            t = jnp.dot(blk, w2_ref[h, q].astype(jnp.float32),
                        preferred_element_type=jnp.float32)
            yb = t if yb is None else yb + t
        yb = jnp.maximum(yb, 0.0)                        # (4B, 64) f32

        # fc1 (torch .view flatten folded in) as a sum of 4 matmuls over the
        # spatial positions p=(u,v); each term is a contiguous B-row slice.
        h1 = None
        for p in range(4):
            blk = yb[p * B:(p + 1) * B, :]               # (B, 64), rows = b
            t = jnp.dot(blk, w3_ref[h, p].astype(jnp.float32),
                        preferred_element_type=jnp.float32)
            h1 = t if h1 is None else h1 + t
        h1 = jnp.maximum(h1 + b3_ref[h], 0.0)            # (B, 256) f32

        # fc2, lane-dense padded output.
        out = jnp.dot(h1, w4_ref[h].astype(jnp.float32),
                      preferred_element_type=jnp.float32) + b4_ref[h]
        o_ref[h] = out.astype(o_ref.dtype)               # (B, 128)


def _heads_per_block():
    """2 heads per block on dual-TensorCore chips (one grid step per core);
    all heads in one step on single-TC chips (grid steps are serial there)."""
    try:
        kind = jax.devices()[0].device_kind.lower()
    except Exception:
        kind = ""
    dual_tc = any(tag in kind for tag in ("v7", "v4", "v5p"))
    return 2 if dual_tc else NUM_HEADS


def frozen_heads(xa, w1, w2, w3, b3, w4, b4):
    """Fused per-head conv/conv/fc1/fc2.  Grid = head blocks (parallel)."""
    H, M1, K1 = xa.shape
    B = M1 // 16
    N1 = w1.shape[-1]
    hpb = _heads_per_block()
    if H % hpb:
        hpb = H
    grid = (H // hpb,)

    flops = 2 * H * (M1 * K1 * N1 + 4 * (4 * B) * N1 * N1
                     + 4 * B * N1 * 256 + B * 256 * NP)
    args = (xa, w1, w2, w3, b3, w4, b4)
    bytes_accessed = int(sum(a.size * a.dtype.itemsize for a in args)
                         + H * B * NP * 4)

    kernel = functools.partial(_frozen_heads_kernel, heads=hpb, batch=B)
    return pl.pallas_call(
        kernel,
        out_shape=jax.ShapeDtypeStruct((H, B, NP), jnp.float32),
        grid=grid,
        in_specs=[
            pl.BlockSpec((hpb, M1, K1), lambda g: (g, 0, 0)),
            pl.BlockSpec((hpb, K1, N1), lambda g: (g, 0, 0)),
            pl.BlockSpec((hpb, 4, N1, N1), lambda g: (g, 0, 0, 0)),
            pl.BlockSpec((hpb, 4, N1, 256), lambda g: (g, 0, 0, 0)),
            pl.BlockSpec((hpb, 1, 256), lambda g: (g, 0, 0)),
            pl.BlockSpec((hpb, 256, NP), lambda g: (g, 0, 0)),
            pl.BlockSpec((hpb, 1, NP), lambda g: (g, 0, 0)),
        ],
        out_specs=pl.BlockSpec((hpb, B, NP), lambda g: (g, 0, 0)),
        compiler_params=pltpu.CompilerParams(
            dimension_semantics=("parallel",)),
        cost_estimate=pl.CostEstimate(
            flops=flops, transcendentals=0, bytes_accessed=bytes_accessed),
    )(*args)


# ------------------------------ JAX glue -----------------------------------

def latents_to_conv1_patches(lat_nhwc):
    """(H, B, 8, 8, C) NHWC latents -> (H, 16*B, 4*C) conv1 patch matrices.

    Row order (r, s, u, v, b); column order (i, j, c).  Channels stay on the
    lane dim, so this is a major-dims relayout (fused with the producer and
    the bf16 cast).  Each latent element appears exactly once (2x2 / stride-2
    patches are non-overlapping)."""
    H, B = lat_nhwc.shape[:2]
    C = lat_nhwc.shape[-1]
    x = lat_nhwc.reshape(H, B, 2, 2, 2, 2, 2, 2, C)     # h,b,u,r,i,v,s,j,c
    x = x.transpose(0, 3, 6, 2, 5, 1, 4, 7, 8)          # h,r,s,u,v,b,i,j,c
    return x.reshape(H, 16 * B, 4 * C).astype(jnp.bfloat16)


def frozen_backbone_stub(params, x):
    """Deterministic stand-in for model_cls(..., latent=True).

    Latents are emitted channels-last (NHWC) so the head-stack patch relayout
    is a cheap major-dims transpose."""
    B, C, Hh, Ww = x.shape
    pooled = x.reshape(B, C, 8, Hh // 8, 8, Ww // 8).mean(axis=(3, 5))  # (B,3,8,8)
    latents = jnp.einsum("bchw,ncd->nbhwd", pooled, params["stub_proj"])  # (4,B,8,8,640)
    f640 = latents[0].mean(axis=(1, 2))
    gap = x.mean(axis=(2, 3))
    output_original = gap @ params["stub_cls_w"] + params["stub_cls_b"]
    return latents, f640, output_original


def init_params(key, widen_factor=10, num_classes=NUM_CLASSES):
    cin = 64 * widen_factor
    ks = jax.random.split(key, 27)

    def normal(k, shape, std):
        return jax.random.normal(k, shape, jnp.float32) * std

    conv1_raw = jnp.stack([normal(ks[i], (64, cin, 2, 2),
                                  1.0 / jnp.sqrt(cin * 4.0)) for i in range(4)])
    conv2_raw = jnp.stack([normal(ks[4 + i], (64, 64, 2, 2), 1.0 / 16.0)
                           for i in range(4)])
    fc1_w_raw = jnp.stack([normal(ks[8 + i], (256, 256), 1.0 / 16.0)
                           for i in range(4)])
    fc1_b_raw = jnp.stack([normal(ks[12 + i], (256,), 1.0 / 16.0)
                           for i in range(4)])
    fc2_w_raw = jnp.stack([normal(ks[16 + i], (num_classes, 256), 1.0 / 16.0)
                           for i in range(4)])
    fc2_b_raw = jnp.stack([normal(ks[20 + i], (num_classes,), 1.0 / 16.0)
                           for i in range(4)])

    # --- kernel-layout weights (built once at init; bf16 storage) ---
    # conv1: (Cout, Cin, 2, 2) -> (4*Cin, Cout) patch-matmul weight with
    # column order (i, j, c) to match the NHWC patch layout.
    w1 = jnp.stack([jnp.transpose(conv1_raw[h], (2, 3, 1, 0)).reshape(4 * cin, 64)
                    for h in range(4)]).astype(jnp.bfloat16)
    # conv2: per kernel position q=(r,s): W2_q[c, c2] = w[c2, c, r, s]
    w2 = jnp.stack([jnp.transpose(conv2_raw[h], (2, 3, 1, 0)).reshape(4, 64, 64)
                    for h in range(4)]).astype(jnp.bfloat16)
    # fc1: per spatial position p: W3_p[c, n] = W[n, c*4 + p]
    w3 = jnp.stack([jnp.transpose(fc1_w_raw[h].T.reshape(64, 4, 256), (1, 0, 2))
                    for h in range(4)]).astype(jnp.bfloat16)
    b3 = fc1_b_raw[:, None, :]                                   # (4,1,256) f32
    pad_n = NP - num_classes
    w4 = jnp.stack([jnp.pad(fc2_w_raw[h].T, ((0, 0), (0, pad_n)))
                    for h in range(4)]).astype(jnp.bfloat16)     # (4,256,128)
    b4 = jnp.pad(fc2_b_raw, ((0, 0), (0, pad_n)))[:, None, :]    # (4,1,128) f32

    return {
        "w1": w1, "w2": w2, "w3": w3, "b3": b3, "w4": w4, "b4": b4,
        "stub_proj": normal(ks[24], (4, 3, cin), 0.1),
        "stub_cls_w": normal(ks[25], (3, num_classes), 0.1),
        "stub_cls_b": normal(ks[26], (num_classes,), 0.1),
        # raw torch-layout f32 copies kept only for the reference check below
        "raw_conv1": conv1_raw, "raw_conv2": conv2_raw,
        "raw_fc1_w": fc1_w_raw, "raw_fc1_b": fc1_b_raw,
        "raw_fc2_w": fc2_w_raw, "raw_fc2_b": fc2_b_raw,
    }


@jax.jit
def frozen_forward(params, x):
    latents, f640, output_original = frozen_backbone_stub(params, x)
    del f640  # unused in the torch forward as well

    xa = latents_to_conv1_patches(latents)                       # (4, 16B, 2560) bf16
    out_pad = frozen_heads(xa, params["w1"], params["w2"], params["w3"],
                           params["b3"], params["w4"], params["b4"])  # (4,B,128)
    out = out_pad[..., :NUM_CLASSES]
    return [out[0], out[1], out[2], out[3], output_original]


# --------------------------- plain-XLA reference ---------------------------

def reference_forward(params, x):
    """Straightforward (torch-order, f32) re-implementation used to verify."""
    latents, _, output_original = frozen_backbone_stub(params, x)
    hp = jax.lax.Precision.HIGHEST
    outs = []
    for h in range(NUM_HEADS):
        f = jnp.transpose(latents[h], (0, 3, 1, 2))   # NHWC -> NCHW
        B, C = f.shape[:2]
        A = params["raw_conv1"][h]
        Bw = params["raw_conv2"][h]
        W1, c1 = params["raw_fc1_w"][h], params["raw_fc1_b"][h]
        W2f, c2 = params["raw_fc2_w"][h], params["raw_fc2_b"][h]
        p1 = f.reshape(B, C, 4, 2, 4, 2).transpose(0, 2, 4, 1, 3, 5)
        p1 = p1.reshape(B * 16, C * 4)
        g = jnp.maximum(jnp.dot(p1, A.reshape(64, C * 4).T, precision=hp), 0.0)
        g = g.reshape(B, 4, 4, 64).transpose(0, 3, 1, 2)
        p2 = g.reshape(B, 64, 2, 2, 2, 2).transpose(0, 2, 4, 1, 3, 5)
        p2 = p2.reshape(B * 4, 256)
        e = jnp.maximum(jnp.dot(p2, Bw.reshape(64, 256).T, precision=hp), 0.0)
        e = e.reshape(B, 2, 2, 64).transpose(0, 3, 1, 2)
        flat = e.reshape(B, 256)
        h1 = jnp.maximum(jnp.dot(flat, W1.T, precision=hp) + c1, 0.0)
        outs.append(jnp.dot(h1, W2f.T, precision=hp) + c2)
    outs.append(output_original)
    return outs


if __name__ == "__main__":
    key = jax.random.PRNGKey(0)
    k_x, k_p = jax.random.split(key)
    # CIFAR-like input implied by the module (latents end up 8x8 spatial)
    x = jax.random.normal(k_x, (2, 3, 32, 32), jnp.float32)
    params = init_params(k_p, widen_factor=10, num_classes=NUM_CLASSES)

    outputs = frozen_forward(params, x)
    outputs = jax.block_until_ready(outputs)

    assert len(outputs) == 5
    for o in outputs[:4]:
        assert o.shape == (2, NUM_CLASSES)
    assert outputs[4].shape == (2, NUM_CLASSES)

    # bf16 weights/activations (f32 accumulate) vs the f32 HIGHEST-precision
    # reference -> loosened tolerance (layout bugs still produce O(1) errors).
    refs = reference_forward(params, x)
    for o, r in zip(outputs[:4], refs[:4]):
        err = float(jnp.max(jnp.abs(o - r)))
        assert bool(jnp.allclose(o, r, atol=3e-2, rtol=3e-2)), err

    print("KERNEL_OK")
</pallas_src>

<mosaic_0001>
module attributes {stable_mosaic.version = 11 : i64} {
  func.func @_frozen_heads_kernel(%arg0: i32, %arg1: memref<4x32x2560xbf16, #tpu.memory_space<vmem>>, %arg2: memref<4x2560x64xbf16, #tpu.memory_space<vmem>>, %arg3: memref<4x4x64x64xbf16, #tpu.memory_space<vmem>>, %arg4: memref<4x4x64x256xbf16, #tpu.memory_space<vmem>>, %arg5: memref<4x1x256xf32, #tpu.memory_space<vmem>>, %arg6: memref<4x256x128xbf16, #tpu.memory_space<vmem>>, %arg7: memref<4x1x128xf32, #tpu.memory_space<vmem>>, %arg8: memref<4x2x128xf32, #tpu.memory_space<vmem>>) attributes {dimension_semantics = [#tpu.dimension_semantics<parallel>], iteration_bounds = array<i64: 1>, scalar_prefetch = 0 : i64, scratch_operands = 0 : i64, tpu.core_type = #tpu.core_type<tc>, window_params = [{transform_indices = @transform_0, window_bounds = array<i64: 4, 32, 2560>}, {transform_indices = @transform_1, window_bounds = array<i64: 4, 2560, 64>}, {transform_indices = @transform_2, window_bounds = array<i64: 4, 4, 64, 64>}, {transform_indices = @transform_3, window_bounds = array<i64: 4, 4, 64, 256>}, {transform_indices = @transform_4, window_bounds = array<i64: 4, 1, 256>}, {transform_indices = @transform_5, window_bounds = array<i64: 4, 256, 128>}, {transform_indices = @transform_6, window_bounds = array<i64: 4, 1, 128>}, {transform_indices = @transform_7, window_bounds = array<i64: 4, 2, 128>}]} {
    %c0 = arith.constant 0 : index
    %c0_0 = arith.constant 0 : index
    %c0_1 = arith.constant 0 : index
    %0 = vector.load %arg1[%c0, %c0_0, %c0_1] : memref<4x32x2560xbf16, #tpu.memory_space<vmem>>, vector<1x32x2560xbf16>
    %1 = vector.shape_cast %0 : vector<1x32x2560xbf16> to vector<32x2560xbf16>
    %c0_2 = arith.constant 0 : index
    %c0_3 = arith.constant 0 : index
    %c0_4 = arith.constant 0 : index
    %2 = vector.load %arg2[%c0_2, %c0_3, %c0_4] : memref<4x2560x64xbf16, #tpu.memory_space<vmem>>, vector<1x2560x64xbf16>
    %3 = vector.shape_cast %2 : vector<1x2560x64xbf16> to vector<2560x64xbf16>
    %cst = arith.constant dense<0.000000e+00> : vector<32x64xf32>
    %4 = tpu.matmul %1, %3, %cst {dimension_numbers = #tpu.dot_dimension_numbers<[1], [0], [0], [1], [0, 0, 1, 1], [], []>} : vector<32x2560xbf16>, vector<2560x64xbf16>, vector<32x64xf32> -> vector<32x64xf32>
    %cst_5 = arith.constant 0.000000e+00 : f32
    %5 = vector.broadcast %cst_5 : f32 to vector<32x64xf32>
    %6 = arith.maximumf %4, %5 : vector<32x64xf32>
    %7 = vector.extract_strided_slice %6 {offsets = [0, 0], sizes = [8, 64], strides = [1, 1]} : vector<32x64xf32> to vector<8x64xf32>
    %c0_6 = arith.constant 0 : index
    %c0_7 = arith.constant 0 : index
    %c0_8 = arith.constant 0 : index
    %c0_9 = arith.constant 0 : index
    %8 = vector.load %arg3[%c0_6, %c0_7, %c0_8, %c0_9] : memref<4x4x64x64xbf16, #tpu.memory_space<vmem>>, vector<1x1x64x64xbf16>
    %9 = vector.shape_cast %8 : vector<1x1x64x64xbf16> to vector<64x64xbf16>
    %10 = arith.extf %9 : vector<64x64xbf16> to vector<64x64xf32>
    %cst_10 = arith.constant dense<0.000000e+00> : vector<8x64xf32>
    %11 = tpu.matmul %7, %10, %cst_10 {dimension_numbers = #tpu.dot_dimension_numbers<[1], [0], [0], [1], [0, 0, 1, 1], [], []>} : vector<8x64xf32>, vector<64x64xf32>, vector<8x64xf32> -> vector<8x64xf32>
    %12 = vector.extract_strided_slice %6 {offsets = [8, 0], sizes = [8, 64], strides = [1, 1]} : vector<32x64xf32> to vector<8x64xf32>
    %c0_11 = arith.constant 0 : index
    %c1 = arith.constant 1 : index
    %c0_12 = arith.constant 0 : index
    %c0_13 = arith.constant 0 : index
    %13 = vector.load %arg3[%c0_11, %c1, %c0_12, %c0_13] : memref<4x4x64x64xbf16, #tpu.memory_space<vmem>>, vector<1x1x64x64xbf16>
    %14 = vector.shape_cast %13 : vector<1x1x64x64xbf16> to vector<64x64xbf16>
    %15 = arith.extf %14 : vector<64x64xbf16> to vector<64x64xf32>
    %cst_14 = arith.constant dense<0.000000e+00> : vector<8x64xf32>
    %16 = tpu.matmul %12, %15, %cst_14 {dimension_numbers = #tpu.dot_dimension_numbers<[1], [0], [0], [1], [0, 0, 1, 1], [], []>} : vector<8x64xf32>, vector<64x64xf32>, vector<8x64xf32> -> vector<8x64xf32>
    %17 = arith.addf %11, %16 : vector<8x64xf32>
    %18 = vector.extract_strided_slice %6 {offsets = [16, 0], sizes = [8, 64], strides = [1, 1]} : vector<32x64xf32> to vector<8x64xf32>
    %c0_15 = arith.constant 0 : index
    %c2 = arith.constant 2 : index
    %c0_16 = arith.constant 0 : index
    %c0_17 = arith.constant 0 : index
    %19 = vector.load %arg3[%c0_15, %c2, %c0_16, %c0_17] : memref<4x4x64x64xbf16, #tpu.memory_space<vmem>>, vector<1x1x64x64xbf16>
    %20 = vector.shape_cast %19 : vector<1x1x64x64xbf16> to vector<64x64xbf16>
    %21 = arith.extf %20 : vector<64x64xbf16> to vector<64x64xf32>
    %cst_18 = arith.constant dense<0.000000e+00> : vector<8x64xf32>
    %22 = tpu.matmul %18, %21, %cst_18 {dimension_numbers = #tpu.dot_dimension_numbers<[1], [0], [0], [1], [0, 0, 1, 1], [], []>} : vector<8x64xf32>, vector<64x64xf32>, vector<8x64xf32> -> vector<8x64xf32>
    %23 = arith.addf %17, %22 : vector<8x64xf32>
    %24 = vector.extract_strided_slice %6 {offsets = [24, 0], sizes = [8, 64], strides = [1, 1]} : vector<32x64xf32> to vector<8x64xf32>
    %c0_19 = arith.constant 0 : index
    %c3 = arith.constant 3 : index
    %c0_20 = arith.constant 0 : index
    %c0_21 = arith.constant 0 : index
    %25 = vector.load %arg3[%c0_19, %c3, %c0_20, %c0_21] : memref<4x4x64x64xbf16, #tpu.memory_space<vmem>>, vector<1x1x64x64xbf16>
    %26 = vector.shape_cast %25 : vector<1x1x64x64xbf16> to vector<64x64xbf16>
    %27 = arith.extf %26 : vector<64x64xbf16> to vector<64x64xf32>
    %cst_22 = arith.constant dense<0.000000e+00> : vector<8x64xf32>
    %28 = tpu.matmul %24, %27, %cst_22 {dimension_numbers = #tpu.dot_dimension_numbers<[1], [0], [0], [1], [0, 0, 1, 1], [], []>} : vector<8x64xf32>, vector<64x64xf32>, vector<8x64xf32> -> vector<8x64xf32>
    %29 = arith.addf %23, %28 : vector<8x64xf32>
    %cst_23 = arith.constant 0.000000e+00 : f32
    %30 = vector.broadcast %cst_23 : f32 to vector<8x64xf32>
    %31 = arith.maximumf %29, %30 : vector<8x64xf32>
    %32 = vector.extract_strided_slice %31 {offsets = [0, 0], sizes = [2, 64], strides = [1, 1]} : vector<8x64xf32> to vector<2x64xf32>
    %c0_24 = arith.constant 0 : index
    %c0_25 = arith.constant 0 : index
    %c0_26 = arith.constant 0 : index
    %c0_27 = arith.constant 0 : index
    %33 = vector.load %arg4[%c0_24, %c0_25, %c0_26, %c0_27] : memref<4x4x64x256xbf16, #tpu.memory_space<vmem>>, vector<1x1x64x256xbf16>
    %34 = vector.shape_cast %33 : vector<1x1x64x256xbf16> to vector<64x256xbf16>
    %35 = arith.extf %34 : vector<64x256xbf16> to vector<64x256xf32>
    %cst_28 = arith.constant dense<0.000000e+00> : vector<2x256xf32>
    %36 = tpu.matmul %32, %35, %cst_28 {dimension_numbers = #tpu.dot_dimension_numbers<[1], [0], [0], [1], [0, 0, 1, 1], [], []>} : vector<2x64xf32>, vector<64x256xf32>, vector<2x256xf32> -> vector<2x256xf32>
    %37 = vector.extract_strided_slice %31 {offsets = [2, 0], sizes = [2, 64], strides = [1, 1]} : vector<8x64xf32> to vector<2x64xf32>
    %c0_29 = arith.constant 0 : index
    %c1_30 = arith.constant 1 : index
    %c0_31 = arith.constant 0 : index
    %c0_32 = arith.constant 0 : index
    %38 = vector.load %arg4[%c0_29, %c1_30, %c0_31, %c0_32] : memref<4x4x64x256xbf16, #tpu.memory_space<vmem>>, vector<1x1x64x256xbf16>
    %39 = vector.shape_cast %38 : vector<1x1x64x256xbf16> to vector<64x256xbf16>
    %40 = arith.extf %39 : vector<64x256xbf16> to vector<64x256xf32>
    %cst_33 = arith.constant dense<0.000000e+00> : vector<2x256xf32>
    %41 = tpu.matmul %37, %40, %cst_33 {dimension_numbers = #tpu.dot_dimension_numbers<[1], [0], [0], [1], [0, 0, 1, 1], [], []>} : vector<2x64xf32>, vector<64x256xf32>, vector<2x256xf32> -> vector<2x256xf32>
    %42 = arith.addf %36, %41 : vector<2x256xf32>
    %43 = vector.extract_strided_slice %31 {offsets = [4, 0], sizes = [2, 64], strides = [1, 1]} : vector<8x64xf32> to vector<2x64xf32>
    %c0_34 = arith.constant 0 : index
    %c2_35 = arith.constant 2 : index
    %c0_36 = arith.constant 0 : index
    %c0_37 = arith.constant 0 : index
    %44 = vector.load %arg4[%c0_34, %c2_35, %c0_36, %c0_37] : memref<4x4x64x256xbf16, #tpu.memory_space<vmem>>, vector<1x1x64x256xbf16>
    %45 = vector.shape_cast %44 : vector<1x1x64x256xbf16> to vector<64x256xbf16>
    %46 = arith.extf %45 : vector<64x256xbf16> to vector<64x256xf32>
    %cst_38 = arith.constant dense<0.000000e+00> : vector<2x256xf32>
    %47 = tpu.matmul %43, %46, %cst_38 {dimension_numbers = #tpu.dot_dimension_numbers<[1], [0], [0], [1], [0, 0, 1, 1], [], []>} : vector<2x64xf32>, vector<64x256xf32>, vector<2x256xf32> -> vector<2x256xf32>
    %48 = arith.addf %42, %47 : vector<2x256xf32>
    %49 = vector.extract_strided_slice %31 {offsets = [6, 0], sizes = [2, 64], strides = [1, 1]} : vector<8x64xf32> to vector<2x64xf32>
    %c0_39 = arith.constant 0 : index
    %c3_40 = arith.constant 3 : index
    %c0_41 = arith.constant 0 : index
    %c0_42 = arith.constant 0 : index
    %50 = vector.load %arg4[%c0_39, %c3_40, %c0_41, %c0_42] : memref<4x4x64x256xbf16, #tpu.memory_space<vmem>>, vector<1x1x64x256xbf16>
    %51 = vector.shape_cast %50 : vector<1x1x64x256xbf16> to vector<64x256xbf16>
    %52 = arith.extf %51 : vector<64x256xbf16> to vector<64x256xf32>
    %cst_43 = arith.constant dense<0.000000e+00> : vector<2x256xf32>
    %53 = tpu.matmul %49, %52, %cst_43 {dimension_numbers = #tpu.dot_dimension_numbers<[1], [0], [0], [1], [0, 0, 1, 1], [], []>} : vector<2x64xf32>, vector<64x256xf32>, vector<2x256xf32> -> vector<2x256xf32>
    %54 = arith.addf %48, %53 : vector<2x256xf32>
    %c0_44 = arith.constant 0 : index
    %c0_45 = arith.constant 0 : index
    %c0_46 = arith.constant 0 : index
    %55 = vector.load %arg5[%c0_44, %c0_45, %c0_46] : memref<4x1x256xf32, #tpu.memory_space<vmem>>, vector<1x1x256xf32>
    %56 = vector.shape_cast %55 : vector<1x1x256xf32> to vector<1x256xf32>
    %57 = vector.broadcast %56 : vector<1x256xf32> to vector<2x256xf32>
    %58 = arith.addf %54, %57 : vector<2x256xf32>
    %cst_47 = arith.constant 0.000000e+00 : f32
    %59 = vector.broadcast %cst_47 : f32 to vector<2x256xf32>
    %60 = arith.maximumf %58, %59 : vector<2x256xf32>
    %c0_48 = arith.constant 0 : index
    %c0_49 = arith.constant 0 : index
    %c0_50 = arith.constant 0 : index
    %61 = vector.load %arg6[%c0_48, %c0_49, %c0_50] : memref<4x256x128xbf16, #tpu.memory_space<vmem>>, vector<1x256x128xbf16>
    %62 = vector.shape_cast %61 : vector<1x256x128xbf16> to vector<256x128xbf16>
    %63 = arith.extf %62 : vector<256x128xbf16> to vector<256x128xf32>
    %cst_51 = arith.constant dense<0.000000e+00> : vector<2x128xf32>
    %64 = tpu.matmul %60, %63, %cst_51 {dimension_numbers = #tpu.dot_dimension_numbers<[1], [0], [0], [1], [0, 0, 1, 1], [], []>} : vector<2x256xf32>, vector<256x128xf32>, vector<2x128xf32> -> vector<2x128xf32>
    %c0_52 = arith.constant 0 : index
    %c0_53 = arith.constant 0 : index
    %c0_54 = arith.constant 0 : index
    %65 = vector.load %arg7[%c0_52, %c0_53, %c0_54] : memref<4x1x128xf32, #tpu.memory_space<vmem>>, vector<1x1x128xf32>
    %66 = vector.shape_cast %65 : vector<1x1x128xf32> to vector<1x128xf32>
    %67 = vector.broadcast %66 : vector<1x128xf32> to vector<2x128xf32>
    %68 = arith.addf %64, %67 : vector<2x128xf32>
    %c0_55 = arith.constant 0 : index
    %c0_56 = arith.constant 0 : index
    %c0_57 = arith.constant 0 : index
    %69 = vector.load %arg8[%c0_55, %c0_56, %c0_57] : memref<4x2x128xf32, #tpu.memory_space<vmem>>, vector<1x2x128xf32>
    %70 = vector.shape_cast %69 : vector<1x2x128xf32> to vector<2x128xf32>
    %71 = vector.shape_cast %68 : vector<2x128xf32> to vector<1x2x128xf32>
    tpu.vector_store %arg8[%c0_55, %c0_56, %c0_57], %71 {strides = array<i32>} : memref<4x2x128xf32, #tpu.memory_space<vmem>>, vector<1x2x128xf32>,
    %c1_58 = arith.constant 1 : index
    %c0_59 = arith.constant 0 : index
    %c0_60 = arith.constant 0 : index
    %72 = vector.load %arg1[%c1_58, %c0_59, %c0_60] : memref<4x32x2560xbf16, #tpu.memory_space<vmem>>, vector<1x32x2560xbf16>
    %73 = vector.shape_cast %72 : vector<1x32x2560xbf16> to vector<32x2560xbf16>
    %c1_61 = arith.constant 1 : index
    %c0_62 = arith.constant 0 : index
    %c0_63 = arith.constant 0 : index
    %74 = vector.load %arg2[%c1_61, %c0_62, %c0_63] : memref<4x2560x64xbf16, #tpu.memory_space<vmem>>, vector<1x2560x64xbf16>
    %75 = vector.shape_cast %74 : vector<1x2560x64xbf16> to vector<2560x64xbf16>
    %cst_64 = arith.constant dense<0.000000e+00> : vector<32x64xf32>
    %76 = tpu.matmul %73, %75, %cst_64 {dimension_numbers = #tpu.dot_dimension_numbers<[1], [0], [0], [1], [0, 0, 1, 1], [], []>} : vector<32x2560xbf16>, vector<2560x64xbf16>, vector<32x64xf32> -> vector<32x64xf32>
    %cst_65 = arith.constant 0.000000e+00 : f32
    %77 = vector.broadcast %cst_65 : f32 to vector<32x64xf32>
    %78 = arith.maximumf %76, %77 : vector<32x64xf32>
    %79 = vector.extract_strided_slice %78 {offsets = [0, 0], sizes = [8, 64], strides = [1, 1]} : vector<32x64xf32> to vector<8x64xf32>
    %c1_66 = arith.constant 1 : index
    %c0_67 = arith.constant 0 : index
    %c0_68 = arith.constant 0 : index
    %c0_69 = arith.constant 0 : index
    %80 = vector.load %arg3[%c1_66, %c0_67, %c0_68, %c0_69] : memref<4x4x64x64xbf16, #tpu.memory_space<vmem>>, vector<1x1x64x64xbf16>
    %81 = vector.shape_cast %80 : vector<1x1x64x64xbf16> to vector<64x64xbf16>
    %82 = arith.extf %81 : vector<64x64xbf16> to vector<64x64xf32>
    %cst_70 = arith.constant dense<0.000000e+00> : vector<8x64xf32>
    %83 = tpu.matmul %79, %82, %cst_70 {dimension_numbers = #tpu.dot_dimension_numbers<[1], [0], [0], [1], [0, 0, 1, 1], [], []>} : vector<8x64xf32>, vector<64x64xf32>, vector<8x64xf32> -> vector<8x64xf32>
    %84 = vector.extract_strided_slice %78 {offsets = [8, 0], sizes = [8, 64], strides = [1, 1]} : vector<32x64xf32> to vector<8x64xf32>
    %c1_71 = arith.constant 1 : index
    %c1_72 = arith.constant 1 : index
    %c0_73 = arith.constant 0 : index
    %c0_74 = arith.constant 0 : index
    %85 = vector.load %arg3[%c1_71, %c1_72, %c0_73, %c0_74] : memref<4x4x64x64xbf16, #tpu.memory_space<vmem>>, vector<1x1x64x64xbf16>
    %86 = vector.shape_cast %85 : vector<1x1x64x64xbf16> to vector<64x64xbf16>
    %87 = arith.extf %86 : vector<64x64xbf16> to vector<64x64xf32>
    %cst_75 = arith.constant dense<0.000000e+00> : vector<8x64xf32>
    %88 = tpu.matmul %84, %87, %cst_75 {dimension_numbers = #tpu.dot_dimension_numbers<[1], [0], [0], [1], [0, 0, 1, 1], [], []>} : vector<8x64xf32>, vector<64x64xf32>, vector<8x64xf32> -> vector<8x64xf32>
    %89 = arith.addf %83, %88 : vector<8x64xf32>
    %90 = vector.extract_strided_slice %78 {offsets = [16, 0], sizes = [8, 64], strides = [1, 1]} : vector<32x64xf32> to vector<8x64xf32>
    %c1_76 = arith.constant 1 : index
    %c2_77 = arith.constant 2 : index
    %c0_78 = arith.constant 0 : index
    %c0_79 = arith.constant 0 : index
    %91 = vector.load %arg3[%c1_76, %c2_77, %c0_78, %c0_79] : memref<4x4x64x64xbf16, #tpu.memory_space<vmem>>, vector<1x1x64x64xbf16>
    %92 = vector.shape_cast %91 : vector<1x1x64x64xbf16> to vector<64x64xbf16>
    %93 = arith.extf %92 : vector<64x64xbf16> to vector<64x64xf32>
    %cst_80 = arith.constant dense<0.000000e+00> : vector<8x64xf32>
    %94 = tpu.matmul %90, %93, %cst_80 {dimension_numbers = #tpu.dot_dimension_numbers<[1], [0], [0], [1], [0, 0, 1, 1], [], []>} : vector<8x64xf32>, vector<64x64xf32>, vector<8x64xf32> -> vector<8x64xf32>
    %95 = arith.addf %89, %94 : vector<8x64xf32>
    %96 = vector.extract_strided_slice %78 {offsets = [24, 0], sizes = [8, 64], strides = [1, 1]} : vector<32x64xf32> to vector<8x64xf32>
    %c1_81 = arith.constant 1 : index
    %c3_82 = arith.constant 3 : index
    %c0_83 = arith.constant 0 : index
    %c0_84 = arith.constant 0 : index
    %97 = vector.load %arg3[%c1_81, %c3_82, %c0_83, %c0_84] : memref<4x4x64x64xbf16, #tpu.memory_space<vmem>>, vector<1x1x64x64xbf16>
    %98 = vector.shape_cast %97 : vector<1x1x64x64xbf16> to vector<64x64xbf16>
    %99 = arith.extf %98 : vector<64x64xbf16> to vector<64x64xf32>
    %cst_85 = arith.constant dense<0.000000e+00> : vector<8x64xf32>
    %100 = tpu.matmul %96, %99, %cst_85 {dimension_numbers = #tpu.dot_dimension_numbers<[1], [0], [0], [1], [0, 0, 1, 1], [], []>} : vector<8x64xf32>, vector<64x64xf32>, vector<8x64xf32> -> vector<8x64xf32>
    %101 = arith.addf %95, %100 : vector<8x64xf32>
    %cst_86 = arith.constant 0.000000e+00 : f32
    %102 = vector.broadcast %cst_86 : f32 to vector<8x64xf32>
    %103 = arith.maximumf %101, %102 : vector<8x64xf32>
    %104 = vector.extract_strided_slice %103 {offsets = [0, 0], sizes = [2, 64], strides = [1, 1]} : vector<8x64xf32> to vector<2x64xf32>
    %c1_87 = arith.constant 1 : index
    %c0_88 = arith.constant 0 : index
    %c0_89 = arith.constant 0 : index
    %c0_90 = arith.constant 0 : index
    %105 = vector.load %arg4[%c1_87, %c0_88, %c0_89, %c0_90] : memref<4x4x64x256xbf16, #tpu.memory_space<vmem>>, vector<1x1x64x256xbf16>
    %106 = vector.shape_cast %105 : vector<1x1x64x256xbf16> to vector<64x256xbf16>
    %107 = arith.extf %106 : vector<64x256xbf16> to vector<64x256xf32>
    %cst_91 = arith.constant dense<0.000000e+00> : vector<2x256xf32>
    %108 = tpu.matmul %104, %107, %cst_91 {dimension_numbers = #tpu.dot_dimension_numbers<[1], [0], [0], [1], [0, 0, 1, 1], [], []>} : vector<2x64xf32>, vector<64x256xf32>, vector<2x256xf32> -> vector<2x256xf32>
    %109 = vector.extract_strided_slice %103 {offsets = [2, 0], sizes = [2, 64], strides = [1, 1]} : vector<8x64xf32> to vector<2x64xf32>
    %c1_92 = arith.constant 1 : index
    %c1_93 = arith.constant 1 : index
    %c0_94 = arith.constant 0 : index
    %c0_95 = arith.constant 0 : index
    %110 = vector.load %arg4[%c1_92, %c1_93, %c0_94, %c0_95] : memref<4x4x64x256xbf16, #tpu.memory_space<vmem>>, vector<1x1x64x256xbf16>
    %111 = vector.shape_cast %110 : vector<1x1x64x256xbf16> to vector<64x256xbf16>
    %112 = arith.extf %111 : vector<64x256xbf16> to vector<64x256xf32>
    %cst_96 = arith.constant dense<0.000000e+00> : vector<2x256xf32>
    %113 = tpu.matmul %109, %112, %cst_96 {dimension_numbers = #tpu.dot_dimension_numbers<[1], [0], [0], [1], [0, 0, 1, 1], [], []>} : vector<2x64xf32>, vector<64x256xf32>, vector<2x256xf32> -> vector<2x256xf32>
    %114 = arith.addf %108, %113 : vector<2x256xf32>
    %115 = vector.extract_strided_slice %103 {offsets = [4, 0], sizes = [2, 64], strides = [1, 1]} : vector<8x64xf32> to vector<2x64xf32>
    %c1_97 = arith.constant 1 : index
    %c2_98 = arith.constant 2 : index
    %c0_99 = arith.constant 0 : index
    %c0_100 = arith.constant 0 : index
    %116 = vector.load %arg4[%c1_97, %c2_98, %c0_99, %c0_100] : memref<4x4x64x256xbf16, #tpu.memory_space<vmem>>, vector<1x1x64x256xbf16>
    %117 = vector.shape_cast %116 : vector<1x1x64x256xbf16> to vector<64x256xbf16>
    %118 = arith.extf %117 : vector<64x256xbf16> to vector<64x256xf32>
    %cst_101 = arith.constant dense<0.000000e+00> : vector<2x256xf32>
    %119 = tpu.matmul %115, %118, %cst_101 {dimension_numbers = #tpu.dot_dimension_numbers<[1], [0], [0], [1], [0, 0, 1, 1], [], []>} : vector<2x64xf32>, vector<64x256xf32>, vector<2x256xf32> -> vector<2x256xf32>
    %120 = arith.addf %114, %119 : vector<2x256xf32>
    %121 = vector.extract_strided_slice %103 {offsets = [6, 0], sizes = [2, 64], strides = [1, 1]} : vector<8x64xf32> to vector<2x64xf32>
    %c1_102 = arith.constant 1 : index
    %c3_103 = arith.constant 3 : index
    %c0_104 = arith.constant 0 : index
    %c0_105 = arith.constant 0 : index
    %122 = vector.load %arg4[%c1_102, %c3_103, %c0_104, %c0_105] : memref<4x4x64x256xbf16, #tpu.memory_space<vmem>>, vector<1x1x64x256xbf16>
    %123 = vector.shape_cast %122 : vector<1x1x64x256xbf16> to vector<64x256xbf16>
    %124 = arith.extf %123 : vector<64x256xbf16> to vector<64x256xf32>
    %cst_106 = arith.constant dense<0.000000e+00> : vector<2x256xf32>
    %125 = tpu.matmul %121, %124, %cst_106 {dimension_numbers = #tpu.dot_dimension_numbers<[1], [0], [0], [1], [0, 0, 1, 1], [], []>} : vector<2x64xf32>, vector<64x256xf32>, vector<2x256xf32> -> vector<2x256xf32>
    %126 = arith.addf %120, %125 : vector<2x256xf32>
    %c1_107 = arith.constant 1 : index
    %c0_108 = arith.constant 0 : index
    %c0_109 = arith.constant 0 : index
    %127 = vector.load %arg5[%c1_107, %c0_108, %c0_109] : memref<4x1x256xf32, #tpu.memory_space<vmem>>, vector<1x1x256xf32>
    %128 = vector.shape_cast %127 : vector<1x1x256xf32> to vector<1x256xf32>
    %129 = vector.broadcast %128 : vector<1x256xf32> to vector<2x256xf32>
    %130 = arith.addf %126, %129 : vector<2x256xf32>
    %cst_110 = arith.constant 0.000000e+00 : f32
    %131 = vector.broadcast %cst_110 : f32 to vector<2x256xf32>
    %132 = arith.maximumf %130, %131 : vector<2x256xf32>
    %c1_111 = arith.constant 1 : index
    %c0_112 = arith.constant 0 : index
    %c0_113 = arith.constant 0 : index
    %133 = vector.load %arg6[%c1_111, %c0_112, %c0_113] : memref<4x256x128xbf16, #tpu.memory_space<vmem>>, vector<1x256x128xbf16>
    %134 = vector.shape_cast %133 : vector<1x256x128xbf16> to vector<256x128xbf16>
    %135 = arith.extf %134 : vector<256x128xbf16> to vector<256x128xf32>
    %cst_114 = arith.constant dense<0.000000e+00> : vector<2x128xf32>
    %136 = tpu.matmul %132, %135, %cst_114 {dimension_numbers = #tpu.dot_dimension_numbers<[1], [0], [0], [1], [0, 0, 1, 1], [], []>} : vector<2x256xf32>, vector<256x128xf32>, vector<2x128xf32> -> vector<2x128xf32>
    %c1_115 = arith.constant 1 : index
    %c0_116 = arith.constant 0 : index
    %c0_117 = arith.constant 0 : index
    %137 = vector.load %arg7[%c1_115, %c0_116, %c0_117] : memref<4x1x128xf32, #tpu.memory_space<vmem>>, vector<1x1x128xf32>
    %138 = vector.shape_cast %137 : vector<1x1x128xf32> to vector<1x128xf32>
    %139 = vector.broadcast %138 : vector<1x128xf32> to vector<2x128xf32>
    %140 = arith.addf %136, %139 : vector<2x128xf32>
    %c1_118 = arith.constant 1 : index
    %c0_119 = arith.constant 0 : index
    %c0_120 = arith.constant 0 : index
    %141 = vector.load %arg8[%c1_118, %c0_119, %c0_120] : memref<4x2x128xf32, #tpu.memory_space<vmem>>, vector<1x2x128xf32>
    %142 = vector.shape_cast %141 : vector<1x2x128xf32> to vector<2x128xf32>
    %143 = vector.shape_cast %140 : vector<2x128xf32> to vector<1x2x128xf32>
    tpu.vector_store %arg8[%c1_118, %c0_119, %c0_120], %143 {strides = array<i32>} : memref<4x2x128xf32, #tpu.memory_space<vmem>>, vector<1x2x128xf32>,
    %c2_121 = arith.constant 2 : index
    %c0_122 = arith.constant 0 : index
    %c0_123 = arith.constant 0 : index
    %144 = vector.load %arg1[%c2_121, %c0_122, %c0_123] : memref<4x32x2560xbf16, #tpu.memory_space<vmem>>, vector<1x32x2560xbf16>
    %145 = vector.shape_cast %144 : vector<1x32x2560xbf16> to vector<32x2560xbf16>
    %c2_124 = arith.constant 2 : index
    %c0_125 = arith.constant 0 : index
    %c0_126 = arith.constant 0 : index
    %146 = vector.load %arg2[%c2_124, %c0_125, %c0_126] : memref<4x2560x64xbf16, #tpu.memory_space<vmem>>, vector<1x2560x64xbf16>
    %147 = vector.shape_cast %146 : vector<1x2560x64xbf16> to vector<2560x64xbf16>
    %cst_127 = arith.constant dense<0.000000e+00> : vector<32x64xf32>
    %148 = tpu.matmul %145, %147, %cst_127 {dimension_numbers = #tpu.dot_dimension_numbers<[1], [0], [0], [1], [0, 0, 1, 1], [], []>} : vector<32x2560xbf16>, vector<2560x64xbf16>, vector<32x64xf32> -> vector<32x64xf32>
    %cst_128 = arith.constant 0.000000e+00 : f32
    %149 = vector.broadcast %cst_128 : f32 to vector<32x64xf32>
    %150 = arith.maximumf %148, %149 : vector<32x64xf32>
    %151 = vector.extract_strided_slice %150 {offsets = [0, 0], sizes = [8, 64], strides = [1, 1]} : vector<32x64xf32> to vector<8x64xf32>
    %c2_129 = arith.constant 2 : index
    %c0_130 = arith.constant 0 : index
    %c0_131 = arith.constant 0 : index
    %c0_132 = arith.constant 0 : index
    %152 = vector.load %arg3[%c2_129, %c0_130, %c0_131, %c0_132] : memref<4x4x64x64xbf16, #tpu.memory_space<vmem>>, vector<1x1x64x64xbf16>
    %153 = vector.shape_cast %152 : vector<1x1x64x64xbf16> to vector<64x64xbf16>
    %154 = arith.extf %153 : vector<64x64xbf16> to vector<64x64xf32>
    %cst_133 = arith.constant dense<0.000000e+00> : vector<8x64xf32>
    %155 = tpu.matmul %151, %154, %cst_133 {dimension_numbers = #tpu.dot_dimension_numbers<[1], [0], [0], [1], [0, 0, 1, 1], [], []>} : vector<8x64xf32>, vector<64x64xf32>, vector<8x64xf32> -> vector<8x64xf32>
    %156 = vector.extract_strided_slice %150 {offsets = [8, 0], sizes = [8, 64], strides = [1, 1]} : vector<32x64xf32> to vector<8x64xf32>
    %c2_134 = arith.constant 2 : index
    %c1_135 = arith.constant 1 : index
    %c0_136 = arith.constant 0 : index
    %c0_137 = arith.constant 0 : index
    %157 = vector.load %arg3[%c2_134, %c1_135, %c0_136, %c0_137] : memref<4x4x64x64xbf16, #tpu.memory_space<vmem>>, vector<1x1x64x64xbf16>
    %158 = vector.shape_cast %157 : vector<1x1x64x64xbf16> to vector<64x64xbf16>
    %159 = arith.extf %158 : vector<64x64xbf16> to vector<64x64xf32>
    %cst_138 = arith.constant dense<0.000000e+00> : vector<8x64xf32>
    %160 = tpu.matmul %156, %159, %cst_138 {dimension_numbers = #tpu.dot_dimension_numbers<[1], [0], [0], [1], [0, 0, 1, 1], [], []>} : vector<8x64xf32>, vector<64x64xf32>, vector<8x64xf32> -> vector<8x64xf32>
    %161 = arith.addf %155, %160 : vector<8x64xf32>
    %162 = vector.extract_strided_slice %150 {offsets = [16, 0], sizes = [8, 64], strides = [1, 1]} : vector<32x64xf32> to vector<8x64xf32>
    %c2_139 = arith.constant 2 : index
    %c2_140 = arith.constant 2 : index
    %c0_141 = arith.constant 0 : index
    %c0_142 = arith.constant 0 : index
    %163 = vector.load %arg3[%c2_139, %c2_140, %c0_141, %c0_142] : memref<4x4x64x64xbf16, #tpu.memory_space<vmem>>, vector<1x1x64x64xbf16>
    %164 = vector.shape_cast %163 : vector<1x1x64x64xbf16> to vector<64x64xbf16>
    %165 = arith.extf %164 : vector<64x64xbf16> to vector<64x64xf32>
    %cst_143 = arith.constant dense<0.000000e+00> : vector<8x64xf32>
    %166 = tpu.matmul %162, %165, %cst_143 {dimension_numbers = #tpu.dot_dimension_numbers<[1], [0], [0], [1], [0, 0, 1, 1], [], []>} : vector<8x64xf32>, vector<64x64xf32>, vector<8x64xf32> -> vector<8x64xf32>
    %167 = arith.addf %161, %166 : vector<8x64xf32>
    %168 = vector.extract_strided_slice %150 {offsets = [24, 0], sizes = [8, 64], strides = [1, 1]} : vector<32x64xf32> to vector<8x64xf32>
    %c2_144 = arith.constant 2 : index
    %c3_145 = arith.constant 3 : index
    %c0_146 = arith.constant 0 : index
    %c0_147 = arith.constant 0 : index
    %169 = vector.load %arg3[%c2_144, %c3_145, %c0_146, %c0_147] : memref<4x4x64x64xbf16, #tpu.memory_space<vmem>>, vector<1x1x64x64xbf16>
    %170 = vector.shape_cast %169 : vector<1x1x64x64xbf16> to vector<64x64xbf16>
    %171 = arith.extf %170 : vector<64x64xbf16> to vector<64x64xf32>
    %cst_148 = arith.constant dense<0.000000e+00> : vector<8x64xf32>
    %172 = tpu.matmul %168, %171, %cst_148 {dimension_numbers = #tpu.dot_dimension_numbers<[1], [0], [0], [1], [0, 0, 1, 1], [], []>} : vector<8x64xf32>, vector<64x64xf32>, vector<8x64xf32> -> vector<8x64xf32>
    %173 = arith.addf %167, %172 : vector<8x64xf32>
    %cst_149 = arith.constant 0.000000e+00 : f32
    %174 = vector.broadcast %cst_149 : f32 to vector<8x64xf32>
    %175 = arith.maximumf %173, %174 : vector<8x64xf32>
    %176 = vector.extract_strided_slice %175 {offsets = [0, 0], sizes = [2, 64], strides = [1, 1]} : vector<8x64xf32> to vector<2x64xf32>
    %c2_150 = arith.constant 2 : index
    %c0_151 = arith.constant 0 : index
    %c0_152 = arith.constant 0 : index
    %c0_153 = arith.constant 0 : index
    %177 = vector.load %arg4[%c2_150, %c0_151, %c0_152, %c0_153] : memref<4x4x64x256xbf16, #tpu.memory_space<vmem>>, vector<1x1x64x256xbf16>
    %178 = vector.shape_cast %177 : vector<1x1x64x256xbf16> to vector<64x256xbf16>
    %179 = arith.extf %178 : vector<64x256xbf16> to vector<64x256xf32>
    %cst_154 = arith.constant dense<0.000000e+00> : vector<2x256xf32>
    %180 = tpu.matmul %176, %179, %cst_154 {dimension_numbers = #tpu.dot_dimension_numbers<[1], [0], [0], [1], [0, 0, 1, 1], [], []>} : vector<2x64xf32>, vector<64x256xf32>, vector<2x256xf32> -> vector<2x256xf32>
    %181 = vector.extract_strided_slice %175 {offsets = [2, 0], sizes = [2, 64], strides = [1, 1]} : vector<8x64xf32> to vector<2x64xf32>
    %c2_155 = arith.constant 2 : index
    %c1_156 = arith.constant 1 : index
    %c0_157 = arith.constant 0 : index
    %c0_158 = arith.constant 0 : index
    %182 = vector.load %arg4[%c2_155, %c1_156, %c0_157, %c0_158] : memref<4x4x64x256xbf16, #tpu.memory_space<vmem>>, vector<1x1x64x256xbf16>
    %183 = vector.shape_cast %182 : vector<1x1x64x256xbf16> to vector<64x256xbf16>
    %184 = arith.extf %183 : vector<64x256xbf16> to vector<64x256xf32>
    %cst_159 = arith.constant dense<0.000000e+00> : vector<2x256xf32>
    %185 = tpu.matmul %181, %184, %cst_159 {dimension_numbers = #tpu.dot_dimension_numbers<[1], [0], [0], [1], [0, 0, 1, 1], [], []>} : vector<2x64xf32>, vector<64x256xf32>, vector<2x256xf32> -> vector<2x256xf32>
    %186 = arith.addf %180, %185 : vector<2x256xf32>
    %187 = vector.extract_strided_slice %175 {offsets = [4, 0], sizes = [2, 64], strides = [1, 1]} : vector<8x64xf32> to vector<2x64xf32>
    %c2_160 = arith.constant 2 : index
    %c2_161 = arith.constant 2 : index
    %c0_162 = arith.constant 0 : index
    %c0_163 = arith.constant 0 : index
    %188 = vector.load %arg4[%c2_160, %c2_161, %c0_162, %c0_163] : memref<4x4x64x256xbf16, #tpu.memory_space<vmem>>, vector<1x1x64x256xbf16>
    %189 = vector.shape_cast %188 : vector<1x1x64x256xbf16> to vector<64x256xbf16>
    %190 = arith.extf %189 : vector<64x256xbf16> to vector<64x256xf32>
    %cst_164 = arith.constant dense<0.000000e+00> : vector<2x256xf32>
    %191 = tpu.matmul %187, %190, %cst_164 {dimension_numbers = #tpu.dot_dimension_numbers<[1], [0], [0], [1], [0, 0, 1, 1], [], []>} : vector<2x64xf32>, vector<64x256xf32>, vector<2x256xf32> -> vector<2x256xf32>
    %192 = arith.addf %186, %191 : vector<2x256xf32>
    %193 = vector.extract_strided_slice %175 {offsets = [6, 0], sizes = [2, 64], strides = [1, 1]} : vector<8x64xf32> to vector<2x64xf32>
    %c2_165 = arith.constant 2 : index
    %c3_166 = arith.constant 3 : index
    %c0_167 = arith.constant 0 : index
    %c0_168 = arith.constant 0 : index
    %194 = vector.load %arg4[%c2_165, %c3_166, %c0_167, %c0_168] : memref<4x4x64x256xbf16, #tpu.memory_space<vmem>>, vector<1x1x64x256xbf16>
    %195 = vector.shape_cast %194 : vector<1x1x64x256xbf16> to vector<64x256xbf16>
    %196 = arith.extf %195 : vector<64x256xbf16> to vector<64x256xf32>
    %cst_169 = arith.constant dense<0.000000e+00> : vector<2x256xf32>
    %197 = tpu.matmul %193, %196, %cst_169 {dimension_numbers = #tpu.dot_dimension_numbers<[1], [0], [0], [1], [0, 0, 1, 1], [], []>} : vector<2x64xf32>, vector<64x256xf32>, vector<2x256xf32> -> vector<2x256xf32>
    %198 = arith.addf %192, %197 : vector<2x256xf32>
    %c2_170 = arith.constant 2 : index
    %c0_171 = arith.constant 0 : index
    %c0_172 = arith.constant 0 : index
    %199 = vector.load %arg5[%c2_170, %c0_171, %c0_172] : memref<4x1x256xf32, #tpu.memory_space<vmem>>, vector<1x1x256xf32>
    %200 = vector.shape_cast %199 : vector<1x1x256xf32> to vector<1x256xf32>
    %201 = vector.broadcast %200 : vector<1x256xf32> to vector<2x256xf32>
    %202 = arith.addf %198, %201 : vector<2x256xf32>
    %cst_173 = arith.constant 0.000000e+00 : f32
    %203 = vector.broadcast %cst_173 : f32 to vector<2x256xf32>
    %204 = arith.maximumf %202, %203 : vector<2x256xf32>
    %c2_174 = arith.constant 2 : index
    %c0_175 = arith.constant 0 : index
    %c0_176 = arith.constant 0 : index
    %205 = vector.load %arg6[%c2_174, %c0_175, %c0_176] : memref<4x256x128xbf16, #tpu.memory_space<vmem>>, vector<1x256x128xbf16>
    %206 = vector.shape_cast %205 : vector<1x256x128xbf16> to vector<256x128xbf16>
    %207 = arith.extf %206 : vector<256x128xbf16> to vector<256x128xf32>
    %cst_177 = arith.constant dense<0.000000e+00> : vector<2x128xf32>
    %208 = tpu.matmul %204, %207, %cst_177 {dimension_numbers = #tpu.dot_dimension_numbers<[1], [0], [0], [1], [0, 0, 1, 1], [], []>} : vector<2x256xf32>, vector<256x128xf32>, vector<2x128xf32> -> vector<2x128xf32>
    %c2_178 = arith.constant 2 : index
    %c0_179 = arith.constant 0 : index
    %c0_180 = arith.constant 0 : index
    %209 = vector.load %arg7[%c2_178, %c0_179, %c0_180] : memref<4x1x128xf32, #tpu.memory_space<vmem>>, vector<1x1x128xf32>
    %210 = vector.shape_cast %209 : vector<1x1x128xf32> to vector<1x128xf32>
    %211 = vector.broadcast %210 : vector<1x128xf32> to vector<2x128xf32>
    %212 = arith.addf %208, %211 : vector<2x128xf32>
    %c2_181 = arith.constant 2 : index
    %c0_182 = arith.constant 0 : index
    %c0_183 = arith.constant 0 : index
    %213 = vector.load %arg8[%c2_181, %c0_182, %c0_183] : memref<4x2x128xf32, #tpu.memory_space<vmem>>, vector<1x2x128xf32>
    %214 = vector.shape_cast %213 : vector<1x2x128xf32> to vector<2x128xf32>
    %215 = vector.shape_cast %212 : vector<2x128xf32> to vector<1x2x128xf32>
    tpu.vector_store %arg8[%c2_181, %c0_182, %c0_183], %215 {strides = array<i32>} : memref<4x2x128xf32, #tpu.memory_space<vmem>>, vector<1x2x128xf32>,
    %c3_184 = arith.constant 3 : index
    %c0_185 = arith.constant 0 : index
    %c0_186 = arith.constant 0 : index
    %216 = vector.load %arg1[%c3_184, %c0_185, %c0_186] : memref<4x32x2560xbf16, #tpu.memory_space<vmem>>, vector<1x32x2560xbf16>
    %217 = vector.shape_cast %216 : vector<1x32x2560xbf16> to vector<32x2560xbf16>
    %c3_187 = arith.constant 3 : index
    %c0_188 = arith.constant 0 : index
    %c0_189 = arith.constant 0 : index
    %218 = vector.load %arg2[%c3_187, %c0_188, %c0_189] : memref<4x2560x64xbf16, #tpu.memory_space<vmem>>, vector<1x2560x64xbf16>
    %219 = vector.shape_cast %218 : vector<1x2560x64xbf16> to vector<2560x64xbf16>
    %cst_190 = arith.constant dense<0.000000e+00> : vector<32x64xf32>
    %220 = tpu.matmul %217, %219, %cst_190 {dimension_numbers = #tpu.dot_dimension_numbers<[1], [0], [0], [1], [0, 0, 1, 1], [], []>} : vector<32x2560xbf16>, vector<2560x64xbf16>, vector<32x64xf32> -> vector<32x64xf32>
    %cst_191 = arith.constant 0.000000e+00 : f32
    %221 = vector.broadcast %cst_191 : f32 to vector<32x64xf32>
    %222 = arith.maximumf %220, %221 : vector<32x64xf32>
    %223 = vector.extract_strided_slice %222 {offsets = [0, 0], sizes = [8, 64], strides = [1, 1]} : vector<32x64xf32> to vector<8x64xf32>
    %c3_192 = arith.constant 3 : index
    %c0_193 = arith.constant 0 : index
    %c0_194 = arith.constant 0 : index
    %c0_195 = arith.constant 0 : index
    %224 = vector.load %arg3[%c3_192, %c0_193, %c0_194, %c0_195] : memref<4x4x64x64xbf16, #tpu.memory_space<vmem>>, vector<1x1x64x64xbf16>
    %225 = vector.shape_cast %224 : vector<1x1x64x64xbf16> to vector<64x64xbf16>
    %226 = arith.extf %225 : vector<64x64xbf16> to vector<64x64xf32>
    %cst_196 = arith.constant dense<0.000000e+00> : vector<8x64xf32>
    %227 = tpu.matmul %223, %226, %cst_196 {dimension_numbers = #tpu.dot_dimension_numbers<[1], [0], [0], [1], [0, 0, 1, 1], [], []>} : vector<8x64xf32>, vector<64x64xf32>, vector<8x64xf32> -> vector<8x64xf32>
    %228 = vector.extract_strided_slice %222 {offsets = [8, 0], sizes = [8, 64], strides = [1, 1]} : vector<32x64xf32> to vector<8x64xf32>
    %c3_197 = arith.constant 3 : index
    %c1_198 = arith.constant 1 : index
    %c0_199 = arith.constant 0 : index
    %c0_200 = arith.constant 0 : index
    %229 = vector.load %arg3[%c3_197, %c1_198, %c0_199, %c0_200] : memref<4x4x64x64xbf16, #tpu.memory_space<vmem>>, vector<1x1x64x64xbf16>
    %230 = vector.shape_cast %229 : vector<1x1x64x64xbf16> to vector<64x64xbf16>
    %231 = arith.extf %230 : vector<64x64xbf16> to vector<64x64xf32>
    %cst_201 = arith.constant dense<0.000000e+00> : vector<8x64xf32>
    %232 = tpu.matmul %228, %231, %cst_201 {dimension_numbers = #tpu.dot_dimension_numbers<[1], [0], [0], [1], [0, 0, 1, 1], [], []>} : vector<8x64xf32>, vector<64x64xf32>, vector<8x64xf32> -> vector<8x64xf32>
    %233 = arith.addf %227, %232 : vector<8x64xf32>
    %234 = vector.extract_strided_slice %222 {offsets = [16, 0], sizes = [8, 64], strides = [1, 1]} : vector<32x64xf32> to vector<8x64xf32>
    %c3_202 = arith.constant 3 : index
    %c2_203 = arith.constant 2 : index
    %c0_204 = arith.constant 0 : index
    %c0_205 = arith.constant 0 : index
    %235 = vector.load %arg3[%c3_202, %c2_203, %c0_204, %c0_205] : memref<4x4x64x64xbf16, #tpu.memory_space<vmem>>, vector<1x1x64x64xbf16>
    %236 = vector.shape_cast %235 : vector<1x1x64x64xbf16> to vector<64x64xbf16>
    %237 = arith.extf %236 : vector<64x64xbf16> to vector<64x64xf32>
    %cst_206 = arith.constant dense<0.000000e+00> : vector<8x64xf32>
    %238 = tpu.matmul %234, %237, %cst_206 {dimension_numbers = #tpu.dot_dimension_numbers<[1], [0], [0], [1], [0, 0, 1, 1], [], []>} : vector<8x64xf32>, vector<64x64xf32>, vector<8x64xf32> -> vector<8x64xf32>
    %239 = arith.addf %233, %238 : vector<8x64xf32>
    %240 = vector.extract_strided_slice %222 {offsets = [24, 0], sizes = [8, 64], strides = [1, 1]} : vector<32x64xf32> to vector<8x64xf32>
    %c3_207 = arith.constant 3 : index
    %c3_208 = arith.constant 3 : index
    %c0_209 = arith.constant 0 : index
    %c0_210 = arith.constant 0 : index
    %241 = vector.load %arg3[%c3_207, %c3_208, %c0_209, %c0_210] : memref<4x4x64x64xbf16, #tpu.memory_space<vmem>>, vector<1x1x64x64xbf16>
    %242 = vector.shape_cast %241 : vector<1x1x64x64xbf16> to vector<64x64xbf16>
    %243 = arith.extf %242 : vector<64x64xbf16> to vector<64x64xf32>
    %cst_211 = arith.constant dense<0.000000e+00> : vector<8x64xf32>
    %244 = tpu.matmul %240, %243, %cst_211 {dimension_numbers = #tpu.dot_dimension_numbers<[1], [0], [0], [1], [0, 0, 1, 1], [], []>} : vector<8x64xf32>, vector<64x64xf32>, vector<8x64xf32> -> vector<8x64xf32>
    %245 = arith.addf %239, %244 : vector<8x64xf32>
    %cst_212 = arith.constant 0.000000e+00 : f32
    %246 = vector.broadcast %cst_212 : f32 to vector<8x64xf32>
    %247 = arith.maximumf %245, %246 : vector<8x64xf32>
    %248 = vector.extract_strided_slice %247 {offsets = [0, 0], sizes = [2, 64], strides = [1, 1]} : vector<8x64xf32> to vector<2x64xf32>
    %c3_213 = arith.constant 3 : index
    %c0_214 = arith.constant 0 : index
    %c0_215 = arith.constant 0 : index
    %c0_216 = arith.constant 0 : index
    %249 = vector.load %arg4[%c3_213, %c0_214, %c0_215, %c0_216] : memref<4x4x64x256xbf16, #tpu.memory_space<vmem>>, vector<1x1x64x256xbf16>
    %250 = vector.shape_cast %249 : vector<1x1x64x256xbf16> to vector<64x256xbf16>
    %251 = arith.extf %250 : vector<64x256xbf16> to vector<64x256xf32>
    %cst_217 = arith.constant dense<0.000000e+00> : vector<2x256xf32>
    %252 = tpu.matmul %248, %251, %cst_217 {dimension_numbers = #tpu.dot_dimension_numbers<[1], [0], [0], [1], [0, 0, 1, 1], [], []>} : vector<2x64xf32>, vector<64x256xf32>, vector<2x256xf32> -> vector<2x256xf32>
    %253 = vector.extract_strided_slice %247 {offsets = [2, 0], sizes = [2, 64], strides = [1, 1]} : vector<8x64xf32> to vector<2x64xf32>
    %c3_218 = arith.constant 3 : index
    %c1_219 = arith.constant 1 : index
    %c0_220 = arith.constant 0 : index
    %c0_221 = arith.constant 0 : index
    %254 = vector.load %arg4[%c3_218, %c1_219, %c0_220, %c0_221] : memref<4x4x64x256xbf16, #tpu.memory_space<vmem>>, vector<1x1x64x256xbf16>
    %255 = vector.shape_cast %254 : vector<1x1x64x256xbf16> to vector<64x256xbf16>
    %256 = arith.extf %255 : vector<64x256xbf16> to vector<64x256xf32>
    %cst_222 = arith.constant dense<0.000000e+00> : vector<2x256xf32>
    %257 = tpu.matmul %253, %256, %cst_222 {dimension_numbers = #tpu.dot_dimension_numbers<[1], [0], [0], [1], [0, 0, 1, 1], [], []>} : vector<2x64xf32>, vector<64x256xf32>, vector<2x256xf32> -> vector<2x256xf32>
    %258 = arith.addf %252, %257 : vector<2x256xf32>
    %259 = vector.extract_strided_slice %247 {offsets = [4, 0], sizes = [2, 64], strides = [1, 1]} : vector<8x64xf32> to vector<2x64xf32>
    %c3_223 = arith.constant 3 : index
    %c2_224 = arith.constant 2 : index
    %c0_225 = arith.constant 0 : index
    %c0_226 = arith.constant 0 : index
    %260 = vector.load %arg4[%c3_223, %c2_224, %c0_225, %c0_226] : memref<4x4x64x256xbf16, #tpu.memory_space<vmem>>, vector<1x1x64x256xbf16>
    %261 = vector.shape_cast %260 : vector<1x1x64x256xbf16> to vector<64x256xbf16>
    %262 = arith.extf %261 : vector<64x256xbf16> to vector<64x256xf32>
    %cst_227 = arith.constant dense<0.000000e+00> : vector<2x256xf32>
    %263 = tpu.matmul %259, %262, %cst_227 {dimension_numbers = #tpu.dot_dimension_numbers<[1], [0], [0], [1], [0, 0, 1, 1], [], []>} : vector<2x64xf32>, vector<64x256xf32>, vector<2x256xf32> -> vector<2x256xf32>
    %264 = arith.addf %258, %263 : vector<2x256xf32>
    %265 = vector.extract_strided_slice %247 {offsets = [6, 0], sizes = [2, 64], strides = [1, 1]} : vector<8x64xf32> to vector<2x64xf32>
    %c3_228 = arith.constant 3 : index
    %c3_229 = arith.constant 3 : index
    %c0_230 = arith.constant 0 : index
    %c0_231 = arith.constant 0 : index
    %266 = vector.load %arg4[%c3_228, %c3_229, %c0_230, %c0_231] : memref<4x4x64x256xbf16, #tpu.memory_space<vmem>>, vector<1x1x64x256xbf16>
    %267 = vector.shape_cast %266 : vector<1x1x64x256xbf16> to vector<64x256xbf16>
    %268 = arith.extf %267 : vector<64x256xbf16> to vector<64x256xf32>
    %cst_232 = arith.constant dense<0.000000e+00> : vector<2x256xf32>
    %269 = tpu.matmul %265, %268, %cst_232 {dimension_numbers = #tpu.dot_dimension_numbers<[1], [0], [0], [1], [0, 0, 1, 1], [], []>} : vector<2x64xf32>, vector<64x256xf32>, vector<2x256xf32> -> vector<2x256xf32>
    %270 = arith.addf %264, %269 : vector<2x256xf32>
    %c3_233 = arith.constant 3 : index
    %c0_234 = arith.constant 0 : index
    %c0_235 = arith.constant 0 : index
    %271 = vector.load %arg5[%c3_233, %c0_234, %c0_235] : memref<4x1x256xf32, #tpu.memory_space<vmem>>, vector<1x1x256xf32>
    %272 = vector.shape_cast %271 : vector<1x1x256xf32> to vector<1x256xf32>
    %273 = vector.broadcast %272 : vector<1x256xf32> to vector<2x256xf32>
    %274 = arith.addf %270, %273 : vector<2x256xf32>
    %cst_236 = arith.constant 0.000000e+00 : f32
    %275 = vector.broadcast %cst_236 : f32 to vector<2x256xf32>
    %276 = arith.maximumf %274, %275 : vector<2x256xf32>
    %c3_237 = arith.constant 3 : index
    %c0_238 = arith.constant 0 : index
    %c0_239 = arith.constant 0 : index
    %277 = vector.load %arg6[%c3_237, %c0_238, %c0_239] : memref<4x256x128xbf16, #tpu.memory_space<vmem>>, vector<1x256x128xbf16>
    %278 = vector.shape_cast %277 : vector<1x256x128xbf16> to vector<256x128xbf16>
    %279 = arith.extf %278 : vector<256x128xbf16> to vector<256x128xf32>
    %cst_240 = arith.constant dense<0.000000e+00> : vector<2x128xf32>
    %280 = tpu.matmul %276, %279, %cst_240 {dimension_numbers = #tpu.dot_dimension_numbers<[1], [0], [0], [1], [0, 0, 1, 1], [], []>} : vector<2x256xf32>, vector<256x128xf32>, vector<2x128xf32> -> vector<2x128xf32>
    %c3_241 = arith.constant 3 : index
    %c0_242 = arith.constant 0 : index
    %c0_243 = arith.constant 0 : index
    %281 = vector.load %arg7[%c3_241, %c0_242, %c0_243] : memref<4x1x128xf32, #tpu.memory_space<vmem>>, vector<1x1x128xf32>
    %282 = vector.shape_cast %281 : vector<1x1x128xf32> to vector<1x128xf32>
    %283 = vector.broadcast %282 : vector<1x128xf32> to vector<2x128xf32>
    %284 = arith.addf %280, %283 : vector<2x128xf32>
    %c3_244 = arith.constant 3 : index
    %c0_245 = arith.constant 0 : index
    %c0_246 = arith.constant 0 : index
    %285 = vector.load %arg8[%c3_244, %c0_245, %c0_246] : memref<4x2x128xf32, #tpu.memory_space<vmem>>, vector<1x2x128xf32>
    %286 = vector.shape_cast %285 : vector<1x2x128xf32> to vector<2x128xf32>
    %287 = vector.shape_cast %284 : vector<2x128xf32> to vector<1x2x128xf32>
    tpu.vector_store %arg8[%c3_244, %c0_245, %c0_246], %287 {strides = array<i32>} : memref<4x2x128xf32, #tpu.memory_space<vmem>>, vector<1x2x128xf32>,
    return
  }
  func.func @transform_0(%arg0: i32) -> (i32, i32, i32) {
    %c0_i32 = arith.constant 0 : i32
    %c0_i32_0 = arith.constant 0 : i32
    %c0_i32_1 = arith.constant 0 : i32
    return %arg0, %c0_i32, %c0_i32_0 : i32, i32, i32
  }
  func.func @transform_1(%arg0: i32) -> (i32, i32, i32) {
    %c0_i32 = arith.constant 0 : i32
    %c0_i32_0 = arith.constant 0 : i32
    %c0_i32_1 = arith.constant 0 : i32
    return %arg0, %c0_i32, %c0_i32_0 : i32, i32, i32
  }
  func.func @transform_2(%arg0: i32) -> (i32, i32, i32, i32) {
    %c0_i32 = arith.constant 0 : i32
    %c0_i32_0 = arith.constant 0 : i32
    %c0_i32_1 = arith.constant 0 : i32
    %c0_i32_2 = arith.constant 0 : i32
    return %arg0, %c0_i32, %c0_i32_0, %c0_i32_1 : i32, i32, i32, i32
  }
  func.func @transform_3(%arg0: i32) -> (i32, i32, i32, i32) {
    %c0_i32 = arith.constant 0 : i32
    %c0_i32_0 = arith.constant 0 : i32
    %c0_i32_1 = arith.constant 0 : i32
    %c0_i32_2 = arith.constant 0 : i32
    return %arg0, %c0_i32, %c0_i32_0, %c0_i32_1 : i32, i32, i32, i32
  }
  func.func @transform_4(%arg0: i32) -> (i32, i32, i32) {
    %c0_i32 = arith.constant 0 : i32
    %c0_i32_0 = arith.constant 0 : i32
    %c0_i32_1 = arith.constant 0 : i32
    return %arg0, %c0_i32, %c0_i32_0 : i32, i32, i32
  }
  func.func @transform_5(%arg0: i32) -> (i32, i32, i32) {
    %c0_i32 = arith.constant 0 : i32
    %c0_i32_0 = arith.constant 0 : i32
    %c0_i32_1 = arith.constant 0 : i32
    return %arg0, %c0_i32, %c0_i32_0 : i32, i32, i32
  }
  func.func @transform_6(%arg0: i32) -> (i32, i32, i32) {
    %c0_i32 = arith.constant 0 : i32
    %c0_i32_0 = arith.constant 0 : i32
    %c0_i32_1 = arith.constant 0 : i32
    return %arg0, %c0_i32, %c0_i32_0 : i32, i32, i32
  }
  func.func @transform_7(%arg0: i32) -> (i32, i32, i32) {
    %c0_i32 = arith.constant 0 : i32
    %c0_i32_0 = arith.constant 0 : i32
    %c0_i32_1 = arith.constant 0 : i32
    return %arg0, %c0_i32, %c0_i32_0 : i32, i32, i32
  }
}

</mosaic_0001>

<bundles_post_ra>
// kernel: frozen_forward.1
= control target key start
LH: loop header
LB: loop body
LE: loop exit
PB: predicated region body
PF: predicated region fallthrough
CT: control target
= control target key end

     0   :  { %vm1963_vm0 = vcmask 523264   ;;  %s20190_s1 = inlined_call_operand.vmem [shape: bf16[4,2560,64], index: 1, kind: input, shape index: {}]   ;;  %s20191_s0 = inlined_call_operand.vmem [shape: bf16[4,32,2560], index: 0, kind: input, shape index: {}]   ;;  %s20192_s2 = inlined_call_operand.vmem [shape: bf16[4,4,64,64], index: 2, kind: input, shape index: {}]   ;;  %s20193_s3 = inlined_call_operand.vmem [shape: bf16[4,4,64,256], index: 3, kind: input, shape index: {}]   ;;  %s20194_s5 = inlined_call_operand.vmem [shape: bf16[4,256,128], index: 5, kind: input, shape index: {}]   ;;  %s20195_s4 = inlined_call_operand.vmem [shape: f32[4,1,256], index: 4, kind: input, shape index: {}]   ;;  %s20196_s6 = inlined_call_operand.vmem [shape: f32[4,1,128], index: 6, kind: input, shape index: {}]   ;;  %s20197_s7 = inlined_call_operand.vmem [shape: f32[4,2,128], index: 7, kind: output, shape index: {}]  }
   0x1   :  { %v14615_v0 = vld [vmem:[%s20190_s1 + $0x38] sm:$0xff]  ;;  %v14614_v4 = vld [vmem:[%s20190_s1 + $0x30] sm:$0xff]  ;;  %v14613_v8 = vld [vmem:[%s20190_s1 + $0x28] sm:$0xff] }
   0x2   :  { %v14623_v1 = vld [vmem:[%s20190_s1 + $0x78] sm:$0xff]  ;;  %1546 = vmatpush.bf16.msra.mxu0 %v14615_v0  ;;  %v14622_v5 = vld [vmem:[%s20190_s1 + $0x70] sm:$0xff]  ;;  %v14621_v9 = vld [vmem:[%s20190_s1 + $0x68] sm:$0xff] }
   0x3   :  { %v14631_v2 = vld [vmem:[%s20190_s1 + $0xb8] sm:$0xff]  ;;  %1565 = vmatpush.bf16.msra.mxu1 %v14623_v1  ;;  %v14630_v6 = vld [vmem:[%s20190_s1 + $0xb0] sm:$0xff]  ;;  %v14629_v10 = vld [vmem:[%s20190_s1 + $0xa8] sm:$0xff] }
   0x4   :  { %v14639_v3 = vld [vmem:[%s20190_s1 + $0xf8] sm:$0xff]  ;;  %1584 = vmatpush.bf16.msra.mxu2 %v14631_v2  ;;  %v14638_v7 = vld [vmem:[%s20190_s1 + $0xf0] sm:$0xff]  ;;  %v14637_v11 = vld [vmem:[%s20190_s1 + $0xe8] sm:$0xff] }
   0x5   :  { %1603 = vmatpush.bf16.msra.mxu3 %v14639_v3  ;;  %v14612_v12 = vld [vmem:[%s20190_s1 + $0x20] sm:$0xff]  ;;  %v14611_v16 = vld [vmem:[%s20190_s1 + $0x18] sm:$0xff]  ;;  %v14610_v20 = vld [vmem:[%s20190_s1 + $0x10] sm:$0xff] }
   0x6   :  { %1547 = vmatpush.bf16.msra.mxu0 %v14614_v4  ;;  %v14620_v13 = vld [vmem:[%s20190_s1 + $0x60] sm:$0xff]  ;;  %v14619_v17 = vld [vmem:[%s20190_s1 + $0x58] sm:$0xff]  ;;  %v14618_v21 = vld [vmem:[%s20190_s1 + $0x50] sm:$0xff] }
   0x7   :  { %1566 = vmatpush.bf16.msra.mxu1 %v14622_v5  ;;  %v14628_v14 = vld [vmem:[%s20190_s1 + $0xa0] sm:$0xff]  ;;  %v14627_v18 = vld [vmem:[%s20190_s1 + $0x98] sm:$0xff]  ;;  %v14626_v22 = vld [vmem:[%s20190_s1 + $0x90] sm:$0xff] }
   0x8   :  { %1585 = vmatpush.bf16.msra.mxu2 %v14630_v6  ;;  %v14636_v15 = vld [vmem:[%s20190_s1 + $0xe0] sm:$0xff]  ;;  %v14635_v19 = vld [vmem:[%s20190_s1 + $0xd8] sm:$0xff]  ;;  %v14634_v23 = vld [vmem:[%s20190_s1 + $0xd0] sm:$0xff] }
   0x9   :  { %1604 = vmatpush.bf16.msra.mxu3 %v14638_v7  ;;  %v14609_v24 = vld [vmem:[%s20190_s1 + $0x8] sm:$0xff]  ;;  %v14608_v28 = vld [vmem:[%s20190_s1] sm:$0xff]  ;;  %v14578_v33 = vld [vmem:[%s20191_s0 + $0x4c] sm:$0xf0] }
   0xa   :  { %1548 = vmatpush.bf16.msra.mxu0 %v14613_v8  ;;  %v14617_v25 = vld [vmem:[%s20190_s1 + $0x48] sm:$0xff]  ;;  %v14616_v29 = vld [vmem:[%s20190_s1 + $0x40] sm:$0xff]  ;;  %v9899_v35 = vld [vmem:[%s20191_s0 + $0x50] sm:$0xf0] }
   0xb   :  { %1567 = vmatpush.bf16.msra.mxu1 %v14621_v9  ;;  %v14625_v26 = vld [vmem:[%s20190_s1 + $0x88] sm:$0xff]  ;;  %v14624_v30 = vld [vmem:[%s20190_s1 + $0x80] sm:$0xff]  ;;  %v14579_v37 = vld [vmem:[%s20191_s0 + $0x54] sm:$0xf0] }
   0xc   :  { %1586 = vmatpush.bf16.msra.mxu2 %v14629_v10  ;;  %v14633_v27 = vld [vmem:[%s20190_s1 + $0xc8] sm:$0xff]  ;;  %v14632_v31 = vld [vmem:[%s20190_s1 + $0xc0] sm:$0xff]  ;;  %v9907_v39 = vld [vmem:[%s20191_s0 + $0x58] sm:$0xf0] }
   0xd   :  { %1605 = vmatpush.bf16.msra.mxu3 %v14637_v11  ;;  %v9897_v32 = vld [vmem:[%s20191_s0] sm:$0xf]  ;;  %v14568_v34 = vld [vmem:[%s20191_s0 + $0x4] sm:$0xf]  ;;  %v9905_v36 = vld [vmem:[%s20191_s0 + $0x8] sm:$0xf] }
   0xe   :  { %1549 = vmatpush.bf16.msra.mxu0 %v14612_v12  ;;  %v14569_v38 = vld [vmem:[%s20191_s0 + $0xc] sm:$0xf]  ;;  %v14663_v40 = vld [vmem:[%s20190_s1 + $0x1b8] sm:$0xff]  ;;  %v9898_v42 = vor.u32 %v14578_v33, %v9897_v32  ;;  %v9902_v43 = vor.u32 %v14568_v34, %v9899_v35  ;;  %v9906_v44 = vor.u32 %v14579_v37, %v9905_v36  ;;  %v14662_v48 = vld [vmem:[%s20190_s1 + $0x1b0] sm:$0xff] }
   0xf   :  { %1568 = vmatpush.bf16.msra.mxu1 %v14620_v13  ;;  %v14647_v41 = vld [vmem:[%s20190_s1 + $0x138] sm:$0xff]  ;;  %v9910_v45 = vor.u32 %v14569_v38, %v9907_v39  ;;  %v14646_v49 = vld [vmem:[%s20190_s1 + $0x130] sm:$0xff]  ;;  %v14661_v52 = vld [vmem:[%s20190_s1 + $0x1a8] sm:$0xff] }
  0x10   :  { %1587 = vmatpush.bf16.msra.mxu2 %v14628_v14  ;;  %v14655_v46 = vld [vmem:[%s20190_s1 + $0x178] sm:$0xff]  ;;  %v14654_v50 = vld [vmem:[%s20190_s1 + $0x170] sm:$0xff]  ;;  %v14645_v53 = vld [vmem:[%s20190_s1 + $0x128] sm:$0xff] }
  0x11   :  { %1606 = vmatpush.bf16.msra.mxu3 %v14636_v15  ;;  %v14671_v47 = vld [vmem:[%s20190_s1 + $0x1f8] sm:$0xff]  ;;  %v14670_v51 = vld [vmem:[%s20190_s1 + $0x1f0] sm:$0xff]  ;;  %v14653_v54 = vld [vmem:[%s20190_s1 + $0x168] sm:$0xff] }
  0x12   :  { %1550 = vmatpush.bf16.msra.mxu0 %v14611_v16  ;;  %v14669_v55 = vld [vmem:[%s20190_s1 + $0x1e8] sm:$0xff]  ;;  %v14660_v56 = vld [vmem:[%s20190_s1 + $0x1a0] sm:$0xff]  ;;  %v14598_v61 = vld [vmem:[%s20191_s0 + $0xec] sm:$0xf0] }
  0x13   :  { %1569 = vmatpush.bf16.msra.mxu1 %v14619_v17  ;;  %v14644_v57 = vld [vmem:[%s20190_s1 + $0x120] sm:$0xff]  ;;  %v9979_v63 = vld [vmem:[%s20191_s0 + $0xf0] sm:$0xf0]  ;;  %v9985_v0 = vld [vmem:[%s20191_s0 + $0xa8] sm:$0xf] }
  0x14   :  { %1588 = vmatpush.bf16.msra.mxu2 %v14627_v18  ;;  %v14652_v58 = vld [vmem:[%s20190_s1 + $0x160] sm:$0xff]  ;;  %v14599_v1 = vld [vmem:[%s20191_s0 + $0xf4] sm:$0xf0]  ;;  %v14589_v2 = vld [vmem:[%s20191_s0 + $0xac] sm:$0xf] }
  0x15   :  { %1607 = vmatpush.bf16.msra.mxu3 %v14635_v19  ;;  %v14668_v59 = vld [vmem:[%s20190_s1 + $0x1e0] sm:$0xff]  ;;  %v9987_v3 = vld [vmem:[%s20191_s0 + $0xf8] sm:$0xf0]  ;;  %v9986_v8 = vor.u32 %v14599_v1, %v9985_v0  ;;  %v14658_v12 = vld [vmem:[%s20190_s1 + $0x190] sm:$0xff] }
  0x16   :  { %1551 = vmatpush.bf16.msra.mxu0 %v14610_v20  ;;  %v9977_v60 = vld [vmem:[%s20191_s0 + $0xa0] sm:$0xf]  ;;  %v14588_v62 = vld [vmem:[%s20191_s0 + $0xa4] sm:$0xf]  ;;  %v14659_v4 = vld [vmem:[%s20190_s1 + $0x198] sm:$0xff]  ;;  %v9990_v9 = vor.u32 %v14589_v2, %v9987_v3 }
  0x17   :  { %1570 = vmatpush.bf16.msra.mxu1 %v14618_v21  ;;  %v14643_v5 = vld [vmem:[%s20190_s1 + $0x118] sm:$0xff]  ;;  %v9978_v6 = vor.u32 %v14598_v61, %v9977_v60  ;;  %v9982_v7 = vor.u32 %v14588_v62, %v9979_v63  ;;  %v14642_v13 = vld [vmem:[%s20190_s1 + $0x110] sm:$0xff]  ;;  %v14657_v16 = vld [vmem:[%s20190_s1 + $0x188] sm:$0xff] }
  0x18   :  { %1589 = vmatpush.bf16.msra.mxu2 %v14626_v22  ;;  %v14651_v10 = vld [vmem:[%s20190_s1 + $0x158] sm:$0xff]  ;;  %v14650_v14 = vld [vmem:[%s20190_s1 + $0x150] sm:$0xff]  ;;  %v14641_v17 = vld [vmem:[%s20190_s1 + $0x108] sm:$0xff] }
  0x19   :  { %1608 = vmatpush.bf16.msra.mxu3 %v14634_v23  ;;  %v14667_v11 = vld [vmem:[%s20190_s1 + $0x1d8] sm:$0xff]  ;;  %v14666_v15 = vld [vmem:[%s20190_s1 + $0x1d0] sm:$0xff]  ;;  %v14649_v18 = vld [vmem:[%s20190_s1 + $0x148] sm:$0xff] }
  0x1a   :  { %1552 = vmatpush.bf16.msra.mxu0 %v14609_v24  ;;  %v14665_v19 = vld [vmem:[%s20190_s1 + $0x1c8] sm:$0xff]  ;;  %v14656_v20 = vld [vmem:[%s20190_s1 + $0x180] sm:$0xff]  ;;  %v9913_v24 = vld [vmem:[%s20191_s0 + $0x10] sm:$0xf] }
  0x1b   :  { %1571 = vmatpush.bf16.msra.mxu1 %v14617_v25  ;;  %v14640_v21 = vld [vmem:[%s20190_s1 + $0x100] sm:$0xff]  ;;  %v14695_v25 = vld [vmem:[%s20190_s1 + $0x2b8] sm:$0xff]  ;;  %v9923_v33 = vld [vmem:[%s20191_s0 + $0x68] sm:$0xf0] }
  0x1c   :  { %1590 = vmatpush.bf16.msra.mxu2 %v14625_v26  ;;  %v14648_v22 = vld [vmem:[%s20190_s1 + $0x140] sm:$0xff]  ;;  %v14679_v26 = vld [vmem:[%s20190_s1 + $0x238] sm:$0xff]  ;;  %v14694_v37 = vld [vmem:[%s20190_s1 + $0x2b0] sm:$0xff] }
  0x1d   :  { %1609 = vmatpush.bf16.msra.mxu3 %v14633_v27  ;;  %v14664_v23 = vld [vmem:[%s20190_s1 + $0x1c0] sm:$0xff]  ;;  %v14571_v32 = vld [vmem:[%s20191_s0 + $0x1c] sm:$0xf]  ;;  %v10003_v61 = vld [vmem:[%s20191_s0 + $0x108] sm:$0xf0] }
  0x1e   :  { %1553 = vmatpush.bf16.msra.mxu0 %v14608_v28  ;;  %v14580_v27 = vld [vmem:[%s20191_s0 + $0x5c] sm:$0xf0]  ;;  %v14570_v28 = vld [vmem:[%s20191_s0 + $0x14] sm:$0xf]  ;;  %v14687_v34 = vld [vmem:[%s20190_s1 + $0x278] sm:$0xff] }
  0x1f   :  { %1572 = vmatpush.bf16.msra.mxu1 %v14616_v29  ;;  %v9915_v29 = vld [vmem:[%s20191_s0 + $0x60] sm:$0xf0]  ;;  %v14703_v35 = vld [vmem:[%s20190_s1 + $0x2f8] sm:$0xff]  ;;  %v9914_v36 = vor.u32 %v14580_v27, %v9913_v24  ;;  %v14690_v1 = vld [vmem:[%s20190_s1 + $0x290] sm:$0xff] }
  0x20   :  { %1591 = vmatpush.bf16.msra.mxu2 %v14624_v30  ;;  %v9921_v30 = vld [vmem:[%s20191_s0 + $0x18] sm:$0xf]  ;;  %v9918_v38 = vor.u32 %v14570_v28, %v9915_v29  ;;  %v9931_v24 = vld [vmem:[%s20191_s0 + $0x70] sm:$0xf0]  ;;  %v14573_v27 = vld [vmem:[%s20191_s0 + $0x2c] sm:$0xf] }
  0x21   :  { %1610 = vmatpush.bf16.msra.mxu3 %v14632_v31  ;;  %1554 = vmatmul.bf16.vlgmr.msra.gmra.mxu0 %v9898_v42  ;;  %v14581_v31 = vld [vmem:[%s20191_s0 + $0x64] sm:$0xf0]  ;;  %v14686_v42 = vld [vmem:[%s20190_s1 + $0x270] sm:$0xff]  ;;  %v14675_v60 = vld [vmem:[%s20190_s1 + $0x218] sm:$0xff] }
  0x22   :  { %1622 = vmatpush.bf16.msrb.mxu0 %v14647_v41  ;;  %1573 = vmatmul.bf16.vlgmr.msra.gmra.mxu1 %v9902_v43  ;;  %v9922_v39 = vor.u32 %v14581_v31, %v9921_v30  ;;  %v14678_v41 = vld [vmem:[%s20190_s1 + $0x230] sm:$0xff]  ;;  %v14683_v62 = vld [vmem:[%s20190_s1 + $0x258] sm:$0xff] }
  0x23   :  { %1592 = vmatmul.bf16.vlgmr.msra.gmra.mxu2 %v9906_v44  ;;  %1641 = vmatpush.bf16.msrb.mxu1 %v14655_v46  ;;  %v14702_v43 = vld [vmem:[%s20190_s1 + $0x2f0] sm:$0xff]  ;;  %v14693_v44 = vld [vmem:[%s20190_s1 + $0x2a8] sm:$0xff]  ;;  %v14699_v63 = vld [vmem:[%s20190_s1 + $0x2d8] sm:$0xff] }
  0x24   :  { %1660 = vmatpush.bf16.msrb.mxu2 %v14663_v40  ;;  %1611 = vmatmul.bf16.vlgmr.msra.gmra.mxu3 %v9910_v45  ;;  %v9926_v40 = vor.u32 %v14571_v32, %v9923_v33  ;;  %v14677_v45 = vld [vmem:[%s20190_s1 + $0x228] sm:$0xff]  ;;  %v9939_v28 = vld [vmem:[%s20191_s0 + $0x78] sm:$0xf0]  ;;  %v14718_v30 = vld [vmem:[%s20190_s1 + $0x370] sm:$0xff] }
  0x25   :  { %1679 = vmatpush.bf16.msrb.mxu3 %v14671_v47  ;;  %v14685_v46 = vld [vmem:[%s20190_s1 + $0x268] sm:$0xff]  ;;  %v9942_v33 = vor.u32 %v14573_v27, %v9939_v28 }
  0x26   :  { %1623 = vmatpush.bf16.msrb.mxu0 %v14646_v49  ;;  %v14701_v47 = vld [vmem:[%s20190_s1 + $0x2e8] sm:$0xff]  ;;  %v14676_v49 = vld [vmem:[%s20190_s1 + $0x220] sm:$0xff] }
  0x27   :  { %1642 = vmatpush.bf16.msrb.mxu1 %v14654_v50  ;;  %v14684_v50 = vld [vmem:[%s20190_s1 + $0x260] sm:$0xff]  ;;  %v14757_v28 = vld [vmem:[%s20190_s1 + $0x4a8] sm:$0xff] }
  0x28   :  { %1661 = vmatpush.bf16.msrb.mxu2 %v14662_v48  ;;  %v14692_v48 = vld [vmem:[%s20190_s1 + $0x2a0] sm:$0xff] }
  0x29   :  { %1680 = vmatpush.bf16.msrb.mxu3 %v14670_v51  ;;  %v14700_v51 = vld [vmem:[%s20190_s1 + $0x2e0] sm:$0xff] }
  0x2a   :  { %1624 = vmatpush.bf16.msrb.mxu0 %v14645_v53  ;;  %v14600_v53 = vld [vmem:[%s20191_s0 + $0xfc] sm:$0xf0] }
  0x2b   :  { %1643 = vmatpush.bf16.msrb.mxu1 %v14653_v54  ;;  %v14691_v54 = vld [vmem:[%s20190_s1 + $0x298] sm:$0xff] }
  0x2c   :  { %1662 = vmatpush.bf16.msrb.mxu2 %v14661_v52  ;;  %v9993_v52 = vld [vmem:[%s20191_s0 + $0xb0] sm:$0xf] }
  0x2d   :  { %1681 = vmatpush.bf16.msrb.mxu3 %v14669_v55  ;;  %v14590_v55 = vld [vmem:[%s20191_s0 + $0xb4] sm:$0xf]  ;;  %v9994_v0 = vor.u32 %v14600_v53, %v9993_v52  ;;  %v14593_v52 = vld [vmem:[%s20191_s0 + $0xcc] sm:$0xf]  ;;  %v14707_v53 = vld [vmem:[%s20190_s1 + $0x318] sm:$0xff] }
  0x2e   :  { %1625 = vmatpush.bf16.msrb.mxu0 %v14644_v57  ;;  %v10001_v57 = vld [vmem:[%s20191_s0 + $0xb8] sm:$0xf] }
  0x2f   :  { %1644 = vmatpush.bf16.msrb.mxu1 %v14652_v58  ;;  %v14601_v58 = vld [vmem:[%s20191_s0 + $0x104] sm:$0xf0] }
  0x30   :  { %1663 = vmatpush.bf16.msrb.mxu2 %v14660_v56  ;;  %v9995_v56 = vld [vmem:[%s20191_s0 + $0x100] sm:$0xf0]  ;;  %v10002_v3 = vor.u32 %v14601_v58, %v10001_v57  ;;  %v14714_v58 = vld [vmem:[%s20190_s1 + $0x350] sm:$0xff] }
  0x31   :  { %1682 = vmatpush.bf16.msrb.mxu3 %v14668_v59  ;;  %1559 = vmatmul.bf16.gmra.mxu0 %v9978_v6  ;;  %v14591_v59 = vld [vmem:[%s20191_s0 + $0xbc] sm:$0xf]  ;;  %v9998_v2 = vor.u32 %v14590_v55, %v9995_v56  ;;  %v14682_v6 = vld [vmem:[%s20190_s1 + $0x250] sm:$0xff] }
  0x32   :  { %1626 = vmatpush.bf16.msrb.mxu0 %v14643_v5  ;;  %1578 = vmatmul.bf16.gmra.mxu1 %v9982_v7  ;;  %v14674_v5 = vld [vmem:[%s20190_s1 + $0x210] sm:$0xff]  ;;  %v14731_v55 = vld [vmem:[%s20190_s1 + $0x3d8] sm:$0xff] }
  0x33   :  { %1597 = vmatmul.bf16.gmra.mxu2 %v9986_v8  ;;  %1645 = vmatpush.bf16.msrb.mxu1 %v14651_v10  ;;  %v14698_v7 = vld [vmem:[%s20190_s1 + $0x2d0] sm:$0xff]  ;;  %v14689_v8 = vld [vmem:[%s20190_s1 + $0x288] sm:$0xff] }
  0x34   :  { %1664 = vmatpush.bf16.msrb.mxu2 %v14659_v4  ;;  %1616 = vmatmul.bf16.gmra.mxu3 %v9990_v9  ;;  %v10006_v4 = vor.u32 %v14591_v59, %v10003_v61  ;;  %v14673_v9 = vld [vmem:[%s20190_s1 + $0x208] sm:$0xff]  ;;  %v14722_v56 = vld [vmem:[%s20190_s1 + $0x390] sm:$0xff] }
  0x35   :  { %1683 = vmatpush.bf16.msrb.mxu3 %v14667_v11  ;;  %v14681_v10 = vld [vmem:[%s20190_s1 + $0x248] sm:$0xff] }
  0x36   :  { %1627 = vmatpush.bf16.msrb.mxu0 %v14642_v13  ;;  %v14697_v11 = vld [vmem:[%s20190_s1 + $0x2c8] sm:$0xff]  ;;  %v14727_v13 = vld [vmem:[%s20190_s1 + $0x3b8] sm:$0xff] }
  0x37   :  { %1646 = vmatpush.bf16.msrb.mxu1 %v14650_v14  ;;  %v14672_v14 = vld [vmem:[%s20190_s1 + $0x200] sm:$0xff] }
  0x38   :  { %1665 = vmatpush.bf16.msrb.mxu2 %v14658_v12  ;;  %v14688_v12 = vld [vmem:[%s20190_s1 + $0x280] sm:$0xff] }
  0x39   :  { %1684 = vmatpush.bf16.msrb.mxu3 %v14666_v15  ;;  %v14680_v15 = vld [vmem:[%s20190_s1 + $0x240] sm:$0xff] }
  0x3a   :  { %1628 = vmatpush.bf16.msrb.mxu0 %v14641_v17  ;;  %v9929_v17 = vld [vmem:[%s20191_s0 + $0x20] sm:$0xf] }
  0x3b   :  { %1647 = vmatpush.bf16.msrb.mxu1 %v14649_v18  ;;  %v14582_v18 = vld [vmem:[%s20191_s0 + $0x6c] sm:$0xf0] }
  0x3c   :  { %1666 = vmatpush.bf16.msrb.mxu2 %v14657_v16  ;;  %v14696_v16 = vld [vmem:[%s20190_s1 + $0x2c0] sm:$0xff]  ;;  %v9930_v29 = vor.u32 %v14582_v18, %v9929_v17  ;;  %v9953_v18 = vld [vmem:[%s20191_s0 + $0x38] sm:$0xf] }
  0x3d   :  { %1685 = vmatpush.bf16.msrb.mxu3 %v14665_v19  ;;  %v14711_v19 = vld [vmem:[%s20190_s1 + $0x338] sm:$0xff]  ;;  %v9947_v17 = vld [vmem:[%s20191_s0 + $0x80] sm:$0xf0] }
  0x3e   :  { %1629 = vmatpush.bf16.msrb.mxu0 %v14640_v21  ;;  %v14572_v21 = vld [vmem:[%s20191_s0 + $0x24] sm:$0xf] }
  0x3f   :  { %1648 = vmatpush.bf16.msrb.mxu1 %v14648_v22  ;;  %v14735_v22 = vld [vmem:[%s20190_s1 + $0x3f8] sm:$0xff]  ;;  %v9934_v31 = vor.u32 %v14572_v21, %v9931_v24  ;;  %v9955_v21 = vld [vmem:[%s20191_s0 + $0x88] sm:$0xf0]  ;;  %v14766_v24 = vld [vmem:[%s20190_s1 + $0x4f0] sm:$0xff] }
  0x40   :  { %1667 = vmatpush.bf16.msrb.mxu2 %v14656_v20  ;;  %v14719_v20 = vld [vmem:[%s20190_s1 + $0x378] sm:$0xff] }
  0x41   :  { %1686 = vmatpush.bf16.msrb.mxu3 %v14664_v23  ;;  %1630 = vmatmul.bf16.vlgmr.msrb.gmra.mxu0 %v9914_v36  ;;  %v14726_v23 = vld [vmem:[%s20190_s1 + $0x3b0] sm:$0xff]  ;;  %v14725_v36 = vld [vmem:[%s20190_s1 + $0x3a8] sm:$0xff] }
  0x42   :  { %1698 = vmatpush.bf16.msra.mxu0 %v14679_v26  ;;  %1649 = vmatmul.bf16.vlgmr.msrb.gmra.mxu1 %v9918_v38  ;;  %v14583_v26 = vld [vmem:[%s20191_s0 + $0x74] sm:$0xf0]  ;;  %v14709_v38 = vld [vmem:[%s20190_s1 + $0x328] sm:$0xff] }
  0x43   :  { %1717 = vmatpush.bf16.msra.mxu1 %v14687_v34  ;;  %1668 = vmatmul.bf16.vlgmr.msrb.gmra.mxu2 %v9922_v39  ;;  %v14710_v34 = vld [vmem:[%s20190_s1 + $0x330] sm:$0xff]  ;;  %v14733_v39 = vld [vmem:[%s20190_s1 + $0x3e8] sm:$0xff] }
  0x44   :  { %1736 = vmatpush.bf16.msra.mxu2 %v14695_v25  ;;  %1687 = vmatmul.bf16.vlgmr.msrb.gmra.mxu3 %v9926_v40  ;;  %v9937_v25 = vld [vmem:[%s20191_s0 + $0x28] sm:$0xf]  ;;  %v14724_v40 = vld [vmem:[%s20190_s1 + $0x3a0] sm:$0xff] }
  0x45   :  { %1755 = vmatpush.bf16.msra.mxu3 %v14703_v35  ;;  %v9938_v32 = vor.u32 %v14583_v26, %v9937_v25  ;;  %v14734_v35 = vld [vmem:[%s20190_s1 + $0x3f0] sm:$0xff] }
  0x46   :  { %1699 = vmatpush.bf16.msra.mxu0 %v14678_v41  ;;  %v14716_v41 = vld [vmem:[%s20190_s1 + $0x360] sm:$0xff] }
  0x47   :  { %1718 = vmatpush.bf16.msra.mxu1 %v14686_v42  ;;  %v14708_v42 = vld [vmem:[%s20190_s1 + $0x320] sm:$0xff] }
  0x48   :  { %1737 = vmatpush.bf16.msra.mxu2 %v14694_v37  ;;  %v14717_v37 = vld [vmem:[%s20190_s1 + $0x368] sm:$0xff] }
  0x49   :  { %1756 = vmatpush.bf16.msra.mxu3 %v14702_v43  ;;  %v14732_v43 = vld [vmem:[%s20190_s1 + $0x3e0] sm:$0xff] }
  0x4a   :  { %1700 = vmatpush.bf16.msra.mxu0 %v14677_v45  ;;  %v10009_v45 = vld [vmem:[%s20191_s0 + $0xc0] sm:$0xf] }
  0x4b   :  { %1719 = vmatpush.bf16.msra.mxu1 %v14685_v46  ;;  %v14602_v46 = vld [vmem:[%s20191_s0 + $0x10c] sm:$0xf0] }
  0x4c   :  { %1738 = vmatpush.bf16.msra.mxu2 %v14693_v44  ;;  %v14723_v44 = vld [vmem:[%s20190_s1 + $0x398] sm:$0xff]  ;;  %v10010_v57 = vor.u32 %v14602_v46, %v10009_v45  ;;  %v14605_v45 = vld [vmem:[%s20191_s0 + $0x124] sm:$0xf0] }
  0x4d   :  { %1757 = vmatpush.bf16.msra.mxu3 %v14701_v47  ;;  %v14715_v47 = vld [vmem:[%s20190_s1 + $0x358] sm:$0xff] }
  0x4e   :  { %1701 = vmatpush.bf16.msra.mxu0 %v14676_v49  ;;  %v10011_v49 = vld [vmem:[%s20191_s0 + $0x110] sm:$0xf0]  ;;  %v14595_v46 = vld [vmem:[%s20191_s0 + $0xdc] sm:$0xf] }
  0x4f   :  { %1720 = vmatpush.bf16.msra.mxu1 %v14684_v50  ;;  %v10017_v50 = vld [vmem:[%s20191_s0 + $0xc8] sm:$0xf] }
  0x50   :  { %1739 = vmatpush.bf16.msra.mxu2 %v14692_v48  ;;  %v14592_v48 = vld [vmem:[%s20191_s0 + $0xc4] sm:$0xf] }
  0x51   :  { %1758 = vmatpush.bf16.msra.mxu3 %v14700_v51  ;;  %1635 = vmatmul.bf16.gmra.mxu0 %v9994_v0  ;;  %v14603_v51 = vld [vmem:[%s20191_s0 + $0x114] sm:$0xf0]  ;;  %v10014_v59 = vor.u32 %v14592_v48, %v10011_v49  ;;  %v14721_v0 = vld [vmem:[%s20190_s1 + $0x388] sm:$0xff]  ;;  %v14738_v49 = vld [vmem:[%s20190_s1 + $0x410] sm:$0xff] }
  0x52   :  { %1702 = vmatpush.bf16.msra.mxu0 %v14675_v60  ;;  %1654 = vmatmul.bf16.gmra.mxu1 %v9998_v2  ;;  %v10018_v60 = vor.u32 %v14603_v51, %v10017_v50  ;;  %v14705_v2 = vld [vmem:[%s20190_s1 + $0x308] sm:$0xff]  ;;  %v14746_v50 = vld [vmem:[%s20190_s1 + $0x450] sm:$0xff] }
  0x53   :  { %1721 = vmatpush.bf16.msra.mxu1 %v14683_v62  ;;  %1673 = vmatmul.bf16.gmra.mxu2 %v10002_v3  ;;  %v14706_v62 = vld [vmem:[%s20190_s1 + $0x310] sm:$0xff]  ;;  %v14729_v3 = vld [vmem:[%s20190_s1 + $0x3c8] sm:$0xff] }
  0x54   :  { %1740 = vmatpush.bf16.msra.mxu2 %v14691_v54  ;;  %1692 = vmatmul.bf16.gmra.mxu3 %v10006_v4  ;;  %v10019_v54 = vld [vmem:[%s20191_s0 + $0x118] sm:$0xf0]  ;;  %v14720_v4 = vld [vmem:[%s20190_s1 + $0x380] sm:$0xff]  ;;  %v10035_v48 = vld [vmem:[%s20191_s0 + $0x128] sm:$0xf0] }
  0x55   :  { %1759 = vmatpush.bf16.msra.mxu3 %v14699_v63  ;;  %v10022_v61 = vor.u32 %v14593_v52, %v10019_v54  ;;  %v14730_v63 = vld [vmem:[%s20190_s1 + $0x3d0] sm:$0xff] }
  0x56   :  { %1703 = vmatpush.bf16.msra.mxu0 %v14674_v5  ;;  %v14712_v5 = vld [vmem:[%s20190_s1 + $0x340] sm:$0xff]  ;;  %v14762_v52 = vld [vmem:[%s20190_s1 + $0x4d0] sm:$0xff] }
  0x57   :  { %1722 = vmatpush.bf16.msra.mxu1 %v14682_v6  ;;  %v14759_v6 = vld [vmem:[%s20190_s1 + $0x4b8] sm:$0xff] }
  0x58   :  { %1741 = vmatpush.bf16.msra.mxu2 %v14690_v1  ;;  %v14713_v1 = vld [vmem:[%s20190_s1 + $0x348] sm:$0xff] }
  0x59   :  { %1760 = vmatpush.bf16.msra.mxu3 %v14698_v7  ;;  %v14751_v7 = vld [vmem:[%s20190_s1 + $0x478] sm:$0xff] }
  0x5a   :  { %1704 = vmatpush.bf16.msra.mxu0 %v14673_v9  ;;  %v14728_v9 = vld [vmem:[%s20190_s1 + $0x3c0] sm:$0xff] }
  0x5b   :  { %1723 = vmatpush.bf16.msra.mxu1 %v14681_v10  ;;  %v14743_v10 = vld [vmem:[%s20190_s1 + $0x438] sm:$0xff] }
  0x5c   :  { %1742 = vmatpush.bf16.msra.mxu2 %v14689_v8  ;;  %v14704_v8 = vld [vmem:[%s20190_s1 + $0x300] sm:$0xff] }
  0x5d   :  { %1761 = vmatpush.bf16.msra.mxu3 %v14697_v11  ;;  %v9945_v11 = vld [vmem:[%s20191_s0 + $0x30] sm:$0xf] }
  0x5e   :  { %1705 = vmatpush.bf16.msra.mxu0 %v14672_v14  ;;  %v14584_v14 = vld [vmem:[%s20191_s0 + $0x7c] sm:$0xf0] }
  0x5f   :  { %1724 = vmatpush.bf16.msra.mxu1 %v14680_v15  ;;  %v14574_v15 = vld [vmem:[%s20191_s0 + $0x34] sm:$0xf] }
  0x60   :  { %1743 = vmatpush.bf16.msra.mxu2 %v14688_v12  ;;  %v14767_v12 = vld [vmem:[%s20190_s1 + $0x4f8] sm:$0xff]  ;;  %v9950_v25 = vor.u32 %v14574_v15, %v9947_v17 }
  0x61   :  { %1762 = vmatpush.bf16.msra.mxu3 %v14696_v16  ;;  %1706 = vmatmul.bf16.vlgmr.msra.gmra.mxu0 %v9930_v29  ;;  %v14750_v16 = vld [vmem:[%s20190_s1 + $0x470] sm:$0xff]  ;;  %v14741_v29 = vld [vmem:[%s20190_s1 + $0x428] sm:$0xff] }
  0x62   :  { %1774 = vmatpush.bf16.msrb.mxu0 %v14711_v19  ;;  %1725 = vmatmul.bf16.vlgmr.msra.gmra.mxu1 %v9934_v31  ;;  %v14585_v19 = vld [vmem:[%s20191_s0 + $0x84] sm:$0xf0] }
  0x63   :  { %1793 = vmatpush.bf16.msrb.mxu1 %v14719_v20  ;;  %1744 = vmatmul.bf16.vlgmr.msra.gmra.mxu2 %v9938_v32  ;;  %v14575_v20 = vld [vmem:[%s20191_s0 + $0x3c] sm:$0xf]  ;;  %v9954_v26 = vor.u32 %v14585_v19, %v9953_v18  ;;  %v14765_v31 = vld [vmem:[%s20190_s1 + $0x4e8] sm:$0xff]  ;;  %v14756_v32 = vld [vmem:[%s20190_s1 + $0x4a0] sm:$0xff] }
  0x64   :  { %1812 = vmatpush.bf16.msrb.mxu2 %v14727_v13  ;;  %1763 = vmatmul.bf16.vlgmr.msra.gmra.mxu3 %v9942_v33  ;;  %v14758_v13 = vld [vmem:[%s20190_s1 + $0x4b0] sm:$0xff]  ;;  %v9958_v27 = vor.u32 %v14575_v20, %v9955_v21  ;;  %v14740_v33 = vld [vmem:[%s20190_s1 + $0x420] sm:$0xff] }
  0x65   :  { %1831 = vmatpush.bf16.msrb.mxu3 %v14735_v22  ;;  %v14742_v22 = vld [vmem:[%s20190_s1 + $0x430] sm:$0xff] }
  0x66   :  { %1775 = vmatpush.bf16.msrb.mxu0 %v14710_v34  ;;  %v14748_v34 = vld [vmem:[%s20190_s1 + $0x460] sm:$0xff] }
  0x67   :  { %1794 = vmatpush.bf16.msrb.mxu1 %v14718_v30  ;;  %v14749_v30 = vld [vmem:[%s20190_s1 + $0x468] sm:$0xff] }
  0x68   :  { %1813 = vmatpush.bf16.msrb.mxu2 %v14726_v23  ;;  %v9946_v23 = vor.u32 %v14584_v14, %v9945_v11 }
  0x69   :  { %1832 = vmatpush.bf16.msrb.mxu3 %v14734_v35  ;;  %v14764_v35 = vld [vmem:[%s20190_s1 + $0x4e0] sm:$0xff] }
  0x6a   :  { %1776 = vmatpush.bf16.msrb.mxu0 %v14709_v38  ;;  %v14747_v38 = vld [vmem:[%s20190_s1 + $0x458] sm:$0xff] }
  0x6b   :  { %1795 = vmatpush.bf16.msrb.mxu1 %v14717_v37  ;;  %v14739_v37 = vld [vmem:[%s20190_s1 + $0x418] sm:$0xff] }
  0x6c   :  { %1814 = vmatpush.bf16.msrb.mxu2 %v14725_v36  ;;  %v14755_v36 = vld [vmem:[%s20190_s1 + $0x498] sm:$0xff] }
  0x6d   :  { %1833 = vmatpush.bf16.msrb.mxu3 %v14733_v39  ;;  %v10025_v39 = vld [vmem:[%s20191_s0 + $0xd0] sm:$0xf] }
  0x6e   :  { %1777 = vmatpush.bf16.msrb.mxu0 %v14708_v42  ;;  %v14594_v42 = vld [vmem:[%s20191_s0 + $0xd4] sm:$0xf] }
  0x6f   :  { %1796 = vmatpush.bf16.msrb.mxu1 %v14716_v41  ;;  %v14763_v41 = vld [vmem:[%s20190_s1 + $0x4d8] sm:$0xff] }
  0x70   :  { %1815 = vmatpush.bf16.msrb.mxu2 %v14724_v40  ;;  %v14604_v40 = vld [vmem:[%s20191_s0 + $0x11c] sm:$0xf0] }
  0x71   :  { %1834 = vmatpush.bf16.msrb.mxu3 %v14732_v43  ;;  %1711 = vmatmul.bf16.gmra.mxu0 %v10010_v57  ;;  %v10027_v43 = vld [vmem:[%s20191_s0 + $0x120] sm:$0xf0]  ;;  %v10026_v51 = vor.u32 %v14604_v40, %v10025_v39  ;;  %v14737_v57 = vld [vmem:[%s20190_s1 + $0x408] sm:$0xff] }
  0x72   :  { %1778 = vmatpush.bf16.msrb.mxu0 %v14707_v53  ;;  %1730 = vmatmul.bf16.gmra.mxu1 %v10014_v59  ;;  %v10030_v53 = vor.u32 %v14594_v42, %v10027_v43  ;;  %v14761_v59 = vld [vmem:[%s20190_s1 + $0x4c8] sm:$0xff] }
  0x73   :  { %1797 = vmatpush.bf16.msrb.mxu1 %v14715_v47  ;;  %1749 = vmatmul.bf16.gmra.mxu2 %v10018_v60  ;;  %v14754_v47 = vld [vmem:[%s20190_s1 + $0x490] sm:$0xff]  ;;  %v14752_v60 = vld [vmem:[%s20190_s1 + $0x480] sm:$0xff] }
  0x74   :  { %1816 = vmatpush.bf16.msrb.mxu2 %v14723_v44  ;;  %1768 = vmatmul.bf16.gmra.mxu3 %v10022_v61  ;;  %v10033_v44 = vld [vmem:[%s20191_s0 + $0xd8] sm:$0xf]  ;;  %v14736_v61 = vld [vmem:[%s20190_s1 + $0x400] sm:$0xff] }
  0x75   :  { %1835 = vmatpush.bf16.msrb.mxu3 %v14731_v55  ;;  %v10034_v54 = vor.u32 %v14605_v45, %v10033_v44  ;;  %v10038_v55 = vor.u32 %v14595_v46, %v10035_v48 }
  0x76   :  { %1779 = vmatpush.bf16.msrb.mxu0 %v14706_v62  ;;  %v14744_v62 = vld [vmem:[%s20190_s1 + $0x440] sm:$0xff] }
  0x77   :  { %1798 = vmatpush.bf16.msrb.mxu1 %v14714_v58  ;;  %v14745_v58 = vld [vmem:[%s20190_s1 + $0x448] sm:$0xff] }
  0x78   :  { %1817 = vmatpush.bf16.msrb.mxu2 %v14722_v56  ;;  %v14753_v56 = vld [vmem:[%s20190_s1 + $0x488] sm:$0xff] }
  0x79   :  { %1836 = vmatpush.bf16.msrb.mxu3 %v14730_v63  ;;  %v14760_v63 = vld [vmem:[%s20190_s1 + $0x4c0] sm:$0xff] }
  0x7a   :  { %1780 = vmatpush.bf16.msrb.mxu0 %v14705_v2  ;;  %v14576_v2 = vld [vmem:[%s20191_s0 + $0x44] sm:$0xf] }
  0x7b   :  { %1799 = vmatpush.bf16.msrb.mxu1 %v14713_v1  ;;  %v14586_v1 = vld [vmem:[%s20191_s0 + $0x8c] sm:$0xf0] }
  0x7c   :  { %1818 = vmatpush.bf16.msrb.mxu2 %v14721_v0  ;;  %v9961_v0 = vld [vmem:[%s20191_s0 + $0x40] sm:$0xf] }
  0x7d   :  { %1837 = vmatpush.bf16.msrb.mxu3 %v14729_v3  ;;  %v9963_v3 = vld [vmem:[%s20191_s0 + $0x90] sm:$0xf0] }
  0x7e   :  { %1781 = vmatpush.bf16.msrb.mxu0 %v14704_v8  ;;  %v9962_v8 = vor.u32 %v14586_v1, %v9961_v0  ;;  %v9966_v11 = vor.u32 %v14576_v2, %v9963_v3 }
  0x7f   :  { %1800 = vmatpush.bf16.msrb.mxu1 %v14712_v5  ;;  %v14587_v5 = vld [vmem:[%s20191_s0 + $0x94] sm:$0xf0] }
  0x80   :  { %1819 = vmatpush.bf16.msrb.mxu2 %v14720_v4  ;;  %v9969_v4 = vld [vmem:[%s20191_s0 + $0x48] sm:$0xf] }
  0x81   :  { %1838 = vmatpush.bf16.msrb.mxu3 %v14728_v9  ;;  %1782 = vmatmul.bf16.vlgmr.msrb.gmra.mxu0 %v9946_v23  ;;  %v14606_v23 = vld [vmem:[%s20191_s0 + $0x12c] sm:$0xf0] }
  0x82   :  { %1850 = vmatpush.bf16.msra.mxu0 %v14743_v10  ;;  %1801 = vmatmul.bf16.vlgmr.msrb.gmra.mxu1 %v9950_v25  ;;  %v10043_v25 = vld [vmem:[%s20191_s0 + $0x130] sm:$0xf0] }
  0x83   :  { %1869 = vmatpush.bf16.msra.mxu1 %v14751_v7  ;;  %1820 = vmatmul.bf16.vlgmr.msrb.gmra.mxu2 %v9954_v26  ;;  %v9971_v7 = vld [vmem:[%s20191_s0 + $0x98] sm:$0xf0]  ;;  %v10049_v26 = vld [vmem:[%s20191_s0 + $0xe8] sm:$0xf] }
  0x84   :  { %1888 = vmatpush.bf16.msra.mxu2 %v14759_v6  ;;  %1839 = vmatmul.bf16.vlgmr.msrb.gmra.mxu3 %v9958_v27  ;;  %v14577_v6 = vld [vmem:[%s20191_s0 + $0x4c] sm:$0xf]  ;;  %v14607_v27 = vld [vmem:[%s20191_s0 + $0x134] sm:$0xf0] }
  0x85   :  { %1907 = vmatpush.bf16.msra.mxu3 %v14767_v12  ;;  %v9970_v12 = vor.u32 %v14587_v5, %v9969_v4 }
  0x86   :  { %1851 = vmatpush.bf16.msra.mxu0 %v14742_v22  ;;  %v10041_v22 = vld [vmem:[%s20191_s0 + $0xe0] sm:$0xf] }
  0x87   :  { %1870 = vmatpush.bf16.msra.mxu1 %v14750_v16 }
  0x88   :  { %1889 = vmatpush.bf16.msra.mxu2 %v14758_v13  ;;  %v9974_v13 = vor.u32 %v14577_v6, %v9971_v7 }
  0x89   :  { %1908 = vmatpush.bf16.msra.mxu3 %v14766_v24  ;;  %v14596_v24 = vld [vmem:[%s20191_s0 + $0xe4] sm:$0xf] }
  0x8a   :  { %1852 = vmatpush.bf16.msra.mxu0 %v14741_v29  ;;  %v10051_v29 = vld [vmem:[%s20191_s0 + $0x138] sm:$0xf0] }
  0x8b   :  { %1871 = vmatpush.bf16.msra.mxu1 %v14749_v30 }
  0x8c   :  { %1890 = vmatpush.bf16.msra.mxu2 %v14757_v28  ;;  %v14597_v28 = vld [vmem:[%s20191_s0 + $0xec] sm:$0xf] }
  0x8d   :  { %1909 = vmatpush.bf16.msra.mxu3 %v14765_v31 }
  0x8e   :  { %1853 = vmatpush.bf16.msra.mxu0 %v14740_v33 }
  0x8f   :  { %1872 = vmatpush.bf16.msra.mxu1 %v14748_v34 }
  0x90   :  { %1891 = vmatpush.bf16.msra.mxu2 %v14756_v32  ;;  %v10042_v32 = vor.u32 %v14606_v23, %v10041_v22 }
  0x91   :  { %1910 = vmatpush.bf16.msra.mxu3 %v14764_v35  ;;  %1787 = vmatmul.bf16.gmra.mxu0 %v10026_v51  ;;  %v10046_v35 = vor.u32 %v14596_v24, %v10043_v25 }
  0x92   :  { %1854 = vmatpush.bf16.msra.mxu0 %v14739_v37  ;;  %1806 = vmatmul.bf16.gmra.mxu1 %v10030_v53  ;;  %v10054_v37 = vor.u32 %v14597_v28, %v10051_v29 }
  0x93   :  { %1873 = vmatpush.bf16.msra.mxu1 %v14747_v38  ;;  %1825 = vmatmul.bf16.gmra.mxu2 %v10034_v54 }
  0x94   :  { %1892 = vmatpush.bf16.msra.mxu2 %v14755_v36  ;;  %1844 = vmatmul.bf16.gmra.mxu3 %v10038_v55  ;;  %v10050_v36 = vor.u32 %v14607_v27, %v10049_v26 }
  0x95   :  { %1911 = vmatpush.bf16.msra.mxu3 %v14763_v41 }
  0x96   :  { %1855 = vmatpush.bf16.msra.mxu0 %v14738_v49 }
  0x97   :  { %1874 = vmatpush.bf16.msra.mxu1 %v14746_v50 }
  0x98   :  { %1893 = vmatpush.bf16.msra.mxu2 %v14754_v47 }
  0x99   :  { %1912 = vmatpush.bf16.msra.mxu3 %v14762_v52 }
  0x9a   :  { %1856 = vmatpush.bf16.msra.mxu0 %v14737_v57 }
  0x9b   :  { %1875 = vmatpush.bf16.msra.mxu1 %v14745_v58 }
  0x9c   :  { %1894 = vmatpush.bf16.msra.mxu2 %v14753_v56 }
  0x9d   :  { %1913 = vmatpush.bf16.msra.mxu3 %v14761_v59 }
  0x9e   :  { %1857 = vmatpush.bf16.msra.mxu0 %v14736_v61  ;;  %v1555_v9 = vpop.f32.mrf.mxu0 }
  0x9f   :  { %1876 = vmatpush.bf16.msra.mxu1 %v14744_v62  ;;  %v1574_v10 = vpop.f32.mrf.mxu1 }
  0xa0   :  { %1895 = vmatpush.bf16.msra.mxu2 %v14752_v60  ;;  %v1575_v14 = vadd.f32 %v1574_v10, %v1555_v9 }
  0xa1   :  { %1914 = vmatpush.bf16.msra.mxu3 %v14760_v63  ;;  %1858 = vmatmul.bf16.vlgmr.msra.gmra.mxu0 %v9962_v8 }
  0xa2   :  { %1877 = vmatmul.bf16.vlgmr.msra.gmra.mxu1 %v9966_v11 }
  0xa3   :  { %1896 = vmatmul.bf16.vlgmr.msra.gmra.mxu2 %v9970_v12 }
  0xa4   :  { %1915 = vmatmul.bf16.vlgmr.msra.gmra.mxu3 %v9974_v13 }
  0xa6   :  { %v1593_v15 = vpop.f32.mrf.mxu2  ;;  %v1557_v18 = vpop.f32.mrf.mxu0 }
  0xa7   :  { %v1612_v16 = vpop.f32.mrf.mxu3  ;;  %v1594_v17 = vadd.f32 %v1593_v15, %v1575_v14  ;;  %v1576_v19 = vpop.f32.mrf.mxu1 }
  0xa8   :  { %v1577_v20 = vadd.f32 %v1576_v19, %v1557_v18 }
  0xa9   :  { %v1613_v21 = vadd.f32 %v1612_v16, %v1594_v17 }
  0xae   :  { %v1595_v30 = vpop.f32.mrf.mxu2  ;;  %v1560_v33 = vpop.f32.mrf.mxu0 }
  0xaf   :  { %v1614_v31 = vpop.f32.mrf.mxu3  ;;  %v1579_v34 = vpop.f32.mrf.mxu1  ;;  %v1596_v51 = vadd.f32 %v1595_v30, %v1577_v20  ;;  %v15886_v30 = vld [vmem:[%s20192_s2 + $0x38] sm:$0xff]  }
  0xb0   :  { %v1580_v38 = vadd.f32 %v1579_v34, %v1560_v33 }
  0xb1   :  { %1863 = vmatmul.bf16.gmra.mxu0 %v10042_v32  ;;  %v1615_v53 = vadd.f32 %v1614_v31, %v1596_v51  ;;  %v15882_v31 = vld [vmem:[%s20192_s2 + $0x18] sm:$0xff]   ;;  %v15399_v32 = vunpack.c.h.bf16 %v15886_v30 }
  0xb2   :  { %1882 = vmatmul.bf16.gmra.mxu1 %v10046_v35  ;;  %v15383_v33 = vunpack.c.h.bf16 %v15882_v31 }
  0xb3   :  { %1901 = vmatmul.bf16.gmra.mxu2 %v10050_v36 }
  0xb4   :  { %1920 = vmatmul.bf16.gmra.mxu3 %v10054_v37  ;;  %1975 = vmatpush.msrb.mxu2 %v15399_v32  ;;  %v15382_v37 = vunpack.c.l.bf16 %v15882_v31  ;;  %v15894_v31 = vld [vmem:[%s20192_s2 + $0x78] sm:$0xff]  }
  0xb5   :  { %1998 = vmatpush.msrb.mxu3 %v15383_v33 }
  0xb6   :  { %v1598_v39 = vpop.f32.mrf.mxu2  ;;  %v1562_v42 = vpop.f32.mrf.mxu0 }
  0xb7   :  { %v1617_v40 = vpop.f32.mrf.mxu3  ;;  %v1599_v41 = vadd.f32 %v1598_v39, %v1580_v38  ;;  %v1581_v43 = vpop.f32.mrf.mxu1  ;;  %v15398_v39 = vunpack.c.l.bf16 %v15886_v30  ;;  %1999 = vmatpush.msrb.mxu3 %v15382_v37  ;;  %v15888_v30 = vld [vmem:[%s20192_s2 + $0x48] sm:$0xff]   ;;  %v15431_v37 = vunpack.c.h.bf16 %v15894_v31 }
  0xb8   :  { %v1582_v44 = vadd.f32 %v1581_v43, %v1562_v42  ;;  %v15885_v42 = vld [vmem:[%s20192_s2 + $0x30] sm:$0xff]  }
  0xb9   :  { %v1618_v45 = vadd.f32 %v1617_v40, %v1599_v41  ;;  %v15881_v40 = vld [vmem:[%s20192_s2 + $0x10] sm:$0xff]   ;;  %1976 = vmatpush.msrb.mxu2 %v15398_v39  ;;  %v15395_v43 = vunpack.c.h.bf16 %v15885_v42 }
  0xba   :  { %v15379_v41 = vunpack.c.h.bf16 %v15881_v40 }
  0xbb   :  { %1977 = vmatpush.msrb.mxu2 %v15395_v43  ;;  %v15430_v43 = vunpack.c.l.bf16 %v15894_v31 }
  0xbc   :  { %2000 = vmatpush.msrb.mxu3 %v15379_v41 }
  0xbe   :  { %v1600_v46 = vpop.f32.mrf.mxu2  ;;  %v1631_v48 = vpop.f32.mrf.mxu0 }
  0xbf   :  { %v1619_v47 = vpop.f32.mrf.mxu3  ;;  %v1650_v49 = vpop.f32.mrf.mxu1  ;;  %v1632_v50 = vadd.f32 %v1631_v48, %v1613_v21  ;;  %v1601_v3 = vadd.f32 %v1600_v46, %v1582_v44  ;;  %v15378_v44 = vunpack.c.l.bf16 %v15881_v40  ;;  %v15880_v46 = vld [vmem:[%s20192_s2 + $0x8] sm:$0xff]  }
  0xc0   :  { %v15884_v48 = vld [vmem:[%s20192_s2 + $0x28] sm:$0xff]  }
  0xc1   :  { %v1651_v52 = vadd.f32 %v1650_v49, %v1632_v50  ;;  %v1620_v5 = vadd.f32 %v1619_v47, %v1601_v3  ;;  %2001 = vmatpush.msrb.mxu3 %v15378_v44  ;;  %v15375_v47 = vunpack.c.h.bf16 %v15880_v46  ;;  %v15391_v50 = vunpack.c.h.bf16 %v15884_v48 }
  0xc3   :  { %2002 = vmatpush.msrb.mxu3 %v15375_v47 }
  0xc6   :  { %v1669_v54 = vpop.f32.mrf.mxu2  ;;  %v1633_v57 = vpop.f32.mrf.mxu0 }
  0xc7   :  { %v1670_v55 = vadd.f32 %v1669_v54, %v1651_v52  ;;  %v1688_v56 = vpop.f32.mrf.mxu3  ;;  %v1634_v58 = vadd.f32 %v1633_v57, %v1615_v53  ;;  %v1652_v59 = vpop.f32.mrf.mxu1  ;;  %v15374_v53 = vunpack.c.l.bf16 %v15880_v46 }
  0xc9   :  { %v16770_v60 = vadd.f32 %v1688_v56, %v1670_v55  ;;  %v16772_v61 = vadd.f32 %v1652_v59, %v1634_v58  ;;  %v15390_v55 = vunpack.c.l.bf16 %v15884_v48  ;;  %v15369_v56 = vld [vmem:[%s20192_s2] sm:$0xff]   ;;  %2003 = vmatpush.msrb.mxu3 %v15374_v53 }
  0xca   :  { %v15371_v58 = vunpack.c.h.bf16 %v15369_v56  ;;  %v15883_v59 = vld [vmem:[%s20192_s2 + $0x20] sm:$0xff]  }
  0xcb   :  { %v15386_v3 = vunpack.c.l.bf16 %v15883_v59 }
  0xcc   :  { %2004 = vmatpush.msrb.mxu3 %v15371_v58 }
  0xce   :  { %v16774_v62 = vpop.f32.mrf.mxu2  ;;  %v1636_v0 = vpop.f32.mrf.mxu0 }
  0xcf   :  { %v16776_v63 = vpop.f32.mrf.mxu3  ;;  %v1655_v1 = vpop.f32.mrf.mxu1  ;;  %v1637_v2 = vadd.f32 %v1636_v0, %v1618_v45  ;;  %v15394_v45 = vunpack.c.l.bf16 %v15885_v42  ;;  %v15387_v0 = vunpack.c.h.bf16 %v15883_v59  ;;  %v15406_v42 = vunpack.c.l.bf16 %v15888_v30 }
  0xd1   :  { %v1656_v4 = vadd.f32 %v1655_v1, %v1637_v2  ;;  %1978 = vmatpush.msrb.mxu2 %v15394_v45  ;;  %v1672_v1 = vadd.f32 %v16774_v62, %v16772_v61  ;;  %v15370_v2 = vunpack.c.l.bf16 %v15369_v56 }
  0xd3   :  { %1979 = vmatpush.msrb.mxu2 %v15391_v50  ;;  %2005 = vmatpush.msrb.mxu3 %v15370_v2 }
  0xd5   :  { %1980 = vmatpush.msrb.mxu2 %v15390_v55  ;;  %2079 = vmatpush.msra.mxu3 %v15431_v37 }
  0xd6   :  { %v1674_v6 = vpop.f32.mrf.mxu2  ;;  %v1638_v9 = vpop.f32.mrf.mxu0 }
  0xd7   :  { %v1675_v7 = vadd.f32 %v1674_v6, %v1656_v4  ;;  %v1693_v8 = vpop.f32.mrf.mxu3  ;;  %v1639_v10 = vadd.f32 %v1638_v9, %v1620_v5  ;;  %v1657_v11 = vpop.f32.mrf.mxu1  ;;  %1981 = vmatpush.msrb.mxu2 %v15387_v0  ;;  %v15890_v4 = vld [vmem:[%s20192_s2 + $0x58] sm:$0xff]   ;;  %2080 = vmatpush.msra.mxu3 %v15430_v43 }
  0xd8   :  { %v15415_v5 = vunpack.c.h.bf16 %v15890_v4  ;;  %v15414_v9 = vunpack.c.l.bf16 %v15890_v4 }
  0xd9   :  { %v16778_v12 = vadd.f32 %v1693_v8, %v1675_v7  ;;  %v16780_v13 = vadd.f32 %v1657_v11, %v1639_v10  ;;  %1982 = vmatpush.msrb.mxu2 %v15386_v3  ;;  %v1691_v7 = vadd.f32 %v16776_v63, %v1672_v1  ;;  %v15889_v11 = vld [vmem:[%s20192_s2 + $0x50] sm:$0xff]  }
  0xdb   :  { %2038 = vmatpush.msra.mxu2 %v15415_v5 }
  0xdd   :  { %2039 = vmatpush.msra.mxu2 %v15414_v9 }
  0xde   :  { %v16782_v14 = vpop.f32.mrf.mxu2  ;;  %v1707_v16 = vpop.f32.mrf.mxu0 }
  0xdf   :  { %v16784_v15 = vpop.f32.mrf.mxu3  ;;  %v16786_v17 = vpop.f32.mrf.mxu1  ;;  %v1708_v57 = vadd.f32 %v1707_v16, %v16770_v60  ;;  %v1677_v48 = vadd.f32 %v16782_v14, %v16780_v13 }
  0xe1   :  { %v1727_v60 = vadd.f32 %v16786_v17, %v1708_v57  ;;  %v15411_v17 = vunpack.c.h.bf16 %v15889_v11  ;;  %v1696_v14 = vadd.f32 %v16784_v15, %v1677_v48 }
  0xe3   :  { %2040 = vmatpush.msra.mxu2 %v15411_v17 }
  0xe6   :  { %v16788_v18 = vpop.f32.mrf.mxu2  ;;  %v16792_v20 = vpop.f32.mrf.mxu0 }
  0xe7   :  { %v16790_v19 = vpop.f32.mrf.mxu3  ;;  %v16794_v21 = vpop.f32.mrf.mxu1  ;;  %v1746_v8 = vadd.f32 %v16788_v18, %v1727_v60  ;;  %v1710_v16 = vadd.f32 %v16792_v20, %v1691_v7  ;;  %v15410_v18 = vunpack.c.l.bf16 %v15889_v11  ;;  %v15407_v20 = vunpack.c.h.bf16 %v15888_v30 }
  0xe9   :  { %v1765_v63 = vadd.f32 %v16790_v19, %v1746_v8  ;;  %v1729_v32 = vadd.f32 %v16794_v21, %v1710_v16  ;;  %2041 = vmatpush.msra.mxu2 %v15410_v18  ;;  %v15887_v21 = vld [vmem:[%s20192_s2 + $0x40] sm:$0xff]  }
  0xea   :  { %v15403_v46 = vunpack.c.h.bf16 %v15887_v21  ;;  %v15402_v55 = vunpack.c.l.bf16 %v15887_v21 }
  0xeb   :  { %2042 = vmatpush.msra.mxu2 %v15407_v20 }
  0xed   :  { %2043 = vmatpush.msra.mxu2 %v15406_v42 }
  0xee   :  { %v16796_v22 = vpop.f32.mrf.mxu2  ;;  %v16800_v24 = vpop.f32.mrf.mxu0 }
  0xef   :  { %v16798_v23 = vpop.f32.mrf.mxu3  ;;  %v16802_v25 = vpop.f32.mrf.mxu1  ;;  %v1748_v19 = vadd.f32 %v16796_v22, %v1729_v32  ;;  %v1713_v22 = vadd.f32 %v16800_v24, %v16778_v12  ;;  %2044 = vmatpush.msra.mxu2 %v15403_v46  ;;  %v15892_v12 = vld [vmem:[%s20192_s2 + $0x68] sm:$0xff]  }
  0xf0   :  { %v15423_v57 = vunpack.c.h.bf16 %v15892_v12  ;;  %v15422_v0 = vunpack.c.l.bf16 %v15892_v12 }
  0xf1   :  { %v1767_v50 = vadd.f32 %v16798_v23, %v1748_v19  ;;  %v1732_v24 = vadd.f32 %v16802_v25, %v1713_v22  ;;  %2045 = vmatpush.msra.mxu2 %v15402_v55  ;;  %v15891_v25 = vld [vmem:[%s20192_s2 + $0x60] sm:$0xff]  }
  0xf2   :  { %v15419_v15 = vunpack.c.h.bf16 %v15891_v25  ;;  %v15418_v4 = vunpack.c.l.bf16 %v15891_v25 }
  0xf6   :  { %v16804_v26 = vpop.f32.mrf.mxu2  ;;  %v16808_v28 = vpop.f32.mrf.mxu0 }
  0xf7   :  { %v16806_v27 = vpop.f32.mrf.mxu3  ;;  %v16810_v29 = vpop.f32.mrf.mxu1  ;;  %v1751_v23 = vadd.f32 %v16804_v26, %v1732_v24  ;;  %v10730_v24 = vld [vmem:[%s20193_s3 + $0x78] sm:$0xff] }
  0xf9   :  { %v1770_v26 = vadd.f32 %v16806_v27, %v1751_v23 }
  0xfe   :  { %v16818_v34 = vpop.f32.mrf.mxu2  ;;  %v16822_v36 = vpop.f32.mrf.mxu0 }
  0xff   :  { %v16820_v35 = vpop.f32.mrf.mxu3  ;;  %v16824_v38 = vpop.f32.mrf.mxu1  ;;  %v1784_v33 = vadd.f32 %v16822_v36, %v1765_v63  ;;  %v15893_v36 = vld [vmem:[%s20192_s2 + $0x70] sm:$0xff]  }
 0x100   :  { %v15427_v47 = vunpack.c.h.bf16 %v15893_v36  ;;  %v15426_v56 = vunpack.c.l.bf16 %v15893_v36 }
 0x101   :  { %v1803_v45 = vadd.f32 %v16824_v38, %v1784_v33 }
 0x102   :  { %2081 = vmatpush.msra.mxu3 %v15427_v47 }
 0x104   :  { %2082 = vmatpush.msra.mxu3 %v15426_v56 }
 0x106   :  { %v16838_v49 = vpop.f32.mrf.mxu2  ;;  %v16842_v52 = vpop.f32.mrf.mxu0  ;;  %2083 = vmatpush.msra.mxu3 %v15423_v57  ;;  %v2100_v57 = vld [vmem:[%s20193_s3 + $0x38] sm:$0xff] }
 0x107   :  { %v16840_v51 = vpop.f32.mrf.mxu3  ;;  %v16844_v54 = vpop.f32.mrf.mxu1  ;;  %v1822_v53 = vadd.f32 %v16838_v49, %v1803_v45  ;;  %v1786_v38 = vadd.f32 %v16842_v52, %v1767_v50  ;;  %v1715_v52 = vadd.f32 %v16808_v28, %v1696_v14  ;;  %v2141_v14 = vunpack.c.h.bf16 %v10730_v24 }
 0x108   :  { %2084 = vmatpush.msra.mxu3 %v15422_v0  ;;  %v2099_v0 = vld [vmem:[%s20193_s3 + $0x30] sm:$0xff] }
 0x109   :  { %v1841_v49 = vadd.f32 %v16840_v51, %v1822_v53  ;;  %v1805_v2 = vadd.f32 %v16844_v54, %v1786_v38  ;;  %v1734_v60 = vadd.f32 %v16810_v29, %v1715_v52  ;;  %v10729_v38 = vld [vmem:[%s20193_s3 + $0x70] sm:$0xff]  ;;  %2174 = vmatpush.msrb.mxu1 %v2141_v14  ;;  %v2114_v25 = vunpack.c.h.bf16 %v2099_v0  ;;  %v10728_v52 = vld [vmem:[%s20193_s3 + $0x68] sm:$0xff] }
 0x10a   :  { %2085 = vmatpush.msra.mxu3 %v15419_v15  ;;  %v2138_v23 = vunpack.c.l.bf16 %v10729_v38  ;;  %v2136_v15 = vunpack.c.l.bf16 %v10728_v52 }
 0x10b   :  { %v1753_v28 = vadd.f32 %v16818_v34, %v1734_v60  ;;  %v2097_v60 = vld [vmem:[%s20193_s3 + $0x20] sm:$0xff] }
 0x10c   :  { %2086 = vmatpush.msra.mxu3 %v15418_v4 }
 0x10d   :  { %v1772_v29 = vadd.f32 %v16820_v35, %v1753_v28  ;;  %v2110_v28 = vunpack.c.h.bf16 %v2097_v60 }
 0x10e   :  { %v16859_v6 = vpop.f32.mrf.mxu2  ;;  %v16865_v62 = vpop.f32.mrf.mxu0 }
 0x10f   :  { %v16863_v61 = vpop.f32.mrf.mxu3  ;;  %v16867_v10 = vpop.f32.mrf.mxu1  ;;  %v1824_v51 = vadd.f32 %v16859_v6, %v1805_v2  ;;  %v1789_v5 = vadd.f32 %v16865_v62, %v1770_v26  ;;  %v2098_v2 = vld [vmem:[%s20193_s3 + $0x28] sm:$0xff]  ;;  %v2137_v26 = vunpack.c.h.bf16 %v10728_v52  ;;  %v10747_v52 = vld [vmem:[%s20193_s3 + $0xd0] sm:$0xff] }
 0x110   :  { %v2112_v4 = vunpack.c.h.bf16 %v2098_v2 }
 0x111   :  { %v1843_v54 = vadd.f32 %v16863_v61, %v1824_v51  ;;  %v1808_v27 = vadd.f32 %v16867_v10, %v1789_v5  ;;  %v2111_v51 = vunpack.c.l.bf16 %v2098_v2  ;;  %v2096_v5 = vld [vmem:[%s20193_s3 + $0x18] sm:$0xff] }
 0x116   :  { %v16882_v39 = vpop.f32.mrf.mxu2  ;;  %v16887_v41 = vpop.f32.mrf.mxu0 }
 0x117   :  { %v16885_v40 = vpop.f32.mrf.mxu3  ;;  %v16889_v44 = vpop.f32.mrf.mxu1  ;;  %v1827_v62 = vadd.f32 %v16882_v39, %v1808_v27  ;;  %v1791_v30 = vadd.f32 %v16887_v41, %v1772_v29 }
 0x119   :  { %v1846_v61 = vadd.f32 %v16885_v40, %v1827_v62  ;;  %v1810_v10 = vadd.f32 %v16889_v44, %v1791_v30  ;;  %v10725_v62 = vld [vmem:[%s20193_s3 + $0x50] sm:$0xff]  ;;  %v10724_v30 = vld [vmem:[%s20193_s3 + $0x48] sm:$0xff] }
 0x11e   :  { %v1828_v13 = vpop.f32.mrf.mxu2  ;;  %v1859_v59 = vpop.f32.mrf.mxu0 }
 0x11f   :  { %v1847_v58 = vpop.f32.mrf.mxu3  ;;  %v1878_v1 = vpop.f32.mrf.mxu1  ;;  %v1860_v3 = vadd.f32 %v1859_v59, %v1841_v49  ;;  %v1829_v35 = vadd.f32 %v1828_v13, %v1810_v10  ;;  %v2140_v13 = vunpack.c.l.bf16 %v10730_v24  ;;  %v2139_v49 = vunpack.c.h.bf16 %v10729_v38  ;;  %v10723_v10 = vld [vmem:[%s20193_s3 + $0x40] sm:$0xff] }
 0x120   :  { %v2116_v59 = vunpack.c.h.bf16 %v2100_v57  ;;  %v10749_v24 = vld [vmem:[%s20193_s3 + $0xe0] sm:$0xff] }
 0x121   :  { %v1879_v7 = vadd.f32 %v1878_v1, %v1860_v3  ;;  %v1848_v21 = vadd.f32 %v1847_v58, %v1829_v35  ;;  %v2115_v58 = vunpack.c.l.bf16 %v2100_v57  ;;  %2154 = vmatpush.msrb.mxu0 %v2140_v13  ;;  %2175 = vmatpush.msrb.mxu1 %v2139_v49  ;;  %v2113_v1 = vunpack.c.l.bf16 %v2099_v0  ;;  %v10727_v3 = vld [vmem:[%s20193_s3 + $0x60] sm:$0xff]  ;;  %v10748_v49 = vld [vmem:[%s20193_s3 + $0xd8] sm:$0xff] }
 0x122   :  { %v2315_v13 = vunpack.c.l.bf16 %v10749_v24  ;;  %v2316_v14 = vunpack.c.h.bf16 %v10749_v24  ;;  %v2313_v0 = vunpack.c.l.bf16 %v10748_v49 }
 0x123   :  { %2155 = vmatpush.msrb.mxu0 %v2138_v23  ;;  %2176 = vmatpush.msrb.mxu1 %v2137_v26  ;;  %v10739_v23 = vld [vmem:[%s20193_s3 + $0xa0] sm:$0xff]  ;;  %v2312_v26 = vunpack.c.h.bf16 %v10747_v52 }
 0x125   :  { %2156 = vmatpush.msrb.mxu0 %v2136_v15  ;;  %v2311_v15 = vunpack.c.l.bf16 %v10747_v52 }
 0x126   :  { %v1897_v8 = vpop.f32.mrf.mxu2  ;;  %v1861_v16 = vpop.f32.mrf.mxu0 }
 0x127   :  { %v1898_v9 = vadd.f32 %v1897_v8, %v1879_v7  ;;  %v1916_v11 = vpop.f32.mrf.mxu3  ;;  %v1880_v17 = vpop.f32.mrf.mxu1  ;;  %v1862_v63 = vadd.f32 %v1861_v16, %v1843_v54  ;;  %v2134_v7 = vunpack.c.l.bf16 %v10727_v3  ;;  %v2109_v8 = vunpack.c.l.bf16 %v2097_v60  ;;  %v10726_v16 = vld [vmem:[%s20193_s3 + $0x58] sm:$0xff]  ;;  %v10736_v60 = vld [vmem:[%s20193_s3 + $0x88] sm:$0xff] }
 0x128   :  { %v2135_v54 = vunpack.c.h.bf16 %v10727_v3  ;;  %v2132_v27 = vunpack.c.l.bf16 %v10726_v16 }
 0x129   :  { %v1917_v6 = vadd.f32 %v1916_v11, %v1898_v9  ;;  %v1881_v31 = vadd.f32 %v1880_v17, %v1862_v63  ;;  %v2107_v9 = vunpack.c.l.bf16 %v2096_v5  ;;  %v2108_v11 = vunpack.c.h.bf16 %v2096_v5  ;;  %2157 = vmatpush.msrb.mxu0 %v2134_v7  ;;  %v2095_v17 = vld [vmem:[%s20193_s3 + $0x10] sm:$0xff] }
 0x12a   :  { %2177 = vmatpush.msrb.mxu1 %v2135_v54  ;;  %v2105_v63 = vunpack.c.l.bf16 %v2095_v17  ;;  %v2106_v29 = vunpack.c.h.bf16 %v2095_v17 }
 0x12b   :  { %v1926_v18 = vmax.f32 %v1917_v6, 0.0  ;;  %v2133_v6 = vunpack.c.h.bf16 %v10726_v16  ;;  %2158 = vmatpush.msrb.mxu0 %v2132_v27  ;;  %v10735_v27 = vld [vmem:[%s20193_s3 + $0x80] sm:$0xff] }
 0x12d   :  { %10704 = vmatmul.msk.f32.vlgmr.msrb.gmra.mxu3 %vm1963_vm0, %v1926_v18  ;;  %v2094_v18 = vld [vmem:[%s20193_s3 + $0x8] sm:$0xff]  ;;  %2178 = vmatpush.msrb.mxu1 %v2133_v6  ;;  %v2237_v6 = vunpack.c.l.bf16 %v10735_v27 }
 0x12e   :  { %v1899_v34 = vpop.f32.mrf.mxu2  ;;  %v1864_v20 = vpop.f32.mrf.mxu0  ;;  %2216 = vmatpush.msrb.mxu3 %v2116_v59  ;;  %v2246_v59 = vunpack.c.h.bf16 %v10739_v23 }
 0x12f   :  { %v1900_v32 = vadd.f32 %v1899_v34, %v1881_v31  ;;  %v1918_v33 = vpop.f32.mrf.mxu3  ;;  %v1865_v19 = vadd.f32 %v1864_v20, %v1846_v61  ;;  %v1883_v42 = vpop.f32.mrf.mxu1  ;;  %v2130_v31 = vunpack.c.l.bf16 %v10725_v62  ;;  %v2131_v34 = vunpack.c.h.bf16 %v10725_v62  ;;  %v10752_v20 = vld [vmem:[%s20193_s3 + $0xf8] sm:$0xff] }
 0x130   :  { %2217 = vmatpush.msrb.mxu3 %v2114_v25  ;;  %v2103_v61 = vunpack.c.l.bf16 %v2094_v18  ;;  %v10738_v25 = vld [vmem:[%s20193_s3 + $0x98] sm:$0xff] }
 0x131   :  { %v1919_v37 = vadd.f32 %v1918_v33, %v1900_v32  ;;  %v1884_v39 = vadd.f32 %v1883_v42, %v1865_v19  ;;  %v2104_v32 = vunpack.c.h.bf16 %v2094_v18  ;;  %v2093_v33 = vld [vmem:[%s20193_s3] sm:$0xff]  ;;  %v2129_v19 = vunpack.c.h.bf16 %v10724_v30  ;;  %2159 = vmatpush.msrb.mxu0 %v2130_v31  ;;  %2179 = vmatpush.msrb.mxu1 %v2131_v34 }
 0x132   :  { %2218 = vmatpush.msrb.mxu3 %v2112_v4  ;;  %v2101_v42 = vunpack.c.l.bf16 %v2093_v33  ;;  %v2102_v35 = vunpack.c.h.bf16 %v2093_v33  ;;  %v2243_v2 = vunpack.c.l.bf16 %v10738_v25  ;;  %v2244_v3 = vunpack.c.h.bf16 %v10738_v25  ;;  %v10746_v4 = vld [vmem:[%s20193_s3 + $0xc8] sm:$0xff]  ;;  %v15909_v33 = vld [vmem:[%s20194_s5 + $0x78] sm:$0xff]  }
 0x133   :  { %v1927_v43 = vmax.f32 %v1919_v37, 0.0  ;;  %v2128_v37 = vunpack.c.l.bf16 %v10724_v30  ;;  %2180 = vmatpush.msrb.mxu1 %v2129_v19  ;;  %v2310_v54 = vunpack.c.h.bf16 %v10746_v4  ;;  %v15905_v25 = vld [vmem:[%s20194_s5 + $0x58] sm:$0xff]  }
 0x134   :  { %2219 = vmatpush.msrb.mxu3 %v2110_v28  ;;  %v2309_v28 = vunpack.c.l.bf16 %v10746_v4  ;;  %v15896_v4 = vld [vmem:[%s20194_s5 + $0x10] sm:$0xff]  }
 0x135   :  { %10703 = vmatmul.msk.f32.vlgmr.msrb.gmra.mxu2 %vm1963_vm0, %v1927_v43  ;;  %v2321_v43 = vunpack.c.l.bf16 %v10752_v20  ;;  %2160 = vmatpush.msrb.mxu0 %v2128_v37 }
 0x136   :  { %v1902_v41 = vpop.f32.mrf.mxu2  ;;  %v1866_v45 = vpop.f32.mrf.mxu0  ;;  %2196 = vmatpush.msrb.mxu2 %v2115_v58  ;;  %2220 = vmatpush.msrb.mxu3 %v2108_v11  ;;  %v2245_v58 = vunpack.c.l.bf16 %v10739_v23  ;;  %v2240_v11 = vunpack.c.h.bf16 %v10736_v60 }
 0x137   :  { %v1903_v36 = vadd.f32 %v1902_v41, %v1884_v39  ;;  %v1921_v22 = vpop.f32.mrf.mxu3  ;;  %v1867_v40 = vadd.f32 %v1866_v45, %v1848_v21  ;;  %v1885_v48 = vpop.f32.mrf.mxu1  ;;  %v2322_v39 = vunpack.c.h.bf16 %v10752_v20  ;;  %v2126_v41 = vunpack.c.l.bf16 %v10723_v10  ;;  %v14815_v20 = vld [vmem:[%s20190_s1 + $0x538] sm:$0xff] }
 0x138   :  { %2197 = vmatpush.msrb.mxu2 %v2113_v1  ;;  %2221 = vmatpush.msrb.mxu3 %v2106_v29  ;;  %v2127_v21 = vunpack.c.h.bf16 %v10723_v10  ;;  %v2314_v1 = vunpack.c.h.bf16 %v10748_v49  ;;  %v14823_v10 = vld [vmem:[%s20190_s1 + $0x578] sm:$0xff]  ;;  %v14820_v49 = vld [vmem:[%s20190_s1 + $0x560] sm:$0xff] }
 0x139   :  { %v1922_v46 = vadd.f32 %v1921_v22, %v1903_v36  ;;  %v1886_v50 = vadd.f32 %v1885_v48, %v1867_v40  ;;  %v10742_v36 = vld [vmem:[%s20193_s3 + $0xb8] sm:$0xff]  ;;  %v10751_v22 = vld [vmem:[%s20193_s3 + $0xf0] sm:$0xff]  ;;  %2161 = vmatpush.msrb.mxu0 %v2126_v41 }
 0x13a   :  { %2198 = vmatpush.msrb.mxu2 %v2111_v51  ;;  %2222 = vmatpush.msrb.mxu3 %v2104_v32  ;;  %v2251_v45 = vunpack.c.l.bf16 %v10742_v36  ;;  %v2319_v40 = vunpack.c.l.bf16 %v10751_v22  ;;  %v10741_v48 = vld [vmem:[%s20193_s3 + $0xb0] sm:$0xff]  ;;  %v15901_v32 = vld [vmem:[%s20194_s5 + $0x38] sm:$0xff]  }
 0x13b   :  { %v1928_v47 = vmax.f32 %v1922_v46, 0.0  ;;  %v2252_v46 = vunpack.c.h.bf16 %v10742_v36  ;;  %2181 = vmatpush.msrb.mxu1 %v2127_v21  ;;  %v10737_v51 = vld [vmem:[%s20193_s3 + $0x90] sm:$0xff]  ;;  %v15463_v19 = vunpack.c.h.bf16 %v15901_v32  ;;  %v15462_v41 = vunpack.c.l.bf16 %v15901_v32 }
 0x13c   :  { %2199 = vmatpush.msrb.mxu2 %v2109_v8  ;;  %2223 = vmatpush.msrb.mxu3 %v2102_v35  ;;  %v2241_v5 = vunpack.c.l.bf16 %v10737_v51  ;;  %v2242_v7 = vunpack.c.h.bf16 %v10737_v51  ;;  %v10745_v8 = vld [vmem:[%s20193_s3 + $0xc0] sm:$0xff]  ;;  %v15494_v21 = vunpack.c.l.bf16 %v15909_v33  ;;  %v14822_v36 = vld [vmem:[%s20190_s1 + $0x570] sm:$0xff] }
 0x13d   :  { %10713 = vmatmul.msk.f32.vlgmr.msra.gmra.mxu2 %vm1963_vm0, %v1928_v47  ;;  %v2320_v47 = vunpack.c.h.bf16 %v10751_v22  ;;  %2264 = vmatpush.msra.mxu0 %v2251_v45  ;;  %v2307_v16 = vunpack.c.l.bf16 %v10745_v8  ;;  %v2308_v17 = vunpack.c.h.bf16 %v10745_v8  ;;  %v15908_v22 = vld [vmem:[%s20194_s5 + $0x70] sm:$0xff]  }
 0x13e   :  { %v1904_v44 = vpop.f32.mrf.mxu2  ;;  %2200 = vmatpush.msrb.mxu2 %v2107_v9  ;;  %2284 = vmatpush.msra.mxu1 %v2252_v46  ;;  %v2239_v9 = vunpack.c.l.bf16 %v10736_v60  ;;  %v15491_v46 = vunpack.c.h.bf16 %v15908_v22  ;;  %v14810_v51 = vld [vmem:[%s20190_s1 + $0x510] sm:$0xff] }
 0x13f   :  { %v1905_v53 = vadd.f32 %v1904_v44, %v1886_v50  ;;  %v1923_v55 = vpop.f32.mrf.mxu3  ;;  %v10750_v50 = vld [vmem:[%s20193_s3 + $0xe8] sm:$0xff]  ;;  %v2249_v44 = vunpack.c.l.bf16 %v10741_v48  ;;  %v15904_v60 = vld [vmem:[%s20194_s5 + $0x50] sm:$0xff]  }
 0x140   :  { %2201 = vmatpush.msrb.mxu2 %v2105_v63  ;;  %v2238_v63 = vunpack.c.h.bf16 %v10735_v27  ;;  %v14818_v8 = vld [vmem:[%s20190_s1 + $0x550] sm:$0xff]  ;;  %v15474_v27 = vunpack.c.l.bf16 %v15904_v60 }
 0x141   :  { %v1924_v56 = vadd.f32 %v1923_v55, %v1905_v53  ;;  %v2250_v53 = vunpack.c.h.bf16 %v10741_v48  ;;  %v2317_v55 = vunpack.c.l.bf16 %v10750_v50  ;;  %2265 = vmatpush.msra.mxu0 %v2249_v44  ;;  %v15899_v48 = vld [vmem:[%s20194_s5 + $0x28] sm:$0xff]   ;;  %v14778_v32 = vld [vmem:[%s20191_s0 + $0x18c] sm:$0xf0] }
 0x142   :  { %2202 = vmatpush.msrb.mxu2 %v2103_v61 }
 0x143   :  { %v1929_v12 = vmax.f32 %v1924_v56, 0.0  ;;  %v2318_v56 = vunpack.c.h.bf16 %v10750_v50  ;;  %2285 = vmatpush.msra.mxu1 %v2250_v53  ;;  %v15907_v50 = vld [vmem:[%s20194_s5 + $0x68] sm:$0xff]   ;;  %v15490_v53 = vunpack.c.l.bf16 %v15908_v22  ;;  %v14839_v22 = vld [vmem:[%s20190_s1 + $0x5f8] sm:$0xff] }
 0x144   :  { %2203 = vmatpush.msrb.mxu2 %v2101_v42  ;;  %v15495_v42 = vunpack.c.h.bf16 %v15909_v33  ;;  %v15487_v24 = vunpack.c.h.bf16 %v15907_v50  ;;  %v15486_v23 = vunpack.c.l.bf16 %v15907_v50  ;;  %v14816_v33 = vld [vmem:[%s20190_s1 + $0x540] sm:$0xff]  ;;  %v14829_v50 = vld [vmem:[%s20190_s1 + $0x5a8] sm:$0xff] }
 0x145   :  { %10722 = vmatmul.msk.f32.vlgmr.msra.gmra.mxu3 %vm1963_vm0, %v1929_v12  ;;  %v10740_v12 = vld [vmem:[%s20193_s3 + $0xa8] sm:$0xff] }
 0x146   :  { %2334 = vmatpush.msra.mxu2 %v2321_v43  ;;  %2354 = vmatpush.msra.mxu3 %v2322_v39  ;;  %v2247_v38 = vunpack.c.l.bf16 %v10740_v12  ;;  %v2248_v57 = vunpack.c.h.bf16 %v10740_v12  ;;  %v15900_v43 = vld [vmem:[%s20194_s5 + $0x30] sm:$0xff]   ;;  %v15455_v12 = vunpack.c.h.bf16 %v15899_v48 }
 0x147   :  { %v14814_v39 = vld [vmem:[%s20190_s1 + $0x530] sm:$0xff]  ;;  %v15459_v45 = vunpack.c.h.bf16 %v15900_v43  ;;  %v15458_v44 = vunpack.c.l.bf16 %v15900_v43  ;;  %v14855_v43 = vld [vmem:[%s20190_s1 + $0x678] sm:$0xff] }
 0x148   :  { %2335 = vmatpush.msra.mxu2 %v2319_v40  ;;  %2355 = vmatpush.msra.mxu3 %v2320_v47  ;;  %v14813_v40 = vld [vmem:[%s20190_s1 + $0x528] sm:$0xff] }
 0x149   :  { %2266 = vmatpush.msra.mxu0 %v2247_v38  ;;  %2286 = vmatpush.msra.mxu1 %v2248_v57  ;;  %v14812_v38 = vld [vmem:[%s20190_s1 + $0x520] sm:$0xff] }
 0x14a   :  { %2336 = vmatpush.msra.mxu2 %v2317_v55  ;;  %2356 = vmatpush.msra.mxu3 %v2318_v56  ;;  %v14821_v56 = vld [vmem:[%s20190_s1 + $0x568] sm:$0xff]  ;;  %v15898_v57 = vld [vmem:[%s20194_s5 + $0x20] sm:$0xff]  }
 0x14b   :  { %2267 = vmatpush.msra.mxu0 %v2245_v58  ;;  %2287 = vmatpush.msra.mxu1 %v2246_v59  ;;  %v15451_v58 = vunpack.c.h.bf16 %v15898_v57  ;;  %v15450_v52 = vunpack.c.l.bf16 %v15898_v57  ;;  %v14798_v57 = vld [vmem:[%s20191_s0 + $0x22c] sm:$0xf0] }
 0x14c   :  { %2337 = vmatpush.msra.mxu2 %v2315_v13  ;;  %2357 = vmatpush.msra.mxu3 %v2316_v14  ;;  %v15906_v13 = vld [vmem:[%s20194_s5 + $0x60] sm:$0xff]   ;;  %v15454_v14 = vunpack.c.l.bf16 %v15899_v48  ;;  %v14845_v48 = vld [vmem:[%s20190_s1 + $0x628] sm:$0xff] }
 0x14d   :  { %2268 = vmatpush.msra.mxu0 %v2243_v2  ;;  %2288 = vmatpush.msra.mxu1 %v2244_v3  ;;  %v15483_v59 = vunpack.c.h.bf16 %v15906_v13  ;;  %v15482_v2 = vunpack.c.l.bf16 %v15906_v13  ;;  %v14819_v3 = vld [vmem:[%s20190_s1 + $0x558] sm:$0xff] }
 0x14e   :  { %2338 = vmatpush.msra.mxu2 %v2313_v0  ;;  %2358 = vmatpush.msra.mxu3 %v2314_v1  ;;  %v14811_v0 = vld [vmem:[%s20190_s1 + $0x518] sm:$0xff] }
 0x14f   :  { %2269 = vmatpush.msra.mxu0 %v2241_v5  ;;  %2289 = vmatpush.msra.mxu1 %v2242_v7  ;;  %v15897_v1 = vld [vmem:[%s20194_s5 + $0x18] sm:$0xff]   ;;  %v15478_v7 = vunpack.c.l.bf16 %v15905_v25 }
 0x150   :  { %2339 = vmatpush.msra.mxu2 %v2311_v15  ;;  %2359 = vmatpush.msra.mxu3 %v2312_v26  ;;  %v15447_v15 = vunpack.c.h.bf16 %v15897_v1  ;;  %v15479_v26 = vunpack.c.h.bf16 %v15905_v25  ;;  %v15446_v5 = vunpack.c.l.bf16 %v15897_v1  ;;  %v14851_v1 = vld [vmem:[%s20190_s1 + $0x658] sm:$0xff]  ;;  %v14842_v25 = vld [vmem:[%s20190_s1 + $0x610] sm:$0xff] }
 0x151   :  { %2270 = vmatpush.msra.mxu0 %v2239_v9  ;;  %2290 = vmatpush.msra.mxu1 %v2240_v11  ;;  %v14809_v9 = vld [vmem:[%s20190_s1 + $0x508] sm:$0xff] }
 0x152   :  { %2340 = vmatpush.msra.mxu2 %v2309_v28  ;;  %2360 = vmatpush.msra.mxu3 %v2310_v54  ;;  %v15443_v28 = vunpack.c.h.bf16 %v15896_v4  ;;  %v15475_v54 = vunpack.c.h.bf16 %v15904_v60  ;;  %v15895_v11 = vld [vmem:[%s20194_s5 + $0x8] sm:$0xff]   ;;  %v14840_v60 = vld [vmem:[%s20190_s1 + $0x600] sm:$0xff] }
 0x153   :  { %2271 = vmatpush.msra.mxu0 %v2237_v6  ;;  %2291 = vmatpush.msra.mxu1 %v2238_v63  ;;  %v14817_v6 = vld [vmem:[%s20190_s1 + $0x548] sm:$0xff]  ;;  %v15439_v63 = vunpack.c.h.bf16 %v15895_v11 }
 0x154   :  { %2341 = vmatpush.msra.mxu2 %v2307_v16  ;;  %2361 = vmatpush.msra.mxu3 %v2308_v17  ;;  %v15903_v16 = vld [vmem:[%s20194_s5 + $0x48] sm:$0xff]   ;;  %v15442_v17 = vunpack.c.l.bf16 %v15896_v4 }
 0x155   :  { %v14849_v4 = vld [vmem:[%s20190_s1 + $0x648] sm:$0xff] }
 0x1b0   :  { %v2007_v62 = vpop.f32.mrf.mxu3 }
 0x1b8   :  { %v1984_v29 = vpop.f32.mrf.mxu2 }
 0x1b9   :  { %v2008_v30 = vadd.f32 %v2007_v62, %v1984_v29  ;;  %v15471_v29 = vunpack.c.h.bf16 %v15903_v16  ;;  %v14808_v62 = vld [vmem:[%s20190_s1 + $0x500] sm:$0xff] }
 0x1c0   :  { %v2047_v18 = vpop.f32.mrf.mxu2 }
 0x1c1   :  { %v2050_v31 = vadd.f32 %v2047_v18, %v2008_v30  ;;  %v15433_v18 = vld [vmem:[%s20194_s5] sm:$0xff]  }
 0x1c2   :  { %v15902_v30 = vld [vmem:[%s20194_s5 + $0x40] sm:$0xff]  }
 0x1c8   :  { %v2088_v34 = vpop.f32.mrf.mxu3 }
 0x1c9   :  { %v2091_v61 = vadd.f32 %v2088_v34, %v2050_v31  ;;  %v15438_v31 = vunpack.c.l.bf16 %v15895_v11  ;;  %v15470_v34 = vunpack.c.l.bf16 %v15903_v16  ;;  %v14770_v16 = vld [vmem:[%s20191_s0 + $0x154] sm:$0xf] }
 0x1cb   :  { %v2092_v37 = vmax.f32 %v2091_v61, 0.0  ;;  %v11117_v61 = vld [vmem:[%s20191_s0 + $0x140] sm:$0xf] }
 0x1cd   :  { %10733 = vmatmul.msk.f32.vlgmr.msrb.gmra.mxu2 %vm1963_vm0, %v2092_v37  ;;  %10734 = vmatmul.msk.f32.vlgmr.msrb.gmra.mxu3 %vm1963_vm0, %v2092_v37  ;;  %v2143_v35 = vrot.slane %v2092_v37, 2  ;;  %v2323_v47 = vrot.slane %v2092_v37, 6  ;;  %v2253_v55 = vrot.slane %v2092_v37, 4  ;;  %v15467_v37 = vunpack.c.h.bf16 %v15902_v30 }
 0x1ce   :  { %4009 = vmatpush.bf16.msrb.mxu2 %v14815_v20  ;;  %4028 = vmatpush.bf16.msrb.mxu3 %v14823_v10  ;;  %v14847_v20 = vld [vmem:[%s20190_s1 + $0x638] sm:$0xff]  ;;  %v15435_v10 = vunpack.c.h.bf16 %v15433_v18 }
 0x1cf   :  { %10731 = vmatmul.msk.f32.vlgmr.msrb.gmra.mxu0 %vm1963_vm0, %v2143_v35  ;;  %10732 = vmatmul.msk.f32.vlgmr.msrb.gmra.mxu1 %vm1963_vm0, %v2143_v35  ;;  %v11118_v35 = vor.u32 %v14778_v32, %v11117_v61 }
 0x1d0   :  { %2446 = vmatpush.msrb.mxu0 %v15463_v19  ;;  %2466 = vmatpush.msrb.mxu1 %v15495_v42  ;;  %v14768_v19 = vld [vmem:[%s20191_s0 + $0x144] sm:$0xf]  ;;  %v11119_v42 = vld [vmem:[%s20191_s0 + $0x190] sm:$0xf0] }
 0x1d2   :  { %4010 = vmatpush.bf16.msrb.mxu2 %v14814_v39  ;;  %2447 = vmatpush.msrb.mxu0 %v15462_v41  ;;  %v15434_v39 = vunpack.c.l.bf16 %v15433_v18  ;;  %v15466_v41 = vunpack.c.l.bf16 %v15902_v30 }
 0x1d3   :  { %2467 = vmatpush.msrb.mxu1 %v15494_v21  ;;  %4029 = vmatpush.bf16.msrb.mxu3 %v14822_v36  ;;  %v11122_v21 = vor.u32 %v14768_v19, %v11119_v42  ;;  %v14831_v36 = vld [vmem:[%s20190_s1 + $0x5b8] sm:$0xff]  ;;  %v2368_v19 = vld [vmem:[%s20195_s4] sm:$0x3] }
 0x1d4   :  { %2448 = vmatpush.msrb.mxu0 %v15459_v45  ;;  %v14846_v45 = vld [vmem:[%s20190_s1 + $0x630] sm:$0xff] }
 0x1d5   :  { %10753 = vmatmul.msk.f32.vlgmr.msra.gmra.mxu2 %vm1963_vm0, %v2323_v47  ;;  %10754 = vmatmul.msk.f32.vlgmr.msra.gmra.mxu3 %vm1963_vm0, %v2323_v47  ;;  %v14854_v47 = vld [vmem:[%s20190_s1 + $0x670] sm:$0xff] }
 0x1d6   :  { %2468 = vmatpush.msrb.mxu1 %v15491_v46  ;;  %4011 = vmatpush.bf16.msrb.mxu2 %v14813_v40  ;;  %v14830_v46 = vld [vmem:[%s20190_s1 + $0x5b0] sm:$0xff] }
 0x1d7   :  { %10743 = vmatmul.msk.f32.vlgmr.msra.gmra.mxu0 %vm1963_vm0, %v2253_v55  ;;  %10744 = vmatmul.msk.f32.vlgmr.msra.gmra.mxu1 %vm1963_vm0, %v2253_v55  ;;  %v14838_v40 = vld [vmem:[%s20190_s1 + $0x5f0] sm:$0xff]  ;;  %v14844_v55 = vld [vmem:[%s20190_s1 + $0x620] sm:$0xff] }
 0x1d8   :  { %2449 = vmatpush.msrb.mxu0 %v15458_v44  ;;  %2469 = vmatpush.msrb.mxu1 %v15490_v53  ;;  %v14837_v44 = vld [vmem:[%s20190_s1 + $0x5e8] sm:$0xff] }
 0x1d9   :  { %4030 = vmatpush.bf16.msrb.mxu3 %v14821_v56  ;;  %v14853_v53 = vld [vmem:[%s20190_s1 + $0x668] sm:$0xff]  ;;  %v14828_v56 = vld [vmem:[%s20190_s1 + $0x5a0] sm:$0xff] }
 0x1da   :  { %2450 = vmatpush.msrb.mxu0 %v15455_v12  ;;  %2470 = vmatpush.msrb.mxu1 %v15487_v24  ;;  %v14836_v12 = vld [vmem:[%s20190_s1 + $0x5e0] sm:$0xff] }
 0x1db   :  { %4012 = vmatpush.bf16.msrb.mxu2 %v14812_v38  ;;  %v14852_v24 = vld [vmem:[%s20190_s1 + $0x660] sm:$0xff] }
 0x1dc   :  { %2451 = vmatpush.msrb.mxu0 %v15454_v14  ;;  %2471 = vmatpush.msrb.mxu1 %v15486_v23  ;;  %v11197_v38 = vld [vmem:[%s20191_s0 + $0x1e0] sm:$0xf]  ;;  %v14843_v14 = vld [vmem:[%s20190_s1 + $0x618] sm:$0xff]  ;;  %v14788_v23 = vld [vmem:[%s20191_s0 + $0x1e4] sm:$0xf] }
 0x1dd   :  { %4031 = vmatpush.bf16.msrb.mxu3 %v14820_v49  ;;  %v11198_v13 = vor.u32 %v14798_v57, %v11197_v38  ;;  %v11199_v49 = vld [vmem:[%s20191_s0 + $0x230] sm:$0xf0] }
 0x1de   :  { %2452 = vmatpush.msrb.mxu0 %v15451_v58  ;;  %2472 = vmatpush.msrb.mxu1 %v15483_v59  ;;  %v11202_v58 = vor.u32 %v14788_v23, %v11199_v49  ;;  %v14827_v59 = vld [vmem:[%s20190_s1 + $0x598] sm:$0xff] }
 0x1df   :  { %4013 = vmatpush.bf16.msrb.mxu2 %v14811_v0  ;;  %v14835_v0 = vld [vmem:[%s20190_s1 + $0x5d8] sm:$0xff] }
 0x1e0   :  { %2453 = vmatpush.msrb.mxu0 %v15450_v52  ;;  %2473 = vmatpush.msrb.mxu1 %v15482_v2  ;;  %v14826_v52 = vld [vmem:[%s20190_s1 + $0x590] sm:$0xff] }
 0x1e1   :  { %4032 = vmatpush.bf16.msrb.mxu3 %v14819_v3  ;;  %v14834_v2 = vld [vmem:[%s20190_s1 + $0x5d0] sm:$0xff] }
 0x1e2   :  { %2454 = vmatpush.msrb.mxu0 %v15447_v15  ;;  %2474 = vmatpush.msrb.mxu1 %v15479_v26  ;;  %v14850_v3 = vld [vmem:[%s20190_s1 + $0x650] sm:$0xff]  ;;  %v14841_v15 = vld [vmem:[%s20190_s1 + $0x608] sm:$0xff] }
 0x1e3   :  { %4014 = vmatpush.bf16.msrb.mxu2 %v14810_v51  ;;  %v14825_v26 = vld [vmem:[%s20190_s1 + $0x588] sm:$0xff] }
 0x1e4   :  { %2455 = vmatpush.msrb.mxu0 %v15446_v5  ;;  %2475 = vmatpush.msrb.mxu1 %v15478_v7  ;;  %v14833_v51 = vld [vmem:[%s20190_s1 + $0x5c8] sm:$0xff]  ;;  %v14824_v5 = vld [vmem:[%s20190_s1 + $0x580] sm:$0xff] }
 0x1e5   :  { %4033 = vmatpush.bf16.msrb.mxu3 %v14818_v8  ;;  %v14832_v7 = vld [vmem:[%s20190_s1 + $0x5c0] sm:$0xff]  ;;  %v11133_v8 = vld [vmem:[%s20191_s0 + $0x150] sm:$0xf] }
 0x1e6   :  { %2456 = vmatpush.msrb.mxu0 %v15443_v28  ;;  %2476 = vmatpush.msrb.mxu1 %v15475_v54  ;;  %v14780_v28 = vld [vmem:[%s20191_s0 + $0x19c] sm:$0xf0] }
 0x1e7   :  { %4015 = vmatpush.bf16.msrb.mxu2 %v14809_v9  ;;  %v14848_v54 = vld [vmem:[%s20190_s1 + $0x640] sm:$0xff]  ;;  %v14879_v9 = vld [vmem:[%s20190_s1 + $0x738] sm:$0xff]  ;;  %v11134_v11 = vor.u32 %v14780_v28, %v11133_v8  ;;  %v14869_v8 = vld [vmem:[%s20190_s1 + $0x6e8] sm:$0xff] }
 0x1e8   :  { %2457 = vmatpush.msrb.mxu0 %v15442_v17  ;;  %2477 = vmatpush.msrb.mxu1 %v15474_v27  ;;  %v11135_v17 = vld [vmem:[%s20191_s0 + $0x1a0] sm:$0xf0] }
 0x1e9   :  { %4034 = vmatpush.bf16.msrb.mxu3 %v14817_v6  ;;  %v11138_v27 = vor.u32 %v14770_v16, %v11135_v17  ;;  %v14887_v6 = vld [vmem:[%s20190_s1 + $0x778] sm:$0xff]  ;;  %v14860_v17 = vld [vmem:[%s20190_s1 + $0x6a0] sm:$0xff] }
 0x1ea   :  { %2458 = vmatpush.msrb.mxu0 %v15439_v63  ;;  %2478 = vmatpush.msrb.mxu1 %v15471_v29  ;;  %v14878_v63 = vld [vmem:[%s20190_s1 + $0x730] sm:$0xff]  ;;  %v14919_v16 = vld [vmem:[%s20190_s1 + $0x878] sm:$0xff] }
 0x1eb   :  { %4016 = vmatpush.bf16.msrb.mxu2 %v14808_v62  ;;  %v14886_v29 = vld [vmem:[%s20190_s1 + $0x770] sm:$0xff]  ;;  %v14877_v62 = vld [vmem:[%s20190_s1 + $0x728] sm:$0xff] }
 0x1ec   :  { %2459 = vmatpush.msrb.mxu0 %v15438_v31  ;;  %2479 = vmatpush.msrb.mxu1 %v15470_v34  ;;  %v14885_v31 = vld [vmem:[%s20190_s1 + $0x768] sm:$0xff]  ;;  %v14876_v34 = vld [vmem:[%s20190_s1 + $0x720] sm:$0xff] }
 0x1ed   :  { %4035 = vmatpush.bf16.msrb.mxu3 %v14816_v33  ;;  %v11213_v33 = vld [vmem:[%s20191_s0 + $0x1f0] sm:$0xf] }
 0x1ee   :  { %2460 = vmatpush.msrb.mxu0 %v15435_v10  ;;  %2480 = vmatpush.msrb.mxu1 %v15467_v37  ;;  %v14884_v10 = vld [vmem:[%s20190_s1 + $0x760] sm:$0xff]  ;;  %v14875_v37 = vld [vmem:[%s20190_s1 + $0x718] sm:$0xff] }
 0x1ef   :  { %4085 = vmatpush.bf16.msra.mxu2 %v14847_v20  ;;  %v14800_v20 = vld [vmem:[%s20191_s0 + $0x23c] sm:$0xf0] }
 0x1f0   :  { %4017 = vmatmul.bf16.vlgmr.msrb.gmra.mxu2 %v11118_v35  ;;  %2461 = vmatpush.msrb.mxu0 %v15434_v39  ;;  %v11214_v42 = vor.u32 %v14800_v20, %v11213_v33  ;;  %v11207_v33 = vld [vmem:[%s20191_s0 + $0x238] sm:$0xf0]  ;;  %v14858_v20 = vld [vmem:[%s20190_s1 + $0x690] sm:$0xff] }
 0x1f1   :  { %4104 = vmatpush.bf16.msra.mxu3 %v14855_v43  ;;  %2481 = vmatpush.msrb.mxu1 %v15466_v41 }
 0x1f2   :  { %4036 = vmatmul.bf16.vlgmr.msrb.gmra.mxu3 %v11122_v21  ;;  %4047 = vmatpush.bf16.msra.mxu0 %v14831_v36  ;;  %v14790_v21 = vld [vmem:[%s20191_s0 + $0x1f4] sm:$0xf]  ;;  %v2370_v36 = vperm.slane %v2368_v19, 0 }
 0x1f3   :  { %4066 = vmatpush.bf16.msra.mxu1 %v14839_v22  ;;  %4086 = vmatpush.bf16.msra.mxu2 %v14846_v45  ;;  %v11215_v22 = vld [vmem:[%s20191_s0 + $0x240] sm:$0xf0] }
 0x1f5   :  { %4105 = vmatpush.bf16.msra.mxu3 %v14854_v47  ;;  %v11218_v47 = vor.u32 %v14790_v21, %v11215_v22  ;;  %v14865_v21 = vld [vmem:[%s20190_s1 + $0x6c8] sm:$0xff]  ;;  %v14792_v22 = vld [vmem:[%s20191_s0 + $0x204] sm:$0xf] }
 0x1f6   :  { %4048 = vmatpush.bf16.msra.mxu0 %v14830_v46 }
 0x1f7   :  { %4067 = vmatpush.bf16.msra.mxu1 %v14838_v40  ;;  %4087 = vmatpush.bf16.msra.mxu2 %v14845_v48  ;;  %v2371_v40 = vperm.slane %v2368_v19, 1  ;;  %v14883_v48 = vld [vmem:[%s20190_s1 + $0x758] sm:$0xff]  ;;  %v11229_v19 = vld [vmem:[%s20191_s0 + $0x200] sm:$0xf] }
 0x1f9   :  { %4106 = vmatpush.bf16.msra.mxu3 %v14853_v53  ;;  %v14874_v53 = vld [vmem:[%s20190_s1 + $0x710] sm:$0xff] }
 0x1fa   :  { %4049 = vmatpush.bf16.msra.mxu0 %v14829_v50 }
 0x1fb   :  { %4068 = vmatpush.bf16.msra.mxu1 %v14837_v44  ;;  %4088 = vmatpush.bf16.msra.mxu2 %v14844_v55 }
 0x1fd   :  { %4107 = vmatpush.bf16.msra.mxu3 %v14852_v24  ;;  %v14873_v24 = vld [vmem:[%s20190_s1 + $0x708] sm:$0xff] }
 0x1fe   :  { %4050 = vmatpush.bf16.msra.mxu0 %v14828_v56 }
 0x1ff   :  { %4069 = vmatpush.bf16.msra.mxu1 %v14836_v12  ;;  %4089 = vmatpush.bf16.msra.mxu2 %v14843_v14  ;;  %v14882_v12 = vld [vmem:[%s20190_s1 + $0x750] sm:$0xff]  ;;  %v14871_v14 = vld [vmem:[%s20190_s1 + $0x6f8] sm:$0xff] }
 0x200   :  { %4022 = vmatmul.bf16.gmra.mxu2 %v11198_v13  ;;  %v14863_v13 = vld [vmem:[%s20190_s1 + $0x6b8] sm:$0xff] }
 0x201   :  { %4108 = vmatpush.bf16.msra.mxu3 %v14851_v1  ;;  %v14872_v1 = vld [vmem:[%s20190_s1 + $0x700] sm:$0xff] }
 0x202   :  { %4041 = vmatmul.bf16.gmra.mxu3 %v11202_v58  ;;  %4051 = vmatpush.bf16.msra.mxu0 %v14827_v59  ;;  %v11125_v58 = vld [vmem:[%s20191_s0 + $0x148] sm:$0xf]  ;;  %v14779_v59 = vld [vmem:[%s20191_s0 + $0x194] sm:$0xf0] }
 0x203   :  { %4070 = vmatpush.bf16.msra.mxu1 %v14835_v0  ;;  %4090 = vmatpush.bf16.msra.mxu2 %v14842_v25  ;;  %v14881_v0 = vld [vmem:[%s20190_s1 + $0x748] sm:$0xff] }
 0x204   :  { %v14769_v25 = vld [vmem:[%s20191_s0 + $0x14c] sm:$0xf] }
 0x205   :  { %4109 = vmatpush.bf16.msra.mxu3 %v14850_v3  ;;  %v14862_v3 = vld [vmem:[%s20190_s1 + $0x6b0] sm:$0xff] }
 0x206   :  { %4052 = vmatpush.bf16.msra.mxu0 %v14826_v52  ;;  %v14911_v52 = vld [vmem:[%s20190_s1 + $0x838] sm:$0xff] }
 0x207   :  { %4071 = vmatpush.bf16.msra.mxu1 %v14834_v2  ;;  %4091 = vmatpush.bf16.msra.mxu2 %v14841_v15  ;;  %v11127_v2 = vld [vmem:[%s20191_s0 + $0x198] sm:$0xf0]  ;;  %v14870_v15 = vld [vmem:[%s20190_s1 + $0x6f0] sm:$0xff] }
 0x209   :  { %4110 = vmatpush.bf16.msra.mxu3 %v14849_v4  ;;  %v14782_v4 = vld [vmem:[%s20191_s0 + $0x1ac] sm:$0xf0] }
 0x20a   :  { %4053 = vmatpush.bf16.msra.mxu0 %v14825_v26  ;;  %v14880_v26 = vld [vmem:[%s20190_s1 + $0x740] sm:$0xff] }
 0x20b   :  { %4072 = vmatpush.bf16.msra.mxu1 %v14833_v51  ;;  %4092 = vmatpush.bf16.msra.mxu2 %v14840_v60  ;;  %v11149_v51 = vld [vmem:[%s20191_s0 + $0x160] sm:$0xf]  ;;  %v11126_v60 = vor.u32 %v14779_v59, %v11125_v58  ;;  %v11143_v58 = vld [vmem:[%s20191_s0 + $0x1a8] sm:$0xf0] }
 0x20c   :  { %v11150_v28 = vor.u32 %v14782_v4, %v11149_v51  ;;  %v14893_v59 = vld [vmem:[%s20190_s1 + $0x7a8] sm:$0xff]  ;;  %v14774_v51 = vld [vmem:[%s20191_s0 + $0x174] sm:$0xf] }
 0x20d   :  { %4111 = vmatpush.bf16.msra.mxu3 %v14848_v54  ;;  %v14772_v54 = vld [vmem:[%s20191_s0 + $0x164] sm:$0xf] }
 0x20e   :  { %4054 = vmatpush.bf16.msra.mxu0 %v14824_v5  ;;  %v11130_v5 = vor.u32 %v14769_v25, %v11127_v2  ;;  %v11165_v2 = vld [vmem:[%s20191_s0 + $0x170] sm:$0xf] }
 0x20f   :  { %4073 = vmatpush.bf16.msra.mxu1 %v14832_v7  ;;  %4161 = vmatpush.bf16.msrb.mxu2 %v14879_v9  ;;  %v14861_v7 = vld [vmem:[%s20190_s1 + $0x6a8] sm:$0xff]  ;;  %v11151_v9 = vld [vmem:[%s20191_s0 + $0x1b0] sm:$0xf0] }
 0x210   :  { %4093 = vmatmul.bf16.vlgmr.msra.gmra.mxu2 %v11134_v11  ;;  %v11154_v11 = vor.u32 %v14772_v54, %v11151_v9  ;;  %v14899_v54 = vld [vmem:[%s20190_s1 + $0x7d8] sm:$0xff]  ;;  %v14950_v9 = vld [vmem:[%s20190_s1 + $0x970] sm:$0xff] }
 0x211   :  { %4180 = vmatpush.bf16.msrb.mxu3 %v14887_v6  ;;  %v14910_v6 = vld [vmem:[%s20190_s1 + $0x830] sm:$0xff] }
 0x212   :  { %4112 = vmatmul.bf16.vlgmr.msra.gmra.mxu3 %v11138_v27  ;;  %v14868_v27 = vld [vmem:[%s20190_s1 + $0x6e0] sm:$0xff] }
 0x213   :  { %4162 = vmatpush.bf16.msrb.mxu2 %v14878_v63  ;;  %v14918_v63 = vld [vmem:[%s20190_s1 + $0x870] sm:$0xff] }
 0x215   :  { %4181 = vmatpush.bf16.msrb.mxu3 %v14886_v29  ;;  %v14909_v29 = vld [vmem:[%s20190_s1 + $0x828] sm:$0xff] }
 0x217   :  { %4163 = vmatpush.bf16.msrb.mxu2 %v14877_v62  ;;  %v14859_v62 = vld [vmem:[%s20190_s1 + $0x698] sm:$0xff] }
 0x219   :  { %4182 = vmatpush.bf16.msrb.mxu3 %v14885_v31  ;;  %v14908_v31 = vld [vmem:[%s20190_s1 + $0x820] sm:$0xff] }
 0x21b   :  { %4164 = vmatpush.bf16.msrb.mxu2 %v14876_v34  ;;  %v11205_v34 = vld [vmem:[%s20191_s0 + $0x1e8] sm:$0xf] }
 0x21d   :  { %4183 = vmatpush.bf16.msrb.mxu3 %v14884_v10  ;;  %v14866_v10 = vld [vmem:[%s20190_s1 + $0x6d0] sm:$0xff] }
 0x21f   :  { %4165 = vmatpush.bf16.msrb.mxu2 %v14875_v37  ;;  %v14916_v37 = vld [vmem:[%s20190_s1 + $0x860] sm:$0xff] }
 0x220   :  { %4098 = vmatmul.bf16.gmra.mxu2 %v11214_v42  ;;  %v14802_v42 = vld [vmem:[%s20191_s0 + $0x24c] sm:$0xf0] }
 0x221   :  { %4184 = vmatpush.bf16.msrb.mxu3 %v14883_v48  ;;  %v14864_v48 = vld [vmem:[%s20190_s1 + $0x6c0] sm:$0xff] }
 0x222   :  { %4117 = vmatmul.bf16.gmra.mxu3 %v11218_v47  ;;  %v14856_v47 = vld [vmem:[%s20190_s1 + $0x680] sm:$0xff] }
 0x223   :  { %4166 = vmatpush.bf16.msrb.mxu2 %v14874_v53  ;;  %v14903_v53 = vld [vmem:[%s20190_s1 + $0x7f8] sm:$0xff] }
 0x225   :  { %4185 = vmatpush.bf16.msrb.mxu3 %v14882_v12  ;;  %v14894_v12 = vld [vmem:[%s20190_s1 + $0x7b0] sm:$0xff] }
 0x227   :  { %4167 = vmatpush.bf16.msrb.mxu2 %v14873_v24  ;;  %v14902_v24 = vld [vmem:[%s20190_s1 + $0x7f0] sm:$0xff] }
 0x229   :  { %4186 = vmatpush.bf16.msrb.mxu3 %v14881_v0  ;;  %v14901_v0 = vld [vmem:[%s20190_s1 + $0x7e8] sm:$0xff] }
 0x22b   :  { %4168 = vmatpush.bf16.msrb.mxu2 %v14872_v1  ;;  %v14912_v1 = vld [vmem:[%s20190_s1 + $0x840] sm:$0xff] }
 0x22d   :  { %4187 = vmatpush.bf16.msrb.mxu3 %v14880_v26  ;;  %v14900_v26 = vld [vmem:[%s20190_s1 + $0x7e0] sm:$0xff] }
 0x22f   :  { %4237 = vmatpush.bf16.msra.mxu2 %v14911_v52 }
 0x230   :  { %4169 = vmatmul.bf16.vlgmr.msrb.gmra.mxu2 %v11150_v28  ;;  %v14891_v28 = vld [vmem:[%s20190_s1 + $0x798] sm:$0xff] }
 0x231   :  { %4256 = vmatpush.bf16.msra.mxu3 %v14919_v16  ;;  %v14890_v16 = vld [vmem:[%s20190_s1 + $0x790] sm:$0xff] }
 0x232   :  { %4188 = vmatmul.bf16.vlgmr.msrb.gmra.mxu3 %v11154_v11  ;;  %v14941_v11 = vld [vmem:[%s20190_s1 + $0x928] sm:$0xff] }
 0x233   :  { %4238 = vmatpush.bf16.msra.mxu2 %v14910_v6  ;;  %v14949_v6 = vld [vmem:[%s20190_s1 + $0x968] sm:$0xff] }
 0x235   :  { %4257 = vmatpush.bf16.msra.mxu3 %v14918_v63  ;;  %v14940_v63 = vld [vmem:[%s20190_s1 + $0x920] sm:$0xff] }
 0x237   :  { %4239 = vmatpush.bf16.msra.mxu2 %v14909_v29  ;;  %v14801_v29 = vld [vmem:[%s20191_s0 + $0x244] sm:$0xf0] }
 0x23b   :  { %4240 = vmatpush.bf16.msra.mxu2 %v14908_v31  ;;  %v14897_v31 = vld [vmem:[%s20190_s1 + $0x7c8] sm:$0xff] }
 0x24c   :  { %v2163_v18 = vpop.f32.mrf.mxu0  ;;  %v2183_v30 = vpop.f32.mrf.mxu1 }
 0x250   :  { %v2205_v61 = vpop.f32.mrf.mxu2  ;;  %v2225_v32 = vpop.f32.mrf.mxu3 }
 0x251   :  { %v2206_v39 = vadd.f32 %v2205_v61, %v2163_v18  ;;  %v2226_v41 = vadd.f32 %v2225_v32, %v2183_v30  ;;  %v14867_v18 = vld [vmem:[%s20190_s1 + $0x6d8] sm:$0xff]  ;;  %v14917_v30 = vld [vmem:[%s20190_s1 + $0x868] sm:$0xff] }
 0x252   :  { %v14799_v61 = vld [vmem:[%s20191_s0 + $0x234] sm:$0xf0]  ;;  %v14789_v32 = vld [vmem:[%s20191_s0 + $0x1ec] sm:$0xf]  ;;  %4258 = vmatpush.bf16.msra.mxu3 %v14917_v30 }
 0x253   :  { %v14889_v30 = vld [vmem:[%s20190_s1 + $0x788] sm:$0xff] }
 0x254   :  { %v2273_v35 = vpop.f32.mrf.mxu0  ;;  %v2293_v43 = vpop.f32.mrf.mxu1 }
 0x255   :  { %v2296_v45 = vadd.f32 %v2273_v35, %v2206_v39  ;;  %v2297_v46 = vadd.f32 %v2293_v43, %v2226_v41  ;;  %v14907_v35 = vld [vmem:[%s20190_s1 + $0x818] sm:$0xff]  ;;  %v11206_v43 = vor.u32 %v14799_v61, %v11205_v34  ;;  %v11210_v39 = vor.u32 %v14789_v32, %v11207_v33  ;;  %v14857_v41 = vld [vmem:[%s20190_s1 + $0x688] sm:$0xff]  ;;  %v14948_v32 = vld [vmem:[%s20190_s1 + $0x960] sm:$0xff] }
 0x256   :  { %4259 = vmatpush.bf16.msra.mxu3 %v14916_v37  ;;  %4241 = vmatpush.bf16.msra.mxu2 %v14907_v35  ;;  %v11245_v33 = vld [vmem:[%s20191_s0 + $0x210] sm:$0xf]  ;;  %v14888_v37 = vld [vmem:[%s20190_s1 + $0x780] sm:$0xff]  ;;  %v14927_v35 = vld [vmem:[%s20190_s1 + $0x8b8] sm:$0xff] }
 0x258   :  { %v2343_v50 = vpop.f32.mrf.mxu2  ;;  %v2363_v44 = vpop.f32.mrf.mxu3 }
 0x259   :  { %v2366_v55 = vadd.f32 %v2343_v50, %v2296_v45  ;;  %v2367_v56 = vadd.f32 %v2363_v44, %v2297_v46  ;;  %v11231_v45 = vld [vmem:[%s20191_s0 + $0x250] sm:$0xf0]  ;;  %v14895_v44 = vld [vmem:[%s20190_s1 + $0x7b8] sm:$0xff] }
 0x25a   :  { %v11234_v46 = vor.u32 %v14792_v22, %v11231_v45  ;;  %v14906_v50 = vld [vmem:[%s20190_s1 + $0x810] sm:$0xff] }
 0x25b   :  { %v2374_v38 = vadd.f32 %v2370_v36, %v2366_v55  ;;  %v2375_v57 = vadd.f32 %v2371_v40, %v2367_v56  ;;  %v11230_v36 = vor.u32 %v14802_v42, %v11229_v19  ;;  %v14915_v40 = vld [vmem:[%s20190_s1 + $0x858] sm:$0xff]  ;;  %4242 = vmatpush.bf16.msra.mxu2 %v14906_v50  ;;  %v14914_v55 = vld [vmem:[%s20190_s1 + $0x850] sm:$0xff]  ;;  %v14905_v56 = vld [vmem:[%s20190_s1 + $0x808] sm:$0xff] }
 0x25c   :  { %4193 = vmatmul.bf16.gmra.mxu3 %v11234_v46  ;;  %v14896_v19 = vld [vmem:[%s20190_s1 + $0x7c0] sm:$0xff]  ;;  %v14794_v42 = vld [vmem:[%s20191_s0 + $0x214] sm:$0xf]  ;;  %v14933_v50 = vld [vmem:[%s20190_s1 + $0x8e8] sm:$0xff] }
 0x25d   :  { %v2376_v23 = vmax.f32 %v2374_v38, 0.0  ;;  %v2377_v49 = vmax.f32 %v2375_v57, 0.0  ;;  %4174 = vmatmul.bf16.gmra.mxu2 %v11230_v36  ;;  %4260 = vmatpush.bf16.msra.mxu3 %v14915_v40  ;;  %v14913_v38 = vld [vmem:[%s20190_s1 + $0x848] sm:$0xff]  ;;  %v14904_v57 = vld [vmem:[%s20190_s1 + $0x800] sm:$0xff]  ;;  %v14947_v36 = vld [vmem:[%s20190_s1 + $0x958] sm:$0xff] }
 0x25e   :  { %v14938_v22 = vld [vmem:[%s20190_s1 + $0x910] sm:$0xff] }
 0x25f   :  { %2462 = vmatmul.f32.vlgmr.msrb.gmra.mxu0 %v2376_v23  ;;  %2482 = vmatmul.f32.vlgmr.msrb.gmra.mxu1 %v2377_v49  ;;  %v14781_v23 = vld [vmem:[%s20191_s0 + $0x1a4] sm:$0xf0]  ;;  %v14771_v49 = vld [vmem:[%s20191_s0 + $0x15c] sm:$0xf]  ;;  %v14926_v45 = vld [vmem:[%s20190_s1 + $0x8b0] sm:$0xff] }
 0x260   :  { %4123 = vmatpush.bf16.msrb.mxu0 %v14863_v13  ;;  %4142 = vmatpush.bf16.msrb.mxu1 %v14871_v14  ;;  %v11141_v13 = vld [vmem:[%s20191_s0 + $0x158] sm:$0xf]  ;;  %v11146_v52 = vor.u32 %v14771_v49, %v11143_v58  ;;  %v14934_v46 = vld [vmem:[%s20190_s1 + $0x8f0] sm:$0xff]  ;;  %v11181_v49 = vld [vmem:[%s20191_s0 + $0x180] sm:$0xf] }
 0x261   :  { %4261 = vmatpush.bf16.msra.mxu3 %v14914_v55  ;;  %4243 = vmatpush.bf16.msra.mxu2 %v14905_v56  ;;  %v14943_v14 = vld [vmem:[%s20190_s1 + $0x938] sm:$0xff]  ;;  %v11142_v25 = vor.u32 %v14781_v23, %v11141_v13  ;;  %v14946_v40 = vld [vmem:[%s20190_s1 + $0x950] sm:$0xff]  ;;  %v14773_v55 = vld [vmem:[%s20191_s0 + $0x16c] sm:$0xf] }
 0x262   :  { %v11159_v56 = vld [vmem:[%s20191_s0 + $0x1b8] sm:$0xf0]  ;;  %v14944_v23 = vld [vmem:[%s20190_s1 + $0x940] sm:$0xff]  ;;  %v14786_v58 = vld [vmem:[%s20191_s0 + $0x1cc] sm:$0xf0] }
 0x264   :  { %4124 = vmatpush.bf16.msrb.mxu0 %v14862_v3  ;;  %4143 = vmatpush.bf16.msrb.mxu1 %v14870_v15  ;;  %v14784_v3 = vld [vmem:[%s20191_s0 + $0x1bc] sm:$0xf0] }
 0x265   :  { %4262 = vmatpush.bf16.msra.mxu3 %v14913_v38  ;;  %4244 = vmatpush.bf16.msra.mxu2 %v14904_v57  ;;  %v14892_v15 = vld [vmem:[%s20190_s1 + $0x7a0] sm:$0xff]  ;;  %v11166_v4 = vor.u32 %v14784_v3, %v11165_v2 }
 0x266   :  { %v14924_v38 = vld [vmem:[%s20190_s1 + $0x8a0] sm:$0xff] }
 0x267   :  { %4055 = vmatmul.bf16.vlgmr.msra.gmra.mxu0 %v11126_v60  ;;  %4074 = vmatmul.bf16.vlgmr.msra.gmra.mxu1 %v11130_v5  ;;  %v11167_v60 = vld [vmem:[%s20191_s0 + $0x1c0] sm:$0xf0] }
 0x268   :  { %4125 = vmatpush.bf16.msrb.mxu0 %v14861_v7  ;;  %4144 = vmatpush.bf16.msrb.mxu1 %v14869_v8  ;;  %v11170_v5 = vor.u32 %v14774_v51, %v11167_v60  ;;  %v14951_v7 = vld [vmem:[%s20190_s1 + $0x978] sm:$0xff]  ;;  %v14942_v8 = vld [vmem:[%s20190_s1 + $0x930] sm:$0xff]  ;;  %v14932_v57 = vld [vmem:[%s20190_s1 + $0x8e0] sm:$0xff] }
 0x269   :  { %4313 = vmatpush.bf16.msrb.mxu2 %v14943_v14  ;;  %4263 = vmatpush.bf16.msra.mxu3 %v14912_v1  ;;  %v11162_v14 = vor.u32 %v14773_v55, %v11159_v56  ;;  %v14931_v1 = vld [vmem:[%s20190_s1 + $0x8d8] sm:$0xff]  ;;  %v14922_v51 = vld [vmem:[%s20190_s1 + $0x890] sm:$0xff]  ;;  %v14921_v60 = vld [vmem:[%s20190_s1 + $0x888] sm:$0xff] }
 0x26a   :  { %v14805_v55 = vld [vmem:[%s20191_s0 + $0x264] sm:$0xf0]  ;;  %v14795_v56 = vld [vmem:[%s20191_s0 + $0x21c] sm:$0xf] }
 0x26c   :  { %4126 = vmatpush.bf16.msrb.mxu0 %v14860_v17  ;;  %4145 = vmatpush.bf16.msrb.mxu1 %v14868_v27  ;;  %v14898_v17 = vld [vmem:[%s20190_s1 + $0x7d0] sm:$0xff]  ;;  %v11221_v27 = vld [vmem:[%s20191_s0 + $0x1f8] sm:$0xf] }
 0x26d   :  { %4245 = vmatmul.bf16.vlgmr.msra.gmra.mxu2 %v11166_v4  ;;  %4264 = vmatmul.bf16.vlgmr.msra.gmra.mxu3 %v11170_v5  ;;  %v11222_v34 = vor.u32 %v14801_v29, %v11221_v27  ;;  %v14930_v4 = vld [vmem:[%s20190_s1 + $0x8d0] sm:$0xff]  ;;  %v14929_v5 = vld [vmem:[%s20190_s1 + $0x8c8] sm:$0xff]  ;;  %v14967_v29 = vld [vmem:[%s20190_s1 + $0x9f8] sm:$0xff] }
 0x26e   :  { %4332 = vmatpush.bf16.msrb.mxu3 %v14951_v7  ;;  %4314 = vmatpush.bf16.msrb.mxu2 %v14942_v8  ;;  %v11237_v7 = vld [vmem:[%s20191_s0 + $0x208] sm:$0xf]  ;;  %v14803_v8 = vld [vmem:[%s20191_s0 + $0x254] sm:$0xf0] }
 0x26f   :  { %v11238_v27 = vor.u32 %v14803_v8, %v11237_v7 }
 0x270   :  { %4127 = vmatpush.bf16.msrb.mxu0 %v14859_v62  ;;  %4146 = vmatpush.bf16.msrb.mxu1 %v14867_v18  ;;  %v14791_v62 = vld [vmem:[%s20191_s0 + $0x1fc] sm:$0xf]  ;;  %v11223_v18 = vld [vmem:[%s20191_s0 + $0x248] sm:$0xf0] }
 0x271   :  { %v11226_v61 = vor.u32 %v14791_v62, %v11223_v18  ;;  %v11261_v62 = vld [vmem:[%s20191_s0 + $0x220] sm:$0xf]  ;;  %v14806_v18 = vld [vmem:[%s20191_s0 + $0x26c] sm:$0xf0] }
 0x272   :  { %4333 = vmatpush.bf16.msrb.mxu3 %v14950_v9  ;;  %4315 = vmatpush.bf16.msrb.mxu2 %v14941_v11 }
 0x273   :  { %v4018_v3 = vpop.f32.mrf.mxu2 }
 0x274   :  { %4128 = vmatpush.bf16.msrb.mxu0 %v14858_v20  ;;  %4147 = vmatpush.bf16.msrb.mxu1 %v14866_v10  ;;  %v14804_v20 = vld [vmem:[%s20191_s0 + $0x25c] sm:$0xf0]  ;;  %v14939_v10 = vld [vmem:[%s20190_s1 + $0x918] sm:$0xff] }
 0x276   :  { %4334 = vmatpush.bf16.msrb.mxu3 %v14949_v6  ;;  %4316 = vmatpush.bf16.msrb.mxu2 %v14940_v63  ;;  %v14959_v63 = vld [vmem:[%s20190_s1 + $0x9b8] sm:$0xff] }
 0x277   :  { %4060 = vmatmul.bf16.gmra.mxu0 %v11206_v43  ;;  %4079 = vmatmul.bf16.gmra.mxu1 %v11210_v39  ;;  %v14935_v43 = vld [vmem:[%s20190_s1 + $0x8f8] sm:$0xff]  ;;  %v11247_v39 = vld [vmem:[%s20191_s0 + $0x260] sm:$0xf0] }
 0x278   :  { %4129 = vmatpush.bf16.msrb.mxu0 %v14857_v41  ;;  %4148 = vmatpush.bf16.msrb.mxu1 %v14865_v21  ;;  %v11246_v41 = vor.u32 %v14804_v20, %v11245_v33  ;;  %v11250_v21 = vor.u32 %v14794_v42, %v11247_v39  ;;  %v14966_v33 = vld [vmem:[%s20190_s1 + $0x9f0] sm:$0xff]  ;;  %v14775_v39 = vld [vmem:[%s20191_s0 + $0x17c] sm:$0xf] }
 0x27a   :  { %4335 = vmatpush.bf16.msrb.mxu3 %v14948_v32  ;;  %4317 = vmatpush.bf16.msrb.mxu2 %v14939_v10  ;;  %v14958_v32 = vld [vmem:[%s20190_s1 + $0x9b0] sm:$0xff] }
 0x27b   :  { %v17696_v9 = vpop.f32.mrf.mxu2 }
 0x27c   :  { %4130 = vmatpush.bf16.msrb.mxu0 %v14856_v47  ;;  %4149 = vmatpush.bf16.msrb.mxu1 %v14864_v48  ;;  %v14937_v47 = vld [vmem:[%s20190_s1 + $0x908] sm:$0xff] }
 0x27d   :  { %4250 = vmatmul.bf16.gmra.mxu2 %v11246_v41  ;;  %4269 = vmatmul.bf16.gmra.mxu3 %v11250_v21  ;;  %v14925_v48 = vld [vmem:[%s20190_s1 + $0x8a8] sm:$0xff]  ;;  %v14956_v21 = vld [vmem:[%s20190_s1 + $0x9a0] sm:$0xff] }
 0x27e   :  { %4336 = vmatpush.bf16.msrb.mxu3 %v14947_v36  ;;  %4318 = vmatpush.bf16.msrb.mxu2 %v14938_v22  ;;  %v11175_v41 = vld [vmem:[%s20191_s0 + $0x1c8] sm:$0xf0]  ;;  %v14964_v36 = vld [vmem:[%s20190_s1 + $0x9e0] sm:$0xff] }
 0x280   :  { %4199 = vmatpush.bf16.msra.mxu0 %v14895_v44  ;;  %4218 = vmatpush.bf16.msra.mxu1 %v14903_v53  ;;  %v11157_v44 = vld [vmem:[%s20191_s0 + $0x168] sm:$0xf]  ;;  %v14783_v53 = vld [vmem:[%s20191_s0 + $0x1b4] sm:$0xf0] }
 0x281   :  { %v11158_v13 = vor.u32 %v14783_v53, %v11157_v44  ;;  %v14961_v44 = vld [vmem:[%s20190_s1 + $0x9c8] sm:$0xff]  ;;  %v11253_v53 = vld [vmem:[%s20191_s0 + $0x218] sm:$0xf] }
 0x282   :  { %4337 = vmatpush.bf16.msrb.mxu3 %v14946_v40  ;;  %4319 = vmatpush.bf16.msrb.mxu2 %v14937_v47  ;;  %v14963_v40 = vld [vmem:[%s20190_s1 + $0x9d8] sm:$0xff]  ;;  %v14954_v47 = vld [vmem:[%s20190_s1 + $0x990] sm:$0xff] }
 0x283   :  { %v4023_v20 = vpop.f32.mrf.mxu2 }
 0x284   :  { %4200 = vmatpush.bf16.msra.mxu0 %v14894_v12  ;;  %4219 = vmatpush.bf16.msra.mxu1 %v14902_v24  ;;  %v14945_v12 = vld [vmem:[%s20190_s1 + $0x948] sm:$0xff]  ;;  %v14936_v24 = vld [vmem:[%s20190_s1 + $0x900] sm:$0xff] }
 0x286   :  { %4338 = vmatpush.bf16.msrb.mxu3 %v14945_v12  ;;  %4320 = vmatpush.bf16.msrb.mxu2 %v14936_v24  ;;  %v11255_v12 = vld [vmem:[%s20191_s0 + $0x268] sm:$0xf0]  ;;  %v14952_v24 = vld [vmem:[%s20190_s1 + $0x980] sm:$0xff] }
 0x287   :  { %4131 = vmatmul.bf16.vlgmr.msrb.gmra.mxu0 %v11142_v25  ;;  %4150 = vmatmul.bf16.vlgmr.msrb.gmra.mxu1 %v11146_v52  ;;  %v11183_v25 = vld [vmem:[%s20191_s0 + $0x1d0] sm:$0xf0]  ;;  %v11182_v52 = vor.u32 %v14786_v58, %v11181_v49  ;;  %v16006_v49 = vld [vmem:[%s20196_s6] ss:$0 sm:$0xff] }
 0x288   :  { %4201 = vmatpush.bf16.msra.mxu0 %v14893_v59  ;;  %4220 = vmatpush.bf16.msra.mxu1 %v14901_v0  ;;  %v14776_v59 = vld [vmem:[%s20191_s0 + $0x184] sm:$0xf]  ;;  %v14923_v0 = vld [vmem:[%s20190_s1 + $0x898] sm:$0xff] }
 0x289   :  { %v11186_v2 = vor.u32 %v14776_v59, %v11183_v25 }
 0x28a   :  { %4339 = vmatpush.bf16.msrb.mxu3 %v14944_v23 }
 0x28c   :  { %4202 = vmatpush.bf16.msra.mxu0 %v14892_v15  ;;  %4221 = vmatpush.bf16.msra.mxu1 %v14900_v26  ;;  %v4037_v15 = vpop.f32.mrf.mxu3 }
 0x28d   :  { %v17670_v26 = vadd.f32 %v4037_v15, %v4018_v3  ;;  %4321 = vmatmul.bf16.vlgmr.msrb.gmra.mxu2 %v11182_v52  ;;  %4340 = vmatmul.bf16.vlgmr.msrb.gmra.mxu3 %v11186_v2  ;;  %v11189_v52 = vld [vmem:[%s20191_s0 + $0x188] sm:$0xf]  ;;  %v14787_v2 = vld [vmem:[%s20191_s0 + $0x1d4] sm:$0xf0]  ;;  %v14777_v3 = vld [vmem:[%s20191_s0 + $0x18c] sm:$0xf] }
 0x28e   :  { %v11191_v15 = vld [vmem:[%s20191_s0 + $0x1d8] sm:$0xf0] }
 0x290   :  { %4203 = vmatpush.bf16.msra.mxu0 %v14891_v28  ;;  %4222 = vmatpush.bf16.msra.mxu1 %v14899_v54  ;;  %v14793_v28 = vld [vmem:[%s20191_s0 + $0x20c] sm:$0xf]  ;;  %v11239_v54 = vld [vmem:[%s20191_s0 + $0x258] sm:$0xf0] }
 0x291   :  { %v11242_v6 = vor.u32 %v14793_v28, %v11239_v54 }
 0x294   :  { %4204 = vmatpush.bf16.msra.mxu0 %v14890_v16  ;;  %4223 = vmatpush.bf16.msra.mxu1 %v14898_v17  ;;  %v17698_v11 = vpop.f32.mrf.mxu3  ;;  %v14920_v16 = vld [vmem:[%s20190_s1 + $0x880] sm:$0xff] }
 0x295   :  { %v14928_v17 = vld [vmem:[%s20190_s1 + $0x8c0] sm:$0xff] }
 0x297   :  { %4136 = vmatmul.bf16.gmra.mxu0 %v11222_v34  ;;  %4155 = vmatmul.bf16.gmra.mxu1 %v11226_v61  ;;  %v11262_v34 = vor.u32 %v14806_v18, %v11261_v62 }
 0x298   :  { %4205 = vmatpush.bf16.msra.mxu0 %v14889_v30  ;;  %4224 = vmatpush.bf16.msra.mxu1 %v14897_v31  ;;  %v14796_v30 = vld [vmem:[%s20191_s0 + $0x224] sm:$0xf]  ;;  %v11263_v31 = vld [vmem:[%s20191_s0 + $0x270] sm:$0xf0] }
 0x299   :  { %v11266_v61 = vor.u32 %v14796_v30, %v11263_v31  ;;  %v11269_v30 = vld [vmem:[%s20191_s0 + $0x228] sm:$0xf]  ;;  %v14797_v31 = vld [vmem:[%s20191_s0 + $0x22c] sm:$0xf] }
 0x29c   :  { %4206 = vmatpush.bf16.msra.mxu0 %v14888_v37  ;;  %4225 = vmatpush.bf16.msra.mxu1 %v14896_v19  ;;  %v4042_v10 = vpop.f32.mrf.mxu3  ;;  %v14957_v37 = vld [vmem:[%s20190_s1 + $0x9a8] sm:$0xff] }
 0x29d   :  { %4326 = vmatmul.bf16.gmra.mxu2 %v11262_v34  ;;  %4345 = vmatmul.bf16.gmra.mxu3 %v11266_v61  ;;  %v14965_v19 = vld [vmem:[%s20190_s1 + $0x9e8] sm:$0xff]  ;;  %v17736_v42 = vadd.f32 %v4042_v10, %v4023_v20 }
 0x2a0   :  { %4275 = vmatpush.bf16.msrb.mxu0 %v14927_v35  ;;  %4294 = vmatpush.bf16.msrb.mxu1 %v14935_v43  ;;  %v11173_v35 = vld [vmem:[%s20191_s0 + $0x178] sm:$0xf]  ;;  %v14785_v43 = vld [vmem:[%s20191_s0 + $0x1c4] sm:$0xf0] }
 0x2a1   :  { %v11174_v22 = vor.u32 %v14785_v43, %v11173_v35 }
 0x2a4   :  { %4276 = vmatpush.bf16.msrb.mxu0 %v14926_v45  ;;  %4295 = vmatpush.bf16.msrb.mxu1 %v14934_v46  ;;  %v11178_v45 = vor.u32 %v14775_v39, %v11175_v41  ;;  %v14955_v46 = vld [vmem:[%s20190_s1 + $0x998] sm:$0xff]  ;;  %v4044_v23 = vpop.f32.mrf.mxu3 }
 0x2a7   :  { %4207 = vmatmul.bf16.vlgmr.msra.gmra.mxu0 %v11158_v13  ;;  %4226 = vmatmul.bf16.vlgmr.msra.gmra.mxu1 %v11162_v14  ;;  %v11258_v13 = vor.u32 %v14795_v56, %v11255_v12  ;;  %v4025_v14 = vpop.f32.mrf.mxu2 }
 0x2a8   :  { %4277 = vmatpush.bf16.msrb.mxu0 %v14925_v48  ;;  %4296 = vmatpush.bf16.msrb.mxu1 %v14933_v50  ;;  %v14962_v48 = vld [vmem:[%s20190_s1 + $0x9d0] sm:$0xff]  ;;  %v14953_v50 = vld [vmem:[%s20190_s1 + $0x988] sm:$0xff]  ;;  %v4045_v35 = vadd.f32 %v4044_v23, %v4025_v14 }
 0x2ac   :  { %4278 = vmatpush.bf16.msrb.mxu0 %v14924_v38  ;;  %4297 = vmatpush.bf16.msrb.mxu1 %v14932_v57  ;;  %v14960_v38 = vld [vmem:[%s20190_s1 + $0x9c0] sm:$0xff]  ;;  %v11254_v57 = vor.u32 %v14805_v55, %v11253_v53 }
 0x2b0   :  { %4279 = vmatpush.bf16.msrb.mxu0 %v14923_v0  ;;  %4298 = vmatpush.bf16.msrb.mxu1 %v14931_v1  ;;  %v4094_v1 = vpop.f32.mrf.mxu2 }
 0x2b4   :  { %4280 = vmatpush.bf16.msrb.mxu0 %v14922_v51  ;;  %4299 = vmatpush.bf16.msrb.mxu1 %v14930_v4  ;;  %v4113_v51 = vpop.f32.mrf.mxu3  ;;  %v11190_v4 = vor.u32 %v14787_v2, %v11189_v52 }
 0x2b7   :  { %4212 = vmatmul.bf16.gmra.mxu0 %v11238_v27  ;;  %4231 = vmatmul.bf16.gmra.mxu1 %v11242_v6 }
 0x2b8   :  { %4281 = vmatpush.bf16.msrb.mxu0 %v14921_v60  ;;  %4300 = vmatpush.bf16.msrb.mxu1 %v14929_v5  ;;  %v11194_v60 = vor.u32 %v14777_v3, %v11191_v15  ;;  %v4096_v54 = vpop.f32.mrf.mxu2 }
 0x2bc   :  { %4282 = vmatpush.bf16.msrb.mxu0 %v14920_v16  ;;  %4301 = vmatpush.bf16.msrb.mxu1 %v14928_v17  ;;  %v4040_v17 = vadd.f32 %v17698_v11, %v17696_v9  ;;  %v4115_v6 = vpop.f32.mrf.mxu3  ;;  %v11271_v9 = vld [vmem:[%s20191_s0 + $0x278] sm:$0xf0] }
 0x2bd   :  { %v11274_v61 = vor.u32 %v14797_v31, %v11271_v9 }
 0x2c0   :  { %4351 = vmatpush.bf16.msra.mxu0 %v14959_v63  ;;  %4370 = vmatpush.bf16.msra.mxu1 %v14967_v29  ;;  %v4099_v11 = vpop.f32.mrf.mxu2 }
 0x2c4   :  { %4352 = vmatpush.bf16.msra.mxu0 %v14958_v32  ;;  %4371 = vmatpush.bf16.msra.mxu1 %v14966_v33  ;;  %v4118_v10 = vpop.f32.mrf.mxu3 }
 0x2c7   :  { %4283 = vmatmul.bf16.vlgmr.msrb.gmra.mxu0 %v11174_v22  ;;  %4302 = vmatmul.bf16.vlgmr.msrb.gmra.mxu1 %v11178_v45 }
 0x2c8   :  { %4353 = vmatpush.bf16.msra.mxu0 %v14957_v37  ;;  %4372 = vmatpush.bf16.msra.mxu1 %v14965_v19  ;;  %v4101_v39 = vpop.f32.mrf.mxu2 }
 0x2cc   :  { %4354 = vmatpush.bf16.msra.mxu0 %v14956_v21  ;;  %4373 = vmatpush.bf16.msra.mxu1 %v14964_v36  ;;  %v4120_v45 = vpop.f32.mrf.mxu3 }
 0x2d0   :  { %4355 = vmatpush.bf16.msra.mxu0 %v14955_v46  ;;  %4374 = vmatpush.bf16.msra.mxu1 %v14963_v40 }
 0x2d4   :  { %4356 = vmatpush.bf16.msra.mxu0 %v14954_v47  ;;  %4375 = vmatpush.bf16.msra.mxu1 %v14962_v48  ;;  %v4170_v47 = vpop.f32.mrf.mxu2 }
 0x2d7   :  { %4288 = vmatmul.bf16.gmra.mxu0 %v11254_v57  ;;  %4307 = vmatmul.bf16.gmra.mxu1 %v11258_v13 }
 0x2d8   :  { %4357 = vmatpush.bf16.msra.mxu0 %v14953_v50  ;;  %4376 = vmatpush.bf16.msra.mxu1 %v14961_v44  ;;  %v17830_v50 = vpop.f32.mrf.mxu3 }
 0x2dc   :  { %4358 = vmatpush.bf16.msra.mxu0 %v14952_v24  ;;  %4377 = vmatpush.bf16.msra.mxu1 %v14960_v38  ;;  %v2463_v58 = vpop.f32.mrf.mxu0  ;;  %v2483_v59 = vpop.f32.mrf.mxu1 }
 0x2dd   :  { %v2464_v0 = vadd.f32 %v16006_v49, %v2463_v58  ;;  %v17834_v12 = vpop.f32.mrf.mxu2 }
 0x2df   :  { %v2484_v25 = vadd.f32 %v2483_v59, %v2464_v0 }
 0x2e0   :  { %v17836_v24 = vpop.f32.mrf.mxu3 }
 0x2e1   :  { %2486 = vst [vmem:[%s20197_s7] sm:$0x3] %v2484_v25 }
 0x2e4   :  { %v4056_v5 = vpop.f32.mrf.mxu0  ;;  %v4075_v7 = vpop.f32.mrf.mxu1 }
 0x2e5   :  { %v4057_v8 = vadd.f32 %v4056_v5, %v17670_v26  ;;  %v14807_v26 = vld [vmem:[%s20191_s0 + $0x274] sm:$0xf0]  ;;  %v17842_v14 = vpop.f32.mrf.mxu2 }
 0x2e6   :  { %v11270_v34 = vor.u32 %v14807_v26, %v11269_v30  ;;  %v15912_v26 = vld [vmem:[%s20192_s2 + $0x90] sm:$0xff]  }
 0x2e7   :  { %v4076_v28 = vadd.f32 %v4075_v7, %v4057_v8  ;;  %4359 = vmatmul.bf16.vlgmr.msra.gmra.mxu0 %v11190_v4  ;;  %4378 = vmatmul.bf16.vlgmr.msra.gmra.mxu1 %v11194_v60  ;;  %v15507_v9 = vunpack.c.h.bf16 %v15912_v26 }
 0x2e8   :  { %v17844_v59 = vpop.f32.mrf.mxu3 }
 0x2e9   :  { %v4095_v16 = vadd.f32 %v4094_v1, %v4076_v28  ;;  %v15917_v28 = vld [vmem:[%s20192_s2 + $0xb8] sm:$0xff]  }
 0x2ea   :  { %v15526_v30 = vunpack.c.l.bf16 %v15917_v28 }
 0x2eb   :  { %v17813_v27 = vadd.f32 %v4113_v51, %v4095_v16  ;;  %v15913_v16 = vld [vmem:[%s20192_s2 + $0x98] sm:$0xff]  }
 0x2ec   :  { %v4058_v63 = vpop.f32.mrf.mxu0  ;;  %v4077_v29 = vpop.f32.mrf.mxu1 }
 0x2ed   :  { %v4059_v62 = vadd.f32 %v4058_v63, %v4040_v17  ;;  %v17848_v25 = vpop.f32.mrf.mxu2  ;;  %v15511_v63 = vunpack.c.h.bf16 %v15913_v16 }
 0x2ef   :  { %v4078_v18 = vadd.f32 %v4077_v29, %v4059_v62  ;;  %4461 = vmatpush.msra.mxu3 %v15511_v63 }
 0x2f0   :  { %v17852_v3 = vpop.f32.mrf.mxu3 }
 0x2f1   :  { %v4097_v48 = vadd.f32 %v4096_v54, %v4078_v18  ;;  %v15527_v54 = vunpack.c.h.bf16 %v15917_v28  ;;  %v15510_v18 = vunpack.c.l.bf16 %v15913_v16  ;;  %v15920_v28 = vld [vmem:[%s20192_s2 + $0xd0] sm:$0xff]  }
 0x2f3   :  { %4438 = vmatpush.msra.mxu2 %v15527_v54  ;;  %4462 = vmatpush.msra.mxu3 %v15510_v18 }
 0x2f4   :  { %v4061_v32 = vpop.f32.mrf.mxu0  ;;  %v4080_v33 = vpop.f32.mrf.mxu1 }
 0x2f5   :  { %v4062_v20 = vadd.f32 %v4061_v32, %v17736_v42  ;;  %v4116_v42 = vadd.f32 %v4115_v6, %v4097_v48  ;;  %v17858_v4 = vpop.f32.mrf.mxu2  ;;  %4439 = vmatpush.msra.mxu2 %v15526_v30  ;;  %4463 = vmatpush.msra.mxu3 %v15507_v9 }
 0x2f7   :  { %v4081_v37 = vadd.f32 %v4080_v33, %v4062_v20  ;;  %4364 = vmatmul.bf16.gmra.mxu0 %v11270_v34  ;;  %4383 = vmatmul.bf16.gmra.mxu1 %v11274_v61  ;;  %v15506_v61 = vunpack.c.l.bf16 %v15912_v26  ;;  %v15911_v33 = vld [vmem:[%s20192_s2 + $0x88] sm:$0xff]  }
 0x2f8   :  { %v17860_v60 = vpop.f32.mrf.mxu3 }
 0x2f9   :  { %v4100_v19 = vadd.f32 %v4099_v11, %v4081_v37  ;;  %4464 = vmatpush.msra.mxu3 %v15506_v61  ;;  %v15915_v37 = vld [vmem:[%s20192_s2 + $0xa8] sm:$0xff]  }
 0x2fb   :  { %v17828_v43 = vadd.f32 %v4118_v10, %v4100_v19  ;;  %v15503_v10 = vunpack.c.h.bf16 %v15911_v33 }
 0x2fc   :  { %v4063_v41 = vpop.f32.mrf.mxu0  ;;  %v4082_v21 = vpop.f32.mrf.mxu1 }
 0x2fd   :  { %v4064_v36 = vadd.f32 %v4063_v41, %v4045_v35  ;;  %v17866_v8 = vpop.f32.mrf.mxu2  ;;  %4465 = vmatpush.msra.mxu3 %v15503_v10 }
 0x2ff   :  { %v4083_v22 = vadd.f32 %v4082_v21, %v4064_v36  ;;  %v15502_v21 = vunpack.c.l.bf16 %v15911_v33  ;;  %v15518_v36 = vunpack.c.l.bf16 %v15915_v37 }
 0x300   :  { %v17875_v6 = vpop.f32.mrf.mxu3 }
 0x301   :  { %v4102_v13 = vadd.f32 %v4101_v39, %v4083_v22  ;;  %v15519_v39 = vunpack.c.h.bf16 %v15915_v37  ;;  %v15910_v22 = vld [vmem:[%s20192_s2 + $0x80] sm:$0xff]   ;;  %4466 = vmatpush.msra.mxu3 %v15502_v21  ;;  %v15923_v21 = vld [vmem:[%s20192_s2 + $0xe8] sm:$0xff]  }
 0x303   :  { %v4121_v23 = vadd.f32 %v4120_v45, %v4102_v13 }
 0x304   :  { %v4132_v46 = vpop.f32.mrf.mxu0  ;;  %v4151_v40 = vpop.f32.mrf.mxu1 }
 0x305   :  { %v4133_v17 = vadd.f32 %v4132_v46, %v17813_v27  ;;  %v15916_v27 = vld [vmem:[%s20192_s2 + $0xb0] sm:$0xff]   ;;  %v17887_v34 = vpop.f32.mrf.mxu2  ;;  %v15499_v46 = vunpack.c.h.bf16 %v15910_v22 }
 0x306   :  { %v15523_v11 = vunpack.c.h.bf16 %v15916_v27  ;;  %v15522_v32 = vunpack.c.l.bf16 %v15916_v27 }
 0x307   :  { %v4152_v31 = vadd.f32 %v4151_v40, %v4133_v17  ;;  %v15914_v40 = vld [vmem:[%s20192_s2 + $0xa0] sm:$0xff]   ;;  %4467 = vmatpush.msra.mxu3 %v15499_v46  ;;  %v15919_v17 = vld [vmem:[%s20192_s2 + $0xc8] sm:$0xff]   ;;  %v15550_v46 = vunpack.c.l.bf16 %v15923_v21 }
 0x308   :  { %4440 = vmatpush.msra.mxu2 %v15523_v11  ;;  %v17897_v41 = vpop.f32.mrf.mxu3  ;;  %v15535_v63 = vunpack.c.h.bf16 %v15919_v17  ;;  %v15534_v9 = vunpack.c.l.bf16 %v15919_v17  ;;  %v15918_v11 = vld [vmem:[%s20192_s2 + $0xc0] sm:$0xff]  }
 0x309   :  { %v4171_v20 = vadd.f32 %v4170_v47, %v4152_v31  ;;  %v15515_v47 = vunpack.c.h.bf16 %v15914_v40  ;;  %v15530_v37 = vunpack.c.l.bf16 %v15918_v11 }
 0x30a   :  { %4441 = vmatpush.msra.mxu2 %v15522_v32 }
 0x30b   :  { %v4190_v45 = vadd.f32 %v17830_v50, %v4171_v20 }
 0x30c   :  { %v4134_v44 = vpop.f32.mrf.mxu0  ;;  %v4153_v53 = vpop.f32.mrf.mxu1  ;;  %4442 = vmatpush.msra.mxu2 %v15519_v39 }
 0x30d   :  { %v4135_v55 = vadd.f32 %v4134_v44, %v4116_v42  ;;  %v15498_v42 = vunpack.c.l.bf16 %v15910_v22  ;;  %v15514_v44 = vunpack.c.l.bf16 %v15914_v40  ;;  %v17913_v13 = vpop.f32.mrf.mxu2  ;;  %v15922_v40 = vld [vmem:[%s20192_s2 + $0xe0] sm:$0xff]  }
 0x30e   :  { %4443 = vmatpush.msra.mxu2 %v15518_v36  ;;  %v15551_v36 = vunpack.c.h.bf16 %v15923_v21 }
 0x30f   :  { %v17832_v56 = vadd.f32 %v4153_v53, %v4135_v55  ;;  %v15921_v53 = vld [vmem:[%s20192_s2 + $0xd8] sm:$0xff]   ;;  %4468 = vmatpush.msra.mxu3 %v15498_v42 }
 0x310   :  { %4444 = vmatpush.msra.mxu2 %v15515_v47 }
 0x311   :  { %v4173_v50 = vadd.f32 %v17834_v12, %v17832_v56  ;;  %v17923_v12 = vpop.f32.mrf.mxu3 }
 0x312   :  { %4445 = vmatpush.msra.mxu2 %v15514_v44 }
 0x313   :  { %v4192_v56 = vadd.f32 %v17836_v24, %v4173_v50  ;;  %v15925_v24 = vld [vmem:[%s20192_s2 + $0xf8] sm:$0xff]  }
 0x314   :  { %v17838_v38 = vpop.f32.mrf.mxu0  ;;  %v17840_v57 = vpop.f32.mrf.mxu1  ;;  %v15559_v18 = vunpack.c.h.bf16 %v15925_v24  ;;  %v15558_v27 = vunpack.c.l.bf16 %v15925_v24 }
 0x315   :  { %v4138_v55 = vadd.f32 %v17838_v38, %v17828_v43  ;;  %v15539_v38 = vunpack.c.h.bf16 %v15920_v28  ;;  %v4322_v31 = vpop.f32.mrf.mxu2 }
 0x316   :  { %4542 = vmatpush.msrb.mxu3 %v15559_v18 }
 0x317   :  { %v4157_v43 = vadd.f32 %v17840_v57, %v4138_v55 }
 0x318   :  { %4543 = vmatpush.msrb.mxu3 %v15558_v27 }
 0x319   :  { %v4176_v57 = vadd.f32 %v17842_v14, %v4157_v43  ;;  %v15924_v14 = vld [vmem:[%s20192_s2 + $0xf0] sm:$0xff]   ;;  %v4341_v10 = vpop.f32.mrf.mxu3 }
 0x31a   :  { %v15554_v39 = vunpack.c.l.bf16 %v15924_v14 }
 0x31b   :  { %v4195_v61 = vadd.f32 %v17844_v59, %v4176_v57 }
 0x31c   :  { %v4139_v49 = vpop.f32.mrf.mxu0  ;;  %v4158_v58 = vpop.f32.mrf.mxu1 }
 0x31d   :  { %v4140_v0 = vadd.f32 %v4139_v49, %v4121_v23  ;;  %v15543_v23 = vunpack.c.h.bf16 %v15921_v53 }
 0x31f   :  { %v17846_v1 = vadd.f32 %v4158_v58, %v4140_v0  ;;  %4501 = vmatpush.msrb.mxu2 %v15543_v23 }
 0x321   :  { %v4178_v59 = vadd.f32 %v17848_v25, %v17846_v1  ;;  %v4343_v50 = vpop.f32.mrf.mxu3 }
 0x323   :  { %v4197_v47 = vadd.f32 %v17852_v3, %v4178_v59 }
 0x324   :  { %v4208_v52 = vpop.f32.mrf.mxu0  ;;  %v17850_v2 = vpop.f32.mrf.mxu1 }
 0x325   :  { %v4209_v48 = vadd.f32 %v4208_v52, %v4190_v45  ;;  %v15542_v52 = vunpack.c.l.bf16 %v15921_v53 }
 0x327   :  { %v4228_v0 = vadd.f32 %v17850_v2, %v4209_v48  ;;  %4502 = vmatpush.msrb.mxu2 %v15542_v52  ;;  %v15538_v2 = vunpack.c.l.bf16 %v15920_v28  ;;  %v15547_v48 = vunpack.c.h.bf16 %v15922_v40 }
 0x329   :  { %v4247_v54 = vadd.f32 %v17858_v4, %v4228_v0  ;;  %4503 = vmatpush.msrb.mxu2 %v15539_v38 }
 0x32b   :  { %4504 = vmatpush.msrb.mxu2 %v15538_v2  ;;  %v4266_v4 = vadd.f32 %v17860_v60, %v4247_v54  ;;  %v15531_v60 = vunpack.c.h.bf16 %v15918_v11 }
 0x32c   :  { %v17854_v15 = vpop.f32.mrf.mxu0  ;;  %v17856_v51 = vpop.f32.mrf.mxu1 }
 0x32d   :  { %v4211_v16 = vadd.f32 %v17854_v15, %v4192_v56  ;;  %4505 = vmatpush.msrb.mxu2 %v15535_v63 }
 0x32f   :  { %v4230_v15 = vadd.f32 %v17856_v51, %v4211_v16  ;;  %4506 = vmatpush.msrb.mxu2 %v15534_v9  ;;  %v15555_v51 = vunpack.c.h.bf16 %v15924_v14 }
 0x331   :  { %v4249_v33 = vadd.f32 %v17866_v8, %v4230_v15  ;;  %4507 = vmatpush.msrb.mxu2 %v15531_v60  ;;  %4544 = vmatpush.msrb.mxu3 %v15555_v51 }
 0x333   :  { %4508 = vmatpush.msrb.mxu2 %v15530_v37  ;;  %4545 = vmatpush.msrb.mxu3 %v15554_v39 }
 0x334   :  { %v17862_v5 = vpop.f32.mrf.mxu0  ;;  %v17864_v7 = vpop.f32.mrf.mxu1 }
 0x335   :  { %v4214_v20 = vadd.f32 %v17862_v5, %v4195_v61  ;;  %v4268_v5 = vadd.f32 %v17875_v6, %v4249_v33  ;;  %4546 = vmatpush.msrb.mxu3 %v15551_v36  ;;  %v15546_v6 = vunpack.c.l.bf16 %v15922_v40  ;;  %v11966_v33 = vld [vmem:[%s20193_s3 + $0x178] sm:$0xff]  ;;  %v11963_v40 = vld [vmem:[%s20193_s3 + $0x160] sm:$0xff] }
 0x336   :  { %v4604_v37 = vunpack.c.l.bf16 %v11966_v33  ;;  %v4605_v39 = vunpack.c.h.bf16 %v11966_v33  ;;  %v11985_v33 = vld [vmem:[%s20193_s3 + $0x1e0] sm:$0xff] }
 0x337   :  { %v4233_v45 = vadd.f32 %v17864_v7, %v4214_v20  ;;  %4547 = vmatpush.msrb.mxu3 %v15550_v46  ;;  %v11965_v20 = vld [vmem:[%s20193_s3 + $0x170] sm:$0xff]  ;;  %v11956_v46 = vld [vmem:[%s20193_s3 + $0x128] sm:$0xff] }
 0x338   :  { %v4602_v21 = vunpack.c.l.bf16 %v11965_v20  ;;  %v4603_v59 = vunpack.c.h.bf16 %v11965_v20  ;;  %4618 = vmatpush.msrb.mxu0 %v4604_v37  ;;  %4638 = vmatpush.msrb.mxu1 %v4605_v39  ;;  %v4779_v37 = vunpack.c.l.bf16 %v11985_v33  ;;  %v4780_v39 = vunpack.c.h.bf16 %v11985_v33 }
 0x339   :  { %v4252_v42 = vadd.f32 %v17887_v34, %v4233_v45  ;;  %4548 = vmatpush.msrb.mxu3 %v15547_v48  ;;  %v11964_v45 = vld [vmem:[%s20193_s3 + $0x168] sm:$0xff]  ;;  %v11955_v48 = vld [vmem:[%s20193_s3 + $0x120] sm:$0xff] }
 0x33a   :  { %4619 = vmatpush.msrb.mxu0 %v4602_v21  ;;  %4639 = vmatpush.msrb.mxu1 %v4603_v59  ;;  %v11975_v21 = vld [vmem:[%s20193_s3 + $0x1a0] sm:$0xff]  ;;  %v11984_v59 = vld [vmem:[%s20193_s3 + $0x1d8] sm:$0xff] }
 0x33b   :  { %4549 = vmatpush.msrb.mxu3 %v15546_v6  ;;  %v4271_v3 = vadd.f32 %v17897_v41, %v4252_v42  ;;  %v4346_v41 = vpop.f32.mrf.mxu3  ;;  %v11954_v42 = vld [vmem:[%s20193_s3 + $0x118] sm:$0xff]  ;;  %v4573_v6 = vunpack.c.l.bf16 %v11955_v48 }
 0x33c   :  { %v17877_v29 = vpop.f32.mrf.mxu0  ;;  %v17879_v62 = vpop.f32.mrf.mxu1 }
 0x33d   :  { %v4216_v44 = vadd.f32 %v17877_v29, %v4197_v47  ;;  %v4600_v47 = vunpack.c.l.bf16 %v11964_v45 }
 0x33f   :  { %4620 = vmatpush.msrb.mxu0 %v4600_v47 }
 0x343   :  { %v4348_v27 = vpop.f32.mrf.mxu3 }
 0x344   :  { %v4284_v19 = vpop.f32.mrf.mxu0  ;;  %v17895_v35 = vpop.f32.mrf.mxu1 }
 0x345   :  { %v4285_v32 = vadd.f32 %v4284_v19, %v4266_v4 }
 0x347   :  { %v4304_v19 = vadd.f32 %v17895_v35, %v4285_v32  ;;  %v4324_v35 = vpop.f32.mrf.mxu2 }
 0x349   :  { %v4323_v1 = vadd.f32 %v4322_v31, %v4304_v19 }
 0x34b   :  { %v4342_v7 = vadd.f32 %v4341_v10, %v4323_v1  ;;  %v11958_v10 = vld [vmem:[%s20193_s3 + $0x138] sm:$0xff]  ;;  %v4601_v1 = vunpack.c.h.bf16 %v11964_v45  ;;  %v11983_v45 = vld [vmem:[%s20193_s3 + $0x1d0] sm:$0xff] }
 0x34c   :  { %v4286_v49 = vpop.f32.mrf.mxu0  ;;  %v17915_v58 = vpop.f32.mrf.mxu1  ;;  %v4579_v19 = vunpack.c.l.bf16 %v11958_v10  ;;  %v4580_v36 = vunpack.c.h.bf16 %v11958_v10  ;;  %v4775_v47 = vunpack.c.l.bf16 %v11983_v45 }
 0x34d   :  { %v4287_v25 = vadd.f32 %v4286_v49, %v4268_v5  ;;  %v4235_v49 = vadd.f32 %v17879_v62, %v4216_v44  ;;  %v4598_v44 = vunpack.c.l.bf16 %v11963_v40  ;;  %4640 = vmatpush.msrb.mxu1 %v4601_v1  ;;  %v4776_v1 = vunpack.c.h.bf16 %v11983_v45 }
 0x34f   :  { %v4306_v53 = vadd.f32 %v17915_v58, %v4287_v25  ;;  %v4254_v34 = vadd.f32 %v17913_v13, %v4235_v49  ;;  %v4327_v29 = vpop.f32.mrf.mxu2  ;;  %v4575_v25 = vunpack.c.l.bf16 %v11956_v46  ;;  %4621 = vmatpush.msrb.mxu0 %v4598_v44 }
 0x351   :  { %v4325_v52 = vadd.f32 %v4324_v35, %v4306_v53  ;;  %v4273_v2 = vadd.f32 %v17923_v12, %v4254_v34  ;;  %v4576_v35 = vunpack.c.h.bf16 %v11956_v46  ;;  %v4599_v53 = vunpack.c.h.bf16 %v11963_v40  ;;  %v11952_v34 = vld [vmem:[%s20193_s3 + $0x108] sm:$0xff] }
 0x353   :  { %v4344_v38 = vadd.f32 %v4343_v50, %v4325_v52  ;;  %v4571_v50 = vunpack.c.l.bf16 %v11954_v42  ;;  %4641 = vmatpush.msrb.mxu1 %v4599_v53 }
 0x354   :  { %v4289_v30 = vpop.f32.mrf.mxu0  ;;  %v4308_v26 = vpop.f32.mrf.mxu1 }
 0x355   :  { %v4290_v28 = vadd.f32 %v4289_v30, %v4271_v3  ;;  %v11953_v3 = vld [vmem:[%s20193_s3 + $0x110] sm:$0xff] }
 0x356   :  { %v4569_v52 = vunpack.c.l.bf16 %v11953_v3 }
 0x357   :  { %v4309_v54 = vadd.f32 %v4308_v26, %v4290_v28  ;;  %v4329_v4 = vpop.f32.mrf.mxu2  ;;  %v4570_v28 = vunpack.c.h.bf16 %v11953_v3 }
 0x359   :  { %v4328_v24 = vadd.f32 %v4327_v29, %v4309_v54  ;;  %v11960_v29 = vld [vmem:[%s20193_s3 + $0x148] sm:$0xff]  ;;  %v4567_v54 = vunpack.c.l.bf16 %v11952_v34 }
 0x35b   :  { %v4347_v18 = vadd.f32 %v4346_v41, %v4328_v24  ;;  %v4592_v41 = vunpack.c.l.bf16 %v11960_v29  ;;  %v4593_v24 = vunpack.c.h.bf16 %v11960_v29 }
 0x35c   :  { %v4291_v8 = vpop.f32.mrf.mxu0  ;;  %v4310_v22 = vpop.f32.mrf.mxu1 }
 0x35d   :  { %v4292_v62 = vadd.f32 %v4291_v8, %v4273_v2  ;;  %v11957_v8 = vld [vmem:[%s20193_s3 + $0x130] sm:$0xff]  ;;  %v11988_v2 = vld [vmem:[%s20193_s3 + $0x1f8] sm:$0xff] }
 0x35e   :  { %v4578_v5 = vunpack.c.h.bf16 %v11957_v8 }
 0x35f   :  { %v4311_v30 = vadd.f32 %v4310_v22, %v4292_v62  ;;  %v4577_v22 = vunpack.c.l.bf16 %v11957_v8  ;;  %v4777_v8 = vunpack.c.l.bf16 %v11984_v59 }
 0x361   :  { %v4330_v31 = vadd.f32 %v4329_v4, %v4311_v30 }
 0x363   :  { %v4349_v14 = vadd.f32 %v4348_v27, %v4330_v31 }
 0x364   :  { %v4360_v55 = vpop.f32.mrf.mxu0  ;;  %v4379_v23 = vpop.f32.mrf.mxu1 }
 0x365   :  { %v4361_v0 = vadd.f32 %v4360_v55, %v4342_v7  ;;  %v4574_v7 = vunpack.c.h.bf16 %v11955_v48  ;;  %v4572_v55 = vunpack.c.h.bf16 %v11954_v42  ;;  %v11972_v48 = vld [vmem:[%s20193_s3 + $0x188] sm:$0xff] }
 0x367   :  { %v4380_v56 = vadd.f32 %v4379_v23, %v4361_v0  ;;  %v11962_v23 = vld [vmem:[%s20193_s3 + $0x158] sm:$0xff] }
 0x368   :  { %v4596_v49 = vunpack.c.l.bf16 %v11962_v23  ;;  %v4597_v0 = vunpack.c.h.bf16 %v11962_v23 }
 0x369   :  { %v4389_v43 = vmax.f32 %v4380_v56, 0.0  ;;  %v11961_v56 = vld [vmem:[%s20193_s3 + $0x150] sm:$0xff] }
 0x36a   :  { %4622 = vmatpush.msrb.mxu0 %v4596_v49  ;;  %4642 = vmatpush.msrb.mxu1 %v4597_v0  ;;  %v11971_v49 = vld [vmem:[%s20193_s3 + $0x180] sm:$0xff] }
 0x36b   :  { %11932 = vmatmul.msk.f32.vlgmr.msra.gmra.mxu3 %vm1963_vm0, %v4389_v43  ;;  %v4594_v43 = vunpack.c.l.bf16 %v11961_v56  ;;  %v4701_v0 = vunpack.c.l.bf16 %v11971_v49 }
 0x36c   :  { %v4362_v58 = vpop.f32.mrf.mxu0  ;;  %v4381_v16 = vpop.f32.mrf.mxu1  ;;  %4680 = vmatpush.msra.mxu3 %v4580_v36  ;;  %v4710_v36 = vunpack.c.h.bf16 %v11975_v21 }
 0x36d   :  { %v4363_v17 = vadd.f32 %v4362_v58, %v4344_v38  ;;  %v4595_v38 = vunpack.c.h.bf16 %v11961_v56  ;;  %v4568_v58 = vunpack.c.h.bf16 %v11952_v34  ;;  %4623 = vmatpush.msrb.mxu0 %v4594_v43 }
 0x36e   :  { %4681 = vmatpush.msra.mxu3 %v4578_v5  ;;  %v11974_v5 = vld [vmem:[%s20193_s3 + $0x198] sm:$0xff] }
 0x36f   :  { %v4382_v57 = vadd.f32 %v4381_v16, %v4363_v17  ;;  %v11951_v16 = vld [vmem:[%s20193_s3 + $0x100] sm:$0xff]  ;;  %4643 = vmatpush.msrb.mxu1 %v4595_v38  ;;  %4624 = vmatpush.msrb.mxu0 %v4592_v41  ;;  %v4707_v46 = vunpack.c.l.bf16 %v11974_v5  ;;  %v4708_v40 = vunpack.c.h.bf16 %v11974_v5  ;;  %v15937_v5 = vld [vmem:[%s20194_s5 + $0xd8] sm:$0xff]  }
 0x370   :  { %4682 = vmatpush.msra.mxu3 %v4576_v35  ;;  %v11959_v17 = vld [vmem:[%s20193_s3 + $0x140] sm:$0xff]  ;;  %v4565_v62 = vunpack.c.l.bf16 %v11951_v16  ;;  %v11982_v35 = vld [vmem:[%s20193_s3 + $0x1c8] sm:$0xff] }
 0x371   :  { %v4390_v63 = vmax.f32 %v4382_v57, 0.0  ;;  %v4566_v57 = vunpack.c.h.bf16 %v11951_v16  ;;  %v4590_v30 = vunpack.c.l.bf16 %v11959_v17  ;;  %v4591_v4 = vunpack.c.h.bf16 %v11959_v17  ;;  %4644 = vmatpush.msrb.mxu1 %v4593_v24  ;;  %v15941_v16 = vld [vmem:[%s20194_s5 + $0xf8] sm:$0xff]  }
 0x372   :  { %4683 = vmatpush.msra.mxu3 %v4574_v7  ;;  %v4773_v7 = vunpack.c.l.bf16 %v11982_v35  ;;  %v4774_v53 = vunpack.c.h.bf16 %v11982_v35  ;;  %v15023_v17 = vld [vmem:[%s20190_s1 + $0xa78] sm:$0xff]  ;;  %v15928_v35 = vld [vmem:[%s20194_s5 + $0x90] sm:$0xff]  }
 0x373   :  { %11931 = vmatmul.msk.f32.vlgmr.msra.gmra.mxu2 %vm1963_vm0, %v4390_v63  ;;  %v4785_v63 = vunpack.c.l.bf16 %v11988_v2  ;;  %4625 = vmatpush.msrb.mxu0 %v4590_v30 }
 0x374   :  { %v4365_v13 = vpop.f32.mrf.mxu0  ;;  %v4384_v15 = vpop.f32.mrf.mxu1  ;;  %4660 = vmatpush.msra.mxu2 %v4579_v19  ;;  %4684 = vmatpush.msra.mxu3 %v4572_v55  ;;  %v4709_v19 = vunpack.c.l.bf16 %v11975_v21  ;;  %v4704_v55 = vunpack.c.h.bf16 %v11972_v48 }
 0x375   :  { %v4366_v26 = vadd.f32 %v4365_v13, %v4347_v18  ;;  %v4786_v18 = vunpack.c.h.bf16 %v11988_v2  ;;  %v11978_v13 = vld [vmem:[%s20193_s3 + $0x1b8] sm:$0xff]  ;;  %4645 = vmatpush.msrb.mxu1 %v4591_v4  ;;  %v15622_v4 = vunpack.c.l.bf16 %v15941_v16 }
 0x376   :  { %4661 = vmatpush.msra.mxu2 %v4577_v22  ;;  %4685 = vmatpush.msra.mxu3 %v4570_v28  ;;  %v4716_v31 = vunpack.c.h.bf16 %v11978_v13  ;;  %v4778_v22 = vunpack.c.h.bf16 %v11984_v59  ;;  %v15015_v2 = vld [vmem:[%s20190_s1 + $0xa38] sm:$0xff]  ;;  %v15020_v59 = vld [vmem:[%s20190_s1 + $0xa60] sm:$0xff] }
 0x377   :  { %v4385_v9 = vadd.f32 %v4384_v15, %v4366_v26  ;;  %v11987_v15 = vld [vmem:[%s20193_s3 + $0x1f0] sm:$0xff]  ;;  %v4715_v26 = vunpack.c.l.bf16 %v11978_v13 }
 0x378   :  { %4662 = vmatpush.msra.mxu2 %v4575_v25  ;;  %4686 = vmatpush.msra.mxu3 %v4568_v58  ;;  %v4784_v27 = vunpack.c.h.bf16 %v11987_v15  ;;  %v11973_v25 = vld [vmem:[%s20193_s3 + $0x190] sm:$0xff]  ;;  %v15933_v58 = vld [vmem:[%s20194_s5 + $0xb8] sm:$0xff]  }
 0x379   :  { %v4391_v11 = vmax.f32 %v4385_v9, 0.0  ;;  %v4783_v9 = vunpack.c.l.bf16 %v11987_v15  ;;  %4728 = vmatpush.msra.mxu0 %v4715_v26  ;;  %4748 = vmatpush.msra.mxu1 %v4716_v31  ;;  %v4705_v42 = vunpack.c.l.bf16 %v11973_v25  ;;  %v4706_v44 = vunpack.c.h.bf16 %v11973_v25  ;;  %v15022_v13 = vld [vmem:[%s20190_s1 + $0xa70] sm:$0xff] }
 0x37a   :  { %4663 = vmatpush.msra.mxu2 %v4573_v6  ;;  %4687 = vmatpush.msra.mxu3 %v4566_v57  ;;  %v11981_v6 = vld [vmem:[%s20193_s3 + $0x1c0] sm:$0xff]  ;;  %v15591_v24 = vunpack.c.h.bf16 %v15933_v58  ;;  %v15590_v30 = vunpack.c.l.bf16 %v15933_v58  ;;  %v15940_v15 = vld [vmem:[%s20194_s5 + $0xf0] sm:$0xff]  }
 0x37b   :  { %11941 = vmatmul.msk.f32.vlgmr.msrb.gmra.mxu2 %vm1963_vm0, %v4391_v11  ;;  %v11977_v11 = vld [vmem:[%s20193_s3 + $0x1b0] sm:$0xff]  ;;  %v4771_v23 = vunpack.c.l.bf16 %v11981_v6  ;;  %v4772_v3 = vunpack.c.h.bf16 %v11981_v6  ;;  %v15619_v31 = vunpack.c.h.bf16 %v15940_v15 }
 0x37c   :  { %v4367_v12 = vpop.f32.mrf.mxu0  ;;  %v4386_v32 = vpop.f32.mrf.mxu1  ;;  %4664 = vmatpush.msra.mxu2 %v4571_v50  ;;  %v4703_v50 = vunpack.c.l.bf16 %v11972_v48  ;;  %v15010_v25 = vld [vmem:[%s20190_s1 + $0xa10] sm:$0xff] }
 0x37d   :  { %v4368_v61 = vadd.f32 %v4367_v12, %v4349_v14  ;;  %v11986_v14 = vld [vmem:[%s20193_s3 + $0x1e8] sm:$0xff]  ;;  %v4713_v12 = vunpack.c.l.bf16 %v11977_v11  ;;  %v15936_v48 = vld [vmem:[%s20194_s5 + $0xd0] sm:$0xff]  }
 0x37e   :  { %4665 = vmatpush.msra.mxu2 %v4569_v52  ;;  %v4702_v52 = vunpack.c.h.bf16 %v11971_v49  ;;  %v15018_v6 = vld [vmem:[%s20190_s1 + $0xa50] sm:$0xff]  ;;  %v15602_v49 = vunpack.c.l.bf16 %v15936_v48 }
 0x37f   :  { %v4387_v60 = vadd.f32 %v4386_v32, %v4368_v61  ;;  %v4714_v61 = vunpack.c.h.bf16 %v11977_v11  ;;  %v4781_v32 = vunpack.c.l.bf16 %v11986_v14  ;;  %4729 = vmatpush.msra.mxu0 %v4713_v12  ;;  %v15931_v11 = vld [vmem:[%s20194_s5 + $0xa8] sm:$0xff]   ;;  %v14978_v58 = vld [vmem:[%s20191_s0 + $0x2cc] sm:$0xf0] }
 0x380   :  { %4666 = vmatpush.msra.mxu2 %v4567_v54 }
 0x381   :  { %v4392_v51 = vmax.f32 %v4387_v60, 0.0  ;;  %v4782_v60 = vunpack.c.h.bf16 %v11986_v14  ;;  %4749 = vmatpush.msra.mxu1 %v4714_v61  ;;  %v15939_v14 = vld [vmem:[%s20194_s5 + $0xe8] sm:$0xff]   ;;  %v15618_v61 = vunpack.c.l.bf16 %v15940_v15  ;;  %v15039_v15 = vld [vmem:[%s20190_s1 + $0xaf8] sm:$0xff] }
 0x382   :  { %4667 = vmatpush.msra.mxu2 %v4565_v62  ;;  %v15623_v62 = vunpack.c.h.bf16 %v15941_v16  ;;  %v15615_v33 = vunpack.c.h.bf16 %v15939_v14  ;;  %v15614_v21 = vunpack.c.l.bf16 %v15939_v14  ;;  %v15016_v16 = vld [vmem:[%s20190_s1 + $0xa40] sm:$0xff]  ;;  %v15029_v14 = vld [vmem:[%s20190_s1 + $0xaa8] sm:$0xff] }
 0x383   :  { %11950 = vmatmul.msk.f32.vlgmr.msrb.gmra.mxu3 %vm1963_vm0, %v4392_v51  ;;  %v11976_v51 = vld [vmem:[%s20193_s3 + $0x1a8] sm:$0xff] }
 0x384   :  { %4798 = vmatpush.msrb.mxu2 %v4785_v63  ;;  %4818 = vmatpush.msrb.mxu3 %v4786_v18  ;;  %v4711_v20 = vunpack.c.l.bf16 %v11976_v51  ;;  %v4712_v10 = vunpack.c.h.bf16 %v11976_v51  ;;  %v15932_v63 = vld [vmem:[%s20194_s5 + $0xb0] sm:$0xff]   ;;  %v15583_v51 = vunpack.c.h.bf16 %v15931_v11 }
 0x385   :  { %v15014_v18 = vld [vmem:[%s20190_s1 + $0xa30] sm:$0xff]  ;;  %v15587_v26 = vunpack.c.h.bf16 %v15932_v63  ;;  %v15586_v12 = vunpack.c.l.bf16 %v15932_v63  ;;  %v15055_v63 = vld [vmem:[%s20190_s1 + $0xb78] sm:$0xff] }
 0x386   :  { %4799 = vmatpush.msrb.mxu2 %v4783_v9  ;;  %4819 = vmatpush.msrb.mxu3 %v4784_v27  ;;  %v15013_v9 = vld [vmem:[%s20190_s1 + $0xa28] sm:$0xff] }
 0x387   :  { %4730 = vmatpush.msra.mxu0 %v4711_v20  ;;  %4750 = vmatpush.msra.mxu1 %v4712_v10  ;;  %v15012_v20 = vld [vmem:[%s20190_s1 + $0xa20] sm:$0xff] }
 0x388   :  { %4800 = vmatpush.msrb.mxu2 %v4781_v32  ;;  %4820 = vmatpush.msrb.mxu3 %v4782_v60  ;;  %v15021_v60 = vld [vmem:[%s20190_s1 + $0xa68] sm:$0xff]  ;;  %v15930_v10 = vld [vmem:[%s20194_s5 + $0xa0] sm:$0xff]  }
 0x389   :  { %4731 = vmatpush.msra.mxu0 %v4709_v19  ;;  %4751 = vmatpush.msra.mxu1 %v4710_v36  ;;  %v15579_v19 = vunpack.c.h.bf16 %v15930_v10  ;;  %v15578_v45 = vunpack.c.l.bf16 %v15930_v10  ;;  %v14998_v10 = vld [vmem:[%s20191_s0 + $0x36c] sm:$0xf0] }
 0x38a   :  { %4801 = vmatpush.msrb.mxu2 %v4779_v37  ;;  %4821 = vmatpush.msrb.mxu3 %v4780_v39  ;;  %v15938_v37 = vld [vmem:[%s20194_s5 + $0xe0] sm:$0xff]   ;;  %v15582_v39 = vunpack.c.l.bf16 %v15931_v11  ;;  %v15045_v11 = vld [vmem:[%s20190_s1 + $0xb28] sm:$0xff] }
 0x38b   :  { %4732 = vmatpush.msra.mxu0 %v4707_v46  ;;  %4752 = vmatpush.msra.mxu1 %v4708_v40  ;;  %v15611_v36 = vunpack.c.h.bf16 %v15938_v37  ;;  %v15610_v46 = vunpack.c.l.bf16 %v15938_v37  ;;  %v15019_v40 = vld [vmem:[%s20190_s1 + $0xa58] sm:$0xff] }
 0x38c   :  { %4802 = vmatpush.msrb.mxu2 %v4777_v8  ;;  %4822 = vmatpush.msrb.mxu3 %v4778_v22  ;;  %v15011_v8 = vld [vmem:[%s20190_s1 + $0xa18] sm:$0xff] }
 0x38d   :  { %4733 = vmatpush.msra.mxu0 %v4705_v42  ;;  %4753 = vmatpush.msra.mxu1 %v4706_v44  ;;  %v15929_v22 = vld [vmem:[%s20194_s5 + $0x98] sm:$0xff]   ;;  %v15606_v44 = vunpack.c.l.bf16 %v15937_v5 }
 0x38e   :  { %4803 = vmatpush.msrb.mxu2 %v4775_v47  ;;  %4823 = vmatpush.msrb.mxu3 %v4776_v1  ;;  %v15575_v47 = vunpack.c.h.bf16 %v15929_v22  ;;  %v15607_v1 = vunpack.c.h.bf16 %v15937_v5  ;;  %v15574_v42 = vunpack.c.l.bf16 %v15929_v22  ;;  %v15051_v22 = vld [vmem:[%s20190_s1 + $0xb58] sm:$0xff]  ;;  %v15042_v5 = vld [vmem:[%s20190_s1 + $0xb10] sm:$0xff] }
 0x38f   :  { %4734 = vmatpush.msra.mxu0 %v4703_v50  ;;  %4754 = vmatpush.msra.mxu1 %v4704_v55  ;;  %v15009_v50 = vld [vmem:[%s20190_s1 + $0xa08] sm:$0xff] }
 0x390   :  { %4804 = vmatpush.msrb.mxu2 %v4773_v7  ;;  %4824 = vmatpush.msrb.mxu3 %v4774_v53  ;;  %v15571_v7 = vunpack.c.h.bf16 %v15928_v35  ;;  %v15603_v53 = vunpack.c.h.bf16 %v15936_v48  ;;  %v15927_v55 = vld [vmem:[%s20194_s5 + $0x88] sm:$0xff]   ;;  %v15040_v48 = vld [vmem:[%s20190_s1 + $0xb00] sm:$0xff] }
 0x391   :  { %4735 = vmatpush.msra.mxu0 %v4701_v0  ;;  %4755 = vmatpush.msra.mxu1 %v4702_v52  ;;  %v15017_v0 = vld [vmem:[%s20190_s1 + $0xa48] sm:$0xff]  ;;  %v15567_v52 = vunpack.c.h.bf16 %v15927_v55 }
 0x392   :  { %4805 = vmatpush.msrb.mxu2 %v4771_v23  ;;  %4825 = vmatpush.msrb.mxu3 %v4772_v3  ;;  %v15935_v23 = vld [vmem:[%s20194_s5 + $0xc8] sm:$0xff]   ;;  %v15570_v3 = vunpack.c.l.bf16 %v15928_v35 }
 0x393   :  { %v15049_v35 = vld [vmem:[%s20190_s1 + $0xb48] sm:$0xff] }
 0x3ee   :  { %v4470_v56 = vpop.f32.mrf.mxu3 }
 0x3f6   :  { %v4447_v28 = vpop.f32.mrf.mxu2 }
 0x3f7   :  { %v4471_v29 = vadd.f32 %v4470_v56, %v4447_v28  ;;  %v15599_v28 = vunpack.c.h.bf16 %v15935_v23  ;;  %v15008_v56 = vld [vmem:[%s20190_s1 + $0xa00] sm:$0xff] }
 0x3fe   :  { %v4510_v34 = vpop.f32.mrf.mxu2 }
 0x3ff   :  { %v4513_v43 = vadd.f32 %v4510_v34, %v4471_v29  ;;  %v15926_v34 = vld [vmem:[%s20194_s5 + $0x80] sm:$0xff]  }
 0x400   :  { %v15934_v29 = vld [vmem:[%s20194_s5 + $0xc0] sm:$0xff]  }
 0x406   :  { %v4551_v38 = vpop.f32.mrf.mxu3 }
 0x407   :  { %v4554_v54 = vadd.f32 %v4551_v38, %v4513_v43  ;;  %v15566_v43 = vunpack.c.l.bf16 %v15927_v55  ;;  %v15598_v38 = vunpack.c.l.bf16 %v15935_v23  ;;  %v14970_v23 = vld [vmem:[%s20191_s0 + $0x294] sm:$0xf] }
 0x409   :  { %v4555_v41 = vmax.f32 %v4554_v54, 0.0  ;;  %v12388_v54 = vld [vmem:[%s20191_s0 + $0x280] sm:$0xf] }
 0x40b   :  { %v4607_v57 = vrot.slane %v4555_v41, 2  ;;  %11969 = vmatmul.msk.f32.vlgmr.msra.gmra.mxu2 %vm1963_vm0, %v4555_v41  ;;  %11970 = vmatmul.msk.f32.vlgmr.msra.gmra.mxu3 %vm1963_vm0, %v4555_v41  ;;  %v4787_v27 = vrot.slane %v4555_v41, 6  ;;  %v4717_v32 = vrot.slane %v4555_v41, 4  ;;  %v15595_v41 = vunpack.c.h.bf16 %v15934_v29 }
 0x40c   :  { %6477 = vmatpush.bf16.msra.mxu2 %v15015_v2  ;;  %6496 = vmatpush.bf16.msra.mxu3 %v15023_v17  ;;  %v15047_v2 = vld [vmem:[%s20190_s1 + $0xb38] sm:$0xff]  ;;  %v15563_v17 = vunpack.c.h.bf16 %v15926_v34 }
 0x40d   :  { %11967 = vmatmul.msk.f32.vlgmr.msrb.gmra.mxu0 %vm1963_vm0, %v4607_v57  ;;  %11968 = vmatmul.msk.f32.vlgmr.msrb.gmra.mxu1 %vm1963_vm0, %v4607_v57  ;;  %v12389_v57 = vor.u32 %v14978_v58, %v12388_v54 }
 0x40e   :  { %4913 = vmatpush.msrb.mxu0 %v15591_v24  ;;  %4933 = vmatpush.msrb.mxu1 %v15623_v62  ;;  %v14968_v24 = vld [vmem:[%s20191_s0 + $0x284] sm:$0xf]  ;;  %v12390_v62 = vld [vmem:[%s20191_s0 + $0x2d0] sm:$0xf0] }
 0x410   :  { %6478 = vmatpush.bf16.msra.mxu2 %v15014_v18  ;;  %4914 = vmatpush.msrb.mxu0 %v15590_v30  ;;  %v15562_v18 = vunpack.c.l.bf16 %v15926_v34  ;;  %v15594_v30 = vunpack.c.l.bf16 %v15934_v29 }
 0x411   :  { %4934 = vmatpush.msrb.mxu1 %v15622_v4  ;;  %6497 = vmatpush.bf16.msra.mxu3 %v15022_v13  ;;  %v12393_v4 = vor.u32 %v14968_v24, %v12390_v62  ;;  %v15031_v13 = vld [vmem:[%s20190_s1 + $0xab8] sm:$0xff]  ;;  %v11991_v24 = vld [vmem:[%s20195_s4 + $0x2] sm:$0x3] }
 0x412   :  { %4915 = vmatpush.msrb.mxu0 %v15587_v26  ;;  %v15046_v26 = vld [vmem:[%s20190_s1 + $0xb30] sm:$0xff] }
 0x413   :  { %11989 = vmatmul.msk.f32.vlgmr.msrb.gmra.mxu2 %vm1963_vm0, %v4787_v27  ;;  %11990 = vmatmul.msk.f32.vlgmr.msrb.gmra.mxu3 %vm1963_vm0, %v4787_v27  ;;  %v15054_v27 = vld [vmem:[%s20190_s1 + $0xb70] sm:$0xff] }
 0x414   :  { %4935 = vmatpush.msrb.mxu1 %v15619_v31  ;;  %6479 = vmatpush.bf16.msra.mxu2 %v15013_v9  ;;  %v15030_v31 = vld [vmem:[%s20190_s1 + $0xab0] sm:$0xff] }
 0x415   :  { %11979 = vmatmul.msk.f32.vlgmr.msra.gmra.mxu0 %vm1963_vm0, %v4717_v32  ;;  %11980 = vmatmul.msk.f32.vlgmr.msra.gmra.mxu1 %vm1963_vm0, %v4717_v32  ;;  %v15038_v9 = vld [vmem:[%s20190_s1 + $0xaf0] sm:$0xff]  ;;  %v15044_v32 = vld [vmem:[%s20190_s1 + $0xb20] sm:$0xff] }
 0x416   :  { %4916 = vmatpush.msrb.mxu0 %v15586_v12  ;;  %4936 = vmatpush.msrb.mxu1 %v15618_v61  ;;  %v15037_v12 = vld [vmem:[%s20190_s1 + $0xae8] sm:$0xff] }
 0x417   :  { %6498 = vmatpush.bf16.msra.mxu3 %v15021_v60  ;;  %v15053_v61 = vld [vmem:[%s20190_s1 + $0xb68] sm:$0xff]  ;;  %v15028_v60 = vld [vmem:[%s20190_s1 + $0xaa0] sm:$0xff] }
 0x418   :  { %4917 = vmatpush.msrb.mxu0 %v15583_v51  ;;  %4937 = vmatpush.msrb.mxu1 %v15615_v33  ;;  %v15036_v51 = vld [vmem:[%s20190_s1 + $0xae0] sm:$0xff] }
 0x419   :  { %6480 = vmatpush.bf16.msra.mxu2 %v15012_v20  ;;  %v15052_v33 = vld [vmem:[%s20190_s1 + $0xb60] sm:$0xff] }
 0x41a   :  { %4918 = vmatpush.msrb.mxu0 %v15582_v39  ;;  %4938 = vmatpush.msrb.mxu1 %v15614_v21  ;;  %v12468_v20 = vld [vmem:[%s20191_s0 + $0x320] sm:$0xf]  ;;  %v15043_v39 = vld [vmem:[%s20190_s1 + $0xb18] sm:$0xff]  ;;  %v14988_v21 = vld [vmem:[%s20191_s0 + $0x324] sm:$0xf] }
 0x41b   :  { %6499 = vmatpush.bf16.msra.mxu3 %v15020_v59  ;;  %v12469_v37 = vor.u32 %v14998_v10, %v12468_v20  ;;  %v12470_v59 = vld [vmem:[%s20191_s0 + $0x370] sm:$0xf0] }
 0x41c   :  { %4919 = vmatpush.msrb.mxu0 %v15579_v19  ;;  %4939 = vmatpush.msrb.mxu1 %v15611_v36  ;;  %v12473_v19 = vor.u32 %v14988_v21, %v12470_v59  ;;  %v15027_v36 = vld [vmem:[%s20190_s1 + $0xa98] sm:$0xff] }
 0x41d   :  { %6481 = vmatpush.bf16.msra.mxu2 %v15011_v8  ;;  %v15035_v8 = vld [vmem:[%s20190_s1 + $0xad8] sm:$0xff] }
 0x41e   :  { %4920 = vmatpush.msrb.mxu0 %v15578_v45  ;;  %4940 = vmatpush.msrb.mxu1 %v15610_v46  ;;  %v15026_v45 = vld [vmem:[%s20190_s1 + $0xa90] sm:$0xff] }
 0x41f   :  { %6500 = vmatpush.bf16.msra.mxu3 %v15019_v40  ;;  %v15034_v46 = vld [vmem:[%s20190_s1 + $0xad0] sm:$0xff] }
 0x420   :  { %4921 = vmatpush.msrb.mxu0 %v15575_v47  ;;  %4941 = vmatpush.msrb.mxu1 %v15607_v1  ;;  %v15050_v40 = vld [vmem:[%s20190_s1 + $0xb50] sm:$0xff]  ;;  %v15041_v47 = vld [vmem:[%s20190_s1 + $0xb08] sm:$0xff] }
 0x421   :  { %6482 = vmatpush.bf16.msra.mxu2 %v15010_v25  ;;  %v15025_v1 = vld [vmem:[%s20190_s1 + $0xa88] sm:$0xff] }
 0x422   :  { %4922 = vmatpush.msrb.mxu0 %v15574_v42  ;;  %4942 = vmatpush.msrb.mxu1 %v15606_v44  ;;  %v15033_v25 = vld [vmem:[%s20190_s1 + $0xac8] sm:$0xff]  ;;  %v15024_v42 = vld [vmem:[%s20190_s1 + $0xa80] sm:$0xff] }
 0x423   :  { %6501 = vmatpush.bf16.msra.mxu3 %v15018_v6  ;;  %v15032_v44 = vld [vmem:[%s20190_s1 + $0xac0] sm:$0xff]  ;;  %v12404_v6 = vld [vmem:[%s20191_s0 + $0x290] sm:$0xf] }
 0x424   :  { %4923 = vmatpush.msrb.mxu0 %v15571_v7  ;;  %4943 = vmatpush.msrb.mxu1 %v15603_v53  ;;  %v14980_v7 = vld [vmem:[%s20191_s0 + $0x2dc] sm:$0xf0] }
 0x425   :  { %6483 = vmatpush.bf16.msra.mxu2 %v15009_v50  ;;  %v15048_v53 = vld [vmem:[%s20190_s1 + $0xb40] sm:$0xff]  ;;  %v15079_v50 = vld [vmem:[%s20190_s1 + $0xc38] sm:$0xff]  ;;  %v12405_v55 = vor.u32 %v14980_v7, %v12404_v6  ;;  %v15069_v6 = vld [vmem:[%s20190_s1 + $0xbe8] sm:$0xff] }
 0x426   :  { %4924 = vmatpush.msrb.mxu0 %v15570_v3  ;;  %4944 = vmatpush.msrb.mxu1 %v15602_v49  ;;  %v12406_v3 = vld [vmem:[%s20191_s0 + $0x2e0] sm:$0xf0] }
 0x427   :  { %6502 = vmatpush.bf16.msra.mxu3 %v15017_v0  ;;  %v12409_v49 = vor.u32 %v14970_v23, %v12406_v3  ;;  %v15087_v0 = vld [vmem:[%s20190_s1 + $0xc78] sm:$0xff]  ;;  %v15060_v3 = vld [vmem:[%s20190_s1 + $0xba0] sm:$0xff] }
 0x428   :  { %4925 = vmatpush.msrb.mxu0 %v15567_v52  ;;  %4945 = vmatpush.msrb.mxu1 %v15599_v28  ;;  %v15078_v52 = vld [vmem:[%s20190_s1 + $0xc30] sm:$0xff]  ;;  %v15119_v23 = vld [vmem:[%s20190_s1 + $0xd78] sm:$0xff] }
 0x429   :  { %6484 = vmatpush.bf16.msra.mxu2 %v15008_v56  ;;  %v15086_v28 = vld [vmem:[%s20190_s1 + $0xc70] sm:$0xff]  ;;  %v15077_v56 = vld [vmem:[%s20190_s1 + $0xc28] sm:$0xff] }
 0x42a   :  { %4926 = vmatpush.msrb.mxu0 %v15566_v43  ;;  %4946 = vmatpush.msrb.mxu1 %v15598_v38  ;;  %v15085_v43 = vld [vmem:[%s20190_s1 + $0xc68] sm:$0xff]  ;;  %v15076_v38 = vld [vmem:[%s20190_s1 + $0xc20] sm:$0xff] }
 0x42b   :  { %6503 = vmatpush.bf16.msra.mxu3 %v15016_v16  ;;  %v12484_v16 = vld [vmem:[%s20191_s0 + $0x330] sm:$0xf] }
 0x42c   :  { %4927 = vmatpush.msrb.mxu0 %v15563_v17  ;;  %4947 = vmatpush.msrb.mxu1 %v15595_v41  ;;  %v15084_v17 = vld [vmem:[%s20190_s1 + $0xc60] sm:$0xff]  ;;  %v15075_v41 = vld [vmem:[%s20190_s1 + $0xc18] sm:$0xff] }
 0x42d   :  { %6553 = vmatpush.bf16.msrb.mxu2 %v15047_v2  ;;  %v15000_v2 = vld [vmem:[%s20191_s0 + $0x37c] sm:$0xf0] }
 0x42e   :  { %6485 = vmatmul.bf16.vlgmr.msra.gmra.mxu2 %v12389_v57  ;;  %4928 = vmatpush.msrb.mxu0 %v15562_v18  ;;  %v12485_v62 = vor.u32 %v15000_v2, %v12484_v16  ;;  %v12478_v16 = vld [vmem:[%s20191_s0 + $0x378] sm:$0xf0]  ;;  %v15058_v2 = vld [vmem:[%s20190_s1 + $0xb90] sm:$0xff] }
 0x42f   :  { %6572 = vmatpush.bf16.msrb.mxu3 %v15055_v63  ;;  %4948 = vmatpush.msrb.mxu1 %v15594_v30 }
 0x430   :  { %6504 = vmatmul.bf16.vlgmr.msra.gmra.mxu3 %v12393_v4  ;;  %6515 = vmatpush.bf16.msra.mxu0 %v15031_v13  ;;  %v14990_v4 = vld [vmem:[%s20191_s0 + $0x334] sm:$0xf]  ;;  %v4835_v13 = vperm.slane %v11991_v24, 0 }
 0x431   :  { %6534 = vmatpush.bf16.msra.mxu1 %v15039_v15  ;;  %6554 = vmatpush.bf16.msrb.mxu2 %v15046_v26  ;;  %v12486_v15 = vld [vmem:[%s20191_s0 + $0x380] sm:$0xf0] }
 0x433   :  { %6573 = vmatpush.bf16.msrb.mxu3 %v15054_v27  ;;  %v12489_v27 = vor.u32 %v14990_v4, %v12486_v15  ;;  %v15065_v4 = vld [vmem:[%s20190_s1 + $0xbc8] sm:$0xff]  ;;  %v14992_v15 = vld [vmem:[%s20191_s0 + $0x344] sm:$0xf] }
 0x434   :  { %6516 = vmatpush.bf16.msra.mxu0 %v15030_v31 }
 0x435   :  { %6535 = vmatpush.bf16.msra.mxu1 %v15038_v9  ;;  %6555 = vmatpush.bf16.msrb.mxu2 %v15045_v11  ;;  %v4836_v9 = vperm.slane %v11991_v24, 1  ;;  %v15083_v11 = vld [vmem:[%s20190_s1 + $0xc58] sm:$0xff]  ;;  %v12500_v24 = vld [vmem:[%s20191_s0 + $0x340] sm:$0xf] }
 0x437   :  { %6574 = vmatpush.bf16.msrb.mxu3 %v15053_v61  ;;  %v15074_v61 = vld [vmem:[%s20190_s1 + $0xc10] sm:$0xff] }
 0x438   :  { %6517 = vmatpush.bf16.msra.mxu0 %v15029_v14 }
 0x439   :  { %6536 = vmatpush.bf16.msra.mxu1 %v15037_v12  ;;  %6556 = vmatpush.bf16.msrb.mxu2 %v15044_v32 }
 0x43b   :  { %6575 = vmatpush.bf16.msrb.mxu3 %v15052_v33  ;;  %v15073_v33 = vld [vmem:[%s20190_s1 + $0xc08] sm:$0xff] }
 0x43c   :  { %6518 = vmatpush.bf16.msra.mxu0 %v15028_v60 }
 0x43d   :  { %6537 = vmatpush.bf16.msra.mxu1 %v15036_v51  ;;  %6557 = vmatpush.bf16.msrb.mxu2 %v15043_v39  ;;  %v15082_v51 = vld [vmem:[%s20190_s1 + $0xc50] sm:$0xff]  ;;  %v15071_v39 = vld [vmem:[%s20190_s1 + $0xbf8] sm:$0xff] }
 0x43e   :  { %6490 = vmatmul.bf16.gmra.mxu2 %v12469_v37  ;;  %v15063_v37 = vld [vmem:[%s20190_s1 + $0xbb8] sm:$0xff] }
 0x43f   :  { %6576 = vmatpush.bf16.msrb.mxu3 %v15051_v22  ;;  %v14979_v22 = vld [vmem:[%s20191_s0 + $0x2d4] sm:$0xf0] }
 0x440   :  { %6509 = vmatmul.bf16.gmra.mxu3 %v12473_v19  ;;  %6519 = vmatpush.bf16.msra.mxu0 %v15027_v36  ;;  %v12396_v19 = vld [vmem:[%s20191_s0 + $0x288] sm:$0xf] }
 0x441   :  { %6538 = vmatpush.bf16.msra.mxu1 %v15035_v8  ;;  %6558 = vmatpush.bf16.msrb.mxu2 %v15042_v5  ;;  %v15081_v36 = vld [vmem:[%s20190_s1 + $0xc48] sm:$0xff]  ;;  %v15072_v8 = vld [vmem:[%s20190_s1 + $0xc00] sm:$0xff] }
 0x442   :  { %v14969_v5 = vld [vmem:[%s20191_s0 + $0x28c] sm:$0xf] }
 0x443   :  { %6577 = vmatpush.bf16.msrb.mxu3 %v15050_v40  ;;  %v15062_v40 = vld [vmem:[%s20190_s1 + $0xbb0] sm:$0xff] }
 0x444   :  { %6520 = vmatpush.bf16.msra.mxu0 %v15026_v45  ;;  %v15111_v45 = vld [vmem:[%s20190_s1 + $0xd38] sm:$0xff] }
 0x445   :  { %6539 = vmatpush.bf16.msra.mxu1 %v15034_v46  ;;  %6559 = vmatpush.bf16.msrb.mxu2 %v15041_v47  ;;  %v12398_v46 = vld [vmem:[%s20191_s0 + $0x2d8] sm:$0xf0]  ;;  %v15070_v47 = vld [vmem:[%s20190_s1 + $0xbf0] sm:$0xff] }
 0x447   :  { %6578 = vmatpush.bf16.msrb.mxu3 %v15049_v35  ;;  %v14982_v35 = vld [vmem:[%s20191_s0 + $0x2ec] sm:$0xf0] }
 0x448   :  { %6521 = vmatpush.bf16.msra.mxu0 %v15025_v1  ;;  %v15080_v1 = vld [vmem:[%s20190_s1 + $0xc40] sm:$0xff] }
 0x449   :  { %6540 = vmatpush.bf16.msra.mxu1 %v15033_v25  ;;  %6560 = vmatpush.bf16.msrb.mxu2 %v15040_v48  ;;  %v12420_v25 = vld [vmem:[%s20191_s0 + $0x2a0] sm:$0xf]  ;;  %v12397_v48 = vor.u32 %v14979_v22, %v12396_v19  ;;  %v12414_v19 = vld [vmem:[%s20191_s0 + $0x2e8] sm:$0xf0] }
 0x44a   :  { %v12421_v7 = vor.u32 %v14982_v35, %v12420_v25  ;;  %v15112_v22 = vld [vmem:[%s20190_s1 + $0xd40] sm:$0xff]  ;;  %v14974_v25 = vld [vmem:[%s20191_s0 + $0x2b4] sm:$0xf] }
 0x44b   :  { %6579 = vmatpush.bf16.msrb.mxu3 %v15048_v53  ;;  %v14972_v53 = vld [vmem:[%s20191_s0 + $0x2a4] sm:$0xf] }
 0x44c   :  { %6522 = vmatpush.bf16.msra.mxu0 %v15024_v42  ;;  %v12401_v42 = vor.u32 %v14969_v5, %v12398_v46  ;;  %v12436_v46 = vld [vmem:[%s20191_s0 + $0x2b0] sm:$0xf] }
 0x44d   :  { %6541 = vmatpush.bf16.msra.mxu1 %v15032_v44  ;;  %6629 = vmatpush.bf16.msra.mxu2 %v15079_v50  ;;  %v15061_v44 = vld [vmem:[%s20190_s1 + $0xba8] sm:$0xff]  ;;  %v12422_v50 = vld [vmem:[%s20191_s0 + $0x2f0] sm:$0xf0] }
 0x44e   :  { %6561 = vmatmul.bf16.vlgmr.msrb.gmra.mxu2 %v12405_v55  ;;  %v12425_v55 = vor.u32 %v14972_v53, %v12422_v50  ;;  %v15099_v53 = vld [vmem:[%s20190_s1 + $0xcd8] sm:$0xff]  ;;  %v15150_v50 = vld [vmem:[%s20190_s1 + $0xe70] sm:$0xff] }
 0x44f   :  { %6648 = vmatpush.bf16.msra.mxu3 %v15087_v0  ;;  %v15110_v0 = vld [vmem:[%s20190_s1 + $0xd30] sm:$0xff] }
 0x450   :  { %6580 = vmatmul.bf16.vlgmr.msrb.gmra.mxu3 %v12409_v49  ;;  %v15068_v49 = vld [vmem:[%s20190_s1 + $0xbe0] sm:$0xff] }
 0x451   :  { %6630 = vmatpush.bf16.msra.mxu2 %v15078_v52  ;;  %v15118_v52 = vld [vmem:[%s20190_s1 + $0xd70] sm:$0xff] }
 0x453   :  { %6649 = vmatpush.bf16.msra.mxu3 %v15086_v28  ;;  %v15109_v28 = vld [vmem:[%s20190_s1 + $0xd28] sm:$0xff] }
 0x455   :  { %6631 = vmatpush.bf16.msra.mxu2 %v15077_v56  ;;  %v15059_v56 = vld [vmem:[%s20190_s1 + $0xb98] sm:$0xff] }
 0x457   :  { %6650 = vmatpush.bf16.msra.mxu3 %v15085_v43  ;;  %v15108_v43 = vld [vmem:[%s20190_s1 + $0xd20] sm:$0xff] }
 0x459   :  { %6632 = vmatpush.bf16.msra.mxu2 %v15076_v38  ;;  %v12476_v38 = vld [vmem:[%s20191_s0 + $0x328] sm:$0xf] }
 0x45b   :  { %6651 = vmatpush.bf16.msra.mxu3 %v15084_v17  ;;  %v15066_v17 = vld [vmem:[%s20190_s1 + $0xbd0] sm:$0xff] }
 0x45d   :  { %6633 = vmatpush.bf16.msra.mxu2 %v15075_v41  ;;  %v15116_v41 = vld [vmem:[%s20190_s1 + $0xd60] sm:$0xff] }
 0x45e   :  { %6566 = vmatmul.bf16.gmra.mxu2 %v12485_v62  ;;  %v15002_v62 = vld [vmem:[%s20191_s0 + $0x38c] sm:$0xf0] }
 0x45f   :  { %6652 = vmatpush.bf16.msra.mxu3 %v15083_v11  ;;  %v15064_v11 = vld [vmem:[%s20190_s1 + $0xbc0] sm:$0xff] }
 0x460   :  { %6585 = vmatmul.bf16.gmra.mxu3 %v12489_v27  ;;  %v15056_v27 = vld [vmem:[%s20190_s1 + $0xb80] sm:$0xff] }
 0x461   :  { %6634 = vmatpush.bf16.msra.mxu2 %v15074_v61  ;;  %v15103_v61 = vld [vmem:[%s20190_s1 + $0xcf8] sm:$0xff] }
 0x463   :  { %6653 = vmatpush.bf16.msra.mxu3 %v15082_v51  ;;  %v15094_v51 = vld [vmem:[%s20190_s1 + $0xcb0] sm:$0xff] }
 0x465   :  { %6635 = vmatpush.bf16.msra.mxu2 %v15073_v33  ;;  %v15102_v33 = vld [vmem:[%s20190_s1 + $0xcf0] sm:$0xff] }
 0x467   :  { %6654 = vmatpush.bf16.msra.mxu3 %v15081_v36  ;;  %v15093_v36 = vld [vmem:[%s20190_s1 + $0xca8] sm:$0xff] }
 0x469   :  { %6636 = vmatpush.bf16.msra.mxu2 %v15072_v8  ;;  %v15101_v8 = vld [vmem:[%s20190_s1 + $0xce8] sm:$0xff] }
 0x46b   :  { %6655 = vmatpush.bf16.msra.mxu3 %v15080_v1  ;;  %v15100_v1 = vld [vmem:[%s20190_s1 + $0xce0] sm:$0xff] }
 0x46d   :  { %6705 = vmatpush.bf16.msrb.mxu2 %v15111_v45 }
 0x46e   :  { %6637 = vmatmul.bf16.vlgmr.msra.gmra.mxu2 %v12421_v7  ;;  %v15091_v7 = vld [vmem:[%s20190_s1 + $0xc98] sm:$0xff] }
 0x46f   :  { %6724 = vmatpush.bf16.msrb.mxu3 %v15119_v23  ;;  %v15090_v23 = vld [vmem:[%s20190_s1 + $0xc90] sm:$0xff] }
 0x470   :  { %6656 = vmatmul.bf16.vlgmr.msra.gmra.mxu3 %v12425_v55  ;;  %v15141_v55 = vld [vmem:[%s20190_s1 + $0xe28] sm:$0xff] }
 0x471   :  { %6706 = vmatpush.bf16.msrb.mxu2 %v15110_v0  ;;  %v15149_v0 = vld [vmem:[%s20190_s1 + $0xe68] sm:$0xff] }
 0x473   :  { %6725 = vmatpush.bf16.msrb.mxu3 %v15118_v52  ;;  %v15140_v52 = vld [vmem:[%s20190_s1 + $0xe20] sm:$0xff] }
 0x475   :  { %6707 = vmatpush.bf16.msrb.mxu2 %v15109_v28  ;;  %v15001_v28 = vld [vmem:[%s20191_s0 + $0x384] sm:$0xf0] }
 0x479   :  { %6708 = vmatpush.bf16.msrb.mxu2 %v15108_v43  ;;  %v15097_v43 = vld [vmem:[%s20190_s1 + $0xcc8] sm:$0xff] }
 0x48a   :  { %v4627_v34 = vpop.f32.mrf.mxu0  ;;  %v4647_v29 = vpop.f32.mrf.mxu1 }
 0x48e   :  { %v4669_v54 = vpop.f32.mrf.mxu2  ;;  %v4689_v58 = vpop.f32.mrf.mxu3 }
 0x48f   :  { %v4670_v18 = vadd.f32 %v4669_v54, %v4627_v34  ;;  %v4690_v30 = vadd.f32 %v4689_v58, %v4647_v29  ;;  %v15067_v34 = vld [vmem:[%s20190_s1 + $0xbd8] sm:$0xff]  ;;  %v15117_v29 = vld [vmem:[%s20190_s1 + $0xd68] sm:$0xff] }
 0x490   :  { %v14999_v54 = vld [vmem:[%s20191_s0 + $0x374] sm:$0xf0]  ;;  %v14989_v58 = vld [vmem:[%s20191_s0 + $0x32c] sm:$0xf]  ;;  %6726 = vmatpush.bf16.msrb.mxu3 %v15117_v29 }
 0x491   :  { %v15089_v29 = vld [vmem:[%s20190_s1 + $0xc88] sm:$0xff] }
 0x492   :  { %v4737_v57 = vpop.f32.mrf.mxu0  ;;  %v4757_v63 = vpop.f32.mrf.mxu1 }
 0x493   :  { %v4760_v26 = vadd.f32 %v4737_v57, %v4670_v18  ;;  %v4761_v31 = vadd.f32 %v4757_v63, %v4690_v30  ;;  %v15107_v57 = vld [vmem:[%s20190_s1 + $0xd18] sm:$0xff]  ;;  %v12477_v63 = vor.u32 %v14999_v54, %v12476_v38  ;;  %v12481_v18 = vor.u32 %v14989_v58, %v12478_v16  ;;  %v15057_v30 = vld [vmem:[%s20190_s1 + $0xb88] sm:$0xff]  ;;  %v15148_v58 = vld [vmem:[%s20190_s1 + $0xe60] sm:$0xff] }
 0x494   :  { %6727 = vmatpush.bf16.msrb.mxu3 %v15116_v41  ;;  %6709 = vmatpush.bf16.msrb.mxu2 %v15107_v57  ;;  %v12516_v16 = vld [vmem:[%s20191_s0 + $0x350] sm:$0xf]  ;;  %v15088_v41 = vld [vmem:[%s20190_s1 + $0xc80] sm:$0xff]  ;;  %v15127_v57 = vld [vmem:[%s20190_s1 + $0xdb8] sm:$0xff] }
 0x496   :  { %v4807_v14 = vpop.f32.mrf.mxu2  ;;  %v4827_v12 = vpop.f32.mrf.mxu3 }
 0x497   :  { %v4830_v32 = vadd.f32 %v4807_v14, %v4760_v26  ;;  %v4831_v60 = vadd.f32 %v4827_v12, %v4761_v31  ;;  %v12502_v26 = vld [vmem:[%s20191_s0 + $0x390] sm:$0xf0]  ;;  %v15095_v12 = vld [vmem:[%s20190_s1 + $0xcb8] sm:$0xff] }
 0x498   :  { %v12505_v31 = vor.u32 %v14992_v15, %v12502_v26  ;;  %v15106_v14 = vld [vmem:[%s20190_s1 + $0xd10] sm:$0xff] }
 0x499   :  { %v4839_v20 = vadd.f32 %v4835_v13, %v4830_v32  ;;  %v4840_v10 = vadd.f32 %v4836_v9, %v4831_v60  ;;  %v12501_v13 = vor.u32 %v15002_v62, %v12500_v24  ;;  %v15115_v9 = vld [vmem:[%s20190_s1 + $0xd58] sm:$0xff]  ;;  %6710 = vmatpush.bf16.msrb.mxu2 %v15106_v14  ;;  %v15114_v32 = vld [vmem:[%s20190_s1 + $0xd50] sm:$0xff]  ;;  %v15105_v60 = vld [vmem:[%s20190_s1 + $0xd08] sm:$0xff] }
 0x49a   :  { %6661 = vmatmul.bf16.gmra.mxu3 %v12505_v31  ;;  %v15096_v24 = vld [vmem:[%s20190_s1 + $0xcc0] sm:$0xff]  ;;  %v14994_v62 = vld [vmem:[%s20191_s0 + $0x354] sm:$0xf]  ;;  %v15133_v14 = vld [vmem:[%s20190_s1 + $0xde8] sm:$0xff] }
 0x49b   :  { %v4841_v21 = vmax.f32 %v4839_v20, 0.0  ;;  %v4842_v59 = vmax.f32 %v4840_v10, 0.0  ;;  %6642 = vmatmul.bf16.gmra.mxu2 %v12501_v13  ;;  %6728 = vmatpush.bf16.msrb.mxu3 %v15115_v9  ;;  %v15113_v20 = vld [vmem:[%s20190_s1 + $0xd48] sm:$0xff]  ;;  %v15104_v10 = vld [vmem:[%s20190_s1 + $0xd00] sm:$0xff]  ;;  %v15147_v13 = vld [vmem:[%s20190_s1 + $0xe58] sm:$0xff] }
 0x49c   :  { %v15138_v15 = vld [vmem:[%s20190_s1 + $0xe10] sm:$0xff] }
 0x49d   :  { %4929 = vmatmul.f32.vlgmr.msrb.gmra.mxu0 %v4841_v21  ;;  %4949 = vmatmul.f32.vlgmr.msrb.gmra.mxu1 %v4842_v59  ;;  %v14981_v21 = vld [vmem:[%s20191_s0 + $0x2e4] sm:$0xf0]  ;;  %v14971_v59 = vld [vmem:[%s20191_s0 + $0x29c] sm:$0xf]  ;;  %v15126_v26 = vld [vmem:[%s20190_s1 + $0xdb0] sm:$0xff] }
 0x49e   :  { %6591 = vmatpush.bf16.msrb.mxu0 %v15063_v37  ;;  %6610 = vmatpush.bf16.msrb.mxu1 %v15071_v39  ;;  %v12412_v37 = vld [vmem:[%s20191_s0 + $0x298] sm:$0xf]  ;;  %v12417_v45 = vor.u32 %v14971_v59, %v12414_v19  ;;  %v15134_v31 = vld [vmem:[%s20190_s1 + $0xdf0] sm:$0xff]  ;;  %v12452_v59 = vld [vmem:[%s20191_s0 + $0x2c0] sm:$0xf] }
 0x49f   :  { %6729 = vmatpush.bf16.msrb.mxu3 %v15114_v32  ;;  %6711 = vmatpush.bf16.msrb.mxu2 %v15105_v60  ;;  %v15143_v39 = vld [vmem:[%s20190_s1 + $0xe38] sm:$0xff]  ;;  %v12413_v5 = vor.u32 %v14981_v21, %v12412_v37  ;;  %v15146_v9 = vld [vmem:[%s20190_s1 + $0xe50] sm:$0xff]  ;;  %v14973_v32 = vld [vmem:[%s20191_s0 + $0x2ac] sm:$0xf] }
 0x4a0   :  { %v12430_v60 = vld [vmem:[%s20191_s0 + $0x2f8] sm:$0xf0]  ;;  %v15144_v21 = vld [vmem:[%s20190_s1 + $0xe40] sm:$0xff]  ;;  %v14986_v19 = vld [vmem:[%s20191_s0 + $0x30c] sm:$0xf0] }
 0x4a2   :  { %6592 = vmatpush.bf16.msrb.mxu0 %v15062_v40  ;;  %6611 = vmatpush.bf16.msrb.mxu1 %v15070_v47  ;;  %v14984_v40 = vld [vmem:[%s20191_s0 + $0x2fc] sm:$0xf0] }
 0x4a3   :  { %6730 = vmatpush.bf16.msrb.mxu3 %v15113_v20  ;;  %6712 = vmatpush.bf16.msrb.mxu2 %v15104_v10  ;;  %v15092_v47 = vld [vmem:[%s20190_s1 + $0xca0] sm:$0xff]  ;;  %v12437_v35 = vor.u32 %v14984_v40, %v12436_v46 }
 0x4a4   :  { %v15124_v20 = vld [vmem:[%s20190_s1 + $0xda0] sm:$0xff] }
 0x4a5   :  { %6523 = vmatmul.bf16.vlgmr.msra.gmra.mxu0 %v12397_v48  ;;  %6542 = vmatmul.bf16.vlgmr.msra.gmra.mxu1 %v12401_v42  ;;  %v12438_v48 = vld [vmem:[%s20191_s0 + $0x300] sm:$0xf0] }
 0x4a6   :  { %6593 = vmatpush.bf16.msrb.mxu0 %v15061_v44  ;;  %6612 = vmatpush.bf16.msrb.mxu1 %v15069_v6  ;;  %v12441_v42 = vor.u32 %v14974_v25, %v12438_v48  ;;  %v15151_v44 = vld [vmem:[%s20190_s1 + $0xe78] sm:$0xff]  ;;  %v15142_v6 = vld [vmem:[%s20190_s1 + $0xe30] sm:$0xff]  ;;  %v15132_v10 = vld [vmem:[%s20190_s1 + $0xde0] sm:$0xff] }
 0x4a7   :  { %6781 = vmatpush.bf16.msra.mxu2 %v15143_v39  ;;  %6731 = vmatpush.bf16.msrb.mxu3 %v15112_v22  ;;  %v12433_v39 = vor.u32 %v14973_v32, %v12430_v60  ;;  %v15131_v22 = vld [vmem:[%s20190_s1 + $0xdd8] sm:$0xff]  ;;  %v15122_v25 = vld [vmem:[%s20190_s1 + $0xd90] sm:$0xff]  ;;  %v15121_v48 = vld [vmem:[%s20190_s1 + $0xd88] sm:$0xff] }
 0x4a8   :  { %v15005_v32 = vld [vmem:[%s20191_s0 + $0x3a4] sm:$0xf0]  ;;  %v14995_v60 = vld [vmem:[%s20191_s0 + $0x35c] sm:$0xf] }
 0x4aa   :  { %6594 = vmatpush.bf16.msrb.mxu0 %v15060_v3  ;;  %6613 = vmatpush.bf16.msrb.mxu1 %v15068_v49  ;;  %v15098_v3 = vld [vmem:[%s20190_s1 + $0xcd0] sm:$0xff]  ;;  %v12492_v49 = vld [vmem:[%s20191_s0 + $0x338] sm:$0xf] }
 0x4ab   :  { %6713 = vmatmul.bf16.vlgmr.msrb.gmra.mxu2 %v12437_v35  ;;  %6732 = vmatmul.bf16.vlgmr.msrb.gmra.mxu3 %v12441_v42  ;;  %v12493_v38 = vor.u32 %v15001_v28, %v12492_v49  ;;  %v15130_v35 = vld [vmem:[%s20190_s1 + $0xdd0] sm:$0xff]  ;;  %v15129_v42 = vld [vmem:[%s20190_s1 + $0xdc8] sm:$0xff]  ;;  %v15167_v28 = vld [vmem:[%s20190_s1 + $0xef8] sm:$0xff] }
 0x4ac   :  { %6800 = vmatpush.bf16.msra.mxu3 %v15151_v44  ;;  %6782 = vmatpush.bf16.msra.mxu2 %v15142_v6  ;;  %v12508_v44 = vld [vmem:[%s20191_s0 + $0x348] sm:$0xf]  ;;  %v15003_v6 = vld [vmem:[%s20191_s0 + $0x394] sm:$0xf0] }
 0x4ad   :  { %v12509_v49 = vor.u32 %v15003_v6, %v12508_v44 }
 0x4ae   :  { %6595 = vmatpush.bf16.msrb.mxu0 %v15059_v56  ;;  %6614 = vmatpush.bf16.msrb.mxu1 %v15067_v34  ;;  %v14991_v56 = vld [vmem:[%s20191_s0 + $0x33c] sm:$0xf]  ;;  %v12494_v34 = vld [vmem:[%s20191_s0 + $0x388] sm:$0xf0] }
 0x4af   :  { %v12497_v54 = vor.u32 %v14991_v56, %v12494_v34  ;;  %v12532_v56 = vld [vmem:[%s20191_s0 + $0x360] sm:$0xf]  ;;  %v15006_v34 = vld [vmem:[%s20191_s0 + $0x3ac] sm:$0xf0] }
 0x4b0   :  { %6801 = vmatpush.bf16.msra.mxu3 %v15150_v50  ;;  %6783 = vmatpush.bf16.msra.mxu2 %v15141_v55 }
 0x4b1   :  { %v6486_v40 = vpop.f32.mrf.mxu2 }
 0x4b2   :  { %6596 = vmatpush.bf16.msrb.mxu0 %v15058_v2  ;;  %6615 = vmatpush.bf16.msrb.mxu1 %v15066_v17  ;;  %v15004_v2 = vld [vmem:[%s20191_s0 + $0x39c] sm:$0xf0]  ;;  %v15139_v17 = vld [vmem:[%s20190_s1 + $0xe18] sm:$0xff] }
 0x4b4   :  { %6802 = vmatpush.bf16.msra.mxu3 %v15149_v0  ;;  %6784 = vmatpush.bf16.msra.mxu2 %v15140_v52  ;;  %v15159_v52 = vld [vmem:[%s20190_s1 + $0xeb8] sm:$0xff] }
 0x4b5   :  { %6528 = vmatmul.bf16.gmra.mxu0 %v12477_v63  ;;  %6547 = vmatmul.bf16.gmra.mxu1 %v12481_v18  ;;  %v15135_v63 = vld [vmem:[%s20190_s1 + $0xdf8] sm:$0xff]  ;;  %v12518_v18 = vld [vmem:[%s20191_s0 + $0x3a0] sm:$0xf0] }
 0x4b6   :  { %6597 = vmatpush.bf16.msrb.mxu0 %v15057_v30  ;;  %6616 = vmatpush.bf16.msrb.mxu1 %v15065_v4  ;;  %v12517_v30 = vor.u32 %v15004_v2, %v12516_v16  ;;  %v12521_v4 = vor.u32 %v14994_v62, %v12518_v18  ;;  %v15166_v16 = vld [vmem:[%s20190_s1 + $0xef0] sm:$0xff]  ;;  %v14975_v18 = vld [vmem:[%s20191_s0 + $0x2bc] sm:$0xf] }
 0x4b8   :  { %6803 = vmatpush.bf16.msra.mxu3 %v15148_v58  ;;  %6785 = vmatpush.bf16.msra.mxu2 %v15139_v17  ;;  %v15158_v58 = vld [vmem:[%s20190_s1 + $0xeb0] sm:$0xff] }
 0x4b9   :  { %v18731_v50 = vpop.f32.mrf.mxu2 }
 0x4ba   :  { %6598 = vmatpush.bf16.msrb.mxu0 %v15056_v27  ;;  %6617 = vmatpush.bf16.msrb.mxu1 %v15064_v11  ;;  %v15137_v27 = vld [vmem:[%s20190_s1 + $0xe08] sm:$0xff] }
 0x4bb   :  { %6718 = vmatmul.bf16.gmra.mxu2 %v12517_v30  ;;  %6737 = vmatmul.bf16.gmra.mxu3 %v12521_v4  ;;  %v15125_v11 = vld [vmem:[%s20190_s1 + $0xda8] sm:$0xff]  ;;  %v15156_v4 = vld [vmem:[%s20190_s1 + $0xea0] sm:$0xff] }
 0x4bc   :  { %6804 = vmatpush.bf16.msra.mxu3 %v15147_v13  ;;  %6786 = vmatpush.bf16.msra.mxu2 %v15138_v15  ;;  %v12446_v30 = vld [vmem:[%s20191_s0 + $0x308] sm:$0xf0]  ;;  %v15164_v13 = vld [vmem:[%s20190_s1 + $0xee0] sm:$0xff] }
 0x4be   :  { %6667 = vmatpush.bf16.msra.mxu0 %v15095_v12  ;;  %6686 = vmatpush.bf16.msra.mxu1 %v15103_v61  ;;  %v12428_v12 = vld [vmem:[%s20191_s0 + $0x2a8] sm:$0xf]  ;;  %v14983_v61 = vld [vmem:[%s20191_s0 + $0x2f4] sm:$0xf0] }
 0x4bf   :  { %v12429_v37 = vor.u32 %v14983_v61, %v12428_v12  ;;  %v15161_v12 = vld [vmem:[%s20190_s1 + $0xec8] sm:$0xff]  ;;  %v12524_v61 = vld [vmem:[%s20191_s0 + $0x358] sm:$0xf] }
 0x4c0   :  { %6805 = vmatpush.bf16.msra.mxu3 %v15146_v9  ;;  %6787 = vmatpush.bf16.msra.mxu2 %v15137_v27  ;;  %v15163_v9 = vld [vmem:[%s20190_s1 + $0xed8] sm:$0xff]  ;;  %v15154_v27 = vld [vmem:[%s20190_s1 + $0xe90] sm:$0xff] }
 0x4c1   :  { %v6491_v2 = vpop.f32.mrf.mxu2 }
 0x4c2   :  { %6668 = vmatpush.bf16.msra.mxu0 %v15094_v51  ;;  %6687 = vmatpush.bf16.msra.mxu1 %v15102_v33  ;;  %v15145_v51 = vld [vmem:[%s20190_s1 + $0xe48] sm:$0xff]  ;;  %v15136_v33 = vld [vmem:[%s20190_s1 + $0xe00] sm:$0xff] }
 0x4c4   :  { %6806 = vmatpush.bf16.msra.mxu3 %v15145_v51  ;;  %6788 = vmatpush.bf16.msra.mxu2 %v15136_v33  ;;  %v12526_v51 = vld [vmem:[%s20191_s0 + $0x3a8] sm:$0xf0]  ;;  %v15152_v33 = vld [vmem:[%s20190_s1 + $0xe80] sm:$0xff] }
 0x4c5   :  { %6599 = vmatmul.bf16.vlgmr.msrb.gmra.mxu0 %v12413_v5  ;;  %6618 = vmatmul.bf16.vlgmr.msrb.gmra.mxu1 %v12417_v45  ;;  %v12454_v5 = vld [vmem:[%s20191_s0 + $0x310] sm:$0xf0]  ;;  %v12453_v45 = vor.u32 %v14986_v19, %v12452_v59  ;;  %v16007_v59 = vld [vmem:[%s20196_s6 + $0x1] ss:$0 sm:$0xff] }
 0x4c6   :  { %6669 = vmatpush.bf16.msra.mxu0 %v15093_v36  ;;  %6688 = vmatpush.bf16.msra.mxu1 %v15101_v8  ;;  %v14976_v36 = vld [vmem:[%s20191_s0 + $0x2c4] sm:$0xf]  ;;  %v15123_v8 = vld [vmem:[%s20190_s1 + $0xd98] sm:$0xff] }
 0x4c7   :  { %v12457_v46 = vor.u32 %v14976_v36, %v12454_v5 }
 0x4c8   :  { %6807 = vmatpush.bf16.msra.mxu3 %v15144_v21 }
 0x4ca   :  { %6670 = vmatpush.bf16.msra.mxu0 %v15092_v47  ;;  %6689 = vmatpush.bf16.msra.mxu1 %v15100_v1  ;;  %v6505_v47 = vpop.f32.mrf.mxu3 }
 0x4cb   :  { %v18705_v1 = vadd.f32 %v6505_v47, %v6486_v40  ;;  %6789 = vmatmul.bf16.vlgmr.msra.gmra.mxu2 %v12453_v45  ;;  %6808 = vmatmul.bf16.vlgmr.msra.gmra.mxu3 %v12457_v46  ;;  %v12460_v45 = vld [vmem:[%s20191_s0 + $0x2c8] sm:$0xf]  ;;  %v14987_v46 = vld [vmem:[%s20191_s0 + $0x314] sm:$0xf0]  ;;  %v14977_v40 = vld [vmem:[%s20191_s0 + $0x2cc] sm:$0xf] }
 0x4cc   :  { %v12462_v47 = vld [vmem:[%s20191_s0 + $0x318] sm:$0xf0] }
 0x4ce   :  { %6671 = vmatpush.bf16.msra.mxu0 %v15091_v7  ;;  %6690 = vmatpush.bf16.msra.mxu1 %v15099_v53  ;;  %v14993_v7 = vld [vmem:[%s20191_s0 + $0x34c] sm:$0xf]  ;;  %v12510_v53 = vld [vmem:[%s20191_s0 + $0x398] sm:$0xf0] }
 0x4cf   :  { %v12513_v0 = vor.u32 %v14993_v7, %v12510_v53 }
 0x4d2   :  { %6672 = vmatpush.bf16.msra.mxu0 %v15090_v23  ;;  %6691 = vmatpush.bf16.msra.mxu1 %v15098_v3  ;;  %v18733_v55 = vpop.f32.mrf.mxu3  ;;  %v15120_v23 = vld [vmem:[%s20190_s1 + $0xd80] sm:$0xff] }
 0x4d3   :  { %v15128_v3 = vld [vmem:[%s20190_s1 + $0xdc0] sm:$0xff] }
 0x4d5   :  { %6604 = vmatmul.bf16.gmra.mxu0 %v12493_v38  ;;  %6623 = vmatmul.bf16.gmra.mxu1 %v12497_v54  ;;  %v12533_v38 = vor.u32 %v15006_v34, %v12532_v56 }
 0x4d6   :  { %6673 = vmatpush.bf16.msra.mxu0 %v15089_v29  ;;  %6692 = vmatpush.bf16.msra.mxu1 %v15097_v43  ;;  %v14996_v29 = vld [vmem:[%s20191_s0 + $0x364] sm:$0xf]  ;;  %v12534_v43 = vld [vmem:[%s20191_s0 + $0x3b0] sm:$0xf0] }
 0x4d7   :  { %v12537_v54 = vor.u32 %v14996_v29, %v12534_v43  ;;  %v12540_v29 = vld [vmem:[%s20191_s0 + $0x368] sm:$0xf]  ;;  %v14997_v43 = vld [vmem:[%s20191_s0 + $0x36c] sm:$0xf] }
 0x4da   :  { %6674 = vmatpush.bf16.msra.mxu0 %v15088_v41  ;;  %6693 = vmatpush.bf16.msra.mxu1 %v15096_v24  ;;  %v6510_v17 = vpop.f32.mrf.mxu3  ;;  %v15157_v41 = vld [vmem:[%s20190_s1 + $0xea8] sm:$0xff] }
 0x4db   :  { %6794 = vmatmul.bf16.gmra.mxu2 %v12533_v38  ;;  %6813 = vmatmul.bf16.gmra.mxu3 %v12537_v54  ;;  %v15165_v24 = vld [vmem:[%s20190_s1 + $0xee8] sm:$0xff]  ;;  %v18771_v62 = vadd.f32 %v6510_v17, %v6491_v2 }
 0x4de   :  { %6743 = vmatpush.bf16.msrb.mxu0 %v15127_v57  ;;  %6762 = vmatpush.bf16.msrb.mxu1 %v15135_v63  ;;  %v12444_v57 = vld [vmem:[%s20191_s0 + $0x2b8] sm:$0xf]  ;;  %v14985_v63 = vld [vmem:[%s20191_s0 + $0x304] sm:$0xf0] }
 0x4df   :  { %v12445_v15 = vor.u32 %v14985_v63, %v12444_v57 }
 0x4e2   :  { %6744 = vmatpush.bf16.msrb.mxu0 %v15126_v26  ;;  %6763 = vmatpush.bf16.msrb.mxu1 %v15134_v31  ;;  %v12449_v26 = vor.u32 %v14975_v18, %v12446_v30  ;;  %v15155_v31 = vld [vmem:[%s20190_s1 + $0xe98] sm:$0xff]  ;;  %v6512_v21 = vpop.f32.mrf.mxu3 }
 0x4e5   :  { %6675 = vmatmul.bf16.vlgmr.msra.gmra.mxu0 %v12429_v37  ;;  %6694 = vmatmul.bf16.vlgmr.msra.gmra.mxu1 %v12433_v39  ;;  %v12529_v37 = vor.u32 %v14995_v60, %v12526_v51  ;;  %v6493_v39 = vpop.f32.mrf.mxu2 }
 0x4e6   :  { %6745 = vmatpush.bf16.msrb.mxu0 %v15125_v11  ;;  %6764 = vmatpush.bf16.msrb.mxu1 %v15133_v14  ;;  %v15162_v11 = vld [vmem:[%s20190_s1 + $0xed0] sm:$0xff]  ;;  %v15153_v14 = vld [vmem:[%s20190_s1 + $0xe88] sm:$0xff]  ;;  %v6513_v57 = vadd.f32 %v6512_v21, %v6493_v39 }
 0x4ea   :  { %6746 = vmatpush.bf16.msrb.mxu0 %v15124_v20  ;;  %6765 = vmatpush.bf16.msrb.mxu1 %v15132_v10  ;;  %v15160_v20 = vld [vmem:[%s20190_s1 + $0xec0] sm:$0xff]  ;;  %v12525_v10 = vor.u32 %v15005_v32, %v12524_v61 }
 0x4ee   :  { %6747 = vmatpush.bf16.msrb.mxu0 %v15123_v8  ;;  %6766 = vmatpush.bf16.msrb.mxu1 %v15131_v22  ;;  %v6562_v22 = vpop.f32.mrf.mxu2 }
 0x4f2   :  { %6748 = vmatpush.bf16.msrb.mxu0 %v15122_v25  ;;  %6767 = vmatpush.bf16.msrb.mxu1 %v15130_v35  ;;  %v6581_v25 = vpop.f32.mrf.mxu3  ;;  %v12461_v35 = vor.u32 %v14987_v46, %v12460_v45 }
 0x4f5   :  { %6680 = vmatmul.bf16.gmra.mxu0 %v12509_v49  ;;  %6699 = vmatmul.bf16.gmra.mxu1 %v12513_v0 }
 0x4f6   :  { %6749 = vmatpush.bf16.msrb.mxu0 %v15121_v48  ;;  %6768 = vmatpush.bf16.msrb.mxu1 %v15129_v42  ;;  %v12465_v48 = vor.u32 %v14977_v40, %v12462_v47  ;;  %v6564_v53 = vpop.f32.mrf.mxu2 }
 0x4fa   :  { %6750 = vmatpush.bf16.msrb.mxu0 %v15120_v23  ;;  %6769 = vmatpush.bf16.msrb.mxu1 %v15128_v3  ;;  %v6508_v3 = vadd.f32 %v18733_v55, %v18731_v50  ;;  %v6583_v0 = vpop.f32.mrf.mxu3  ;;  %v12542_v50 = vld [vmem:[%s20191_s0 + $0x3b8] sm:$0xf0] }
 0x4fb   :  { %v12545_v54 = vor.u32 %v14997_v43, %v12542_v50 }
 0x4fe   :  { %6819 = vmatpush.bf16.msra.mxu0 %v15159_v52  ;;  %6838 = vmatpush.bf16.msra.mxu1 %v15167_v28  ;;  %v6567_v55 = vpop.f32.mrf.mxu2 }
 0x502   :  { %6820 = vmatpush.bf16.msra.mxu0 %v15158_v58  ;;  %6839 = vmatpush.bf16.msra.mxu1 %v15166_v16  ;;  %v6586_v17 = vpop.f32.mrf.mxu3 }
 0x505   :  { %6751 = vmatmul.bf16.vlgmr.msrb.gmra.mxu0 %v12445_v15  ;;  %6770 = vmatmul.bf16.vlgmr.msrb.gmra.mxu1 %v12449_v26 }
 0x506   :  { %6821 = vmatpush.bf16.msra.mxu0 %v15157_v41  ;;  %6840 = vmatpush.bf16.msra.mxu1 %v15165_v24  ;;  %v6569_v18 = vpop.f32.mrf.mxu2 }
 0x50a   :  { %6822 = vmatpush.bf16.msra.mxu0 %v15156_v4  ;;  %6841 = vmatpush.bf16.msra.mxu1 %v15164_v13  ;;  %v6588_v26 = vpop.f32.mrf.mxu3 }
 0x50e   :  { %6823 = vmatpush.bf16.msra.mxu0 %v15155_v31  ;;  %6842 = vmatpush.bf16.msra.mxu1 %v15163_v9 }
 0x512   :  { %6824 = vmatpush.bf16.msra.mxu0 %v15154_v27  ;;  %6843 = vmatpush.bf16.msra.mxu1 %v15162_v11  ;;  %v6638_v27 = vpop.f32.mrf.mxu2 }
 0x515   :  { %6756 = vmatmul.bf16.gmra.mxu0 %v12525_v10  ;;  %6775 = vmatmul.bf16.gmra.mxu1 %v12529_v37 }
 0x516   :  { %6825 = vmatpush.bf16.msra.mxu0 %v15153_v14  ;;  %6844 = vmatpush.bf16.msra.mxu1 %v15161_v12  ;;  %v18865_v14 = vpop.f32.mrf.mxu3 }
 0x51a   :  { %6826 = vmatpush.bf16.msra.mxu0 %v15152_v33  ;;  %6845 = vmatpush.bf16.msra.mxu1 %v15160_v20  ;;  %v4930_v19 = vpop.f32.mrf.mxu0  ;;  %v4950_v36 = vpop.f32.mrf.mxu1 }
 0x51b   :  { %v4931_v8 = vadd.f32 %v16007_v59, %v4930_v19  ;;  %v18869_v51 = vpop.f32.mrf.mxu2 }
 0x51d   :  { %v4951_v5 = vadd.f32 %v4950_v36, %v4931_v8 }
 0x51e   :  { %v18871_v33 = vpop.f32.mrf.mxu3 }
 0x51f   :  { %12025 = vst [vmem:[%s20197_s7 + $0x2] sm:$0x3] %v4951_v5 }
 0x522   :  { %v6524_v42 = vpop.f32.mrf.mxu0  ;;  %v6543_v44 = vpop.f32.mrf.mxu1 }
 0x523   :  { %v6525_v6 = vadd.f32 %v6524_v42, %v18705_v1  ;;  %v15007_v1 = vld [vmem:[%s20191_s0 + $0x3b4] sm:$0xf0]  ;;  %v18877_v39 = vpop.f32.mrf.mxu2 }
 0x524   :  { %v12541_v38 = vor.u32 %v15007_v1, %v12540_v29  ;;  %v15944_v1 = vld [vmem:[%s20192_s2 + $0x110] sm:$0xff]  }
 0x525   :  { %v6544_v7 = vadd.f32 %v6543_v44, %v6525_v6  ;;  %6827 = vmatmul.bf16.vlgmr.msra.gmra.mxu0 %v12461_v35  ;;  %6846 = vmatmul.bf16.vlgmr.msra.gmra.mxu1 %v12465_v48  ;;  %v15635_v50 = vunpack.c.h.bf16 %v15944_v1 }
 0x526   :  { %v18879_v36 = vpop.f32.mrf.mxu3 }
 0x527   :  { %v6563_v23 = vadd.f32 %v6562_v22, %v6544_v7  ;;  %v15949_v7 = vld [vmem:[%s20192_s2 + $0x138] sm:$0xff]  }
 0x528   :  { %v15654_v29 = vunpack.c.l.bf16 %v15949_v7 }
 0x529   :  { %v18848_v49 = vadd.f32 %v6581_v25, %v6563_v23  ;;  %v15945_v23 = vld [vmem:[%s20192_s2 + $0x118] sm:$0xff]  }
 0x52a   :  { %v6526_v52 = vpop.f32.mrf.mxu0  ;;  %v6545_v28 = vpop.f32.mrf.mxu1 }
 0x52b   :  { %v6527_v56 = vadd.f32 %v6526_v52, %v6508_v3  ;;  %v18883_v5 = vpop.f32.mrf.mxu2  ;;  %v15639_v52 = vunpack.c.h.bf16 %v15945_v23 }
 0x52d   :  { %v6546_v34 = vadd.f32 %v6545_v28, %v6527_v56  ;;  %6929 = vmatpush.msrb.mxu3 %v15639_v52 }
 0x52e   :  { %v18887_v40 = vpop.f32.mrf.mxu3 }
 0x52f   :  { %v6565_v11 = vadd.f32 %v6564_v53, %v6546_v34  ;;  %v15655_v53 = vunpack.c.h.bf16 %v15949_v7  ;;  %v15638_v34 = vunpack.c.l.bf16 %v15945_v23  ;;  %v15952_v7 = vld [vmem:[%s20192_s2 + $0x150] sm:$0xff]  }
 0x531   :  { %6906 = vmatpush.msrb.mxu2 %v15655_v53  ;;  %6930 = vmatpush.msrb.mxu3 %v15638_v34 }
 0x532   :  { %v6529_v58 = vpop.f32.mrf.mxu0  ;;  %v6548_v16 = vpop.f32.mrf.mxu1 }
 0x533   :  { %v6530_v2 = vadd.f32 %v6529_v58, %v18771_v62  ;;  %v6584_v62 = vadd.f32 %v6583_v0, %v6565_v11  ;;  %v18893_v35 = vpop.f32.mrf.mxu2  ;;  %6907 = vmatpush.msrb.mxu2 %v15654_v29  ;;  %6931 = vmatpush.msrb.mxu3 %v15635_v50 }
 0x535   :  { %v6549_v41 = vadd.f32 %v6548_v16, %v6530_v2  ;;  %6832 = vmatmul.bf16.gmra.mxu0 %v12541_v38  ;;  %6851 = vmatmul.bf16.gmra.mxu1 %v12545_v54  ;;  %v15634_v54 = vunpack.c.l.bf16 %v15944_v1  ;;  %v15943_v16 = vld [vmem:[%s20192_s2 + $0x108] sm:$0xff]  }
 0x536   :  { %v18895_v48 = vpop.f32.mrf.mxu3 }
 0x537   :  { %v6568_v24 = vadd.f32 %v6567_v55, %v6549_v41  ;;  %6932 = vmatpush.msrb.mxu3 %v15634_v54  ;;  %v15947_v41 = vld [vmem:[%s20192_s2 + $0x128] sm:$0xff]  }
 0x539   :  { %v18863_v63 = vadd.f32 %v6586_v17, %v6568_v24  ;;  %v15631_v17 = vunpack.c.h.bf16 %v15943_v16 }
 0x53a   :  { %v6531_v30 = vpop.f32.mrf.mxu0  ;;  %v6550_v4 = vpop.f32.mrf.mxu1 }
 0x53b   :  { %v6532_v13 = vadd.f32 %v6531_v30, %v6513_v57  ;;  %v18901_v6 = vpop.f32.mrf.mxu2  ;;  %6933 = vmatpush.msrb.mxu3 %v15631_v17 }
 0x53d   :  { %v6551_v15 = vadd.f32 %v6550_v4, %v6532_v13  ;;  %v15630_v4 = vunpack.c.l.bf16 %v15943_v16  ;;  %v15646_v13 = vunpack.c.l.bf16 %v15947_v41 }
 0x53e   :  { %v18910_v0 = vpop.f32.mrf.mxu3 }
 0x53f   :  { %v6570_v37 = vadd.f32 %v6569_v18, %v6551_v15  ;;  %v15647_v18 = vunpack.c.h.bf16 %v15947_v41  ;;  %v15942_v15 = vld [vmem:[%s20192_s2 + $0x100] sm:$0xff]   ;;  %6934 = vmatpush.msrb.mxu3 %v15630_v4  ;;  %v15955_v4 = vld [vmem:[%s20192_s2 + $0x168] sm:$0xff]  }
 0x541   :  { %v6589_v21 = vadd.f32 %v6588_v26, %v6570_v37 }
 0x542   :  { %v6600_v31 = vpop.f32.mrf.mxu0  ;;  %v6619_v9 = vpop.f32.mrf.mxu1 }
 0x543   :  { %v6601_v3 = vadd.f32 %v6600_v31, %v18848_v49  ;;  %v15948_v49 = vld [vmem:[%s20192_s2 + $0x130] sm:$0xff]   ;;  %v18922_v38 = vpop.f32.mrf.mxu2  ;;  %v15627_v31 = vunpack.c.h.bf16 %v15942_v15 }
 0x544   :  { %v15651_v55 = vunpack.c.h.bf16 %v15948_v49  ;;  %v15650_v58 = vunpack.c.l.bf16 %v15948_v49 }
 0x545   :  { %v6620_v43 = vadd.f32 %v6619_v9, %v6601_v3  ;;  %v15946_v9 = vld [vmem:[%s20192_s2 + $0x120] sm:$0xff]   ;;  %6935 = vmatpush.msrb.mxu3 %v15627_v31  ;;  %v15951_v3 = vld [vmem:[%s20192_s2 + $0x148] sm:$0xff]   ;;  %v15678_v31 = vunpack.c.l.bf16 %v15955_v4 }
 0x546   :  { %6908 = vmatpush.msrb.mxu2 %v15651_v55  ;;  %v18932_v30 = vpop.f32.mrf.mxu3  ;;  %v15663_v52 = vunpack.c.h.bf16 %v15951_v3  ;;  %v15662_v50 = vunpack.c.l.bf16 %v15951_v3  ;;  %v15950_v55 = vld [vmem:[%s20192_s2 + $0x140] sm:$0xff]  }
 0x547   :  { %v6639_v2 = vadd.f32 %v6638_v27, %v6620_v43  ;;  %v15643_v27 = vunpack.c.h.bf16 %v15946_v9  ;;  %v15658_v41 = vunpack.c.l.bf16 %v15950_v55 }
 0x548   :  { %6909 = vmatpush.msrb.mxu2 %v15650_v58 }
 0x549   :  { %v6658_v26 = vadd.f32 %v18865_v14, %v6639_v2 }
 0x54a   :  { %v6602_v12 = vpop.f32.mrf.mxu0  ;;  %v6621_v61 = vpop.f32.mrf.mxu1  ;;  %6910 = vmatpush.msrb.mxu2 %v15647_v18 }
 0x54b   :  { %v6603_v32 = vadd.f32 %v6602_v12, %v6584_v62  ;;  %v15626_v62 = vunpack.c.l.bf16 %v15942_v15  ;;  %v15642_v12 = vunpack.c.l.bf16 %v15946_v9  ;;  %v18948_v37 = vpop.f32.mrf.mxu2  ;;  %v15954_v9 = vld [vmem:[%s20192_s2 + $0x160] sm:$0xff]  }
 0x54c   :  { %6911 = vmatpush.msrb.mxu2 %v15646_v13  ;;  %v15679_v13 = vunpack.c.h.bf16 %v15955_v4 }
 0x54d   :  { %v18867_v60 = vadd.f32 %v6621_v61, %v6603_v32  ;;  %v15953_v61 = vld [vmem:[%s20192_s2 + $0x158] sm:$0xff]   ;;  %6936 = vmatpush.msrb.mxu3 %v15626_v62 }
 0x54e   :  { %6912 = vmatpush.msrb.mxu2 %v15643_v27 }
 0x54f   :  { %v6641_v14 = vadd.f32 %v18869_v51, %v18867_v60  ;;  %v18958_v51 = vpop.f32.mrf.mxu3 }
 0x550   :  { %6913 = vmatpush.msrb.mxu2 %v15642_v12 }
 0x551   :  { %v6660_v60 = vadd.f32 %v18871_v33, %v6641_v14  ;;  %v15957_v33 = vld [vmem:[%s20192_s2 + $0x178] sm:$0xff]  }
 0x552   :  { %v18873_v20 = vpop.f32.mrf.mxu0  ;;  %v18875_v10 = vpop.f32.mrf.mxu1  ;;  %v15687_v34 = vunpack.c.h.bf16 %v15957_v33  ;;  %v15686_v49 = vunpack.c.l.bf16 %v15957_v33 }
 0x553   :  { %v6606_v32 = vadd.f32 %v18873_v20, %v18863_v63  ;;  %v15667_v20 = vunpack.c.h.bf16 %v15952_v7  ;;  %v6790_v43 = vpop.f32.mrf.mxu2 }
 0x554   :  { %7010 = vmatpush.msra.mxu3 %v15687_v34 }
 0x555   :  { %v6625_v63 = vadd.f32 %v18875_v10, %v6606_v32 }
 0x556   :  { %7011 = vmatpush.msra.mxu3 %v15686_v49 }
 0x557   :  { %v6644_v10 = vadd.f32 %v18877_v39, %v6625_v63  ;;  %v15956_v39 = vld [vmem:[%s20192_s2 + $0x170] sm:$0xff]   ;;  %v6809_v17 = vpop.f32.mrf.mxu3 }
 0x558   :  { %v15682_v18 = vunpack.c.l.bf16 %v15956_v39 }
 0x559   :  { %v6663_v54 = vadd.f32 %v18879_v36, %v6644_v10 }
 0x55a   :  { %v6607_v59 = vpop.f32.mrf.mxu0  ;;  %v6626_v19 = vpop.f32.mrf.mxu1 }
 0x55b   :  { %v6608_v8 = vadd.f32 %v6607_v59, %v6589_v21  ;;  %v15671_v21 = vunpack.c.h.bf16 %v15953_v61 }
 0x55d   :  { %v18881_v22 = vadd.f32 %v6626_v19, %v6608_v8  ;;  %6969 = vmatpush.msra.mxu2 %v15671_v21 }
 0x55f   :  { %v6646_v36 = vadd.f32 %v18883_v5, %v18881_v22  ;;  %v6811_v14 = vpop.f32.mrf.mxu3 }
 0x561   :  { %v6665_v27 = vadd.f32 %v18887_v40, %v6646_v36 }
 0x562   :  { %v6676_v45 = vpop.f32.mrf.mxu0  ;;  %v18885_v46 = vpop.f32.mrf.mxu1 }
 0x563   :  { %v6677_v11 = vadd.f32 %v6676_v45, %v6658_v26  ;;  %v15670_v45 = vunpack.c.l.bf16 %v15953_v61 }
 0x565   :  { %v6696_v8 = vadd.f32 %v18885_v46, %v6677_v11  ;;  %6970 = vmatpush.msra.mxu2 %v15670_v45  ;;  %v15666_v46 = vunpack.c.l.bf16 %v15952_v7  ;;  %v15675_v11 = vunpack.c.h.bf16 %v15954_v9 }
 0x567   :  { %v6715_v53 = vadd.f32 %v18893_v35, %v6696_v8  ;;  %6971 = vmatpush.msra.mxu2 %v15667_v20 }
 0x569   :  { %6972 = vmatpush.msra.mxu2 %v15666_v46  ;;  %v6734_v35 = vadd.f32 %v18895_v48, %v6715_v53  ;;  %v15659_v48 = vunpack.c.h.bf16 %v15950_v55 }
 0x56a   :  { %v18889_v47 = vpop.f32.mrf.mxu0  ;;  %v18891_v25 = vpop.f32.mrf.mxu1 }
 0x56b   :  { %v6679_v23 = vadd.f32 %v18889_v47, %v6660_v60  ;;  %6973 = vmatpush.msra.mxu2 %v15663_v52 }
 0x56d   :  { %v6698_v47 = vadd.f32 %v18891_v25, %v6679_v23  ;;  %6974 = vmatpush.msra.mxu2 %v15662_v50  ;;  %v15683_v25 = vunpack.c.h.bf16 %v15956_v39 }
 0x56f   :  { %v6717_v16 = vadd.f32 %v18901_v6, %v6698_v47  ;;  %6975 = vmatpush.msra.mxu2 %v15659_v48  ;;  %7012 = vmatpush.msra.mxu3 %v15683_v25 }
 0x571   :  { %6976 = vmatpush.msra.mxu2 %v15658_v41  ;;  %7013 = vmatpush.msra.mxu3 %v15682_v18 }
 0x572   :  { %v18897_v42 = vpop.f32.mrf.mxu0  ;;  %v18899_v44 = vpop.f32.mrf.mxu1 }
 0x573   :  { %v6682_v2 = vadd.f32 %v18897_v42, %v6663_v54  ;;  %v6736_v42 = vadd.f32 %v18910_v0, %v6717_v16  ;;  %7014 = vmatpush.msra.mxu3 %v15679_v13  ;;  %v15674_v0 = vunpack.c.l.bf16 %v15954_v9  ;;  %v13237_v16 = vld [vmem:[%s20193_s3 + $0x278] sm:$0xff]  ;;  %v13234_v9 = vld [vmem:[%s20193_s3 + $0x260] sm:$0xff] }
 0x574   :  { %v7072_v41 = vunpack.c.l.bf16 %v13237_v16  ;;  %v7073_v18 = vunpack.c.h.bf16 %v13237_v16  ;;  %v13256_v16 = vld [vmem:[%s20193_s3 + $0x2e0] sm:$0xff] }
 0x575   :  { %v6701_v26 = vadd.f32 %v18899_v44, %v6682_v2  ;;  %7015 = vmatpush.msra.mxu3 %v15678_v31  ;;  %v13236_v2 = vld [vmem:[%s20193_s3 + $0x270] sm:$0xff]  ;;  %v13227_v31 = vld [vmem:[%s20193_s3 + $0x228] sm:$0xff] }
 0x576   :  { %v7070_v4 = vunpack.c.l.bf16 %v13236_v2  ;;  %v7071_v36 = vunpack.c.h.bf16 %v13236_v2  ;;  %7086 = vmatpush.msrb.mxu0 %v7072_v41  ;;  %7106 = vmatpush.msrb.mxu1 %v7073_v18  ;;  %v7247_v41 = vunpack.c.l.bf16 %v13256_v16  ;;  %v7248_v18 = vunpack.c.h.bf16 %v13256_v16 }
 0x577   :  { %v6720_v62 = vadd.f32 %v18922_v38, %v6701_v26  ;;  %7016 = vmatpush.msra.mxu3 %v15675_v11  ;;  %v13235_v26 = vld [vmem:[%s20193_s3 + $0x268] sm:$0xff]  ;;  %v13226_v11 = vld [vmem:[%s20193_s3 + $0x220] sm:$0xff] }
 0x578   :  { %7087 = vmatpush.msrb.mxu0 %v7070_v4  ;;  %7107 = vmatpush.msrb.mxu1 %v7071_v36  ;;  %v13246_v4 = vld [vmem:[%s20193_s3 + $0x2a0] sm:$0xff]  ;;  %v13255_v36 = vld [vmem:[%s20193_s3 + $0x2d8] sm:$0xff] }
 0x579   :  { %7017 = vmatpush.msra.mxu3 %v15674_v0  ;;  %v6739_v40 = vadd.f32 %v18932_v30, %v6720_v62  ;;  %v6814_v30 = vpop.f32.mrf.mxu3  ;;  %v13225_v62 = vld [vmem:[%s20193_s3 + $0x218] sm:$0xff]  ;;  %v7041_v0 = vunpack.c.l.bf16 %v13226_v11 }
 0x57a   :  { %v18912_v28 = vpop.f32.mrf.mxu0  ;;  %v18914_v56 = vpop.f32.mrf.mxu1 }
 0x57b   :  { %v6684_v12 = vadd.f32 %v18912_v28, %v6665_v27  ;;  %v7068_v27 = vunpack.c.l.bf16 %v13235_v26 }
 0x57d   :  { %7088 = vmatpush.msrb.mxu0 %v7068_v27 }
 0x581   :  { %v6816_v49 = vpop.f32.mrf.mxu3 }
 0x582   :  { %v6752_v24 = vpop.f32.mrf.mxu0  ;;  %v18930_v57 = vpop.f32.mrf.mxu1 }
 0x583   :  { %v6753_v58 = vadd.f32 %v6752_v24, %v6734_v35 }
 0x585   :  { %v6772_v24 = vadd.f32 %v18930_v57, %v6753_v58  ;;  %v6792_v57 = vpop.f32.mrf.mxu2 }
 0x587   :  { %v6791_v22 = vadd.f32 %v6790_v43, %v6772_v24 }
 0x589   :  { %v6810_v44 = vadd.f32 %v6809_v17, %v6791_v22  ;;  %v13229_v17 = vld [vmem:[%s20193_s3 + $0x238] sm:$0xff]  ;;  %v7069_v22 = vunpack.c.h.bf16 %v13235_v26  ;;  %v13254_v26 = vld [vmem:[%s20193_s3 + $0x2d0] sm:$0xff] }
 0x58a   :  { %v6754_v59 = vpop.f32.mrf.mxu0  ;;  %v18950_v19 = vpop.f32.mrf.mxu1  ;;  %v7047_v24 = vunpack.c.l.bf16 %v13229_v17  ;;  %v7048_v13 = vunpack.c.h.bf16 %v13229_v17  ;;  %v7243_v27 = vunpack.c.l.bf16 %v13254_v26 }
 0x58b   :  { %v6755_v5 = vadd.f32 %v6754_v59, %v6736_v42  ;;  %v6703_v59 = vadd.f32 %v18914_v56, %v6684_v12  ;;  %v7066_v12 = vunpack.c.l.bf16 %v13234_v9  ;;  %7108 = vmatpush.msrb.mxu1 %v7069_v22  ;;  %v7244_v22 = vunpack.c.h.bf16 %v13254_v26 }
 0x58d   :  { %v6774_v61 = vadd.f32 %v18950_v19, %v6755_v5  ;;  %v6722_v38 = vadd.f32 %v18948_v37, %v6703_v59  ;;  %v6795_v28 = vpop.f32.mrf.mxu2  ;;  %v7043_v5 = vunpack.c.l.bf16 %v13227_v31  ;;  %7089 = vmatpush.msrb.mxu0 %v7066_v12 }
 0x58f   :  { %v6793_v45 = vadd.f32 %v6792_v57, %v6774_v61  ;;  %v6741_v46 = vadd.f32 %v18958_v51, %v6722_v38  ;;  %v7044_v57 = vunpack.c.h.bf16 %v13227_v31  ;;  %v7067_v61 = vunpack.c.h.bf16 %v13234_v9  ;;  %v13223_v38 = vld [vmem:[%s20193_s3 + $0x208] sm:$0xff] }
 0x591   :  { %v6812_v20 = vadd.f32 %v6811_v14, %v6793_v45  ;;  %v7039_v14 = vunpack.c.l.bf16 %v13225_v62  ;;  %7109 = vmatpush.msrb.mxu1 %v7067_v61 }
 0x592   :  { %v6757_v29 = vpop.f32.mrf.mxu0  ;;  %v6776_v1 = vpop.f32.mrf.mxu1 }
 0x593   :  { %v6758_v7 = vadd.f32 %v6757_v29, %v6739_v40  ;;  %v13224_v40 = vld [vmem:[%s20193_s3 + $0x210] sm:$0xff] }
 0x594   :  { %v7037_v45 = vunpack.c.l.bf16 %v13224_v40 }
 0x595   :  { %v6777_v53 = vadd.f32 %v6776_v1, %v6758_v7  ;;  %v6797_v35 = vpop.f32.mrf.mxu2  ;;  %v7038_v7 = vunpack.c.h.bf16 %v13224_v40 }
 0x597   :  { %v6796_v33 = vadd.f32 %v6795_v28, %v6777_v53  ;;  %v13231_v28 = vld [vmem:[%s20193_s3 + $0x248] sm:$0xff]  ;;  %v7035_v53 = vunpack.c.l.bf16 %v13223_v38 }
 0x599   :  { %v6815_v34 = vadd.f32 %v6814_v30, %v6796_v33  ;;  %v7060_v30 = vunpack.c.l.bf16 %v13231_v28  ;;  %v7061_v33 = vunpack.c.h.bf16 %v13231_v28 }
 0x59a   :  { %v6759_v6 = vpop.f32.mrf.mxu0  ;;  %v6778_v15 = vpop.f32.mrf.mxu1 }
 0x59b   :  { %v6760_v56 = vadd.f32 %v6759_v6, %v6741_v46  ;;  %v13228_v6 = vld [vmem:[%s20193_s3 + $0x230] sm:$0xff]  ;;  %v13259_v46 = vld [vmem:[%s20193_s3 + $0x2f8] sm:$0xff] }
 0x59c   :  { %v7046_v42 = vunpack.c.h.bf16 %v13228_v6 }
 0x59d   :  { %v6779_v29 = vadd.f32 %v6778_v15, %v6760_v56  ;;  %v7045_v15 = vunpack.c.l.bf16 %v13228_v6  ;;  %v7245_v6 = vunpack.c.l.bf16 %v13255_v36 }
 0x59f   :  { %v6798_v43 = vadd.f32 %v6797_v35, %v6779_v29 }
 0x5a1   :  { %v6817_v39 = vadd.f32 %v6816_v49, %v6798_v43 }
 0x5a2   :  { %v6828_v32 = vpop.f32.mrf.mxu0  ;;  %v6847_v21 = vpop.f32.mrf.mxu1 }
 0x5a3   :  { %v6829_v8 = vadd.f32 %v6828_v32, %v6810_v44  ;;  %v7042_v44 = vunpack.c.h.bf16 %v13226_v11  ;;  %v7040_v32 = vunpack.c.h.bf16 %v13225_v62  ;;  %v13243_v11 = vld [vmem:[%s20193_s3 + $0x288] sm:$0xff] }
 0x5a5   :  { %v6848_v60 = vadd.f32 %v6847_v21, %v6829_v8  ;;  %v13233_v21 = vld [vmem:[%s20193_s3 + $0x258] sm:$0xff] }
 0x5a6   :  { %v7064_v59 = vunpack.c.l.bf16 %v13233_v21  ;;  %v7065_v8 = vunpack.c.h.bf16 %v13233_v21 }
 0x5a7   :  { %v6857_v63 = vmax.f32 %v6848_v60, 0.0  ;;  %v13232_v60 = vld [vmem:[%s20193_s3 + $0x250] sm:$0xff] }
 0x5a8   :  { %7090 = vmatpush.msrb.mxu0 %v7064_v59  ;;  %7110 = vmatpush.msrb.mxu1 %v7065_v8  ;;  %v13242_v59 = vld [vmem:[%s20193_s3 + $0x280] sm:$0xff] }
 0x5a9   :  { %13203 = vmatmul.msk.f32.vlgmr.msrb.gmra.mxu3 %vm1963_vm0, %v6857_v63  ;;  %v7062_v63 = vunpack.c.l.bf16 %v13232_v60  ;;  %v7169_v8 = vunpack.c.l.bf16 %v13242_v59 }
 0x5aa   :  { %v6830_v19 = vpop.f32.mrf.mxu0  ;;  %v6849_v23 = vpop.f32.mrf.mxu1  ;;  %7148 = vmatpush.msrb.mxu3 %v7048_v13  ;;  %v7178_v13 = vunpack.c.h.bf16 %v13246_v4 }
 0x5ab   :  { %v6831_v3 = vadd.f32 %v6830_v19, %v6812_v20  ;;  %v7063_v20 = vunpack.c.h.bf16 %v13232_v60  ;;  %v7036_v19 = vunpack.c.h.bf16 %v13223_v38  ;;  %7091 = vmatpush.msrb.mxu0 %v7062_v63 }
 0x5ac   :  { %7149 = vmatpush.msrb.mxu3 %v7046_v42  ;;  %v13245_v42 = vld [vmem:[%s20193_s3 + $0x298] sm:$0xff] }
 0x5ad   :  { %v6850_v10 = vadd.f32 %v6849_v23, %v6831_v3  ;;  %v13222_v23 = vld [vmem:[%s20193_s3 + $0x200] sm:$0xff]  ;;  %7111 = vmatpush.msrb.mxu1 %v7063_v20  ;;  %7092 = vmatpush.msrb.mxu0 %v7060_v30  ;;  %v7175_v31 = vunpack.c.l.bf16 %v13245_v42  ;;  %v7176_v9 = vunpack.c.h.bf16 %v13245_v42  ;;  %v15969_v42 = vld [vmem:[%s20194_s5 + $0x158] sm:$0xff]  }
 0x5ae   :  { %7150 = vmatpush.msrb.mxu3 %v7044_v57  ;;  %v13230_v3 = vld [vmem:[%s20193_s3 + $0x240] sm:$0xff]  ;;  %v7033_v56 = vunpack.c.l.bf16 %v13222_v23  ;;  %v13253_v57 = vld [vmem:[%s20193_s3 + $0x2c8] sm:$0xff] }
 0x5af   :  { %v6858_v52 = vmax.f32 %v6850_v10, 0.0  ;;  %v7034_v10 = vunpack.c.h.bf16 %v13222_v23  ;;  %v7058_v29 = vunpack.c.l.bf16 %v13230_v3  ;;  %v7059_v35 = vunpack.c.h.bf16 %v13230_v3  ;;  %7112 = vmatpush.msrb.mxu1 %v7061_v33  ;;  %v15973_v23 = vld [vmem:[%s20194_s5 + $0x178] sm:$0xff]  }
 0x5b0   :  { %7151 = vmatpush.msrb.mxu3 %v7042_v44  ;;  %v7241_v44 = vunpack.c.l.bf16 %v13253_v57  ;;  %v7242_v61 = vunpack.c.h.bf16 %v13253_v57  ;;  %v15223_v3 = vld [vmem:[%s20190_s1 + $0xf78] sm:$0xff]  ;;  %v15960_v57 = vld [vmem:[%s20194_s5 + $0x110] sm:$0xff]  }
 0x5b1   :  { %13202 = vmatmul.msk.f32.vlgmr.msrb.gmra.mxu2 %vm1963_vm0, %v6858_v52  ;;  %v7253_v52 = vunpack.c.l.bf16 %v13259_v46  ;;  %7093 = vmatpush.msrb.mxu0 %v7058_v29 }
 0x5b2   :  { %v6833_v37 = vpop.f32.mrf.mxu0  ;;  %v6852_v47 = vpop.f32.mrf.mxu1  ;;  %7128 = vmatpush.msrb.mxu2 %v7047_v24  ;;  %7152 = vmatpush.msrb.mxu3 %v7040_v32  ;;  %v7177_v24 = vunpack.c.l.bf16 %v13246_v4  ;;  %v7172_v32 = vunpack.c.h.bf16 %v13243_v11 }
 0x5b3   :  { %v6834_v1 = vadd.f32 %v6833_v37, %v6815_v34  ;;  %v7254_v34 = vunpack.c.h.bf16 %v13259_v46  ;;  %v13249_v37 = vld [vmem:[%s20193_s3 + $0x2b8] sm:$0xff]  ;;  %7113 = vmatpush.msrb.mxu1 %v7059_v35  ;;  %v15750_v35 = vunpack.c.l.bf16 %v15973_v23 }
 0x5b4   :  { %7129 = vmatpush.msrb.mxu2 %v7045_v15  ;;  %7153 = vmatpush.msrb.mxu3 %v7038_v7  ;;  %v7184_v43 = vunpack.c.h.bf16 %v13249_v37  ;;  %v7246_v15 = vunpack.c.h.bf16 %v13255_v36  ;;  %v15215_v46 = vld [vmem:[%s20190_s1 + $0xf38] sm:$0xff]  ;;  %v15220_v36 = vld [vmem:[%s20190_s1 + $0xf60] sm:$0xff] }
 0x5b5   :  { %v6853_v50 = vadd.f32 %v6852_v47, %v6834_v1  ;;  %v13258_v47 = vld [vmem:[%s20193_s3 + $0x2f0] sm:$0xff]  ;;  %v7183_v1 = vunpack.c.l.bf16 %v13249_v37 }
 0x5b6   :  { %7130 = vmatpush.msrb.mxu2 %v7043_v5  ;;  %7154 = vmatpush.msrb.mxu3 %v7036_v19  ;;  %v7252_v49 = vunpack.c.h.bf16 %v13258_v47  ;;  %v13244_v5 = vld [vmem:[%s20193_s3 + $0x290] sm:$0xff]  ;;  %v15965_v19 = vld [vmem:[%s20194_s5 + $0x138] sm:$0xff]  }
 0x5b7   :  { %v6859_v55 = vmax.f32 %v6853_v50, 0.0  ;;  %v7251_v50 = vunpack.c.l.bf16 %v13258_v47  ;;  %7196 = vmatpush.msra.mxu0 %v7183_v1  ;;  %7216 = vmatpush.msra.mxu1 %v7184_v43  ;;  %v7173_v62 = vunpack.c.l.bf16 %v13244_v5  ;;  %v7174_v12 = vunpack.c.h.bf16 %v13244_v5  ;;  %v15222_v37 = vld [vmem:[%s20190_s1 + $0xf70] sm:$0xff] }
 0x5b8   :  { %7131 = vmatpush.msrb.mxu2 %v7041_v0  ;;  %7155 = vmatpush.msrb.mxu3 %v7034_v10  ;;  %v13252_v0 = vld [vmem:[%s20193_s3 + $0x2c0] sm:$0xff]  ;;  %v15719_v33 = vunpack.c.h.bf16 %v15965_v19  ;;  %v15718_v29 = vunpack.c.l.bf16 %v15965_v19  ;;  %v15972_v47 = vld [vmem:[%s20194_s5 + $0x170] sm:$0xff]  }
 0x5b9   :  { %13212 = vmatmul.msk.f32.vlgmr.msra.gmra.mxu2 %vm1963_vm0, %v6859_v55  ;;  %v13248_v55 = vld [vmem:[%s20193_s3 + $0x2b0] sm:$0xff]  ;;  %v7239_v21 = vunpack.c.l.bf16 %v13252_v0  ;;  %v7240_v40 = vunpack.c.h.bf16 %v13252_v0  ;;  %v15747_v43 = vunpack.c.h.bf16 %v15972_v47 }
 0x5ba   :  { %v6835_v51 = vpop.f32.mrf.mxu0  ;;  %v6854_v58 = vpop.f32.mrf.mxu1  ;;  %7132 = vmatpush.msrb.mxu2 %v7039_v14  ;;  %v7171_v14 = vunpack.c.l.bf16 %v13243_v11  ;;  %v15210_v5 = vld [vmem:[%s20190_s1 + $0xf10] sm:$0xff] }
 0x5bb   :  { %v6836_v54 = vadd.f32 %v6835_v51, %v6817_v39  ;;  %v13257_v39 = vld [vmem:[%s20193_s3 + $0x2e8] sm:$0xff]  ;;  %v7181_v51 = vunpack.c.l.bf16 %v13248_v55  ;;  %v15968_v11 = vld [vmem:[%s20194_s5 + $0x150] sm:$0xff]  }
 0x5bc   :  { %7133 = vmatpush.msrb.mxu2 %v7037_v45  ;;  %v7170_v45 = vunpack.c.h.bf16 %v13242_v59  ;;  %v15218_v0 = vld [vmem:[%s20190_s1 + $0xf50] sm:$0xff]  ;;  %v15730_v59 = vunpack.c.l.bf16 %v15968_v11 }
 0x5bd   :  { %v6855_v48 = vadd.f32 %v6854_v58, %v6836_v54  ;;  %v7182_v54 = vunpack.c.h.bf16 %v13248_v55  ;;  %v7249_v58 = vunpack.c.l.bf16 %v13257_v39  ;;  %7197 = vmatpush.msra.mxu0 %v7181_v51  ;;  %v15963_v55 = vld [vmem:[%s20194_s5 + $0x128] sm:$0xff]   ;;  %v15178_v19 = vld [vmem:[%s20191_s0 + $0x40c] sm:$0xf0] }
 0x5be   :  { %7134 = vmatpush.msrb.mxu2 %v7035_v53 }
 0x5bf   :  { %v6860_v25 = vmax.f32 %v6855_v48, 0.0  ;;  %v7250_v48 = vunpack.c.h.bf16 %v13257_v39  ;;  %7217 = vmatpush.msra.mxu1 %v7182_v54  ;;  %v15971_v39 = vld [vmem:[%s20194_s5 + $0x168] sm:$0xff]   ;;  %v15746_v54 = vunpack.c.l.bf16 %v15972_v47  ;;  %v15239_v47 = vld [vmem:[%s20190_s1 + $0xff8] sm:$0xff] }
 0x5c0   :  { %7135 = vmatpush.msrb.mxu2 %v7033_v56  ;;  %v15751_v56 = vunpack.c.h.bf16 %v15973_v23  ;;  %v15743_v16 = vunpack.c.h.bf16 %v15971_v39  ;;  %v15742_v4 = vunpack.c.l.bf16 %v15971_v39  ;;  %v15216_v23 = vld [vmem:[%s20190_s1 + $0xf40] sm:$0xff]  ;;  %v15229_v39 = vld [vmem:[%s20190_s1 + $0xfa8] sm:$0xff] }
 0x5c1   :  { %13221 = vmatmul.msk.f32.vlgmr.msra.gmra.mxu3 %vm1963_vm0, %v6860_v25  ;;  %v13247_v25 = vld [vmem:[%s20193_s3 + $0x2a8] sm:$0xff] }
 0x5c2   :  { %7266 = vmatpush.msra.mxu2 %v7253_v52  ;;  %7286 = vmatpush.msra.mxu3 %v7254_v34  ;;  %v7179_v2 = vunpack.c.l.bf16 %v13247_v25  ;;  %v7180_v17 = vunpack.c.h.bf16 %v13247_v25  ;;  %v15964_v52 = vld [vmem:[%s20194_s5 + $0x130] sm:$0xff]   ;;  %v15711_v25 = vunpack.c.h.bf16 %v15963_v55 }
 0x5c3   :  { %v15214_v34 = vld [vmem:[%s20190_s1 + $0xf30] sm:$0xff]  ;;  %v15715_v1 = vunpack.c.h.bf16 %v15964_v52  ;;  %v15714_v51 = vunpack.c.l.bf16 %v15964_v52  ;;  %v15255_v52 = vld [vmem:[%s20190_s1 + $0x1078] sm:$0xff] }
 0x5c4   :  { %7267 = vmatpush.msra.mxu2 %v7251_v50  ;;  %7287 = vmatpush.msra.mxu3 %v7252_v49  ;;  %v15213_v50 = vld [vmem:[%s20190_s1 + $0xf28] sm:$0xff] }
 0x5c5   :  { %7198 = vmatpush.msra.mxu0 %v7179_v2  ;;  %7218 = vmatpush.msra.mxu1 %v7180_v17  ;;  %v15212_v2 = vld [vmem:[%s20190_s1 + $0xf20] sm:$0xff] }
 0x5c6   :  { %7268 = vmatpush.msra.mxu2 %v7249_v58  ;;  %7288 = vmatpush.msra.mxu3 %v7250_v48  ;;  %v15221_v48 = vld [vmem:[%s20190_s1 + $0xf68] sm:$0xff]  ;;  %v15962_v17 = vld [vmem:[%s20194_s5 + $0x120] sm:$0xff]  }
 0x5c7   :  { %7199 = vmatpush.msra.mxu0 %v7177_v24  ;;  %7219 = vmatpush.msra.mxu1 %v7178_v13  ;;  %v15707_v24 = vunpack.c.h.bf16 %v15962_v17  ;;  %v15706_v26 = vunpack.c.l.bf16 %v15962_v17  ;;  %v15198_v17 = vld [vmem:[%s20191_s0 + $0x4ac] sm:$0xf0] }
 0x5c8   :  { %7269 = vmatpush.msra.mxu2 %v7247_v41  ;;  %7289 = vmatpush.msra.mxu3 %v7248_v18  ;;  %v15970_v41 = vld [vmem:[%s20194_s5 + $0x160] sm:$0xff]   ;;  %v15710_v18 = vunpack.c.l.bf16 %v15963_v55  ;;  %v15245_v55 = vld [vmem:[%s20190_s1 + $0x1028] sm:$0xff] }
 0x5c9   :  { %7200 = vmatpush.msra.mxu0 %v7175_v31  ;;  %7220 = vmatpush.msra.mxu1 %v7176_v9  ;;  %v15739_v13 = vunpack.c.h.bf16 %v15970_v41  ;;  %v15738_v31 = vunpack.c.l.bf16 %v15970_v41  ;;  %v15219_v9 = vld [vmem:[%s20190_s1 + $0xf58] sm:$0xff] }
 0x5ca   :  { %7270 = vmatpush.msra.mxu2 %v7245_v6  ;;  %7290 = vmatpush.msra.mxu3 %v7246_v15  ;;  %v15211_v6 = vld [vmem:[%s20190_s1 + $0xf18] sm:$0xff] }
 0x5cb   :  { %7201 = vmatpush.msra.mxu0 %v7173_v62  ;;  %7221 = vmatpush.msra.mxu1 %v7174_v12  ;;  %v15961_v15 = vld [vmem:[%s20194_s5 + $0x118] sm:$0xff]   ;;  %v15734_v12 = vunpack.c.l.bf16 %v15969_v42 }
 0x5cc   :  { %7271 = vmatpush.msra.mxu2 %v7243_v27  ;;  %7291 = vmatpush.msra.mxu3 %v7244_v22  ;;  %v15703_v27 = vunpack.c.h.bf16 %v15961_v15  ;;  %v15735_v22 = vunpack.c.h.bf16 %v15969_v42  ;;  %v15702_v62 = vunpack.c.l.bf16 %v15961_v15  ;;  %v15251_v15 = vld [vmem:[%s20190_s1 + $0x1058] sm:$0xff]  ;;  %v15242_v42 = vld [vmem:[%s20190_s1 + $0x1010] sm:$0xff] }
 0x5cd   :  { %7202 = vmatpush.msra.mxu0 %v7171_v14  ;;  %7222 = vmatpush.msra.mxu1 %v7172_v32  ;;  %v15209_v14 = vld [vmem:[%s20190_s1 + $0xf08] sm:$0xff] }
 0x5ce   :  { %7272 = vmatpush.msra.mxu2 %v7241_v44  ;;  %7292 = vmatpush.msra.mxu3 %v7242_v61  ;;  %v15699_v44 = vunpack.c.h.bf16 %v15960_v57  ;;  %v15731_v61 = vunpack.c.h.bf16 %v15968_v11  ;;  %v15959_v32 = vld [vmem:[%s20194_s5 + $0x108] sm:$0xff]   ;;  %v15240_v11 = vld [vmem:[%s20190_s1 + $0x1000] sm:$0xff] }
 0x5cf   :  { %7203 = vmatpush.msra.mxu0 %v7169_v8  ;;  %7223 = vmatpush.msra.mxu1 %v7170_v45  ;;  %v15217_v8 = vld [vmem:[%s20190_s1 + $0xf48] sm:$0xff]  ;;  %v15695_v45 = vunpack.c.h.bf16 %v15959_v32 }
 0x5d0   :  { %7273 = vmatpush.msra.mxu2 %v7239_v21  ;;  %7293 = vmatpush.msra.mxu3 %v7240_v40  ;;  %v15967_v21 = vld [vmem:[%s20194_s5 + $0x148] sm:$0xff]   ;;  %v15698_v40 = vunpack.c.l.bf16 %v15960_v57 }
 0x5d1   :  { %v15249_v57 = vld [vmem:[%s20190_s1 + $0x1048] sm:$0xff] }
 0x62c   :  { %v6938_v60 = vpop.f32.mrf.mxu3 }
 0x634   :  { %v6915_v7 = vpop.f32.mrf.mxu2 }
 0x635   :  { %v6939_v28 = vadd.f32 %v6938_v60, %v6915_v7  ;;  %v15727_v7 = vunpack.c.h.bf16 %v15967_v21  ;;  %v15208_v60 = vld [vmem:[%s20190_s1 + $0xf00] sm:$0xff] }
 0x63c   :  { %v6978_v38 = vpop.f32.mrf.mxu2 }
 0x63d   :  { %v6981_v63 = vadd.f32 %v6978_v38, %v6939_v28  ;;  %v15958_v38 = vld [vmem:[%s20194_s5 + $0x100] sm:$0xff]  }
 0x63e   :  { %v15966_v28 = vld [vmem:[%s20194_s5 + $0x140] sm:$0xff]  }
 0x644   :  { %v7019_v20 = vpop.f32.mrf.mxu3 }
 0x645   :  { %v7022_v53 = vadd.f32 %v7019_v20, %v6981_v63  ;;  %v15694_v63 = vunpack.c.l.bf16 %v15959_v32  ;;  %v15726_v20 = vunpack.c.l.bf16 %v15967_v21  ;;  %v15170_v21 = vld [vmem:[%s20191_s0 + $0x3d4] sm:$0xf] }
 0x647   :  { %v7023_v30 = vmax.f32 %v7022_v53, 0.0  ;;  %v13659_v53 = vld [vmem:[%s20191_s0 + $0x3c0] sm:$0xf] }
 0x649   :  { %v7075_v10 = vrot.slane %v7023_v30, 2  ;;  %13240 = vmatmul.msk.f32.vlgmr.msrb.gmra.mxu2 %vm1963_vm0, %v7023_v30  ;;  %13241 = vmatmul.msk.f32.vlgmr.msrb.gmra.mxu3 %vm1963_vm0, %v7023_v30  ;;  %v7255_v49 = vrot.slane %v7023_v30, 6  ;;  %v7185_v58 = vrot.slane %v7023_v30, 4  ;;  %v15723_v30 = vunpack.c.h.bf16 %v15966_v28 }
 0x64a   :  { %8945 = vmatpush.bf16.msrb.mxu2 %v15215_v46  ;;  %8964 = vmatpush.bf16.msrb.mxu3 %v15223_v3  ;;  %v15247_v46 = vld [vmem:[%s20190_s1 + $0x1038] sm:$0xff]  ;;  %v15691_v3 = vunpack.c.h.bf16 %v15958_v38 }
 0x64b   :  { %13238 = vmatmul.msk.f32.vlgmr.msrb.gmra.mxu0 %vm1963_vm0, %v7075_v10  ;;  %13239 = vmatmul.msk.f32.vlgmr.msrb.gmra.mxu1 %vm1963_vm0, %v7075_v10  ;;  %v13660_v10 = vor.u32 %v15178_v19, %v13659_v53 }
 0x64c   :  { %7381 = vmatpush.msrb.mxu0 %v15719_v33  ;;  %7401 = vmatpush.msrb.mxu1 %v15751_v56  ;;  %v15168_v33 = vld [vmem:[%s20191_s0 + $0x3c4] sm:$0xf]  ;;  %v13661_v56 = vld [vmem:[%s20191_s0 + $0x410] sm:$0xf0] }
 0x64e   :  { %8946 = vmatpush.bf16.msrb.mxu2 %v15214_v34  ;;  %7382 = vmatpush.msrb.mxu0 %v15718_v29  ;;  %v15690_v34 = vunpack.c.l.bf16 %v15958_v38  ;;  %v15722_v29 = vunpack.c.l.bf16 %v15966_v28 }
 0x64f   :  { %7402 = vmatpush.msrb.mxu1 %v15750_v35  ;;  %8965 = vmatpush.bf16.msrb.mxu3 %v15222_v37  ;;  %v13664_v35 = vor.u32 %v15168_v33, %v13661_v56  ;;  %v15231_v37 = vld [vmem:[%s20190_s1 + $0xfb8] sm:$0xff]  ;;  %v13262_v33 = vld [vmem:[%s20195_s4 + $0x4] sm:$0x3] }
 0x650   :  { %7383 = vmatpush.msrb.mxu0 %v15715_v1  ;;  %v15246_v1 = vld [vmem:[%s20190_s1 + $0x1030] sm:$0xff] }
 0x651   :  { %13260 = vmatmul.msk.f32.vlgmr.msra.gmra.mxu2 %vm1963_vm0, %v7255_v49  ;;  %13261 = vmatmul.msk.f32.vlgmr.msra.gmra.mxu3 %vm1963_vm0, %v7255_v49  ;;  %v15254_v49 = vld [vmem:[%s20190_s1 + $0x1070] sm:$0xff] }
 0x652   :  { %7403 = vmatpush.msrb.mxu1 %v15747_v43  ;;  %8947 = vmatpush.bf16.msrb.mxu2 %v15213_v50  ;;  %v15230_v43 = vld [vmem:[%s20190_s1 + $0xfb0] sm:$0xff] }
 0x653   :  { %13250 = vmatmul.msk.f32.vlgmr.msra.gmra.mxu0 %vm1963_vm0, %v7185_v58  ;;  %13251 = vmatmul.msk.f32.vlgmr.msra.gmra.mxu1 %vm1963_vm0, %v7185_v58  ;;  %v15238_v50 = vld [vmem:[%s20190_s1 + $0xff0] sm:$0xff]  ;;  %v15244_v58 = vld [vmem:[%s20190_s1 + $0x1020] sm:$0xff] }
 0x654   :  { %7384 = vmatpush.msrb.mxu0 %v15714_v51  ;;  %7404 = vmatpush.msrb.mxu1 %v15746_v54  ;;  %v15237_v51 = vld [vmem:[%s20190_s1 + $0xfe8] sm:$0xff] }
 0x655   :  { %8966 = vmatpush.bf16.msrb.mxu3 %v15221_v48  ;;  %v15253_v54 = vld [vmem:[%s20190_s1 + $0x1068] sm:$0xff]  ;;  %v15228_v48 = vld [vmem:[%s20190_s1 + $0xfa0] sm:$0xff] }
 0x656   :  { %7385 = vmatpush.msrb.mxu0 %v15711_v25  ;;  %7405 = vmatpush.msrb.mxu1 %v15743_v16  ;;  %v15236_v25 = vld [vmem:[%s20190_s1 + $0xfe0] sm:$0xff] }
 0x657   :  { %8948 = vmatpush.bf16.msrb.mxu2 %v15212_v2  ;;  %v15252_v16 = vld [vmem:[%s20190_s1 + $0x1060] sm:$0xff] }
 0x658   :  { %7386 = vmatpush.msrb.mxu0 %v15710_v18  ;;  %7406 = vmatpush.msrb.mxu1 %v15742_v4  ;;  %v13739_v2 = vld [vmem:[%s20191_s0 + $0x460] sm:$0xf]  ;;  %v15243_v18 = vld [vmem:[%s20190_s1 + $0x1018] sm:$0xff]  ;;  %v15188_v4 = vld [vmem:[%s20191_s0 + $0x464] sm:$0xf] }
 0x659   :  { %8967 = vmatpush.bf16.msrb.mxu3 %v15220_v36  ;;  %v13740_v41 = vor.u32 %v15198_v17, %v13739_v2  ;;  %v13741_v36 = vld [vmem:[%s20191_s0 + $0x4b0] sm:$0xf0] }
 0x65a   :  { %7387 = vmatpush.msrb.mxu0 %v15707_v24  ;;  %7407 = vmatpush.msrb.mxu1 %v15739_v13  ;;  %v13744_v24 = vor.u32 %v15188_v4, %v13741_v36  ;;  %v15227_v13 = vld [vmem:[%s20190_s1 + $0xf98] sm:$0xff] }
 0x65b   :  { %8949 = vmatpush.bf16.msrb.mxu2 %v15211_v6  ;;  %v15235_v6 = vld [vmem:[%s20190_s1 + $0xfd8] sm:$0xff] }
 0x65c   :  { %7388 = vmatpush.msrb.mxu0 %v15706_v26  ;;  %7408 = vmatpush.msrb.mxu1 %v15738_v31  ;;  %v15226_v26 = vld [vmem:[%s20190_s1 + $0xf90] sm:$0xff] }
 0x65d   :  { %8968 = vmatpush.bf16.msrb.mxu3 %v15219_v9  ;;  %v15234_v31 = vld [vmem:[%s20190_s1 + $0xfd0] sm:$0xff] }
 0x65e   :  { %7389 = vmatpush.msrb.mxu0 %v15703_v27  ;;  %7409 = vmatpush.msrb.mxu1 %v15735_v22  ;;  %v15250_v9 = vld [vmem:[%s20190_s1 + $0x1050] sm:$0xff]  ;;  %v15241_v27 = vld [vmem:[%s20190_s1 + $0x1008] sm:$0xff] }
 0x65f   :  { %8950 = vmatpush.bf16.msrb.mxu2 %v15210_v5  ;;  %v15225_v22 = vld [vmem:[%s20190_s1 + $0xf88] sm:$0xff] }
 0x660   :  { %7390 = vmatpush.msrb.mxu0 %v15702_v62  ;;  %7410 = vmatpush.msrb.mxu1 %v15734_v12  ;;  %v15233_v5 = vld [vmem:[%s20190_s1 + $0xfc8] sm:$0xff]  ;;  %v15224_v62 = vld [vmem:[%s20190_s1 + $0xf80] sm:$0xff] }
 0x661   :  { %8969 = vmatpush.bf16.msrb.mxu3 %v15218_v0  ;;  %v15232_v12 = vld [vmem:[%s20190_s1 + $0xfc0] sm:$0xff]  ;;  %v13675_v0 = vld [vmem:[%s20191_s0 + $0x3d0] sm:$0xf] }
 0x662   :  { %7391 = vmatpush.msrb.mxu0 %v15699_v44  ;;  %7411 = vmatpush.msrb.mxu1 %v15731_v61  ;;  %v15180_v44 = vld [vmem:[%s20191_s0 + $0x41c] sm:$0xf0] }
 0x663   :  { %8951 = vmatpush.bf16.msrb.mxu2 %v15209_v14  ;;  %v15248_v61 = vld [vmem:[%s20190_s1 + $0x1040] sm:$0xff]  ;;  %v15279_v14 = vld [vmem:[%s20190_s1 + $0x1138] sm:$0xff]  ;;  %v13676_v32 = vor.u32 %v15180_v44, %v13675_v0  ;;  %v15269_v0 = vld [vmem:[%s20190_s1 + $0x10e8] sm:$0xff] }
 0x664   :  { %7392 = vmatpush.msrb.mxu0 %v15698_v40  ;;  %7412 = vmatpush.msrb.mxu1 %v15730_v59  ;;  %v13677_v40 = vld [vmem:[%s20191_s0 + $0x420] sm:$0xf0] }
 0x665   :  { %8970 = vmatpush.bf16.msrb.mxu3 %v15217_v8  ;;  %v13680_v59 = vor.u32 %v15170_v21, %v13677_v40  ;;  %v15287_v8 = vld [vmem:[%s20190_s1 + $0x1178] sm:$0xff]  ;;  %v15260_v40 = vld [vmem:[%s20190_s1 + $0x10a0] sm:$0xff] }
 0x666   :  { %7393 = vmatpush.msrb.mxu0 %v15695_v45  ;;  %7413 = vmatpush.msrb.mxu1 %v15727_v7  ;;  %v15278_v45 = vld [vmem:[%s20190_s1 + $0x1130] sm:$0xff]  ;;  %v15319_v21 = vld [vmem:[%s20190_s1 + $0x1278] sm:$0xff] }
 0x667   :  { %8952 = vmatpush.bf16.msrb.mxu2 %v15208_v60  ;;  %v15286_v7 = vld [vmem:[%s20190_s1 + $0x1170] sm:$0xff]  ;;  %v15277_v60 = vld [vmem:[%s20190_s1 + $0x1128] sm:$0xff] }
 0x668   :  { %7394 = vmatpush.msrb.mxu0 %v15694_v63  ;;  %7414 = vmatpush.msrb.mxu1 %v15726_v20  ;;  %v15285_v63 = vld [vmem:[%s20190_s1 + $0x1168] sm:$0xff]  ;;  %v15276_v20 = vld [vmem:[%s20190_s1 + $0x1120] sm:$0xff] }
 0x669   :  { %8971 = vmatpush.bf16.msrb.mxu3 %v15216_v23  ;;  %v13755_v23 = vld [vmem:[%s20191_s0 + $0x470] sm:$0xf] }
 0x66a   :  { %7395 = vmatpush.msrb.mxu0 %v15691_v3  ;;  %7415 = vmatpush.msrb.mxu1 %v15723_v30  ;;  %v15284_v3 = vld [vmem:[%s20190_s1 + $0x1160] sm:$0xff]  ;;  %v15275_v30 = vld [vmem:[%s20190_s1 + $0x1118] sm:$0xff] }
 0x66b   :  { %9021 = vmatpush.bf16.msra.mxu2 %v15247_v46  ;;  %v15200_v46 = vld [vmem:[%s20191_s0 + $0x4bc] sm:$0xf0] }
 0x66c   :  { %8953 = vmatmul.bf16.vlgmr.msrb.gmra.mxu2 %v13660_v10  ;;  %7396 = vmatpush.msrb.mxu0 %v15690_v34  ;;  %v13756_v56 = vor.u32 %v15200_v46, %v13755_v23  ;;  %v13749_v23 = vld [vmem:[%s20191_s0 + $0x4b8] sm:$0xf0]  ;;  %v15258_v46 = vld [vmem:[%s20190_s1 + $0x1090] sm:$0xff] }
 0x66d   :  { %9040 = vmatpush.bf16.msra.mxu3 %v15255_v52  ;;  %7416 = vmatpush.msrb.mxu1 %v15722_v29 }
 0x66e   :  { %8972 = vmatmul.bf16.vlgmr.msrb.gmra.mxu3 %v13664_v35  ;;  %8983 = vmatpush.bf16.msra.mxu0 %v15231_v37  ;;  %v15190_v35 = vld [vmem:[%s20191_s0 + $0x474] sm:$0xf]  ;;  %v7303_v37 = vperm.slane %v13262_v33, 0 }
 0x66f   :  { %9002 = vmatpush.bf16.msra.mxu1 %v15239_v47  ;;  %9022 = vmatpush.bf16.msra.mxu2 %v15246_v1  ;;  %v13757_v47 = vld [vmem:[%s20191_s0 + $0x4c0] sm:$0xf0] }
 0x671   :  { %9041 = vmatpush.bf16.msra.mxu3 %v15254_v49  ;;  %v13760_v49 = vor.u32 %v15190_v35, %v13757_v47  ;;  %v15265_v35 = vld [vmem:[%s20190_s1 + $0x10c8] sm:$0xff]  ;;  %v15192_v47 = vld [vmem:[%s20191_s0 + $0x484] sm:$0xf] }
 0x672   :  { %8984 = vmatpush.bf16.msra.mxu0 %v15230_v43 }
 0x673   :  { %9003 = vmatpush.bf16.msra.mxu1 %v15238_v50  ;;  %9023 = vmatpush.bf16.msra.mxu2 %v15245_v55  ;;  %v7304_v50 = vperm.slane %v13262_v33, 1  ;;  %v15283_v55 = vld [vmem:[%s20190_s1 + $0x1158] sm:$0xff]  ;;  %v13771_v33 = vld [vmem:[%s20191_s0 + $0x480] sm:$0xf] }
 0x675   :  { %9042 = vmatpush.bf16.msra.mxu3 %v15253_v54  ;;  %v15274_v54 = vld [vmem:[%s20190_s1 + $0x1110] sm:$0xff] }
 0x676   :  { %8985 = vmatpush.bf16.msra.mxu0 %v15229_v39 }
 0x677   :  { %9004 = vmatpush.bf16.msra.mxu1 %v15237_v51  ;;  %9024 = vmatpush.bf16.msra.mxu2 %v15244_v58 }
 0x679   :  { %9043 = vmatpush.bf16.msra.mxu3 %v15252_v16  ;;  %v15273_v16 = vld [vmem:[%s20190_s1 + $0x1108] sm:$0xff] }
 0x67a   :  { %8986 = vmatpush.bf16.msra.mxu0 %v15228_v48 }
 0x67b   :  { %9005 = vmatpush.bf16.msra.mxu1 %v15236_v25  ;;  %9025 = vmatpush.bf16.msra.mxu2 %v15243_v18  ;;  %v15282_v25 = vld [vmem:[%s20190_s1 + $0x1150] sm:$0xff]  ;;  %v15271_v18 = vld [vmem:[%s20190_s1 + $0x10f8] sm:$0xff] }
 0x67c   :  { %8958 = vmatmul.bf16.gmra.mxu2 %v13740_v41  ;;  %v15263_v41 = vld [vmem:[%s20190_s1 + $0x10b8] sm:$0xff] }
 0x67d   :  { %9044 = vmatpush.bf16.msra.mxu3 %v15251_v15  ;;  %v15179_v15 = vld [vmem:[%s20191_s0 + $0x414] sm:$0xf0] }
 0x67e   :  { %8977 = vmatmul.bf16.gmra.mxu3 %v13744_v24  ;;  %8987 = vmatpush.bf16.msra.mxu0 %v15227_v13  ;;  %v13667_v24 = vld [vmem:[%s20191_s0 + $0x3c8] sm:$0xf] }
 0x67f   :  { %9006 = vmatpush.bf16.msra.mxu1 %v15235_v6  ;;  %9026 = vmatpush.bf16.msra.mxu2 %v15242_v42  ;;  %v15281_v13 = vld [vmem:[%s20190_s1 + $0x1148] sm:$0xff]  ;;  %v15272_v6 = vld [vmem:[%s20190_s1 + $0x1100] sm:$0xff] }
 0x680   :  { %v15169_v42 = vld [vmem:[%s20191_s0 + $0x3cc] sm:$0xf] }
 0x681   :  { %9045 = vmatpush.bf16.msra.mxu3 %v15250_v9  ;;  %v15262_v9 = vld [vmem:[%s20190_s1 + $0x10b0] sm:$0xff] }
 0x682   :  { %8988 = vmatpush.bf16.msra.mxu0 %v15226_v26  ;;  %v15311_v26 = vld [vmem:[%s20190_s1 + $0x1238] sm:$0xff] }
 0x683   :  { %9007 = vmatpush.bf16.msra.mxu1 %v15234_v31  ;;  %9027 = vmatpush.bf16.msra.mxu2 %v15241_v27  ;;  %v13669_v31 = vld [vmem:[%s20191_s0 + $0x418] sm:$0xf0]  ;;  %v15270_v27 = vld [vmem:[%s20190_s1 + $0x10f0] sm:$0xff] }
 0x685   :  { %9046 = vmatpush.bf16.msra.mxu3 %v15249_v57  ;;  %v15182_v57 = vld [vmem:[%s20191_s0 + $0x42c] sm:$0xf0] }
 0x686   :  { %8989 = vmatpush.bf16.msra.mxu0 %v15225_v22  ;;  %v15280_v22 = vld [vmem:[%s20190_s1 + $0x1140] sm:$0xff] }
 0x687   :  { %9008 = vmatpush.bf16.msra.mxu1 %v15233_v5  ;;  %9028 = vmatpush.bf16.msra.mxu2 %v15240_v11  ;;  %v13691_v5 = vld [vmem:[%s20191_s0 + $0x3e0] sm:$0xf]  ;;  %v13668_v11 = vor.u32 %v15179_v15, %v13667_v24  ;;  %v13685_v24 = vld [vmem:[%s20191_s0 + $0x428] sm:$0xf0] }
 0x688   :  { %v13692_v44 = vor.u32 %v15182_v57, %v13691_v5  ;;  %v15312_v15 = vld [vmem:[%s20190_s1 + $0x1240] sm:$0xff]  ;;  %v15174_v5 = vld [vmem:[%s20191_s0 + $0x3f4] sm:$0xf] }
 0x689   :  { %9047 = vmatpush.bf16.msra.mxu3 %v15248_v61  ;;  %v15172_v61 = vld [vmem:[%s20191_s0 + $0x3e4] sm:$0xf] }
 0x68a   :  { %8990 = vmatpush.bf16.msra.mxu0 %v15224_v62  ;;  %v13672_v62 = vor.u32 %v15169_v42, %v13669_v31  ;;  %v13707_v31 = vld [vmem:[%s20191_s0 + $0x3f0] sm:$0xf] }
 0x68b   :  { %9009 = vmatpush.bf16.msra.mxu1 %v15232_v12  ;;  %9097 = vmatpush.bf16.msrb.mxu2 %v15279_v14  ;;  %v15261_v12 = vld [vmem:[%s20190_s1 + $0x10a8] sm:$0xff]  ;;  %v13693_v14 = vld [vmem:[%s20191_s0 + $0x430] sm:$0xf0] }
 0x68c   :  { %9029 = vmatmul.bf16.vlgmr.msra.gmra.mxu2 %v13676_v32  ;;  %v13696_v32 = vor.u32 %v15172_v61, %v13693_v14  ;;  %v15299_v61 = vld [vmem:[%s20190_s1 + $0x11d8] sm:$0xff]  ;;  %v15350_v14 = vld [vmem:[%s20190_s1 + $0x1370] sm:$0xff] }
 0x68d   :  { %9116 = vmatpush.bf16.msrb.mxu3 %v15287_v8  ;;  %v15310_v8 = vld [vmem:[%s20190_s1 + $0x1230] sm:$0xff] }
 0x68e   :  { %9048 = vmatmul.bf16.vlgmr.msra.gmra.mxu3 %v13680_v59  ;;  %v15268_v59 = vld [vmem:[%s20190_s1 + $0x10e0] sm:$0xff] }
 0x68f   :  { %9098 = vmatpush.bf16.msrb.mxu2 %v15278_v45  ;;  %v15318_v45 = vld [vmem:[%s20190_s1 + $0x1270] sm:$0xff] }
 0x691   :  { %9117 = vmatpush.bf16.msrb.mxu3 %v15286_v7  ;;  %v15309_v7 = vld [vmem:[%s20190_s1 + $0x1228] sm:$0xff] }
 0x693   :  { %9099 = vmatpush.bf16.msrb.mxu2 %v15277_v60  ;;  %v15259_v60 = vld [vmem:[%s20190_s1 + $0x1098] sm:$0xff] }
 0x695   :  { %9118 = vmatpush.bf16.msrb.mxu3 %v15285_v63  ;;  %v15308_v63 = vld [vmem:[%s20190_s1 + $0x1220] sm:$0xff] }
 0x697   :  { %9100 = vmatpush.bf16.msrb.mxu2 %v15276_v20  ;;  %v13747_v20 = vld [vmem:[%s20191_s0 + $0x468] sm:$0xf] }
 0x699   :  { %9119 = vmatpush.bf16.msrb.mxu3 %v15284_v3  ;;  %v15266_v3 = vld [vmem:[%s20190_s1 + $0x10d0] sm:$0xff] }
 0x69b   :  { %9101 = vmatpush.bf16.msrb.mxu2 %v15275_v30  ;;  %v15316_v30 = vld [vmem:[%s20190_s1 + $0x1260] sm:$0xff] }
 0x69c   :  { %9034 = vmatmul.bf16.gmra.mxu2 %v13756_v56  ;;  %v15202_v56 = vld [vmem:[%s20191_s0 + $0x4cc] sm:$0xf0] }
 0x69d   :  { %9120 = vmatpush.bf16.msrb.mxu3 %v15283_v55  ;;  %v15264_v55 = vld [vmem:[%s20190_s1 + $0x10c0] sm:$0xff] }
 0x69e   :  { %9053 = vmatmul.bf16.gmra.mxu3 %v13760_v49  ;;  %v15256_v49 = vld [vmem:[%s20190_s1 + $0x1080] sm:$0xff] }
 0x69f   :  { %9102 = vmatpush.bf16.msrb.mxu2 %v15274_v54  ;;  %v15303_v54 = vld [vmem:[%s20190_s1 + $0x11f8] sm:$0xff] }
 0x6a1   :  { %9121 = vmatpush.bf16.msrb.mxu3 %v15282_v25  ;;  %v15294_v25 = vld [vmem:[%s20190_s1 + $0x11b0] sm:$0xff] }
 0x6a3   :  { %9103 = vmatpush.bf16.msrb.mxu2 %v15273_v16  ;;  %v15302_v16 = vld [vmem:[%s20190_s1 + $0x11f0] sm:$0xff] }
 0x6a5   :  { %9122 = vmatpush.bf16.msrb.mxu3 %v15281_v13  ;;  %v15293_v13 = vld [vmem:[%s20190_s1 + $0x11a8] sm:$0xff] }
 0x6a7   :  { %9104 = vmatpush.bf16.msrb.mxu2 %v15272_v6  ;;  %v15301_v6 = vld [vmem:[%s20190_s1 + $0x11e8] sm:$0xff] }
 0x6a9   :  { %9123 = vmatpush.bf16.msrb.mxu3 %v15280_v22  ;;  %v15300_v22 = vld [vmem:[%s20190_s1 + $0x11e0] sm:$0xff] }
 0x6ab   :  { %9173 = vmatpush.bf16.msra.mxu2 %v15311_v26 }
 0x6ac   :  { %9105 = vmatmul.bf16.vlgmr.msrb.gmra.mxu2 %v13692_v44  ;;  %v15291_v44 = vld [vmem:[%s20190_s1 + $0x1198] sm:$0xff] }
 0x6ad   :  { %9192 = vmatpush.bf16.msra.mxu3 %v15319_v21  ;;  %v15290_v21 = vld [vmem:[%s20190_s1 + $0x1190] sm:$0xff] }
 0x6ae   :  { %9124 = vmatmul.bf16.vlgmr.msrb.gmra.mxu3 %v13696_v32  ;;  %v15341_v32 = vld [vmem:[%s20190_s1 + $0x1328] sm:$0xff] }
 0x6af   :  { %9174 = vmatpush.bf16.msra.mxu2 %v15310_v8  ;;  %v15349_v8 = vld [vmem:[%s20190_s1 + $0x1368] sm:$0xff] }
 0x6b1   :  { %9193 = vmatpush.bf16.msra.mxu3 %v15318_v45  ;;  %v15340_v45 = vld [vmem:[%s20190_s1 + $0x1320] sm:$0xff] }
 0x6b3   :  { %9175 = vmatpush.bf16.msra.mxu2 %v15309_v7  ;;  %v15201_v7 = vld [vmem:[%s20191_s0 + $0x4c4] sm:$0xf0] }
 0x6b7   :  { %9176 = vmatpush.bf16.msra.mxu2 %v15308_v63  ;;  %v15297_v63 = vld [vmem:[%s20190_s1 + $0x11c8] sm:$0xff] }
 0x6c8   :  { %v7095_v38 = vpop.f32.mrf.mxu0  ;;  %v7115_v28 = vpop.f32.mrf.mxu1 }
 0x6cc   :  { %v7137_v53 = vpop.f32.mrf.mxu2  ;;  %v7157_v19 = vpop.f32.mrf.mxu3 }
 0x6cd   :  { %v7138_v34 = vadd.f32 %v7137_v53, %v7095_v38  ;;  %v7158_v29 = vadd.f32 %v7157_v19, %v7115_v28  ;;  %v15267_v38 = vld [vmem:[%s20190_s1 + $0x10d8] sm:$0xff]  ;;  %v15317_v28 = vld [vmem:[%s20190_s1 + $0x1268] sm:$0xff] }
 0x6ce   :  { %v15199_v53 = vld [vmem:[%s20191_s0 + $0x4b4] sm:$0xf0]  ;;  %v15189_v19 = vld [vmem:[%s20191_s0 + $0x46c] sm:$0xf]  ;;  %9194 = vmatpush.bf16.msra.mxu3 %v15317_v28 }
 0x6cf   :  { %v15289_v28 = vld [vmem:[%s20190_s1 + $0x1188] sm:$0xff] }
 0x6d0   :  { %v7205_v10 = vpop.f32.mrf.mxu0  ;;  %v7225_v52 = vpop.f32.mrf.mxu1 }
 0x6d1   :  { %v7228_v1 = vadd.f32 %v7205_v10, %v7138_v34  ;;  %v7229_v43 = vadd.f32 %v7225_v52, %v7158_v29  ;;  %v15307_v10 = vld [vmem:[%s20190_s1 + $0x1218] sm:$0xff]  ;;  %v13748_v52 = vor.u32 %v15199_v53, %v13747_v20  ;;  %v13752_v34 = vor.u32 %v15189_v19, %v13749_v23  ;;  %v15257_v29 = vld [vmem:[%s20190_s1 + $0x1088] sm:$0xff]  ;;  %v15348_v19 = vld [vmem:[%s20190_s1 + $0x1360] sm:$0xff] }
 0x6d2   :  { %9195 = vmatpush.bf16.msra.mxu3 %v15316_v30  ;;  %9177 = vmatpush.bf16.msra.mxu2 %v15307_v10  ;;  %v13787_v23 = vld [vmem:[%s20191_s0 + $0x490] sm:$0xf]  ;;  %v15288_v30 = vld [vmem:[%s20190_s1 + $0x1180] sm:$0xff]  ;;  %v15327_v10 = vld [vmem:[%s20190_s1 + $0x12b8] sm:$0xff] }
 0x6d4   :  { %v7275_v39 = vpop.f32.mrf.mxu2  ;;  %v7295_v51 = vpop.f32.mrf.mxu3 }
 0x6d5   :  { %v7298_v58 = vadd.f32 %v7275_v39, %v7228_v1  ;;  %v7299_v48 = vadd.f32 %v7295_v51, %v7229_v43  ;;  %v13773_v1 = vld [vmem:[%s20191_s0 + $0x4d0] sm:$0xf0]  ;;  %v15295_v51 = vld [vmem:[%s20190_s1 + $0x11b8] sm:$0xff] }
 0x6d6   :  { %v13776_v43 = vor.u32 %v15192_v47, %v13773_v1  ;;  %v15306_v39 = vld [vmem:[%s20190_s1 + $0x1210] sm:$0xff] }
 0x6d7   :  { %v7307_v2 = vadd.f32 %v7303_v37, %v7298_v58  ;;  %v7308_v17 = vadd.f32 %v7304_v50, %v7299_v48  ;;  %v13772_v37 = vor.u32 %v15202_v56, %v13771_v33  ;;  %v15315_v50 = vld [vmem:[%s20190_s1 + $0x1258] sm:$0xff]  ;;  %9178 = vmatpush.bf16.msra.mxu2 %v15306_v39  ;;  %v15314_v58 = vld [vmem:[%s20190_s1 + $0x1250] sm:$0xff]  ;;  %v15305_v48 = vld [vmem:[%s20190_s1 + $0x1208] sm:$0xff] }
 0x6d8   :  { %9129 = vmatmul.bf16.gmra.mxu3 %v13776_v43  ;;  %v15296_v33 = vld [vmem:[%s20190_s1 + $0x11c0] sm:$0xff]  ;;  %v15194_v56 = vld [vmem:[%s20191_s0 + $0x494] sm:$0xf]  ;;  %v15333_v39 = vld [vmem:[%s20190_s1 + $0x12e8] sm:$0xff] }
 0x6d9   :  { %v7309_v4 = vmax.f32 %v7307_v2, 0.0  ;;  %v7310_v36 = vmax.f32 %v7308_v17, 0.0  ;;  %9110 = vmatmul.bf16.gmra.mxu2 %v13772_v37  ;;  %9196 = vmatpush.bf16.msra.mxu3 %v15315_v50  ;;  %v15313_v2 = vld [vmem:[%s20190_s1 + $0x1248] sm:$0xff]  ;;  %v15304_v17 = vld [vmem:[%s20190_s1 + $0x1200] sm:$0xff]  ;;  %v15347_v37 = vld [vmem:[%s20190_s1 + $0x1358] sm:$0xff] }
 0x6da   :  { %v15338_v47 = vld [vmem:[%s20190_s1 + $0x1310] sm:$0xff] }
 0x6db   :  { %7397 = vmatmul.f32.vlgmr.msrb.gmra.mxu0 %v7309_v4  ;;  %7417 = vmatmul.f32.vlgmr.msrb.gmra.mxu1 %v7310_v36  ;;  %v15181_v4 = vld [vmem:[%s20191_s0 + $0x424] sm:$0xf0]  ;;  %v15171_v36 = vld [vmem:[%s20191_s0 + $0x3dc] sm:$0xf]  ;;  %v15326_v1 = vld [vmem:[%s20190_s1 + $0x12b0] sm:$0xff] }
 0x6dc   :  { %9059 = vmatpush.bf16.msrb.mxu0 %v15263_v41  ;;  %9078 = vmatpush.bf16.msrb.mxu1 %v15271_v18  ;;  %v13683_v41 = vld [vmem:[%s20191_s0 + $0x3d8] sm:$0xf]  ;;  %v13688_v26 = vor.u32 %v15171_v36, %v13685_v24  ;;  %v15334_v43 = vld [vmem:[%s20190_s1 + $0x12f0] sm:$0xff]  ;;  %v13723_v36 = vld [vmem:[%s20191_s0 + $0x400] sm:$0xf] }
 0x6dd   :  { %9197 = vmatpush.bf16.msra.mxu3 %v15314_v58  ;;  %9179 = vmatpush.bf16.msra.mxu2 %v15305_v48  ;;  %v15343_v18 = vld [vmem:[%s20190_s1 + $0x1338] sm:$0xff]  ;;  %v13684_v42 = vor.u32 %v15181_v4, %v13683_v41  ;;  %v15346_v50 = vld [vmem:[%s20190_s1 + $0x1350] sm:$0xff]  ;;  %v15173_v58 = vld [vmem:[%s20191_s0 + $0x3ec] sm:$0xf] }
 0x6de   :  { %v13701_v48 = vld [vmem:[%s20191_s0 + $0x438] sm:$0xf0]  ;;  %v15344_v4 = vld [vmem:[%s20190_s1 + $0x1340] sm:$0xff]  ;;  %v15186_v24 = vld [vmem:[%s20191_s0 + $0x44c] sm:$0xf0] }
 0x6e0   :  { %9060 = vmatpush.bf16.msrb.mxu0 %v15262_v9  ;;  %9079 = vmatpush.bf16.msrb.mxu1 %v15270_v27  ;;  %v15184_v9 = vld [vmem:[%s20191_s0 + $0x43c] sm:$0xf0] }
 0x6e1   :  { %9198 = vmatpush.bf16.msra.mxu3 %v15313_v2  ;;  %9180 = vmatpush.bf16.msra.mxu2 %v15304_v17  ;;  %v15292_v27 = vld [vmem:[%s20190_s1 + $0x11a0] sm:$0xff]  ;;  %v13708_v57 = vor.u32 %v15184_v9, %v13707_v31 }
 0x6e2   :  { %v15324_v2 = vld [vmem:[%s20190_s1 + $0x12a0] sm:$0xff] }
 0x6e3   :  { %8991 = vmatmul.bf16.vlgmr.msra.gmra.mxu0 %v13668_v11  ;;  %9010 = vmatmul.bf16.vlgmr.msra.gmra.mxu1 %v13672_v62  ;;  %v13709_v11 = vld [vmem:[%s20191_s0 + $0x440] sm:$0xf0] }
 0x6e4   :  { %9061 = vmatpush.bf16.msrb.mxu0 %v15261_v12  ;;  %9080 = vmatpush.bf16.msrb.mxu1 %v15269_v0  ;;  %v13712_v62 = vor.u32 %v15174_v5, %v13709_v11  ;;  %v15351_v12 = vld [vmem:[%s20190_s1 + $0x1378] sm:$0xff]  ;;  %v15342_v0 = vld [vmem:[%s20190_s1 + $0x1330] sm:$0xff]  ;;  %v15332_v17 = vld [vmem:[%s20190_s1 + $0x12e0] sm:$0xff] }
 0x6e5   :  { %9249 = vmatpush.bf16.msrb.mxu2 %v15343_v18  ;;  %9199 = vmatpush.bf16.msra.mxu3 %v15312_v15  ;;  %v13704_v18 = vor.u32 %v15173_v58, %v13701_v48  ;;  %v15331_v15 = vld [vmem:[%s20190_s1 + $0x12d8] sm:$0xff]  ;;  %v15322_v5 = vld [vmem:[%s20190_s1 + $0x1290] sm:$0xff]  ;;  %v15321_v11 = vld [vmem:[%s20190_s1 + $0x1288] sm:$0xff] }
 0x6e6   :  { %v15362_v58 = vld [vmem:[%s20190_s1 + $0x13d0] sm:$0xff]  ;;  %v15353_v48 = vld [vmem:[%s20190_s1 + $0x1388] sm:$0xff] }
 0x6e8   :  { %9062 = vmatpush.bf16.msrb.mxu0 %v15260_v40  ;;  %9081 = vmatpush.bf16.msrb.mxu1 %v15268_v59  ;;  %v15298_v40 = vld [vmem:[%s20190_s1 + $0x11d0] sm:$0xff]  ;;  %v13763_v59 = vld [vmem:[%s20191_s0 + $0x478] sm:$0xf] }
 0x6e9   :  { %9181 = vmatmul.bf16.vlgmr.msra.gmra.mxu2 %v13708_v57  ;;  %9200 = vmatmul.bf16.vlgmr.msra.gmra.mxu3 %v13712_v62  ;;  %v13764_v20 = vor.u32 %v15201_v7, %v13763_v59  ;;  %v15330_v57 = vld [vmem:[%s20190_s1 + $0x12d0] sm:$0xff]  ;;  %v15329_v62 = vld [vmem:[%s20190_s1 + $0x12c8] sm:$0xff]  ;;  %v15328_v59 = vld [vmem:[%s20190_s1 + $0x12c0] sm:$0xff] }
 0x6ea   :  { %9268 = vmatpush.bf16.msrb.mxu3 %v15351_v12  ;;  %9250 = vmatpush.bf16.msrb.mxu2 %v15342_v0  ;;  %v13779_v12 = vld [vmem:[%s20191_s0 + $0x488] sm:$0xf]  ;;  %v15359_v7 = vld [vmem:[%s20190_s1 + $0x13b8] sm:$0xff] }
 0x6ec   :  { %9063 = vmatpush.bf16.msrb.mxu0 %v15259_v60  ;;  %9082 = vmatpush.bf16.msrb.mxu1 %v15267_v38  ;;  %v15191_v60 = vld [vmem:[%s20191_s0 + $0x47c] sm:$0xf]  ;;  %v13765_v38 = vld [vmem:[%s20191_s0 + $0x4c8] sm:$0xf0] }
 0x6ed   :  { %v13768_v53 = vor.u32 %v15191_v60, %v13765_v38  ;;  %v15367_v60 = vld [vmem:[%s20190_s1 + $0x13f8] sm:$0xff]  ;;  %v13803_v38 = vld [vmem:[%s20191_s0 + $0x4a0] sm:$0xf] }
 0x6ee   :  { %9269 = vmatpush.bf16.msrb.mxu3 %v15350_v14  ;;  %9251 = vmatpush.bf16.msrb.mxu2 %v15341_v32  ;;  %v15193_v14 = vld [vmem:[%s20191_s0 + $0x48c] sm:$0xf]  ;;  %v13781_v32 = vld [vmem:[%s20191_s0 + $0x4d8] sm:$0xf0] }
 0x6ef   :  { %v8954_v9 = vpop.f32.mrf.mxu2 }
 0x6f0   :  { %9064 = vmatpush.bf16.msrb.mxu0 %v15258_v46  ;;  %9083 = vmatpush.bf16.msrb.mxu1 %v15266_v3  ;;  %v15204_v46 = vld [vmem:[%s20191_s0 + $0x4dc] sm:$0xf0]  ;;  %v15339_v3 = vld [vmem:[%s20190_s1 + $0x1318] sm:$0xff] }
 0x6f2   :  { %9270 = vmatpush.bf16.msrb.mxu3 %v15349_v8  ;;  %9252 = vmatpush.bf16.msrb.mxu2 %v15340_v45  ;;  %v13784_v45 = vor.u32 %v15193_v14, %v13781_v32 }
 0x6f3   :  { %8996 = vmatmul.bf16.gmra.mxu0 %v13748_v52  ;;  %9015 = vmatmul.bf16.gmra.mxu1 %v13752_v34  ;;  %v15335_v52 = vld [vmem:[%s20190_s1 + $0x12f8] sm:$0xff]  ;;  %v13789_v34 = vld [vmem:[%s20191_s0 + $0x4e0] sm:$0xf0] }
 0x6f4   :  { %9065 = vmatpush.bf16.msrb.mxu0 %v15257_v29  ;;  %9084 = vmatpush.bf16.msrb.mxu1 %v15265_v35  ;;  %v13788_v29 = vor.u32 %v15204_v46, %v13787_v23  ;;  %v13792_v35 = vor.u32 %v15194_v56, %v13789_v34  ;;  %v15358_v23 = vld [vmem:[%s20190_s1 + $0x13b0] sm:$0xff]  ;;  %v15365_v56 = vld [vmem:[%s20190_s1 + $0x13e8] sm:$0xff] }
 0x6f5   :  { %v15366_v46 = vld [vmem:[%s20190_s1 + $0x13f0] sm:$0xff]  ;;  %v15185_v34 = vld [vmem:[%s20191_s0 + $0x444] sm:$0xf0] }
 0x6f6   :  { %9271 = vmatpush.bf16.msrb.mxu3 %v15348_v19  ;;  %9253 = vmatpush.bf16.msrb.mxu2 %v15339_v3 }
 0x6f7   :  { %v8956_v0 = vpop.f32.mrf.mxu2 }
 0x6f8   :  { %9066 = vmatpush.bf16.msrb.mxu0 %v15256_v49  ;;  %9085 = vmatpush.bf16.msrb.mxu1 %v15264_v55  ;;  %v15337_v49 = vld [vmem:[%s20190_s1 + $0x1308] sm:$0xff] }
 0x6f9   :  { %9186 = vmatmul.bf16.gmra.mxu2 %v13788_v29  ;;  %9205 = vmatmul.bf16.gmra.mxu3 %v13792_v35  ;;  %v15325_v55 = vld [vmem:[%s20190_s1 + $0x12a8] sm:$0xff]  ;;  %v15175_v29 = vld [vmem:[%s20191_s0 + $0x3fc] sm:$0xf] }
 0x6fa   :  { %9272 = vmatpush.bf16.msrb.mxu3 %v15347_v37  ;;  %9254 = vmatpush.bf16.msrb.mxu2 %v15338_v47  ;;  %v13717_v35 = vld [vmem:[%s20191_s0 + $0x448] sm:$0xf0]  ;;  %v15356_v37 = vld [vmem:[%s20190_s1 + $0x13a0] sm:$0xff] }
 0x6fb   :  { %v15364_v47 = vld [vmem:[%s20190_s1 + $0x13e0] sm:$0xff] }
 0x6fc   :  { %9135 = vmatpush.bf16.msra.mxu0 %v15295_v51  ;;  %9154 = vmatpush.bf16.msra.mxu1 %v15303_v54  ;;  %v13699_v51 = vld [vmem:[%s20191_s0 + $0x3e8] sm:$0xf]  ;;  %v15183_v54 = vld [vmem:[%s20191_s0 + $0x434] sm:$0xf0] }
 0x6fd   :  { %v13700_v41 = vor.u32 %v15183_v54, %v13699_v51  ;;  %v15354_v54 = vld [vmem:[%s20190_s1 + $0x1390] sm:$0xff] }
 0x6fe   :  { %9273 = vmatpush.bf16.msrb.mxu3 %v15346_v50  ;;  %9255 = vmatpush.bf16.msrb.mxu2 %v15337_v49 }
 0x6ff   :  { %v8959_v3 = vpop.f32.mrf.mxu2 }
 0x700   :  { %9136 = vmatpush.bf16.msra.mxu0 %v15294_v25  ;;  %9155 = vmatpush.bf16.msra.mxu1 %v15302_v16  ;;  %v15345_v25 = vld [vmem:[%s20190_s1 + $0x1348] sm:$0xff]  ;;  %v15336_v16 = vld [vmem:[%s20190_s1 + $0x1300] sm:$0xff] }
 0x702   :  { %9274 = vmatpush.bf16.msrb.mxu3 %v15345_v25  ;;  %9256 = vmatpush.bf16.msrb.mxu2 %v15336_v16  ;;  %v15361_v25 = vld [vmem:[%s20190_s1 + $0x13c8] sm:$0xff]  ;;  %v13795_v16 = vld [vmem:[%s20191_s0 + $0x498] sm:$0xf] }
 0x703   :  { %9067 = vmatmul.bf16.vlgmr.msrb.gmra.mxu0 %v13684_v42  ;;  %9086 = vmatmul.bf16.vlgmr.msrb.gmra.mxu1 %v13688_v26  ;;  %v13725_v42 = vld [vmem:[%s20191_s0 + $0x450] sm:$0xf0]  ;;  %v13724_v26 = vor.u32 %v15186_v24, %v13723_v36 }
 0x704   :  { %9137 = vmatpush.bf16.msra.mxu0 %v15293_v13  ;;  %9156 = vmatpush.bf16.msra.mxu1 %v15301_v6  ;;  %v15176_v13 = vld [vmem:[%s20191_s0 + $0x404] sm:$0xf]  ;;  %v15323_v6 = vld [vmem:[%s20190_s1 + $0x1298] sm:$0xff] }
 0x705   :  { %v13728_v31 = vor.u32 %v15176_v13, %v13725_v42  ;;  %v16008_v13 = vld [vmem:[%s20196_s6 + $0x2] ss:$0 sm:$0xff] }
 0x706   :  { %9275 = vmatpush.bf16.msrb.mxu3 %v15344_v4  ;;  %v15360_v4 = vld [vmem:[%s20190_s1 + $0x13c0] sm:$0xff] }
 0x707   :  { %v8961_v50 = vpop.f32.mrf.mxu2 }
 0x708   :  { %9138 = vmatpush.bf16.msra.mxu0 %v15292_v27  ;;  %9157 = vmatpush.bf16.msra.mxu1 %v15300_v22  ;;  %v8973_v27 = vpop.f32.mrf.mxu3 }
 0x709   :  { %v19740_v22 = vadd.f32 %v8973_v27, %v8954_v9  ;;  %9257 = vmatmul.bf16.vlgmr.msrb.gmra.mxu2 %v13724_v26  ;;  %9276 = vmatmul.bf16.vlgmr.msrb.gmra.mxu3 %v13728_v31  ;;  %v13731_v9 = vld [vmem:[%s20191_s0 + $0x408] sm:$0xf]  ;;  %v15187_v27 = vld [vmem:[%s20191_s0 + $0x454] sm:$0xf0] }
 0x70c   :  { %9139 = vmatpush.bf16.msra.mxu0 %v15291_v44  ;;  %9158 = vmatpush.bf16.msra.mxu1 %v15299_v61  ;;  %v15203_v61 = vld [vmem:[%s20191_s0 + $0x4d4] sm:$0xf0] }
 0x70d   :  { %v13780_v8 = vor.u32 %v15203_v61, %v13779_v12 }
 0x70f   :  { %v9030_v26 = vpop.f32.mrf.mxu2 }
 0x710   :  { %9140 = vmatpush.bf16.msra.mxu0 %v15290_v21  ;;  %9159 = vmatpush.bf16.msra.mxu1 %v15298_v40  ;;  %v8975_v44 = vpop.f32.mrf.mxu3  ;;  %v15320_v40 = vld [vmem:[%s20190_s1 + $0x1280] sm:$0xff] }
 0x711   :  { %v19766_v21 = vadd.f32 %v8975_v44, %v8956_v0 }
 0x713   :  { %9072 = vmatmul.bf16.gmra.mxu0 %v13764_v20  ;;  %9091 = vmatmul.bf16.gmra.mxu1 %v13768_v53  ;;  %v13805_v20 = vld [vmem:[%s20191_s0 + $0x4f0] sm:$0xf0] }
 0x714   :  { %9141 = vmatpush.bf16.msra.mxu0 %v15289_v28  ;;  %9160 = vmatpush.bf16.msra.mxu1 %v15297_v63  ;;  %v15206_v28 = vld [vmem:[%s20191_s0 + $0x4ec] sm:$0xf0]  ;;  %v15196_v63 = vld [vmem:[%s20191_s0 + $0x4a4] sm:$0xf] }
 0x715   :  { %v13804_v53 = vor.u32 %v15206_v28, %v13803_v38  ;;  %v13808_v19 = vor.u32 %v15196_v63, %v13805_v20  ;;  %v13811_v28 = vld [vmem:[%s20191_s0 + $0x4a8] sm:$0xf]  ;;  %v15197_v63 = vld [vmem:[%s20191_s0 + $0x4ac] sm:$0xf]  ;;  %v13813_v20 = vld [vmem:[%s20191_s0 + $0x4f8] sm:$0xf0] }
 0x717   :  { %v9032_v32 = vpop.f32.mrf.mxu2 }
 0x718   :  { %9142 = vmatpush.bf16.msra.mxu0 %v15288_v30  ;;  %9161 = vmatpush.bf16.msra.mxu1 %v15296_v33  ;;  %v8978_v30 = vpop.f32.mrf.mxu3  ;;  %v15357_v33 = vld [vmem:[%s20190_s1 + $0x13a8] sm:$0xff] }
 0x719   :  { %9262 = vmatmul.bf16.gmra.mxu2 %v13804_v53  ;;  %9281 = vmatmul.bf16.gmra.mxu3 %v13808_v19 }
 0x71c   :  { %9211 = vmatpush.bf16.msrb.mxu0 %v15327_v10  ;;  %9230 = vmatpush.bf16.msrb.mxu1 %v15335_v52  ;;  %v19804_v10 = vadd.f32 %v8978_v30, %v8959_v3  ;;  %v13715_v52 = vld [vmem:[%s20191_s0 + $0x3f8] sm:$0xf] }
 0x71f   :  { %v9035_v19 = vpop.f32.mrf.mxu2 }
 0x720   :  { %9212 = vmatpush.bf16.msrb.mxu0 %v15326_v1  ;;  %9231 = vmatpush.bf16.msrb.mxu1 %v15334_v43  ;;  %v13716_v1 = vor.u32 %v15185_v34, %v13715_v52  ;;  %v13720_v43 = vor.u32 %v15175_v29, %v13717_v35  ;;  %v8980_v49 = vpop.f32.mrf.mxu3 }
 0x721   :  { %v19830_v51 = vadd.f32 %v8980_v49, %v8961_v50 }
 0x723   :  { %9143 = vmatmul.bf16.vlgmr.msra.gmra.mxu0 %v13700_v41  ;;  %9162 = vmatmul.bf16.vlgmr.msra.gmra.mxu1 %v13704_v18  ;;  %v13797_v41 = vld [vmem:[%s20191_s0 + $0x4e8] sm:$0xf0]  ;;  %v15352_v18 = vld [vmem:[%s20190_s1 + $0x1380] sm:$0xff] }
 0x724   :  { %9213 = vmatpush.bf16.msrb.mxu0 %v15325_v55  ;;  %9232 = vmatpush.bf16.msrb.mxu1 %v15333_v39  ;;  %v15355_v55 = vld [vmem:[%s20190_s1 + $0x1398] sm:$0xff] }
 0x725   :  { %v15363_v39 = vld [vmem:[%s20190_s1 + $0x13d8] sm:$0xff] }
 0x727   :  { %v9037_v35 = vpop.f32.mrf.mxu2 }
 0x728   :  { %9214 = vmatpush.bf16.msrb.mxu0 %v15324_v2  ;;  %9233 = vmatpush.bf16.msrb.mxu1 %v15332_v17  ;;  %v15205_v2 = vld [vmem:[%s20191_s0 + $0x4e4] sm:$0xf0]  ;;  %v15195_v17 = vld [vmem:[%s20191_s0 + $0x49c] sm:$0xf] }
 0x729   :  { %v13796_v36 = vor.u32 %v15205_v2, %v13795_v16  ;;  %v13800_v24 = vor.u32 %v15195_v17, %v13797_v41 }
 0x72c   :  { %9215 = vmatpush.bf16.msrb.mxu0 %v15323_v6  ;;  %9234 = vmatpush.bf16.msrb.mxu1 %v15331_v15 }
 0x730   :  { %9216 = vmatpush.bf16.msrb.mxu0 %v15322_v5  ;;  %9235 = vmatpush.bf16.msrb.mxu1 %v15330_v57  ;;  %v15177_v5 = vld [vmem:[%s20191_s0 + $0x40c] sm:$0xf]  ;;  %v13733_v57 = vld [vmem:[%s20191_s0 + $0x458] sm:$0xf0] }
 0x731   :  { %v13736_v12 = vor.u32 %v15177_v5, %v13733_v57 }
 0x733   :  { %9148 = vmatmul.bf16.gmra.mxu0 %v13780_v8  ;;  %9167 = vmatmul.bf16.gmra.mxu1 %v13784_v45 }
 0x734   :  { %9217 = vmatpush.bf16.msrb.mxu0 %v15321_v11  ;;  %9236 = vmatpush.bf16.msrb.mxu1 %v15329_v62  ;;  %v9049_v11 = vpop.f32.mrf.mxu3  ;;  %v13732_v62 = vor.u32 %v15187_v27, %v13731_v9 }
 0x738   :  { %9218 = vmatpush.bf16.msrb.mxu0 %v15320_v40  ;;  %9237 = vmatpush.bf16.msrb.mxu1 %v15328_v59 }
 0x73c   :  { %9287 = vmatpush.bf16.msra.mxu0 %v15359_v7  ;;  %9306 = vmatpush.bf16.msra.mxu1 %v15367_v60  ;;  %v9051_v8 = vpop.f32.mrf.mxu3 }
 0x740   :  { %9288 = vmatpush.bf16.msra.mxu0 %v15358_v23  ;;  %9307 = vmatpush.bf16.msra.mxu1 %v15366_v46  ;;  %v13816_v46 = vor.u32 %v15197_v63, %v13813_v20  ;;  %v15976_v63 = vld [vmem:[%s20192_s2 + $0x190] sm:$0xff]  }
 0x741   :  { %v15763_v20 = vunpack.c.h.bf16 %v15976_v63 }
 0x743   :  { %9219 = vmatmul.bf16.vlgmr.msrb.gmra.mxu0 %v13716_v1  ;;  %9238 = vmatmul.bf16.vlgmr.msrb.gmra.mxu1 %v13720_v43 }
 0x744   :  { %9289 = vmatpush.bf16.msra.mxu0 %v15357_v33  ;;  %9308 = vmatpush.bf16.msra.mxu1 %v15365_v56  ;;  %v9054_v56 = vpop.f32.mrf.mxu3 }
 0x748   :  { %9290 = vmatpush.bf16.msra.mxu0 %v15356_v37  ;;  %9309 = vmatpush.bf16.msra.mxu1 %v15364_v47 }
 0x74c   :  { %9291 = vmatpush.bf16.msra.mxu0 %v15355_v55  ;;  %9310 = vmatpush.bf16.msra.mxu1 %v15363_v39  ;;  %v9056_v50 = vpop.f32.mrf.mxu3 }
 0x750   :  { %9292 = vmatpush.bf16.msra.mxu0 %v15354_v54  ;;  %9311 = vmatpush.bf16.msra.mxu1 %v15362_v58 }
 0x753   :  { %9224 = vmatmul.bf16.gmra.mxu0 %v13796_v36  ;;  %9243 = vmatmul.bf16.gmra.mxu1 %v13800_v24 }
 0x754   :  { %9293 = vmatpush.bf16.msra.mxu0 %v15353_v48  ;;  %9312 = vmatpush.bf16.msra.mxu1 %v15361_v25  ;;  %v9106_v48 = vpop.f32.mrf.mxu2  ;;  %v19896_v25 = vpop.f32.mrf.mxu3 }
 0x758   :  { %9294 = vmatpush.bf16.msra.mxu0 %v15352_v18  ;;  %9313 = vmatpush.bf16.msra.mxu1 %v15360_v4  ;;  %v7398_v6 = vpop.f32.mrf.mxu0  ;;  %v7418_v15 = vpop.f32.mrf.mxu1 }
 0x759   :  { %v7399_v42 = vadd.f32 %v16008_v13, %v7398_v6 }
 0x75b   :  { %v7419_v31 = vadd.f32 %v7418_v15, %v7399_v42 }
 0x75c   :  { %v19900_v18 = vpop.f32.mrf.mxu2  ;;  %v19902_v4 = vpop.f32.mrf.mxu3 }
 0x75d   :  { %13296 = vst [vmem:[%s20197_s7 + $0x4] sm:$0x3] %v7419_v31 }
 0x760   :  { %v8992_v0 = vpop.f32.mrf.mxu0  ;;  %v9011_v44 = vpop.f32.mrf.mxu1 }
 0x761   :  { %v8993_v61 = vadd.f32 %v8992_v0, %v19740_v22  ;;  %v15207_v22 = vld [vmem:[%s20191_s0 + $0x4f4] sm:$0xf0] }
 0x762   :  { %v13812_v23 = vor.u32 %v15207_v22, %v13811_v28 }
 0x763   :  { %v9012_v14 = vadd.f32 %v9011_v44, %v8993_v61  ;;  %9295 = vmatmul.bf16.vlgmr.msra.gmra.mxu0 %v13732_v62  ;;  %9314 = vmatmul.bf16.vlgmr.msra.gmra.mxu1 %v13736_v12 }
 0x764   :  { %v19906_v6 = vpop.f32.mrf.mxu2 }
 0x765   :  { %v9031_v40 = vadd.f32 %v9030_v26, %v9012_v14  ;;  %v19908_v26 = vpop.f32.mrf.mxu3 }
 0x767   :  { %v9050_v59 = vadd.f32 %v9049_v11, %v9031_v40  ;;  %v15981_v40 = vld [vmem:[%s20192_s2 + $0x1b8] sm:$0xff]  }
 0x768   :  { %v8994_v45 = vpop.f32.mrf.mxu0  ;;  %v9013_v7 = vpop.f32.mrf.mxu1  ;;  %v15782_v22 = vunpack.c.l.bf16 %v15981_v40 }
 0x769   :  { %v8995_v60 = vadd.f32 %v8994_v45, %v19766_v21 }
 0x76b   :  { %v9014_v38 = vadd.f32 %v9013_v7, %v8995_v60 }
 0x76c   :  { %v19912_v27 = vpop.f32.mrf.mxu2 }
 0x76d   :  { %v9033_v53 = vadd.f32 %v9032_v32, %v9014_v38  ;;  %v19916_v11 = vpop.f32.mrf.mxu3 }
 0x76f   :  { %v9052_v21 = vadd.f32 %v9051_v8, %v9033_v53  ;;  %v15977_v8 = vld [vmem:[%s20192_s2 + $0x198] sm:$0xff]   ;;  %v15980_v53 = vld [vmem:[%s20192_s2 + $0x1b0] sm:$0xff]  }
 0x770   :  { %v8997_v3 = vpop.f32.mrf.mxu0  ;;  %v9016_v30 = vpop.f32.mrf.mxu1  ;;  %v15767_v7 = vunpack.c.h.bf16 %v15977_v8  ;;  %v15766_v28 = vunpack.c.l.bf16 %v15977_v8 }
 0x771   :  { %v8998_v33 = vadd.f32 %v8997_v3, %v19804_v10  ;;  %v15975_v3 = vld [vmem:[%s20192_s2 + $0x188] sm:$0xff]  }
 0x772   :  { %9397 = vmatpush.msra.mxu3 %v15767_v7 }
 0x773   :  { %v9017_v52 = vadd.f32 %v9016_v30, %v8998_v33  ;;  %9300 = vmatmul.bf16.gmra.mxu0 %v13812_v23  ;;  %9319 = vmatmul.bf16.gmra.mxu1 %v13816_v46  ;;  %v15762_v23 = vunpack.c.l.bf16 %v15976_v63  ;;  %v15778_v46 = vunpack.c.l.bf16 %v15980_v53  ;;  %v15759_v33 = vunpack.c.h.bf16 %v15975_v3 }
 0x774   :  { %v19922_v0 = vpop.f32.mrf.mxu2  ;;  %9398 = vmatpush.msra.mxu3 %v15766_v28 }
 0x775   :  { %v9036_v34 = vadd.f32 %v9035_v19, %v9017_v52  ;;  %v19924_v44 = vpop.f32.mrf.mxu3  ;;  %v15779_v19 = vunpack.c.h.bf16 %v15980_v53  ;;  %v15982_v53 = vld [vmem:[%s20192_s2 + $0x1c0] sm:$0xff]  }
 0x776   :  { %9399 = vmatpush.msra.mxu3 %v15763_v20 }
 0x777   :  { %v9055_v29 = vadd.f32 %v9054_v56, %v9036_v34  ;;  %v15979_v56 = vld [vmem:[%s20192_s2 + $0x1a8] sm:$0xff]  }
 0x778   :  { %v8999_v37 = vpop.f32.mrf.mxu0  ;;  %v9018_v47 = vpop.f32.mrf.mxu1  ;;  %9400 = vmatpush.msra.mxu3 %v15762_v23 }
 0x779   :  { %v9000_v1 = vadd.f32 %v8999_v37, %v19830_v51  ;;  %v15758_v37 = vunpack.c.l.bf16 %v15975_v3 }
 0x77a   :  { %9401 = vmatpush.msra.mxu3 %v15759_v33 }
 0x77b   :  { %v9019_v43 = vadd.f32 %v9018_v47, %v9000_v1  ;;  %v15774_v47 = vunpack.c.l.bf16 %v15979_v56  ;;  %v15974_v1 = vld [vmem:[%s20192_s2 + $0x180] sm:$0xff]  }
 0x77c   :  { %v19930_v32 = vpop.f32.mrf.mxu2  ;;  %9402 = vmatpush.msra.mxu3 %v15758_v37 }
 0x77d   :  { %v9038_v49 = vadd.f32 %v9037_v35, %v9019_v43  ;;  %v19938_v45 = vpop.f32.mrf.mxu3 }
 0x77f   :  { %v9057_v55 = vadd.f32 %v9056_v50, %v9038_v49  ;;  %v15755_v50 = vunpack.c.h.bf16 %v15974_v1  ;;  %v15978_v49 = vld [vmem:[%s20192_s2 + $0x1a0] sm:$0xff]  }
 0x780   :  { %v9068_v39 = vpop.f32.mrf.mxu0  ;;  %v9087_v54 = vpop.f32.mrf.mxu1 }
 0x781   :  { %v9069_v58 = vadd.f32 %v9068_v39, %v9050_v59  ;;  %v15783_v59 = vunpack.c.h.bf16 %v15981_v40  ;;  %9403 = vmatpush.msra.mxu3 %v15755_v50  ;;  %v15989_v40 = vld [vmem:[%s20192_s2 + $0x1f8] sm:$0xff]  }
 0x782   :  { %v15815_v8 = vunpack.c.h.bf16 %v15989_v40  ;;  %v15814_v20 = vunpack.c.l.bf16 %v15989_v40 }
 0x783   :  { %v9088_v10 = vadd.f32 %v9087_v54, %v9069_v58  ;;  %9374 = vmatpush.msra.mxu2 %v15783_v59  ;;  %v15754_v54 = vunpack.c.l.bf16 %v15974_v1  ;;  %v15770_v58 = vunpack.c.l.bf16 %v15978_v49 }
 0x785   :  { %9375 = vmatpush.msra.mxu2 %v15782_v22  ;;  %v9107_v30 = vadd.f32 %v9106_v48, %v9088_v10  ;;  %v19960_v35 = vpop.f32.mrf.mxu3  ;;  %v15985_v48 = vld [vmem:[%s20192_s2 + $0x1d8] sm:$0xff]   ;;  %9404 = vmatpush.msra.mxu3 %v15754_v54 }
 0x787   :  { %9376 = vmatpush.msra.mxu2 %v15779_v19  ;;  %v9126_v43 = vadd.f32 %v19896_v25, %v9107_v30  ;;  %9478 = vmatpush.msrb.mxu3 %v15815_v8  ;;  %v15786_v30 = vunpack.c.l.bf16 %v15982_v53 }
 0x788   :  { %v9070_v16 = vpop.f32.mrf.mxu0  ;;  %v9089_v2 = vpop.f32.mrf.mxu1 }
 0x789   :  { %v9071_v17 = vadd.f32 %v9070_v16, %v9052_v21  ;;  %v19950_v21 = vpop.f32.mrf.mxu2  ;;  %9377 = vmatpush.msra.mxu2 %v15778_v46  ;;  %v15799_v16 = vunpack.c.h.bf16 %v15985_v48  ;;  %9479 = vmatpush.msrb.mxu3 %v15814_v20 }
 0x78b   :  { %v19898_v41 = vadd.f32 %v9089_v2, %v9071_v17 }
 0x78d   :  { %v9109_v10 = vadd.f32 %v19900_v18, %v19898_v41 }
 0x790   :  { %v9073_v51 = vpop.f32.mrf.mxu0  ;;  %v9092_v36 = vpop.f32.mrf.mxu1 }
 0x791   :  { %v9074_v24 = vadd.f32 %v9073_v51, %v9055_v29  ;;  %v15775_v29 = vunpack.c.h.bf16 %v15979_v56  ;;  %v19974_v25 = vpop.f32.mrf.mxu2  ;;  %v15987_v56 = vld [vmem:[%s20192_s2 + $0x1e8] sm:$0xff]  }
 0x792   :  { %v15806_v1 = vunpack.c.l.bf16 %v15987_v56 }
 0x793   :  { %v19904_v13 = vadd.f32 %v9092_v36, %v9074_v24  ;;  %9378 = vmatpush.msra.mxu2 %v15775_v29  ;;  %v15798_v36 = vunpack.c.l.bf16 %v15985_v48  ;;  %v15984_v24 = vld [vmem:[%s20192_s2 + $0x1d0] sm:$0xff]   ;;  %v15807_v29 = vunpack.c.h.bf16 %v15987_v56 }
 0x794   :  { %v15795_v41 = vunpack.c.h.bf16 %v15984_v24 }
 0x795   :  { %9379 = vmatpush.msra.mxu2 %v15774_v47 }
 0x798   :  { %v9075_v15 = vpop.f32.mrf.mxu0  ;;  %v9094_v42 = vpop.f32.mrf.mxu1 }
 0x799   :  { %v9076_v31 = vadd.f32 %v9075_v15, %v9057_v55  ;;  %v15771_v55 = vunpack.c.h.bf16 %v15978_v49  ;;  %v9128_v15 = vadd.f32 %v19902_v4, %v9109_v10  ;;  %v9112_v4 = vadd.f32 %v19906_v6, %v19904_v13  ;;  %v9258_v22 = vpop.f32.mrf.mxu2  ;;  %v15988_v13 = vld [vmem:[%s20192_s2 + $0x1f0] sm:$0xff]  }
 0x79a   :  { %v15810_v33 = vunpack.c.l.bf16 %v15988_v13 }
 0x79b   :  { %v19910_v9 = vadd.f32 %v9094_v42, %v9076_v31  ;;  %9380 = vmatpush.msra.mxu2 %v15771_v55  ;;  %v19983_v42 = vpop.f32.mrf.mxu3  ;;  %v9131_v6 = vadd.f32 %v19908_v26, %v9112_v4 }
 0x79d   :  { %9381 = vmatpush.msra.mxu2 %v15770_v58  ;;  %v9114_v26 = vadd.f32 %v19912_v27, %v19910_v9 }
 0x79f   :  { %9437 = vmatpush.msrb.mxu2 %v15799_v16  ;;  %v9133_v50 = vadd.f32 %v19916_v11, %v9114_v26 }
 0x7a0   :  { %v9144_v5 = vpop.f32.mrf.mxu0  ;;  %v19914_v57 = vpop.f32.mrf.mxu1 }
 0x7a1   :  { %v9145_v39 = vadd.f32 %v9144_v5, %v9126_v43  ;;  %9438 = vmatpush.msrb.mxu2 %v15798_v36  ;;  %v15794_v5 = vunpack.c.l.bf16 %v15984_v24  ;;  %v15986_v43 = vld [vmem:[%s20192_s2 + $0x1e0] sm:$0xff]  }
 0x7a2   :  { %v15803_v49 = vunpack.c.h.bf16 %v15986_v43 }
 0x7a3   :  { %v9164_v51 = vadd.f32 %v19914_v57, %v9145_v39  ;;  %9439 = vmatpush.msrb.mxu2 %v15795_v41  ;;  %v15983_v57 = vld [vmem:[%s20192_s2 + $0x1c8] sm:$0xff]   ;;  %v9277_v3 = vpop.f32.mrf.mxu3 }
 0x7a4   :  { %v15791_v59 = vunpack.c.h.bf16 %v15983_v57  ;;  %v15790_v63 = vunpack.c.l.bf16 %v15983_v57 }
 0x7a5   :  { %v9183_v18 = vadd.f32 %v19922_v0, %v9164_v51  ;;  %9440 = vmatpush.msrb.mxu2 %v15794_v5 }
 0x7a7   :  { %9441 = vmatpush.msrb.mxu2 %v15791_v59 }
 0x7a8   :  { %v19918_v62 = vpop.f32.mrf.mxu0  ;;  %v19920_v12 = vpop.f32.mrf.mxu1 }
 0x7a9   :  { %v9147_v31 = vadd.f32 %v19918_v62, %v9128_v15  ;;  %v9202_v62 = vadd.f32 %v19924_v44, %v9183_v18  ;;  %9442 = vmatpush.msrb.mxu2 %v15790_v63  ;;  %v15787_v44 = vunpack.c.h.bf16 %v15982_v53 }
 0x7ab   :  { %v9166_v28 = vadd.f32 %v19920_v12, %v9147_v31  ;;  %v15811_v12 = vunpack.c.h.bf16 %v15988_v13  ;;  %9443 = vmatpush.msrb.mxu2 %v15787_v44  ;;  %v9279_v58 = vpop.f32.mrf.mxu3 }
 0x7ad   :  { %v9185_v23 = vadd.f32 %v19930_v32, %v9166_v28  ;;  %9480 = vmatpush.msrb.mxu3 %v15811_v12  ;;  %9444 = vmatpush.msrb.mxu2 %v15786_v30 }
 0x7af   :  { %9481 = vmatpush.msrb.mxu3 %v15810_v33 }
 0x7b0   :  { %v19926_v61 = vpop.f32.mrf.mxu0  ;;  %v19928_v14 = vpop.f32.mrf.mxu1 }
 0x7b1   :  { %v9150_v46 = vadd.f32 %v19926_v61, %v9131_v6  ;;  %v9204_v61 = vadd.f32 %v19938_v45, %v9185_v23  ;;  %9482 = vmatpush.msrb.mxu3 %v15807_v29  ;;  %v15802_v45 = vunpack.c.l.bf16 %v15986_v43  ;;  %v14508_v23 = vld [vmem:[%s20193_s3 + $0x378] sm:$0xff]  ;;  %v14505_v43 = vld [vmem:[%s20193_s3 + $0x360] sm:$0xff] }
 0x7b2   :  { %v9540_v30 = vunpack.c.l.bf16 %v14508_v23  ;;  %v9541_v33 = vunpack.c.h.bf16 %v14508_v23  ;;  %v14527_v23 = vld [vmem:[%s20193_s3 + $0x3e0] sm:$0xff] }
 0x7b3   :  { %v9169_v47 = vadd.f32 %v19928_v14, %v9150_v46  ;;  %9483 = vmatpush.msrb.mxu3 %v15806_v1  ;;  %v14507_v46 = vld [vmem:[%s20193_s3 + $0x370] sm:$0xff]  ;;  %v14498_v1 = vld [vmem:[%s20193_s3 + $0x328] sm:$0xff] }
 0x7b4   :  { %v9538_v56 = vunpack.c.l.bf16 %v14507_v46  ;;  %v9539_v26 = vunpack.c.h.bf16 %v14507_v46  ;;  %9554 = vmatpush.msrb.mxu0 %v9540_v30  ;;  %9574 = vmatpush.msrb.mxu1 %v9541_v33  ;;  %v9715_v30 = vunpack.c.l.bf16 %v14527_v23  ;;  %v9716_v33 = vunpack.c.h.bf16 %v14527_v23 }
 0x7b5   :  { %v9188_v55 = vadd.f32 %v19950_v21, %v9169_v47  ;;  %9484 = vmatpush.msrb.mxu3 %v15803_v49  ;;  %v14506_v47 = vld [vmem:[%s20193_s3 + $0x368] sm:$0xff]  ;;  %v14497_v49 = vld [vmem:[%s20193_s3 + $0x320] sm:$0xff] }
 0x7b6   :  { %9555 = vmatpush.msrb.mxu0 %v9538_v56  ;;  %9575 = vmatpush.msrb.mxu1 %v9539_v26  ;;  %v14517_v56 = vld [vmem:[%s20193_s3 + $0x3a0] sm:$0xff]  ;;  %v14526_v26 = vld [vmem:[%s20193_s3 + $0x3d8] sm:$0xff] }
 0x7b7   :  { %9485 = vmatpush.msrb.mxu3 %v15802_v45  ;;  %v9207_v11 = vadd.f32 %v19960_v35, %v9188_v55  ;;  %v9282_v35 = vpop.f32.mrf.mxu3  ;;  %v14496_v55 = vld [vmem:[%s20193_s3 + $0x318] sm:$0xff]  ;;  %v9509_v45 = vunpack.c.l.bf16 %v14497_v49 }
 0x7b8   :  { %v19940_v60 = vpop.f32.mrf.mxu0  ;;  %v19942_v38 = vpop.f32.mrf.mxu1 }
 0x7b9   :  { %v9152_v39 = vadd.f32 %v19940_v60, %v9133_v50  ;;  %v9536_v50 = vunpack.c.l.bf16 %v14506_v47 }
 0x7bb   :  { %v9171_v16 = vadd.f32 %v19942_v38, %v9152_v39  ;;  %v9534_v39 = vunpack.c.l.bf16 %v14505_v43  ;;  %9556 = vmatpush.msrb.mxu0 %v9536_v50 }
 0x7bd   :  { %v9190_v21 = vadd.f32 %v19974_v25, %v9171_v16  ;;  %9557 = vmatpush.msrb.mxu0 %v9534_v39 }
 0x7bf   :  { %v9209_v5 = vadd.f32 %v19983_v42, %v9190_v21  ;;  %v9284_v20 = vpop.f32.mrf.mxu3  ;;  %v14494_v21 = vld [vmem:[%s20193_s3 + $0x308] sm:$0xff] }
 0x7c0   :  { %v9220_v52 = vpop.f32.mrf.mxu0  ;;  %v19958_v34 = vpop.f32.mrf.mxu1 }
 0x7c1   :  { %v9221_v19 = vadd.f32 %v9220_v52, %v9202_v62 }
 0x7c3   :  { %v9240_v52 = vadd.f32 %v19958_v34, %v9221_v19  ;;  %v9260_v34 = vpop.f32.mrf.mxu2 }
 0x7c5   :  { %v9259_v9 = vadd.f32 %v9258_v22, %v9240_v52 }
 0x7c7   :  { %v9278_v14 = vadd.f32 %v9277_v3, %v9259_v9  ;;  %v14500_v3 = vld [vmem:[%s20193_s3 + $0x338] sm:$0xff]  ;;  %v9537_v9 = vunpack.c.h.bf16 %v14506_v47  ;;  %v14525_v47 = vld [vmem:[%s20193_s3 + $0x3d0] sm:$0xff] }
 0x7c8   :  { %v9222_v2 = vpop.f32.mrf.mxu0  ;;  %v19976_v17 = vpop.f32.mrf.mxu1  ;;  %v9515_v52 = vunpack.c.l.bf16 %v14500_v3  ;;  %v9516_v29 = vunpack.c.h.bf16 %v14500_v3  ;;  %v9711_v50 = vunpack.c.l.bf16 %v14525_v47 }
 0x7c9   :  { %v9223_v27 = vadd.f32 %v9222_v2, %v9204_v61  ;;  %9576 = vmatpush.msrb.mxu1 %v9537_v9  ;;  %v9712_v9 = vunpack.c.h.bf16 %v14525_v47 }
 0x7cb   :  { %v9242_v54 = vadd.f32 %v19976_v17, %v9223_v27  ;;  %v9263_v60 = vpop.f32.mrf.mxu2  ;;  %v9511_v27 = vunpack.c.l.bf16 %v14498_v1 }
 0x7cd   :  { %v9261_v51 = vadd.f32 %v9260_v34, %v9242_v54  ;;  %v9512_v34 = vunpack.c.h.bf16 %v14498_v1  ;;  %v9535_v54 = vunpack.c.h.bf16 %v14505_v43 }
 0x7cf   :  { %v9280_v41 = vadd.f32 %v9279_v58, %v9261_v51  ;;  %v9507_v58 = vunpack.c.l.bf16 %v14496_v55  ;;  %9577 = vmatpush.msrb.mxu1 %v9535_v54 }
 0x7d0   :  { %v9225_v7 = vpop.f32.mrf.mxu0  ;;  %v9244_v0 = vpop.f32.mrf.mxu1 }
 0x7d1   :  { %v9226_v36 = vadd.f32 %v9225_v7, %v9207_v11  ;;  %v14495_v11 = vld [vmem:[%s20193_s3 + $0x310] sm:$0xff] }
 0x7d2   :  { %v9505_v51 = vunpack.c.l.bf16 %v14495_v11 }
 0x7d3   :  { %v9245_v18 = vadd.f32 %v9244_v0, %v9226_v36  ;;  %v9265_v62 = vpop.f32.mrf.mxu2  ;;  %v9506_v36 = vunpack.c.h.bf16 %v14495_v11 }
 0x7d5   :  { %v9264_v40 = vadd.f32 %v9263_v60, %v9245_v18  ;;  %v14502_v60 = vld [vmem:[%s20193_s3 + $0x348] sm:$0xff]  ;;  %v9503_v18 = vunpack.c.l.bf16 %v14494_v21 }
 0x7d7   :  { %v9283_v8 = vadd.f32 %v9282_v35, %v9264_v40  ;;  %v9528_v35 = vunpack.c.l.bf16 %v14502_v60  ;;  %v9529_v40 = vunpack.c.h.bf16 %v14502_v60 }
 0x7d8   :  { %v9227_v32 = vpop.f32.mrf.mxu0  ;;  %v9246_v37 = vpop.f32.mrf.mxu1 }
 0x7d9   :  { %v9228_v38 = vadd.f32 %v9227_v32, %v9209_v5  ;;  %v14499_v32 = vld [vmem:[%s20193_s3 + $0x330] sm:$0xff]  ;;  %v14530_v5 = vld [vmem:[%s20193_s3 + $0x3f8] sm:$0xff] }
 0x7da   :  { %v9514_v61 = vunpack.c.h.bf16 %v14499_v32 }
 0x7db   :  { %v9247_v7 = vadd.f32 %v9246_v37, %v9228_v38  ;;  %v9513_v37 = vunpack.c.l.bf16 %v14499_v32  ;;  %v9713_v32 = vunpack.c.l.bf16 %v14526_v26 }
 0x7dd   :  { %v9266_v22 = vadd.f32 %v9265_v62, %v9247_v7 }
 0x7df   :  { %v9285_v13 = vadd.f32 %v9284_v20, %v9266_v22 }
 0x7e0   :  { %v9296_v48 = vpop.f32.mrf.mxu0  ;;  %v9315_v10 = vpop.f32.mrf.mxu1 }
 0x7e1   :  { %v9297_v2 = vadd.f32 %v9296_v48, %v9278_v14  ;;  %v9510_v14 = vunpack.c.h.bf16 %v14497_v49  ;;  %v9508_v48 = vunpack.c.h.bf16 %v14496_v55  ;;  %v14514_v49 = vld [vmem:[%s20193_s3 + $0x388] sm:$0xff] }
 0x7e3   :  { %v9316_v24 = vadd.f32 %v9315_v10, %v9297_v2  ;;  %v14504_v10 = vld [vmem:[%s20193_s3 + $0x358] sm:$0xff] }
 0x7e4   :  { %v9532_v16 = vunpack.c.l.bf16 %v14504_v10  ;;  %v9533_v2 = vunpack.c.h.bf16 %v14504_v10 }
 0x7e5   :  { %v9325_v15 = vmax.f32 %v9316_v24, 0.0  ;;  %v14503_v24 = vld [vmem:[%s20193_s3 + $0x350] sm:$0xff] }
 0x7e6   :  { %9558 = vmatpush.msrb.mxu0 %v9532_v16  ;;  %9578 = vmatpush.msrb.mxu1 %v9533_v2  ;;  %v14513_v16 = vld [vmem:[%s20193_s3 + $0x380] sm:$0xff] }
 0x7e7   :  { %14474 = vmatmul.msk.f32.vlgmr.msra.gmra.mxu3 %vm1963_vm0, %v9325_v15  ;;  %v9530_v15 = vunpack.c.l.bf16 %v14503_v24  ;;  %v9637_v2 = vunpack.c.l.bf16 %v14513_v16 }
 0x7e8   :  { %v9298_v17 = vpop.f32.mrf.mxu0  ;;  %v9317_v31 = vpop.f32.mrf.mxu1  ;;  %9616 = vmatpush.msra.mxu3 %v9516_v29  ;;  %v9646_v29 = vunpack.c.h.bf16 %v14517_v56 }
 0x7e9   :  { %v9299_v57 = vadd.f32 %v9298_v17, %v9280_v41  ;;  %v9531_v41 = vunpack.c.h.bf16 %v14503_v24  ;;  %v9504_v17 = vunpack.c.h.bf16 %v14494_v21  ;;  %9559 = vmatpush.msrb.mxu0 %v9530_v15 }
 0x7ea   :  { %9617 = vmatpush.msra.mxu3 %v9514_v61  ;;  %v14516_v61 = vld [vmem:[%s20193_s3 + $0x398] sm:$0xff] }
 0x7eb   :  { %v9318_v4 = vadd.f32 %v9317_v31, %v9299_v57  ;;  %v14493_v31 = vld [vmem:[%s20193_s3 + $0x300] sm:$0xff]  ;;  %9579 = vmatpush.msrb.mxu1 %v9531_v41  ;;  %9560 = vmatpush.msrb.mxu0 %v9528_v35  ;;  %v9643_v1 = vunpack.c.l.bf16 %v14516_v61  ;;  %v9644_v43 = vunpack.c.h.bf16 %v14516_v61 }
 0x7ec   :  { %9618 = vmatpush.msra.mxu3 %v9512_v34  ;;  %v14501_v57 = vld [vmem:[%s20193_s3 + $0x340] sm:$0xff]  ;;  %v9501_v38 = vunpack.c.l.bf16 %v14493_v31  ;;  %v14524_v34 = vld [vmem:[%s20193_s3 + $0x3c8] sm:$0xff] }
 0x7ed   :  { %v9326_v59 = vmax.f32 %v9318_v4, 0.0  ;;  %v9502_v4 = vunpack.c.h.bf16 %v14493_v31  ;;  %v9526_v7 = vunpack.c.l.bf16 %v14501_v57  ;;  %v9527_v62 = vunpack.c.h.bf16 %v14501_v57  ;;  %9580 = vmatpush.msrb.mxu1 %v9529_v40  ;;  %v16005_v31 = vld [vmem:[%s20194_s5 + $0x1f8] sm:$0xff]  }
 0x7ee   :  { %9619 = vmatpush.msra.mxu3 %v9510_v14  ;;  %v9709_v14 = vunpack.c.l.bf16 %v14524_v34  ;;  %v9710_v54 = vunpack.c.h.bf16 %v14524_v34  ;;  %v15879_v35 = vunpack.c.h.bf16 %v16005_v31 }
 0x7ef   :  { %14473 = vmatmul.msk.f32.vlgmr.msra.gmra.mxu2 %vm1963_vm0, %v9326_v59  ;;  %v9721_v59 = vunpack.c.l.bf16 %v14530_v5  ;;  %9561 = vmatpush.msrb.mxu0 %v9526_v7 }
 0x7f0   :  { %v9301_v25 = vpop.f32.mrf.mxu0  ;;  %v9320_v28 = vpop.f32.mrf.mxu1  ;;  %9596 = vmatpush.msra.mxu2 %v9515_v52  ;;  %9620 = vmatpush.msra.mxu3 %v9508_v48  ;;  %v9645_v52 = vunpack.c.l.bf16 %v14517_v56  ;;  %v9640_v48 = vunpack.c.h.bf16 %v14514_v49 }
 0x7f1   :  { %v9302_v0 = vadd.f32 %v9301_v25, %v9283_v8  ;;  %v9722_v8 = vunpack.c.h.bf16 %v14530_v5  ;;  %v14520_v25 = vld [vmem:[%s20193_s3 + $0x3b8] sm:$0xff]  ;;  %9581 = vmatpush.msrb.mxu1 %v9527_v62 }
 0x7f2   :  { %9597 = vmatpush.msra.mxu2 %v9513_v37  ;;  %9621 = vmatpush.msra.mxu3 %v9506_v36  ;;  %v9652_v22 = vunpack.c.h.bf16 %v14520_v25  ;;  %v9714_v37 = vunpack.c.h.bf16 %v14526_v26 }
 0x7f3   :  { %v9321_v63 = vadd.f32 %v9320_v28, %v9302_v0  ;;  %v14529_v28 = vld [vmem:[%s20193_s3 + $0x3f0] sm:$0xff]  ;;  %v9651_v0 = vunpack.c.l.bf16 %v14520_v25  ;;  %v15995_v25 = vld [vmem:[%s20194_s5 + $0x1a8] sm:$0xff]  }
 0x7f4   :  { %9598 = vmatpush.msra.mxu2 %v9511_v27  ;;  %9622 = vmatpush.msra.mxu3 %v9504_v17  ;;  %v9720_v20 = vunpack.c.h.bf16 %v14529_v28  ;;  %v14515_v27 = vld [vmem:[%s20193_s3 + $0x390] sm:$0xff]  ;;  %v15997_v17 = vld [vmem:[%s20194_s5 + $0x1b8] sm:$0xff]  }
 0x7f5   :  { %v9327_v53 = vmax.f32 %v9321_v63, 0.0  ;;  %v9719_v63 = vunpack.c.l.bf16 %v14529_v28  ;;  %9664 = vmatpush.msra.mxu0 %v9651_v0  ;;  %9684 = vmatpush.msra.mxu1 %v9652_v22  ;;  %v9641_v55 = vunpack.c.l.bf16 %v14515_v27  ;;  %v9642_v39 = vunpack.c.h.bf16 %v14515_v27  ;;  %v16003_v28 = vld [vmem:[%s20194_s5 + $0x1e8] sm:$0xff]  }
 0x7f6   :  { %9599 = vmatpush.msra.mxu2 %v9509_v45  ;;  %9623 = vmatpush.msra.mxu3 %v9502_v4  ;;  %v14523_v45 = vld [vmem:[%s20193_s3 + $0x3c0] sm:$0xff]  ;;  %v15847_v57 = vunpack.c.h.bf16 %v15997_v17  ;;  %v16004_v4 = vld [vmem:[%s20194_s5 + $0x1f0] sm:$0xff]  }
 0x7f7   :  { %14483 = vmatmul.msk.f32.vlgmr.msrb.gmra.mxu2 %vm1963_vm0, %v9327_v53  ;;  %v14519_v53 = vld [vmem:[%s20193_s3 + $0x3b0] sm:$0xff]  ;;  %v9707_v10 = vunpack.c.l.bf16 %v14523_v45  ;;  %v9708_v11 = vunpack.c.h.bf16 %v14523_v45  ;;  %v15875_v62 = vunpack.c.h.bf16 %v16004_v4  ;;  %v15874_v22 = vunpack.c.l.bf16 %v16004_v4  ;;  %v15998_v45 = vld [vmem:[%s20194_s5 + $0x1c0] sm:$0xff]  }
 0x7f8   :  { %v9303_v42 = vpop.f32.mrf.mxu0  ;;  %v9322_v19 = vpop.f32.mrf.mxu1  ;;  %9600 = vmatpush.msra.mxu2 %v9507_v58  ;;  %v9639_v58 = vunpack.c.l.bf16 %v14514_v49 }
 0x7f9   :  { %v9304_v6 = vadd.f32 %v9303_v42, %v9285_v13  ;;  %v14528_v13 = vld [vmem:[%s20193_s3 + $0x3e8] sm:$0xff]  ;;  %v9649_v42 = vunpack.c.l.bf16 %v14519_v53 }
 0x7fa   :  { %9601 = vmatpush.msra.mxu2 %v9505_v51  ;;  %v9638_v51 = vunpack.c.h.bf16 %v14513_v16 }
 0x7fb   :  { %v9323_v44 = vadd.f32 %v9322_v19, %v9304_v6  ;;  %v9650_v6 = vunpack.c.h.bf16 %v14519_v53  ;;  %v9717_v19 = vunpack.c.l.bf16 %v14528_v13  ;;  %9665 = vmatpush.msra.mxu0 %v9649_v42  ;;  %v15871_v53 = vunpack.c.h.bf16 %v16003_v28 }
 0x7fc   :  { %9602 = vmatpush.msra.mxu2 %v9503_v18  ;;  %v15838_v42 = vunpack.c.l.bf16 %v15995_v25 }
 0x7fd   :  { %v9328_v12 = vmax.f32 %v9323_v44, 0.0  ;;  %v9718_v44 = vunpack.c.h.bf16 %v14528_v13  ;;  %9685 = vmatpush.msra.mxu1 %v9650_v6  ;;  %v15870_v6 = vunpack.c.l.bf16 %v16003_v28 }
 0x7fe   :  { %9603 = vmatpush.msra.mxu2 %v9501_v38  ;;  %v15996_v38 = vld [vmem:[%s20194_s5 + $0x1b0] sm:$0xff]  }
 0x7ff   :  { %14492 = vmatmul.msk.f32.vlgmr.msrb.gmra.mxu3 %vm1963_vm0, %v9328_v12  ;;  %v14518_v12 = vld [vmem:[%s20193_s3 + $0x3a8] sm:$0xff]  ;;  %v15843_v7 = vunpack.c.h.bf16 %v15996_v38  ;;  %v15842_v0 = vunpack.c.l.bf16 %v15996_v38 }
 0x800   :  { %9734 = vmatpush.msrb.mxu2 %v9721_v59  ;;  %9754 = vmatpush.msrb.mxu3 %v9722_v8  ;;  %v9647_v46 = vunpack.c.l.bf16 %v14518_v12  ;;  %v9648_v3 = vunpack.c.h.bf16 %v14518_v12  ;;  %v15846_v59 = vunpack.c.l.bf16 %v15997_v17  ;;  %v15878_v8 = vunpack.c.l.bf16 %v16005_v31 }
 0x802   :  { %9735 = vmatpush.msrb.mxu2 %v9719_v63  ;;  %9755 = vmatpush.msrb.mxu3 %v9720_v20  ;;  %v15839_v20 = vunpack.c.h.bf16 %v15995_v25 }
 0x803   :  { %9666 = vmatpush.msra.mxu0 %v9647_v46  ;;  %9686 = vmatpush.msra.mxu1 %v9648_v3 }
 0x804   :  { %9736 = vmatpush.msrb.mxu2 %v9717_v19  ;;  %9756 = vmatpush.msrb.mxu3 %v9718_v44  ;;  %v15994_v19 = vld [vmem:[%s20194_s5 + $0x1a0] sm:$0xff]  }
 0x805   :  { %9667 = vmatpush.msra.mxu0 %v9645_v52  ;;  %9687 = vmatpush.msra.mxu1 %v9646_v29  ;;  %v16002_v44 = vld [vmem:[%s20194_s5 + $0x1e0] sm:$0xff]   ;;  %v15835_v12 = vunpack.c.h.bf16 %v15994_v19  ;;  %v15834_v46 = vunpack.c.l.bf16 %v15994_v19 }
 0x806   :  { %9737 = vmatpush.msrb.mxu2 %v9715_v30  ;;  %9757 = vmatpush.msrb.mxu3 %v9716_v33  ;;  %v15867_v23 = vunpack.c.h.bf16 %v16002_v44  ;;  %v15866_v3 = vunpack.c.l.bf16 %v16002_v44  ;;  %v15993_v30 = vld [vmem:[%s20194_s5 + $0x198] sm:$0xff]  }
 0x807   :  { %9668 = vmatpush.msra.mxu0 %v9643_v1  ;;  %9688 = vmatpush.msra.mxu1 %v9644_v43  ;;  %v16001_v33 = vld [vmem:[%s20194_s5 + $0x1d8] sm:$0xff]   ;;  %v15831_v56 = vunpack.c.h.bf16 %v15993_v30  ;;  %v15830_v52 = vunpack.c.l.bf16 %v15993_v30 }
 0x808   :  { %9738 = vmatpush.msrb.mxu2 %v9713_v32  ;;  %9758 = vmatpush.msrb.mxu3 %v9714_v37  ;;  %v15863_v26 = vunpack.c.h.bf16 %v16001_v33  ;;  %v15862_v29 = vunpack.c.l.bf16 %v16001_v33  ;;  %v15992_v32 = vld [vmem:[%s20194_s5 + $0x190] sm:$0xff]  }
 0x809   :  { %9669 = vmatpush.msra.mxu0 %v9641_v55  ;;  %9689 = vmatpush.msra.mxu1 %v9642_v39  ;;  %v16000_v37 = vld [vmem:[%s20194_s5 + $0x1d0] sm:$0xff]   ;;  %v15827_v61 = vunpack.c.h.bf16 %v15992_v32  ;;  %v15826_v1 = vunpack.c.l.bf16 %v15992_v32  ;;  %v15990_v39 = vld [vmem:[%s20194_s5 + $0x180] sm:$0xff]  }
 0x80a   :  { %9739 = vmatpush.msrb.mxu2 %v9711_v50  ;;  %9759 = vmatpush.msrb.mxu3 %v9712_v9  ;;  %v15859_v47 = vunpack.c.h.bf16 %v16000_v37  ;;  %v15858_v43 = vunpack.c.l.bf16 %v16000_v37  ;;  %v15991_v50 = vld [vmem:[%s20194_s5 + $0x188] sm:$0xff]  }
 0x80b   :  { %9670 = vmatpush.msra.mxu0 %v9639_v58  ;;  %9690 = vmatpush.msra.mxu1 %v9640_v48  ;;  %v15999_v9 = vld [vmem:[%s20194_s5 + $0x1c8] sm:$0xff]   ;;  %v15823_v27 = vunpack.c.h.bf16 %v15991_v50  ;;  %v15822_v49 = vunpack.c.l.bf16 %v15991_v50  ;;  %v15818_v58 = vunpack.c.l.bf16 %v15990_v39  ;;  %v15850_v48 = vunpack.c.l.bf16 %v15998_v45 }
 0x80c   :  { %9740 = vmatpush.msrb.mxu2 %v9709_v14  ;;  %9760 = vmatpush.msrb.mxu3 %v9710_v54  ;;  %v15855_v34 = vunpack.c.h.bf16 %v15999_v9  ;;  %v15854_v55 = vunpack.c.l.bf16 %v15999_v9  ;;  %v15819_v14 = vunpack.c.h.bf16 %v15990_v39  ;;  %v15851_v54 = vunpack.c.h.bf16 %v15998_v45 }
 0x80d   :  { %9671 = vmatpush.msra.mxu0 %v9637_v2  ;;  %9691 = vmatpush.msra.mxu1 %v9638_v51 }
 0x80e   :  { %9741 = vmatpush.msrb.mxu2 %v9707_v10  ;;  %9761 = vmatpush.msrb.mxu3 %v9708_v11 }
 0x86a   :  { %v9406_v24 = vpop.f32.mrf.mxu3 }
 0x872   :  { %v9383_v36 = vpop.f32.mrf.mxu2 }
 0x873   :  { %v9407_v60 = vadd.f32 %v9406_v24, %v9383_v36  ;;  %v14533_v24 = vld [vmem:[%s20195_s4 + $0x6] sm:$0x3] }
 0x874   :  { %v9772_v17 = vperm.slane %v14533_v24, 1 }
 0x87a   :  { %v9446_v21 = vpop.f32.mrf.mxu2 }
 0x87b   :  { %v9449_v15 = vadd.f32 %v9446_v21, %v9407_v60 }
 0x882   :  { %v9487_v41 = vpop.f32.mrf.mxu3 }
 0x883   :  { %v9490_v18 = vadd.f32 %v9487_v41, %v9449_v15 }
 0x885   :  { %v9491_v5 = vmax.f32 %v9490_v18, 0.0  ;;  %v9771_v18 = vperm.slane %v14533_v24, 0 }
 0x887   :  { %v9543_v40 = vrot.slane %v9491_v5, 2  ;;  %14511 = vmatmul.msk.f32.vlgmr.msra.gmra.mxu2 %vm1963_vm0, %v9491_v5  ;;  %14512 = vmatmul.msk.f32.vlgmr.msra.gmra.mxu3 %vm1963_vm0, %v9491_v5  ;;  %v9723_v63 = vrot.slane %v9491_v5, 6  ;;  %v9653_v13 = vrot.slane %v9491_v5, 4 }
 0x889   :  { %14509 = vmatmul.msk.f32.vlgmr.msrb.gmra.mxu0 %vm1963_vm0, %v9543_v40  ;;  %14510 = vmatmul.msk.f32.vlgmr.msrb.gmra.mxu1 %vm1963_vm0, %v9543_v40 }
 0x88a   :  { %9849 = vmatpush.msrb.mxu0 %v15847_v57  ;;  %9869 = vmatpush.msrb.mxu1 %v15879_v35 }
 0x88c   :  { %9850 = vmatpush.msrb.mxu0 %v15846_v59  ;;  %9870 = vmatpush.msrb.mxu1 %v15878_v8  ;;  %v16009_v8 = vld [vmem:[%s20196_s6 + $0x3] ss:$0 sm:$0xff] }
 0x88e   :  { %9851 = vmatpush.msrb.mxu0 %v15843_v7  ;;  %9871 = vmatpush.msrb.mxu1 %v15875_v62 }
 0x88f   :  { %14531 = vmatmul.msk.f32.vlgmr.msrb.gmra.mxu2 %vm1963_vm0, %v9723_v63  ;;  %14532 = vmatmul.msk.f32.vlgmr.msrb.gmra.mxu3 %vm1963_vm0, %v9723_v63 }
 0x890   :  { %9852 = vmatpush.msrb.mxu0 %v15842_v0  ;;  %9872 = vmatpush.msrb.mxu1 %v15874_v22 }
 0x891   :  { %14521 = vmatmul.msk.f32.vlgmr.msra.gmra.mxu0 %vm1963_vm0, %v9653_v13  ;;  %14522 = vmatmul.msk.f32.vlgmr.msra.gmra.mxu1 %vm1963_vm0, %v9653_v13 }
 0x892   :  { %9853 = vmatpush.msrb.mxu0 %v15839_v20  ;;  %9873 = vmatpush.msrb.mxu1 %v15871_v53 }
 0x894   :  { %9854 = vmatpush.msrb.mxu0 %v15838_v42  ;;  %9874 = vmatpush.msrb.mxu1 %v15870_v6 }
 0x896   :  { %9855 = vmatpush.msrb.mxu0 %v15835_v12  ;;  %9875 = vmatpush.msrb.mxu1 %v15867_v23 }
 0x898   :  { %9856 = vmatpush.msrb.mxu0 %v15834_v46  ;;  %9876 = vmatpush.msrb.mxu1 %v15866_v3 }
 0x89a   :  { %9857 = vmatpush.msrb.mxu0 %v15831_v56  ;;  %9877 = vmatpush.msrb.mxu1 %v15863_v26 }
 0x89c   :  { %9858 = vmatpush.msrb.mxu0 %v15830_v52  ;;  %9878 = vmatpush.msrb.mxu1 %v15862_v29 }
 0x89e   :  { %9859 = vmatpush.msrb.mxu0 %v15827_v61  ;;  %9879 = vmatpush.msrb.mxu1 %v15859_v47 }
 0x8a0   :  { %9860 = vmatpush.msrb.mxu0 %v15826_v1  ;;  %9880 = vmatpush.msrb.mxu1 %v15858_v43 }
 0x8a2   :  { %9861 = vmatpush.msrb.mxu0 %v15823_v27  ;;  %9881 = vmatpush.msrb.mxu1 %v15855_v34 }
 0x8a4   :  { %9862 = vmatpush.msrb.mxu0 %v15822_v49  ;;  %9882 = vmatpush.msrb.mxu1 %v15854_v55 }
 0x8a6   :  { %9863 = vmatpush.msrb.mxu0 %v15819_v14  ;;  %9883 = vmatpush.msrb.mxu1 %v15851_v54 }
 0x8a8   :  { %9864 = vmatpush.msrb.mxu0 %v15818_v58  ;;  %9884 = vmatpush.msrb.mxu1 %v15850_v48 }
 0x906   :  { %v9563_v10 = vpop.f32.mrf.mxu0  ;;  %v9583_v11 = vpop.f32.mrf.mxu1 }
 0x90a   :  { %v9605_v16 = vpop.f32.mrf.mxu2  ;;  %v9625_v2 = vpop.f32.mrf.mxu3 }
 0x90b   :  { %v9606_v21 = vadd.f32 %v9605_v16, %v9563_v10  ;;  %v9626_v60 = vadd.f32 %v9625_v2, %v9583_v11 }
 0x90e   :  { %v9673_v51 = vpop.f32.mrf.mxu0  ;;  %v9693_v36 = vpop.f32.mrf.mxu1 }
 0x90f   :  { %v9696_v15 = vadd.f32 %v9673_v51, %v9606_v21  ;;  %v9697_v41 = vadd.f32 %v9693_v36, %v9626_v60 }
 0x912   :  { %v9743_v31 = vpop.f32.mrf.mxu2  ;;  %v9763_v5 = vpop.f32.mrf.mxu3 }
 0x913   :  { %v9766_v57 = vadd.f32 %v9743_v31, %v9696_v15  ;;  %v9767_v35 = vadd.f32 %v9763_v5, %v9697_v41 }
 0x915   :  { %v9775_v40 = vadd.f32 %v9771_v18, %v9766_v57  ;;  %v9776_v38 = vadd.f32 %v9772_v17, %v9767_v35 }
 0x917   :  { %v9777_v4 = vmax.f32 %v9775_v40, 0.0  ;;  %v9778_v59 = vmax.f32 %v9776_v38, 0.0 }
 0x919   :  { %9865 = vmatmul.f32.vlgmr.msrb.gmra.mxu0 %v9777_v4  ;;  %9885 = vmatmul.f32.vlgmr.msrb.gmra.mxu1 %v9778_v59 }
 0x996   :  { %v9866_v7 = vpop.f32.mrf.mxu0  ;;  %v9886_v25 = vpop.f32.mrf.mxu1 }
 0x997   :  { %v9867_v62 = vadd.f32 %v16009_v8, %v9866_v7 }
 0x999   :  { %v9887_v28 = vadd.f32 %v9886_v25, %v9867_v62 }
 0x99b   :  { %14567 = vst [vmem:[%s20197_s7 + $0x6] sm:$0x3] %v9887_v28 }

</bundles_post_ra>
